<compile_context>
chip_gen: v5e
topology: v5e:2x2
jax: 0.10.0
libtpu: 0.0.40
codegen_flags: <defaults>
</compile_context>

<pallas_src>
import jax
import jax.numpy as jnp
from jax.experimental import pallas as pl
from jax.experimental.pallas import tpu as pltpu

B = 2  # batch size (28x28 input is required: 28 -> 24 -> 12 -> 8 -> 4, 64*4*4 = 1024)


# ----------------------------- fused per-branch kernel -----------------------------

def _fused_branch_kernel(patches_ref, w1_ref, b1_ref, w2_ref, b2_ref,
                         fc1w_ref, fc1b_ref, fc2w_ref, fc2b_ref, out_ref):
    f32 = jnp.float32

    # ---- conv1 (+bias) + maxpool1 ----
    # One MXU matmul over all four pool-parity patch planes at once (rows are
    # (parity, b, i2, j2pad)); pool1 collapses to a 3-op max over the plane axis.
    c1 = jnp.dot(patches_ref[...], w1_ref[0],
                 preferred_element_type=f32)                   # (4*384, 32)
    c1 = c1.reshape(4, B * 192, 32)                            # leading-dim split (free)
    p1 = jnp.maximum(jnp.maximum(c1[0], c1[1]),
                     jnp.maximum(c1[2], c1[3]))                # (384, 32)
    p1 = p1 + b1_ref[0]                                        # bias commutes with max
    p1 = p1.reshape(B, 12, 16, 32)                             # (b, i2, j2pad, c); j2pad>=12 unused

    # ---- conv2: 25 shifted-window MXU matmuls, accumulated in registers/VMEM ----
    acc = jnp.zeros((B * 8 * 8, 64), f32)                      # rows = (b, io, jo)
    for kh in range(5):
        for kw in range(5):
            lhs = p1[:, kh:kh + 8, kw:kw + 8, :].reshape(B * 8 * 8, 32)
            acc = acc + jnp.dot(lhs, w2_ref[0, kh * 5 + kw],
                                preferred_element_type=f32)
    c2 = acc + b2_ref[0]                                       # (128, 64)

    # ---- maxpool2: H via leading-dim reshape, W via adjacent-sublane max ----
    c2 = c2.reshape(B * 4, 2, 8, 64)                           # (b*4+io2, p, jo, c)
    c2 = jnp.max(c2, axis=1)                                   # (8, 8, 64) pooled over H
    c2 = jnp.maximum(c2[:, :7, :], c2[:, 1:, :])               # (8, 7, 64): valid at even jo
    p2 = c2.reshape(B, 4, 7, 64)                               # (b, io2, jo*, c)

    # ---- fc1: NCHW-flatten permutation + column selection folded into the weights ----
    fc1 = jnp.zeros((B, 256), f32)
    for io2 in range(4):
        for jo2 in range(4):
            xs = p2[:, io2, 2 * jo2, :]                        # (B, 64)
            fc1 = fc1 + jnp.dot(xs, fc1w_ref[0, io2 * 4 + jo2],
                                preferred_element_type=f32)
    fc1 = fc1 + fc1b_ref[0]                                    # (B, 256)

    # ---- fc2 + softmax (dim=-1, matching torch.nn.Softmax on a 2-D input) ----
    logits = jnp.dot(fc1, fc2w_ref[0], preferred_element_type=f32) + fc2b_ref[0]  # (B, 10)
    m = jnp.max(logits, axis=-1, keepdims=True)
    e = jnp.exp(logits - m)
    out_ref[0] = e / jnp.sum(e, axis=-1, keepdims=True)


# ----------------------------- XLA-side prep (tiny, shared) -----------------------------

def _build_pool_parity_patches(x):
    """x: (B, 28, 28) -> (4*B*12*16, 32) pool1-parity im2col planes, shared by both branches.

    Row (st, b, i2, j2pad) holds, at column kh*5+kw, the value
    x[b, 2*i2 + s + kh, 2*j2pad + t + kw] with st = 2*s + t; j2pad is padded 12->16
    (zeros) so every in-kernel reshape stays 8-sublane aligned, and K is padded 25->32.
    """
    cols = [x[:, kh:kh + 24, kw:kw + 24] for kh in range(5) for kw in range(5)]
    p = jnp.stack(cols, axis=-1)                               # (B, 24, 24, 25)
    p = p.reshape(B, 12, 2, 12, 2, 25)                         # (b, i2, s, j2, t, k)
    p = jnp.transpose(p, (2, 4, 0, 1, 3, 5))                   # (s, t, b, i2, j2, k)
    p = jnp.pad(p, ((0, 0),) * 4 + ((0, 4), (0, 7)))           # j2: 12->16, k: 25->32
    return p.reshape(4 * B * 192, 32)


@jax.jit
def model_gpu_forward(x_nchw, packed):
    """Reproduces _model_gpu.forward: same input -> two branches -> (softmax1, softmax2)."""
    patches = _build_pool_parity_patches(x_nchw[:, 0].astype(jnp.float32))
    w1, b1, w2, b2, fc1w, fc1b, fc2w, fc2b = packed

    out = pl.pallas_call(
        _fused_branch_kernel,
        out_shape=jax.ShapeDtypeStruct((2, B, 10), jnp.float32),
        grid_spec=pltpu.PrefetchScalarGridSpec(
            num_scalar_prefetch=0,
            grid=(2,),                                                       # branch axis
            in_specs=[
                pl.BlockSpec((4 * B * 192, 32), lambda b: (0, 0)),           # shared patches
                pl.BlockSpec((1, 32, 32), lambda b: (b, 0, 0)),              # conv1 w
                pl.BlockSpec((1, 1, 32), lambda b: (b, 0, 0)),               # conv1 b
                pl.BlockSpec((1, 25, 32, 64), lambda b: (b, 0, 0, 0)),       # conv2 w
                pl.BlockSpec((1, 1, 64), lambda b: (b, 0, 0)),               # conv2 b
                pl.BlockSpec((1, 16, 64, 256), lambda b: (b, 0, 0, 0)),      # fc1 w (packed)
                pl.BlockSpec((1, 1, 256), lambda b: (b, 0, 0)),              # fc1 b
                pl.BlockSpec((1, 256, 10), lambda b: (b, 0, 0)),             # fc2 w
                pl.BlockSpec((1, 1, 10), lambda b: (b, 0, 0)),               # fc2 b
            ],
            out_specs=pl.BlockSpec((1, B, 10), lambda b: (b, 0, 0)),
        ),
        compiler_params=pltpu.CompilerParams(
            dimension_semantics=("parallel",)),                              # v7x: 1 branch / TC
    )(patches, w1, b1, w2, b2, fc1w, fc1b, fc2w, fc2b)
    return out[0], out[1]


# ----------------------------- parameter init & packing -----------------------------

def init_params(key):
    ks = jax.random.split(key, 8)

    def u(k, shape, fan_in):
        bound = 1.0 / (fan_in ** 0.5)
        return jax.random.uniform(k, shape, jnp.float32, -bound, bound)

    return {
        "conv1_w": u(ks[0], (32, 1, 5, 5), 25),
        "conv1_b": u(ks[1], (32,), 25),
        "conv2_w": u(ks[2], (64, 32, 5, 5), 800),
        "conv2_b": u(ks[3], (64,), 800),
        "fc1_w": u(ks[4], (256, 1024), 1024),
        "fc1_b": u(ks[5], (256,), 1024),
        "fc2_w": u(ks[6], (10, 256), 256),
        "fc2_b": u(ks[7], (10,), 256),
    }


def pack_branch_params(p):
    """One-time repack of torch-layout params into the kernel's layouts."""
    w1 = jnp.pad(p["conv1_w"].reshape(32, 25).T, ((0, 7), (0, 0)))          # (32_kpad, 32_cout)
    b1 = p["conv1_b"].reshape(1, 32)
    w2 = jnp.transpose(p["conv2_w"], (2, 3, 1, 0)).reshape(25, 32, 64)      # (tap, cin, cout)
    b2 = p["conv2_b"].reshape(1, 64)
    # fc1: (256, 1024) with flat index c*16 + h*4 + w  ->  (h*4+w, c, 256)
    fc1w = jnp.transpose(p["fc1_w"].reshape(256, 64, 4, 4), (2, 3, 1, 0)).reshape(16, 64, 256)
    fc1b = p["fc1_b"].reshape(1, 256)
    fc2w = p["fc2_w"].T                                                      # (256, 10)
    fc2b = p["fc2_b"].reshape(1, 10)
    return w1, b1, w2, b2, fc1w, fc1b, fc2w, fc2b


def stack_branches(p1, p2):
    a, b = pack_branch_params(p1), pack_branch_params(p2)
    return tuple(jnp.stack([x, y], axis=0) for x, y in zip(a, b))


# ----------------------------- pure-JAX reference (for verification) -----------------------------

def _reference_branch(x, p):
    dn = ("NCHW", "OIHW", "NCHW")
    y = jax.lax.conv_general_dilated(x, p["conv1_w"], (1, 1), "VALID", dimension_numbers=dn)
    y = y + p["conv1_b"][None, :, None, None]
    y = jax.lax.reduce_window(y, -jnp.inf, jax.lax.max, (1, 1, 2, 2), (1, 1, 2, 2), "VALID")
    y = jax.lax.conv_general_dilated(y, p["conv2_w"], (1, 1), "VALID", dimension_numbers=dn)
    y = y + p["conv2_b"][None, :, None, None]
    y = jax.lax.reduce_window(y, -jnp.inf, jax.lax.max, (1, 1, 2, 2), (1, 1, 2, 2), "VALID")
    flat = y.reshape(y.shape[0], -1)
    h = flat @ p["fc1_w"].T + p["fc1_b"]
    o = h @ p["fc2_w"].T + p["fc2_b"]
    return jax.nn.softmax(o, axis=-1)


if __name__ == "__main__":
    # NOTE: the two-GPU placement (cuda:0 / cuda:1) of the original module is mapped to the
    # parallel branch grid axis; there is no per-device placement inside a single TPU kernel.
    key = jax.random.PRNGKey(0)
    k_in, k_m1, k_m2 = jax.random.split(key, 3)

    x = jax.random.normal(k_in, (B, 1, 28, 28), dtype=jnp.float32)
    params_m1 = init_params(k_m1)
    params_m2 = init_params(k_m2)
    packed = stack_branches(params_m1, params_m2)

    out1, out2 = model_gpu_forward(x, packed)
    jax.block_until_ready((out1, out2))

    assert out1.shape == (B, 10) and out2.shape == (B, 10)

    ref1 = _reference_branch(x, params_m1)
    ref2 = _reference_branch(x, params_m2)
    assert bool(jnp.allclose(out1, ref1, atol=2e-3, rtol=2e-2)), "branch 1 mismatch"
    assert bool(jnp.allclose(out2, ref2, atol=2e-3, rtol=2e-2)), "branch 2 mismatch"

    print("KERNEL_OK")
</pallas_src>

<mosaic_0001>
module attributes {stable_mosaic.version = 11 : i64} {
  func.func @_fused_branch_kernel(%arg0: i32, %arg1: memref<1536x32xf32, #tpu.memory_space<vmem>>, %arg2: memref<1x32x32xf32, #tpu.memory_space<vmem>>, %arg3: memref<1x1x32xf32, #tpu.memory_space<vmem>>, %arg4: memref<1x25x32x64xf32, #tpu.memory_space<vmem>>, %arg5: memref<1x1x64xf32, #tpu.memory_space<vmem>>, %arg6: memref<1x16x64x256xf32, #tpu.memory_space<vmem>>, %arg7: memref<1x1x256xf32, #tpu.memory_space<vmem>>, %arg8: memref<1x256x10xf32, #tpu.memory_space<vmem>>, %arg9: memref<1x1x10xf32, #tpu.memory_space<vmem>>, %arg10: memref<1x2x10xf32, #tpu.memory_space<vmem>>) attributes {dimension_semantics = [#tpu.dimension_semantics<parallel>], iteration_bounds = array<i64: 2>, scalar_prefetch = 0 : i64, scratch_operands = 0 : i64, tpu.core_type = #tpu.core_type<tc>, window_params = [{pipeline_mode = #tpu.pipeline_mode<synchronous>, transform_indices = @transform_0, window_bounds = array<i64: 1536, 32>}, {transform_indices = @transform_1, window_bounds = array<i64: 1, 32, 32>}, {transform_indices = @transform_2, window_bounds = array<i64: 1, 1, 32>}, {transform_indices = @transform_3, window_bounds = array<i64: 1, 25, 32, 64>}, {transform_indices = @transform_4, window_bounds = array<i64: 1, 1, 64>}, {transform_indices = @transform_5, window_bounds = array<i64: 1, 16, 64, 256>}, {transform_indices = @transform_6, window_bounds = array<i64: 1, 1, 256>}, {transform_indices = @transform_7, window_bounds = array<i64: 1, 256, 10>}, {transform_indices = @transform_8, window_bounds = array<i64: 1, 1, 10>}, {transform_indices = @transform_9, window_bounds = array<i64: 1, 2, 10>}]} {
    %c0 = arith.constant 0 : index
    %c0_0 = arith.constant 0 : index
    %0 = vector.load %arg1[%c0, %c0_0] : memref<1536x32xf32, #tpu.memory_space<vmem>>, vector<1536x32xf32>
    %c0_1 = arith.constant 0 : index
    %c0_2 = arith.constant 0 : index
    %c0_3 = arith.constant 0 : index
    %1 = vector.load %arg2[%c0_1, %c0_2, %c0_3] : memref<1x32x32xf32, #tpu.memory_space<vmem>>, vector<1x32x32xf32>
    %2 = vector.shape_cast %1 : vector<1x32x32xf32> to vector<32x32xf32>
    %cst = arith.constant dense<0.000000e+00> : vector<1536x32xf32>
    %3 = tpu.matmul %0, %2, %cst {dimension_numbers = #tpu.dot_dimension_numbers<[1], [0], [0], [1], [0, 0, 1, 1], [], []>} : vector<1536x32xf32>, vector<32x32xf32>, vector<1536x32xf32> -> vector<1536x32xf32>
    %4 = vector.shape_cast %3 : vector<1536x32xf32> to vector<4x384x32xf32>
    %5 = vector.extract_strided_slice %4 {offsets = [0, 0, 0], sizes = [1, 384, 32], strides = [1, 1, 1]} : vector<4x384x32xf32> to vector<1x384x32xf32>
    %6 = vector.shape_cast %5 : vector<1x384x32xf32> to vector<384x32xf32>
    %7 = vector.extract_strided_slice %4 {offsets = [1, 0, 0], sizes = [1, 384, 32], strides = [1, 1, 1]} : vector<4x384x32xf32> to vector<1x384x32xf32>
    %8 = vector.shape_cast %7 : vector<1x384x32xf32> to vector<384x32xf32>
    %9 = arith.maximumf %6, %8 : vector<384x32xf32>
    %10 = vector.extract_strided_slice %4 {offsets = [2, 0, 0], sizes = [1, 384, 32], strides = [1, 1, 1]} : vector<4x384x32xf32> to vector<1x384x32xf32>
    %11 = vector.shape_cast %10 : vector<1x384x32xf32> to vector<384x32xf32>
    %12 = vector.extract_strided_slice %4 {offsets = [3, 0, 0], sizes = [1, 384, 32], strides = [1, 1, 1]} : vector<4x384x32xf32> to vector<1x384x32xf32>
    %13 = vector.shape_cast %12 : vector<1x384x32xf32> to vector<384x32xf32>
    %14 = arith.maximumf %11, %13 : vector<384x32xf32>
    %15 = arith.maximumf %9, %14 : vector<384x32xf32>
    %c0_4 = arith.constant 0 : index
    %c0_5 = arith.constant 0 : index
    %c0_6 = arith.constant 0 : index
    %16 = vector.load %arg3[%c0_4, %c0_5, %c0_6] : memref<1x1x32xf32, #tpu.memory_space<vmem>>, vector<1x1x32xf32>
    %17 = vector.shape_cast %16 : vector<1x1x32xf32> to vector<1x32xf32>
    %18 = vector.broadcast %17 : vector<1x32xf32> to vector<384x32xf32>
    %19 = arith.addf %15, %18 : vector<384x32xf32>
    %20 = vector.shape_cast %19 : vector<384x32xf32> to vector<2x12x16x32xf32>
    %cst_7 = arith.constant 0.000000e+00 : f32
    %21 = vector.broadcast %cst_7 : f32 to vector<128x64xf32>
    %22 = vector.extract_strided_slice %20 {offsets = [0, 0, 0, 0], sizes = [2, 8, 8, 32], strides = [1, 1, 1, 1]} : vector<2x12x16x32xf32> to vector<2x8x8x32xf32>
    %23 = vector.shape_cast %22 : vector<2x8x8x32xf32> to vector<128x32xf32>
    %c0_8 = arith.constant 0 : index
    %c0_9 = arith.constant 0 : index
    %c0_10 = arith.constant 0 : index
    %c0_11 = arith.constant 0 : index
    %24 = vector.load %arg4[%c0_8, %c0_9, %c0_10, %c0_11] : memref<1x25x32x64xf32, #tpu.memory_space<vmem>>, vector<1x1x32x64xf32>
    %25 = vector.shape_cast %24 : vector<1x1x32x64xf32> to vector<32x64xf32>
    %cst_12 = arith.constant dense<0.000000e+00> : vector<128x64xf32>
    %26 = tpu.matmul %23, %25, %cst_12 {dimension_numbers = #tpu.dot_dimension_numbers<[1], [0], [0], [1], [0, 0, 1, 1], [], []>} : vector<128x32xf32>, vector<32x64xf32>, vector<128x64xf32> -> vector<128x64xf32>
    %27 = arith.addf %21, %26 : vector<128x64xf32>
    %28 = vector.extract_strided_slice %20 {offsets = [0, 0, 1, 0], sizes = [2, 8, 8, 32], strides = [1, 1, 1, 1]} : vector<2x12x16x32xf32> to vector<2x8x8x32xf32>
    %29 = vector.shape_cast %28 : vector<2x8x8x32xf32> to vector<128x32xf32>
    %c0_13 = arith.constant 0 : index
    %c1 = arith.constant 1 : index
    %c0_14 = arith.constant 0 : index
    %c0_15 = arith.constant 0 : index
    %30 = vector.load %arg4[%c0_13, %c1, %c0_14, %c0_15] : memref<1x25x32x64xf32, #tpu.memory_space<vmem>>, vector<1x1x32x64xf32>
    %31 = vector.shape_cast %30 : vector<1x1x32x64xf32> to vector<32x64xf32>
    %cst_16 = arith.constant dense<0.000000e+00> : vector<128x64xf32>
    %32 = tpu.matmul %29, %31, %cst_16 {dimension_numbers = #tpu.dot_dimension_numbers<[1], [0], [0], [1], [0, 0, 1, 1], [], []>} : vector<128x32xf32>, vector<32x64xf32>, vector<128x64xf32> -> vector<128x64xf32>
    %33 = arith.addf %27, %32 : vector<128x64xf32>
    %34 = vector.extract_strided_slice %20 {offsets = [0, 0, 2, 0], sizes = [2, 8, 8, 32], strides = [1, 1, 1, 1]} : vector<2x12x16x32xf32> to vector<2x8x8x32xf32>
    %35 = vector.shape_cast %34 : vector<2x8x8x32xf32> to vector<128x32xf32>
    %c0_17 = arith.constant 0 : index
    %c2 = arith.constant 2 : index
    %c0_18 = arith.constant 0 : index
    %c0_19 = arith.constant 0 : index
    %36 = vector.load %arg4[%c0_17, %c2, %c0_18, %c0_19] : memref<1x25x32x64xf32, #tpu.memory_space<vmem>>, vector<1x1x32x64xf32>
    %37 = vector.shape_cast %36 : vector<1x1x32x64xf32> to vector<32x64xf32>
    %cst_20 = arith.constant dense<0.000000e+00> : vector<128x64xf32>
    %38 = tpu.matmul %35, %37, %cst_20 {dimension_numbers = #tpu.dot_dimension_numbers<[1], [0], [0], [1], [0, 0, 1, 1], [], []>} : vector<128x32xf32>, vector<32x64xf32>, vector<128x64xf32> -> vector<128x64xf32>
    %39 = arith.addf %33, %38 : vector<128x64xf32>
    %40 = vector.extract_strided_slice %20 {offsets = [0, 0, 3, 0], sizes = [2, 8, 8, 32], strides = [1, 1, 1, 1]} : vector<2x12x16x32xf32> to vector<2x8x8x32xf32>
    %41 = vector.shape_cast %40 : vector<2x8x8x32xf32> to vector<128x32xf32>
    %c0_21 = arith.constant 0 : index
    %c3 = arith.constant 3 : index
    %c0_22 = arith.constant 0 : index
    %c0_23 = arith.constant 0 : index
    %42 = vector.load %arg4[%c0_21, %c3, %c0_22, %c0_23] : memref<1x25x32x64xf32, #tpu.memory_space<vmem>>, vector<1x1x32x64xf32>
    %43 = vector.shape_cast %42 : vector<1x1x32x64xf32> to vector<32x64xf32>
    %cst_24 = arith.constant dense<0.000000e+00> : vector<128x64xf32>
    %44 = tpu.matmul %41, %43, %cst_24 {dimension_numbers = #tpu.dot_dimension_numbers<[1], [0], [0], [1], [0, 0, 1, 1], [], []>} : vector<128x32xf32>, vector<32x64xf32>, vector<128x64xf32> -> vector<128x64xf32>
    %45 = arith.addf %39, %44 : vector<128x64xf32>
    %46 = vector.extract_strided_slice %20 {offsets = [0, 0, 4, 0], sizes = [2, 8, 8, 32], strides = [1, 1, 1, 1]} : vector<2x12x16x32xf32> to vector<2x8x8x32xf32>
    %47 = vector.shape_cast %46 : vector<2x8x8x32xf32> to vector<128x32xf32>
    %c0_25 = arith.constant 0 : index
    %c4 = arith.constant 4 : index
    %c0_26 = arith.constant 0 : index
    %c0_27 = arith.constant 0 : index
    %48 = vector.load %arg4[%c0_25, %c4, %c0_26, %c0_27] : memref<1x25x32x64xf32, #tpu.memory_space<vmem>>, vector<1x1x32x64xf32>
    %49 = vector.shape_cast %48 : vector<1x1x32x64xf32> to vector<32x64xf32>
    %cst_28 = arith.constant dense<0.000000e+00> : vector<128x64xf32>
    %50 = tpu.matmul %47, %49, %cst_28 {dimension_numbers = #tpu.dot_dimension_numbers<[1], [0], [0], [1], [0, 0, 1, 1], [], []>} : vector<128x32xf32>, vector<32x64xf32>, vector<128x64xf32> -> vector<128x64xf32>
    %51 = arith.addf %45, %50 : vector<128x64xf32>
    %52 = vector.extract_strided_slice %20 {offsets = [0, 1, 0, 0], sizes = [2, 8, 8, 32], strides = [1, 1, 1, 1]} : vector<2x12x16x32xf32> to vector<2x8x8x32xf32>
    %53 = vector.shape_cast %52 : vector<2x8x8x32xf32> to vector<128x32xf32>
    %c0_29 = arith.constant 0 : index
    %c5 = arith.constant 5 : index
    %c0_30 = arith.constant 0 : index
    %c0_31 = arith.constant 0 : index
    %54 = vector.load %arg4[%c0_29, %c5, %c0_30, %c0_31] : memref<1x25x32x64xf32, #tpu.memory_space<vmem>>, vector<1x1x32x64xf32>
    %55 = vector.shape_cast %54 : vector<1x1x32x64xf32> to vector<32x64xf32>
    %cst_32 = arith.constant dense<0.000000e+00> : vector<128x64xf32>
    %56 = tpu.matmul %53, %55, %cst_32 {dimension_numbers = #tpu.dot_dimension_numbers<[1], [0], [0], [1], [0, 0, 1, 1], [], []>} : vector<128x32xf32>, vector<32x64xf32>, vector<128x64xf32> -> vector<128x64xf32>
    %57 = arith.addf %51, %56 : vector<128x64xf32>
    %58 = vector.extract_strided_slice %20 {offsets = [0, 1, 1, 0], sizes = [2, 8, 8, 32], strides = [1, 1, 1, 1]} : vector<2x12x16x32xf32> to vector<2x8x8x32xf32>
    %59 = vector.shape_cast %58 : vector<2x8x8x32xf32> to vector<128x32xf32>
    %c0_33 = arith.constant 0 : index
    %c6 = arith.constant 6 : index
    %c0_34 = arith.constant 0 : index
    %c0_35 = arith.constant 0 : index
    %60 = vector.load %arg4[%c0_33, %c6, %c0_34, %c0_35] : memref<1x25x32x64xf32, #tpu.memory_space<vmem>>, vector<1x1x32x64xf32>
    %61 = vector.shape_cast %60 : vector<1x1x32x64xf32> to vector<32x64xf32>
    %cst_36 = arith.constant dense<0.000000e+00> : vector<128x64xf32>
    %62 = tpu.matmul %59, %61, %cst_36 {dimension_numbers = #tpu.dot_dimension_numbers<[1], [0], [0], [1], [0, 0, 1, 1], [], []>} : vector<128x32xf32>, vector<32x64xf32>, vector<128x64xf32> -> vector<128x64xf32>
    %63 = arith.addf %57, %62 : vector<128x64xf32>
    %64 = vector.extract_strided_slice %20 {offsets = [0, 1, 2, 0], sizes = [2, 8, 8, 32], strides = [1, 1, 1, 1]} : vector<2x12x16x32xf32> to vector<2x8x8x32xf32>
    %65 = vector.shape_cast %64 : vector<2x8x8x32xf32> to vector<128x32xf32>
    %c0_37 = arith.constant 0 : index
    %c7 = arith.constant 7 : index
    %c0_38 = arith.constant 0 : index
    %c0_39 = arith.constant 0 : index
    %66 = vector.load %arg4[%c0_37, %c7, %c0_38, %c0_39] : memref<1x25x32x64xf32, #tpu.memory_space<vmem>>, vector<1x1x32x64xf32>
    %67 = vector.shape_cast %66 : vector<1x1x32x64xf32> to vector<32x64xf32>
    %cst_40 = arith.constant dense<0.000000e+00> : vector<128x64xf32>
    %68 = tpu.matmul %65, %67, %cst_40 {dimension_numbers = #tpu.dot_dimension_numbers<[1], [0], [0], [1], [0, 0, 1, 1], [], []>} : vector<128x32xf32>, vector<32x64xf32>, vector<128x64xf32> -> vector<128x64xf32>
    %69 = arith.addf %63, %68 : vector<128x64xf32>
    %70 = vector.extract_strided_slice %20 {offsets = [0, 1, 3, 0], sizes = [2, 8, 8, 32], strides = [1, 1, 1, 1]} : vector<2x12x16x32xf32> to vector<2x8x8x32xf32>
    %71 = vector.shape_cast %70 : vector<2x8x8x32xf32> to vector<128x32xf32>
    %c0_41 = arith.constant 0 : index
    %c8 = arith.constant 8 : index
    %c0_42 = arith.constant 0 : index
    %c0_43 = arith.constant 0 : index
    %72 = vector.load %arg4[%c0_41, %c8, %c0_42, %c0_43] : memref<1x25x32x64xf32, #tpu.memory_space<vmem>>, vector<1x1x32x64xf32>
    %73 = vector.shape_cast %72 : vector<1x1x32x64xf32> to vector<32x64xf32>
    %cst_44 = arith.constant dense<0.000000e+00> : vector<128x64xf32>
    %74 = tpu.matmul %71, %73, %cst_44 {dimension_numbers = #tpu.dot_dimension_numbers<[1], [0], [0], [1], [0, 0, 1, 1], [], []>} : vector<128x32xf32>, vector<32x64xf32>, vector<128x64xf32> -> vector<128x64xf32>
    %75 = arith.addf %69, %74 : vector<128x64xf32>
    %76 = vector.extract_strided_slice %20 {offsets = [0, 1, 4, 0], sizes = [2, 8, 8, 32], strides = [1, 1, 1, 1]} : vector<2x12x16x32xf32> to vector<2x8x8x32xf32>
    %77 = vector.shape_cast %76 : vector<2x8x8x32xf32> to vector<128x32xf32>
    %c0_45 = arith.constant 0 : index
    %c9 = arith.constant 9 : index
    %c0_46 = arith.constant 0 : index
    %c0_47 = arith.constant 0 : index
    %78 = vector.load %arg4[%c0_45, %c9, %c0_46, %c0_47] : memref<1x25x32x64xf32, #tpu.memory_space<vmem>>, vector<1x1x32x64xf32>
    %79 = vector.shape_cast %78 : vector<1x1x32x64xf32> to vector<32x64xf32>
    %cst_48 = arith.constant dense<0.000000e+00> : vector<128x64xf32>
    %80 = tpu.matmul %77, %79, %cst_48 {dimension_numbers = #tpu.dot_dimension_numbers<[1], [0], [0], [1], [0, 0, 1, 1], [], []>} : vector<128x32xf32>, vector<32x64xf32>, vector<128x64xf32> -> vector<128x64xf32>
    %81 = arith.addf %75, %80 : vector<128x64xf32>
    %82 = vector.extract_strided_slice %20 {offsets = [0, 2, 0, 0], sizes = [2, 8, 8, 32], strides = [1, 1, 1, 1]} : vector<2x12x16x32xf32> to vector<2x8x8x32xf32>
    %83 = vector.shape_cast %82 : vector<2x8x8x32xf32> to vector<128x32xf32>
    %c0_49 = arith.constant 0 : index
    %c10 = arith.constant 10 : index
    %c0_50 = arith.constant 0 : index
    %c0_51 = arith.constant 0 : index
    %84 = vector.load %arg4[%c0_49, %c10, %c0_50, %c0_51] : memref<1x25x32x64xf32, #tpu.memory_space<vmem>>, vector<1x1x32x64xf32>
    %85 = vector.shape_cast %84 : vector<1x1x32x64xf32> to vector<32x64xf32>
    %cst_52 = arith.constant dense<0.000000e+00> : vector<128x64xf32>
    %86 = tpu.matmul %83, %85, %cst_52 {dimension_numbers = #tpu.dot_dimension_numbers<[1], [0], [0], [1], [0, 0, 1, 1], [], []>} : vector<128x32xf32>, vector<32x64xf32>, vector<128x64xf32> -> vector<128x64xf32>
    %87 = arith.addf %81, %86 : vector<128x64xf32>
    %88 = vector.extract_strided_slice %20 {offsets = [0, 2, 1, 0], sizes = [2, 8, 8, 32], strides = [1, 1, 1, 1]} : vector<2x12x16x32xf32> to vector<2x8x8x32xf32>
    %89 = vector.shape_cast %88 : vector<2x8x8x32xf32> to vector<128x32xf32>
    %c0_53 = arith.constant 0 : index
    %c11 = arith.constant 11 : index
    %c0_54 = arith.constant 0 : index
    %c0_55 = arith.constant 0 : index
    %90 = vector.load %arg4[%c0_53, %c11, %c0_54, %c0_55] : memref<1x25x32x64xf32, #tpu.memory_space<vmem>>, vector<1x1x32x64xf32>
    %91 = vector.shape_cast %90 : vector<1x1x32x64xf32> to vector<32x64xf32>
    %cst_56 = arith.constant dense<0.000000e+00> : vector<128x64xf32>
    %92 = tpu.matmul %89, %91, %cst_56 {dimension_numbers = #tpu.dot_dimension_numbers<[1], [0], [0], [1], [0, 0, 1, 1], [], []>} : vector<128x32xf32>, vector<32x64xf32>, vector<128x64xf32> -> vector<128x64xf32>
    %93 = arith.addf %87, %92 : vector<128x64xf32>
    %94 = vector.extract_strided_slice %20 {offsets = [0, 2, 2, 0], sizes = [2, 8, 8, 32], strides = [1, 1, 1, 1]} : vector<2x12x16x32xf32> to vector<2x8x8x32xf32>
    %95 = vector.shape_cast %94 : vector<2x8x8x32xf32> to vector<128x32xf32>
    %c0_57 = arith.constant 0 : index
    %c12 = arith.constant 12 : index
    %c0_58 = arith.constant 0 : index
    %c0_59 = arith.constant 0 : index
    %96 = vector.load %arg4[%c0_57, %c12, %c0_58, %c0_59] : memref<1x25x32x64xf32, #tpu.memory_space<vmem>>, vector<1x1x32x64xf32>
    %97 = vector.shape_cast %96 : vector<1x1x32x64xf32> to vector<32x64xf32>
    %cst_60 = arith.constant dense<0.000000e+00> : vector<128x64xf32>
    %98 = tpu.matmul %95, %97, %cst_60 {dimension_numbers = #tpu.dot_dimension_numbers<[1], [0], [0], [1], [0, 0, 1, 1], [], []>} : vector<128x32xf32>, vector<32x64xf32>, vector<128x64xf32> -> vector<128x64xf32>
    %99 = arith.addf %93, %98 : vector<128x64xf32>
    %100 = vector.extract_strided_slice %20 {offsets = [0, 2, 3, 0], sizes = [2, 8, 8, 32], strides = [1, 1, 1, 1]} : vector<2x12x16x32xf32> to vector<2x8x8x32xf32>
    %101 = vector.shape_cast %100 : vector<2x8x8x32xf32> to vector<128x32xf32>
    %c0_61 = arith.constant 0 : index
    %c13 = arith.constant 13 : index
    %c0_62 = arith.constant 0 : index
    %c0_63 = arith.constant 0 : index
    %102 = vector.load %arg4[%c0_61, %c13, %c0_62, %c0_63] : memref<1x25x32x64xf32, #tpu.memory_space<vmem>>, vector<1x1x32x64xf32>
    %103 = vector.shape_cast %102 : vector<1x1x32x64xf32> to vector<32x64xf32>
    %cst_64 = arith.constant dense<0.000000e+00> : vector<128x64xf32>
    %104 = tpu.matmul %101, %103, %cst_64 {dimension_numbers = #tpu.dot_dimension_numbers<[1], [0], [0], [1], [0, 0, 1, 1], [], []>} : vector<128x32xf32>, vector<32x64xf32>, vector<128x64xf32> -> vector<128x64xf32>
    %105 = arith.addf %99, %104 : vector<128x64xf32>
    %106 = vector.extract_strided_slice %20 {offsets = [0, 2, 4, 0], sizes = [2, 8, 8, 32], strides = [1, 1, 1, 1]} : vector<2x12x16x32xf32> to vector<2x8x8x32xf32>
    %107 = vector.shape_cast %106 : vector<2x8x8x32xf32> to vector<128x32xf32>
    %c0_65 = arith.constant 0 : index
    %c14 = arith.constant 14 : index
    %c0_66 = arith.constant 0 : index
    %c0_67 = arith.constant 0 : index
    %108 = vector.load %arg4[%c0_65, %c14, %c0_66, %c0_67] : memref<1x25x32x64xf32, #tpu.memory_space<vmem>>, vector<1x1x32x64xf32>
    %109 = vector.shape_cast %108 : vector<1x1x32x64xf32> to vector<32x64xf32>
    %cst_68 = arith.constant dense<0.000000e+00> : vector<128x64xf32>
    %110 = tpu.matmul %107, %109, %cst_68 {dimension_numbers = #tpu.dot_dimension_numbers<[1], [0], [0], [1], [0, 0, 1, 1], [], []>} : vector<128x32xf32>, vector<32x64xf32>, vector<128x64xf32> -> vector<128x64xf32>
    %111 = arith.addf %105, %110 : vector<128x64xf32>
    %112 = vector.extract_strided_slice %20 {offsets = [0, 3, 0, 0], sizes = [2, 8, 8, 32], strides = [1, 1, 1, 1]} : vector<2x12x16x32xf32> to vector<2x8x8x32xf32>
    %113 = vector.shape_cast %112 : vector<2x8x8x32xf32> to vector<128x32xf32>
    %c0_69 = arith.constant 0 : index
    %c15 = arith.constant 15 : index
    %c0_70 = arith.constant 0 : index
    %c0_71 = arith.constant 0 : index
    %114 = vector.load %arg4[%c0_69, %c15, %c0_70, %c0_71] : memref<1x25x32x64xf32, #tpu.memory_space<vmem>>, vector<1x1x32x64xf32>
    %115 = vector.shape_cast %114 : vector<1x1x32x64xf32> to vector<32x64xf32>
    %cst_72 = arith.constant dense<0.000000e+00> : vector<128x64xf32>
    %116 = tpu.matmul %113, %115, %cst_72 {dimension_numbers = #tpu.dot_dimension_numbers<[1], [0], [0], [1], [0, 0, 1, 1], [], []>} : vector<128x32xf32>, vector<32x64xf32>, vector<128x64xf32> -> vector<128x64xf32>
    %117 = arith.addf %111, %116 : vector<128x64xf32>
    %118 = vector.extract_strided_slice %20 {offsets = [0, 3, 1, 0], sizes = [2, 8, 8, 32], strides = [1, 1, 1, 1]} : vector<2x12x16x32xf32> to vector<2x8x8x32xf32>
    %119 = vector.shape_cast %118 : vector<2x8x8x32xf32> to vector<128x32xf32>
    %c0_73 = arith.constant 0 : index
    %c16 = arith.constant 16 : index
    %c0_74 = arith.constant 0 : index
    %c0_75 = arith.constant 0 : index
    %120 = vector.load %arg4[%c0_73, %c16, %c0_74, %c0_75] : memref<1x25x32x64xf32, #tpu.memory_space<vmem>>, vector<1x1x32x64xf32>
    %121 = vector.shape_cast %120 : vector<1x1x32x64xf32> to vector<32x64xf32>
    %cst_76 = arith.constant dense<0.000000e+00> : vector<128x64xf32>
    %122 = tpu.matmul %119, %121, %cst_76 {dimension_numbers = #tpu.dot_dimension_numbers<[1], [0], [0], [1], [0, 0, 1, 1], [], []>} : vector<128x32xf32>, vector<32x64xf32>, vector<128x64xf32> -> vector<128x64xf32>
    %123 = arith.addf %117, %122 : vector<128x64xf32>
    %124 = vector.extract_strided_slice %20 {offsets = [0, 3, 2, 0], sizes = [2, 8, 8, 32], strides = [1, 1, 1, 1]} : vector<2x12x16x32xf32> to vector<2x8x8x32xf32>
    %125 = vector.shape_cast %124 : vector<2x8x8x32xf32> to vector<128x32xf32>
    %c0_77 = arith.constant 0 : index
    %c17 = arith.constant 17 : index
    %c0_78 = arith.constant 0 : index
    %c0_79 = arith.constant 0 : index
    %126 = vector.load %arg4[%c0_77, %c17, %c0_78, %c0_79] : memref<1x25x32x64xf32, #tpu.memory_space<vmem>>, vector<1x1x32x64xf32>
    %127 = vector.shape_cast %126 : vector<1x1x32x64xf32> to vector<32x64xf32>
    %cst_80 = arith.constant dense<0.000000e+00> : vector<128x64xf32>
    %128 = tpu.matmul %125, %127, %cst_80 {dimension_numbers = #tpu.dot_dimension_numbers<[1], [0], [0], [1], [0, 0, 1, 1], [], []>} : vector<128x32xf32>, vector<32x64xf32>, vector<128x64xf32> -> vector<128x64xf32>
    %129 = arith.addf %123, %128 : vector<128x64xf32>
    %130 = vector.extract_strided_slice %20 {offsets = [0, 3, 3, 0], sizes = [2, 8, 8, 32], strides = [1, 1, 1, 1]} : vector<2x12x16x32xf32> to vector<2x8x8x32xf32>
    %131 = vector.shape_cast %130 : vector<2x8x8x32xf32> to vector<128x32xf32>
    %c0_81 = arith.constant 0 : index
    %c18 = arith.constant 18 : index
    %c0_82 = arith.constant 0 : index
    %c0_83 = arith.constant 0 : index
    %132 = vector.load %arg4[%c0_81, %c18, %c0_82, %c0_83] : memref<1x25x32x64xf32, #tpu.memory_space<vmem>>, vector<1x1x32x64xf32>
    %133 = vector.shape_cast %132 : vector<1x1x32x64xf32> to vector<32x64xf32>
    %cst_84 = arith.constant dense<0.000000e+00> : vector<128x64xf32>
    %134 = tpu.matmul %131, %133, %cst_84 {dimension_numbers = #tpu.dot_dimension_numbers<[1], [0], [0], [1], [0, 0, 1, 1], [], []>} : vector<128x32xf32>, vector<32x64xf32>, vector<128x64xf32> -> vector<128x64xf32>
    %135 = arith.addf %129, %134 : vector<128x64xf32>
    %136 = vector.extract_strided_slice %20 {offsets = [0, 3, 4, 0], sizes = [2, 8, 8, 32], strides = [1, 1, 1, 1]} : vector<2x12x16x32xf32> to vector<2x8x8x32xf32>
    %137 = vector.shape_cast %136 : vector<2x8x8x32xf32> to vector<128x32xf32>
    %c0_85 = arith.constant 0 : index
    %c19 = arith.constant 19 : index
    %c0_86 = arith.constant 0 : index
    %c0_87 = arith.constant 0 : index
    %138 = vector.load %arg4[%c0_85, %c19, %c0_86, %c0_87] : memref<1x25x32x64xf32, #tpu.memory_space<vmem>>, vector<1x1x32x64xf32>
    %139 = vector.shape_cast %138 : vector<1x1x32x64xf32> to vector<32x64xf32>
    %cst_88 = arith.constant dense<0.000000e+00> : vector<128x64xf32>
    %140 = tpu.matmul %137, %139, %cst_88 {dimension_numbers = #tpu.dot_dimension_numbers<[1], [0], [0], [1], [0, 0, 1, 1], [], []>} : vector<128x32xf32>, vector<32x64xf32>, vector<128x64xf32> -> vector<128x64xf32>
    %141 = arith.addf %135, %140 : vector<128x64xf32>
    %142 = vector.extract_strided_slice %20 {offsets = [0, 4, 0, 0], sizes = [2, 8, 8, 32], strides = [1, 1, 1, 1]} : vector<2x12x16x32xf32> to vector<2x8x8x32xf32>
    %143 = vector.shape_cast %142 : vector<2x8x8x32xf32> to vector<128x32xf32>
    %c0_89 = arith.constant 0 : index
    %c20 = arith.constant 20 : index
    %c0_90 = arith.constant 0 : index
    %c0_91 = arith.constant 0 : index
    %144 = vector.load %arg4[%c0_89, %c20, %c0_90, %c0_91] : memref<1x25x32x64xf32, #tpu.memory_space<vmem>>, vector<1x1x32x64xf32>
    %145 = vector.shape_cast %144 : vector<1x1x32x64xf32> to vector<32x64xf32>
    %cst_92 = arith.constant dense<0.000000e+00> : vector<128x64xf32>
    %146 = tpu.matmul %143, %145, %cst_92 {dimension_numbers = #tpu.dot_dimension_numbers<[1], [0], [0], [1], [0, 0, 1, 1], [], []>} : vector<128x32xf32>, vector<32x64xf32>, vector<128x64xf32> -> vector<128x64xf32>
    %147 = arith.addf %141, %146 : vector<128x64xf32>
    %148 = vector.extract_strided_slice %20 {offsets = [0, 4, 1, 0], sizes = [2, 8, 8, 32], strides = [1, 1, 1, 1]} : vector<2x12x16x32xf32> to vector<2x8x8x32xf32>
    %149 = vector.shape_cast %148 : vector<2x8x8x32xf32> to vector<128x32xf32>
    %c0_93 = arith.constant 0 : index
    %c21 = arith.constant 21 : index
    %c0_94 = arith.constant 0 : index
    %c0_95 = arith.constant 0 : index
    %150 = vector.load %arg4[%c0_93, %c21, %c0_94, %c0_95] : memref<1x25x32x64xf32, #tpu.memory_space<vmem>>, vector<1x1x32x64xf32>
    %151 = vector.shape_cast %150 : vector<1x1x32x64xf32> to vector<32x64xf32>
    %cst_96 = arith.constant dense<0.000000e+00> : vector<128x64xf32>
    %152 = tpu.matmul %149, %151, %cst_96 {dimension_numbers = #tpu.dot_dimension_numbers<[1], [0], [0], [1], [0, 0, 1, 1], [], []>} : vector<128x32xf32>, vector<32x64xf32>, vector<128x64xf32> -> vector<128x64xf32>
    %153 = arith.addf %147, %152 : vector<128x64xf32>
    %154 = vector.extract_strided_slice %20 {offsets = [0, 4, 2, 0], sizes = [2, 8, 8, 32], strides = [1, 1, 1, 1]} : vector<2x12x16x32xf32> to vector<2x8x8x32xf32>
    %155 = vector.shape_cast %154 : vector<2x8x8x32xf32> to vector<128x32xf32>
    %c0_97 = arith.constant 0 : index
    %c22 = arith.constant 22 : index
    %c0_98 = arith.constant 0 : index
    %c0_99 = arith.constant 0 : index
    %156 = vector.load %arg4[%c0_97, %c22, %c0_98, %c0_99] : memref<1x25x32x64xf32, #tpu.memory_space<vmem>>, vector<1x1x32x64xf32>
    %157 = vector.shape_cast %156 : vector<1x1x32x64xf32> to vector<32x64xf32>
    %cst_100 = arith.constant dense<0.000000e+00> : vector<128x64xf32>
    %158 = tpu.matmul %155, %157, %cst_100 {dimension_numbers = #tpu.dot_dimension_numbers<[1], [0], [0], [1], [0, 0, 1, 1], [], []>} : vector<128x32xf32>, vector<32x64xf32>, vector<128x64xf32> -> vector<128x64xf32>
    %159 = arith.addf %153, %158 : vector<128x64xf32>
    %160 = vector.extract_strided_slice %20 {offsets = [0, 4, 3, 0], sizes = [2, 8, 8, 32], strides = [1, 1, 1, 1]} : vector<2x12x16x32xf32> to vector<2x8x8x32xf32>
    %161 = vector.shape_cast %160 : vector<2x8x8x32xf32> to vector<128x32xf32>
    %c0_101 = arith.constant 0 : index
    %c23 = arith.constant 23 : index
    %c0_102 = arith.constant 0 : index
    %c0_103 = arith.constant 0 : index
    %162 = vector.load %arg4[%c0_101, %c23, %c0_102, %c0_103] : memref<1x25x32x64xf32, #tpu.memory_space<vmem>>, vector<1x1x32x64xf32>
    %163 = vector.shape_cast %162 : vector<1x1x32x64xf32> to vector<32x64xf32>
    %cst_104 = arith.constant dense<0.000000e+00> : vector<128x64xf32>
    %164 = tpu.matmul %161, %163, %cst_104 {dimension_numbers = #tpu.dot_dimension_numbers<[1], [0], [0], [1], [0, 0, 1, 1], [], []>} : vector<128x32xf32>, vector<32x64xf32>, vector<128x64xf32> -> vector<128x64xf32>
    %165 = arith.addf %159, %164 : vector<128x64xf32>
    %166 = vector.extract_strided_slice %20 {offsets = [0, 4, 4, 0], sizes = [2, 8, 8, 32], strides = [1, 1, 1, 1]} : vector<2x12x16x32xf32> to vector<2x8x8x32xf32>
    %167 = vector.shape_cast %166 : vector<2x8x8x32xf32> to vector<128x32xf32>
    %c0_105 = arith.constant 0 : index
    %c24 = arith.constant 24 : index
    %c0_106 = arith.constant 0 : index
    %c0_107 = arith.constant 0 : index
    %168 = vector.load %arg4[%c0_105, %c24, %c0_106, %c0_107] : memref<1x25x32x64xf32, #tpu.memory_space<vmem>>, vector<1x1x32x64xf32>
    %169 = vector.shape_cast %168 : vector<1x1x32x64xf32> to vector<32x64xf32>
    %cst_108 = arith.constant dense<0.000000e+00> : vector<128x64xf32>
    %170 = tpu.matmul %167, %169, %cst_108 {dimension_numbers = #tpu.dot_dimension_numbers<[1], [0], [0], [1], [0, 0, 1, 1], [], []>} : vector<128x32xf32>, vector<32x64xf32>, vector<128x64xf32> -> vector<128x64xf32>
    %171 = arith.addf %165, %170 : vector<128x64xf32>
    %c0_109 = arith.constant 0 : index
    %c0_110 = arith.constant 0 : index
    %c0_111 = arith.constant 0 : index
    %172 = vector.load %arg5[%c0_109, %c0_110, %c0_111] : memref<1x1x64xf32, #tpu.memory_space<vmem>>, vector<1x1x64xf32>
    %173 = vector.shape_cast %172 : vector<1x1x64xf32> to vector<1x64xf32>
    %174 = vector.broadcast %173 : vector<1x64xf32> to vector<128x64xf32>
    %175 = arith.addf %171, %174 : vector<128x64xf32>
    %176 = vector.shape_cast %175 : vector<128x64xf32> to vector<8x2x8x64xf32>
    %cst_112 = arith.constant dense<0xFF800000> : vector<8x8x64xf32>
    %177 = vector.multi_reduction <maximumf>, %176, %cst_112 [1] : vector<8x2x8x64xf32> to vector<8x8x64xf32>
    %178 = vector.extract_strided_slice %177 {offsets = [0, 0, 0], sizes = [8, 7, 64], strides = [1, 1, 1]} : vector<8x8x64xf32> to vector<8x7x64xf32>
    %179 = vector.extract_strided_slice %177 {offsets = [0, 1, 0], sizes = [8, 7, 64], strides = [1, 1, 1]} : vector<8x8x64xf32> to vector<8x7x64xf32>
    %180 = arith.maximumf %178, %179 : vector<8x7x64xf32>
    %181 = vector.shape_cast %180 : vector<8x7x64xf32> to vector<2x4x7x64xf32>
    %cst_113 = arith.constant 0.000000e+00 : f32
    %182 = vector.broadcast %cst_113 : f32 to vector<2x256xf32>
    %183 = vector.extract_strided_slice %181 {offsets = [0, 0, 0, 0], sizes = [2, 1, 1, 64], strides = [1, 1, 1, 1]} : vector<2x4x7x64xf32> to vector<2x1x1x64xf32>
    %184 = vector.shape_cast %183 : vector<2x1x1x64xf32> to vector<2x64xf32>
    %c0_114 = arith.constant 0 : index
    %c0_115 = arith.constant 0 : index
    %c0_116 = arith.constant 0 : index
    %c0_117 = arith.constant 0 : index
    %185 = vector.load %arg6[%c0_114, %c0_115, %c0_116, %c0_117] : memref<1x16x64x256xf32, #tpu.memory_space<vmem>>, vector<1x1x64x256xf32>
    %186 = vector.shape_cast %185 : vector<1x1x64x256xf32> to vector<64x256xf32>
    %cst_118 = arith.constant dense<0.000000e+00> : vector<2x256xf32>
    %187 = tpu.matmul %184, %186, %cst_118 {dimension_numbers = #tpu.dot_dimension_numbers<[1], [0], [0], [1], [0, 0, 1, 1], [], []>} : vector<2x64xf32>, vector<64x256xf32>, vector<2x256xf32> -> vector<2x256xf32>
    %188 = arith.addf %182, %187 : vector<2x256xf32>
    %189 = vector.extract_strided_slice %181 {offsets = [0, 0, 2, 0], sizes = [2, 1, 1, 64], strides = [1, 1, 1, 1]} : vector<2x4x7x64xf32> to vector<2x1x1x64xf32>
    %190 = vector.shape_cast %189 : vector<2x1x1x64xf32> to vector<2x64xf32>
    %c0_119 = arith.constant 0 : index
    %c1_120 = arith.constant 1 : index
    %c0_121 = arith.constant 0 : index
    %c0_122 = arith.constant 0 : index
    %191 = vector.load %arg6[%c0_119, %c1_120, %c0_121, %c0_122] : memref<1x16x64x256xf32, #tpu.memory_space<vmem>>, vector<1x1x64x256xf32>
    %192 = vector.shape_cast %191 : vector<1x1x64x256xf32> to vector<64x256xf32>
    %cst_123 = arith.constant dense<0.000000e+00> : vector<2x256xf32>
    %193 = tpu.matmul %190, %192, %cst_123 {dimension_numbers = #tpu.dot_dimension_numbers<[1], [0], [0], [1], [0, 0, 1, 1], [], []>} : vector<2x64xf32>, vector<64x256xf32>, vector<2x256xf32> -> vector<2x256xf32>
    %194 = arith.addf %188, %193 : vector<2x256xf32>
    %195 = vector.extract_strided_slice %181 {offsets = [0, 0, 4, 0], sizes = [2, 1, 1, 64], strides = [1, 1, 1, 1]} : vector<2x4x7x64xf32> to vector<2x1x1x64xf32>
    %196 = vector.shape_cast %195 : vector<2x1x1x64xf32> to vector<2x64xf32>
    %c0_124 = arith.constant 0 : index
    %c2_125 = arith.constant 2 : index
    %c0_126 = arith.constant 0 : index
    %c0_127 = arith.constant 0 : index
    %197 = vector.load %arg6[%c0_124, %c2_125, %c0_126, %c0_127] : memref<1x16x64x256xf32, #tpu.memory_space<vmem>>, vector<1x1x64x256xf32>
    %198 = vector.shape_cast %197 : vector<1x1x64x256xf32> to vector<64x256xf32>
    %cst_128 = arith.constant dense<0.000000e+00> : vector<2x256xf32>
    %199 = tpu.matmul %196, %198, %cst_128 {dimension_numbers = #tpu.dot_dimension_numbers<[1], [0], [0], [1], [0, 0, 1, 1], [], []>} : vector<2x64xf32>, vector<64x256xf32>, vector<2x256xf32> -> vector<2x256xf32>
    %200 = arith.addf %194, %199 : vector<2x256xf32>
    %201 = vector.extract_strided_slice %181 {offsets = [0, 0, 6, 0], sizes = [2, 1, 1, 64], strides = [1, 1, 1, 1]} : vector<2x4x7x64xf32> to vector<2x1x1x64xf32>
    %202 = vector.shape_cast %201 : vector<2x1x1x64xf32> to vector<2x64xf32>
    %c0_129 = arith.constant 0 : index
    %c3_130 = arith.constant 3 : index
    %c0_131 = arith.constant 0 : index
    %c0_132 = arith.constant 0 : index
    %203 = vector.load %arg6[%c0_129, %c3_130, %c0_131, %c0_132] : memref<1x16x64x256xf32, #tpu.memory_space<vmem>>, vector<1x1x64x256xf32>
    %204 = vector.shape_cast %203 : vector<1x1x64x256xf32> to vector<64x256xf32>
    %cst_133 = arith.constant dense<0.000000e+00> : vector<2x256xf32>
    %205 = tpu.matmul %202, %204, %cst_133 {dimension_numbers = #tpu.dot_dimension_numbers<[1], [0], [0], [1], [0, 0, 1, 1], [], []>} : vector<2x64xf32>, vector<64x256xf32>, vector<2x256xf32> -> vector<2x256xf32>
    %206 = arith.addf %200, %205 : vector<2x256xf32>
    %207 = vector.extract_strided_slice %181 {offsets = [0, 1, 0, 0], sizes = [2, 1, 1, 64], strides = [1, 1, 1, 1]} : vector<2x4x7x64xf32> to vector<2x1x1x64xf32>
    %208 = vector.shape_cast %207 : vector<2x1x1x64xf32> to vector<2x64xf32>
    %c0_134 = arith.constant 0 : index
    %c4_135 = arith.constant 4 : index
    %c0_136 = arith.constant 0 : index
    %c0_137 = arith.constant 0 : index
    %209 = vector.load %arg6[%c0_134, %c4_135, %c0_136, %c0_137] : memref<1x16x64x256xf32, #tpu.memory_space<vmem>>, vector<1x1x64x256xf32>
    %210 = vector.shape_cast %209 : vector<1x1x64x256xf32> to vector<64x256xf32>
    %cst_138 = arith.constant dense<0.000000e+00> : vector<2x256xf32>
    %211 = tpu.matmul %208, %210, %cst_138 {dimension_numbers = #tpu.dot_dimension_numbers<[1], [0], [0], [1], [0, 0, 1, 1], [], []>} : vector<2x64xf32>, vector<64x256xf32>, vector<2x256xf32> -> vector<2x256xf32>
    %212 = arith.addf %206, %211 : vector<2x256xf32>
    %213 = vector.extract_strided_slice %181 {offsets = [0, 1, 2, 0], sizes = [2, 1, 1, 64], strides = [1, 1, 1, 1]} : vector<2x4x7x64xf32> to vector<2x1x1x64xf32>
    %214 = vector.shape_cast %213 : vector<2x1x1x64xf32> to vector<2x64xf32>
    %c0_139 = arith.constant 0 : index
    %c5_140 = arith.constant 5 : index
    %c0_141 = arith.constant 0 : index
    %c0_142 = arith.constant 0 : index
    %215 = vector.load %arg6[%c0_139, %c5_140, %c0_141, %c0_142] : memref<1x16x64x256xf32, #tpu.memory_space<vmem>>, vector<1x1x64x256xf32>
    %216 = vector.shape_cast %215 : vector<1x1x64x256xf32> to vector<64x256xf32>
    %cst_143 = arith.constant dense<0.000000e+00> : vector<2x256xf32>
    %217 = tpu.matmul %214, %216, %cst_143 {dimension_numbers = #tpu.dot_dimension_numbers<[1], [0], [0], [1], [0, 0, 1, 1], [], []>} : vector<2x64xf32>, vector<64x256xf32>, vector<2x256xf32> -> vector<2x256xf32>
    %218 = arith.addf %212, %217 : vector<2x256xf32>
    %219 = vector.extract_strided_slice %181 {offsets = [0, 1, 4, 0], sizes = [2, 1, 1, 64], strides = [1, 1, 1, 1]} : vector<2x4x7x64xf32> to vector<2x1x1x64xf32>
    %220 = vector.shape_cast %219 : vector<2x1x1x64xf32> to vector<2x64xf32>
    %c0_144 = arith.constant 0 : index
    %c6_145 = arith.constant 6 : index
    %c0_146 = arith.constant 0 : index
    %c0_147 = arith.constant 0 : index
    %221 = vector.load %arg6[%c0_144, %c6_145, %c0_146, %c0_147] : memref<1x16x64x256xf32, #tpu.memory_space<vmem>>, vector<1x1x64x256xf32>
    %222 = vector.shape_cast %221 : vector<1x1x64x256xf32> to vector<64x256xf32>
    %cst_148 = arith.constant dense<0.000000e+00> : vector<2x256xf32>
    %223 = tpu.matmul %220, %222, %cst_148 {dimension_numbers = #tpu.dot_dimension_numbers<[1], [0], [0], [1], [0, 0, 1, 1], [], []>} : vector<2x64xf32>, vector<64x256xf32>, vector<2x256xf32> -> vector<2x256xf32>
    %224 = arith.addf %218, %223 : vector<2x256xf32>
    %225 = vector.extract_strided_slice %181 {offsets = [0, 1, 6, 0], sizes = [2, 1, 1, 64], strides = [1, 1, 1, 1]} : vector<2x4x7x64xf32> to vector<2x1x1x64xf32>
    %226 = vector.shape_cast %225 : vector<2x1x1x64xf32> to vector<2x64xf32>
    %c0_149 = arith.constant 0 : index
    %c7_150 = arith.constant 7 : index
    %c0_151 = arith.constant 0 : index
    %c0_152 = arith.constant 0 : index
    %227 = vector.load %arg6[%c0_149, %c7_150, %c0_151, %c0_152] : memref<1x16x64x256xf32, #tpu.memory_space<vmem>>, vector<1x1x64x256xf32>
    %228 = vector.shape_cast %227 : vector<1x1x64x256xf32> to vector<64x256xf32>
    %cst_153 = arith.constant dense<0.000000e+00> : vector<2x256xf32>
    %229 = tpu.matmul %226, %228, %cst_153 {dimension_numbers = #tpu.dot_dimension_numbers<[1], [0], [0], [1], [0, 0, 1, 1], [], []>} : vector<2x64xf32>, vector<64x256xf32>, vector<2x256xf32> -> vector<2x256xf32>
    %230 = arith.addf %224, %229 : vector<2x256xf32>
    %231 = vector.extract_strided_slice %181 {offsets = [0, 2, 0, 0], sizes = [2, 1, 1, 64], strides = [1, 1, 1, 1]} : vector<2x4x7x64xf32> to vector<2x1x1x64xf32>
    %232 = vector.shape_cast %231 : vector<2x1x1x64xf32> to vector<2x64xf32>
    %c0_154 = arith.constant 0 : index
    %c8_155 = arith.constant 8 : index
    %c0_156 = arith.constant 0 : index
    %c0_157 = arith.constant 0 : index
    %233 = vector.load %arg6[%c0_154, %c8_155, %c0_156, %c0_157] : memref<1x16x64x256xf32, #tpu.memory_space<vmem>>, vector<1x1x64x256xf32>
    %234 = vector.shape_cast %233 : vector<1x1x64x256xf32> to vector<64x256xf32>
    %cst_158 = arith.constant dense<0.000000e+00> : vector<2x256xf32>
    %235 = tpu.matmul %232, %234, %cst_158 {dimension_numbers = #tpu.dot_dimension_numbers<[1], [0], [0], [1], [0, 0, 1, 1], [], []>} : vector<2x64xf32>, vector<64x256xf32>, vector<2x256xf32> -> vector<2x256xf32>
    %236 = arith.addf %230, %235 : vector<2x256xf32>
    %237 = vector.extract_strided_slice %181 {offsets = [0, 2, 2, 0], sizes = [2, 1, 1, 64], strides = [1, 1, 1, 1]} : vector<2x4x7x64xf32> to vector<2x1x1x64xf32>
    %238 = vector.shape_cast %237 : vector<2x1x1x64xf32> to vector<2x64xf32>
    %c0_159 = arith.constant 0 : index
    %c9_160 = arith.constant 9 : index
    %c0_161 = arith.constant 0 : index
    %c0_162 = arith.constant 0 : index
    %239 = vector.load %arg6[%c0_159, %c9_160, %c0_161, %c0_162] : memref<1x16x64x256xf32, #tpu.memory_space<vmem>>, vector<1x1x64x256xf32>
    %240 = vector.shape_cast %239 : vector<1x1x64x256xf32> to vector<64x256xf32>
    %cst_163 = arith.constant dense<0.000000e+00> : vector<2x256xf32>
    %241 = tpu.matmul %238, %240, %cst_163 {dimension_numbers = #tpu.dot_dimension_numbers<[1], [0], [0], [1], [0, 0, 1, 1], [], []>} : vector<2x64xf32>, vector<64x256xf32>, vector<2x256xf32> -> vector<2x256xf32>
    %242 = arith.addf %236, %241 : vector<2x256xf32>
    %243 = vector.extract_strided_slice %181 {offsets = [0, 2, 4, 0], sizes = [2, 1, 1, 64], strides = [1, 1, 1, 1]} : vector<2x4x7x64xf32> to vector<2x1x1x64xf32>
    %244 = vector.shape_cast %243 : vector<2x1x1x64xf32> to vector<2x64xf32>
    %c0_164 = arith.constant 0 : index
    %c10_165 = arith.constant 10 : index
    %c0_166 = arith.constant 0 : index
    %c0_167 = arith.constant 0 : index
    %245 = vector.load %arg6[%c0_164, %c10_165, %c0_166, %c0_167] : memref<1x16x64x256xf32, #tpu.memory_space<vmem>>, vector<1x1x64x256xf32>
    %246 = vector.shape_cast %245 : vector<1x1x64x256xf32> to vector<64x256xf32>
    %cst_168 = arith.constant dense<0.000000e+00> : vector<2x256xf32>
    %247 = tpu.matmul %244, %246, %cst_168 {dimension_numbers = #tpu.dot_dimension_numbers<[1], [0], [0], [1], [0, 0, 1, 1], [], []>} : vector<2x64xf32>, vector<64x256xf32>, vector<2x256xf32> -> vector<2x256xf32>
    %248 = arith.addf %242, %247 : vector<2x256xf32>
    %249 = vector.extract_strided_slice %181 {offsets = [0, 2, 6, 0], sizes = [2, 1, 1, 64], strides = [1, 1, 1, 1]} : vector<2x4x7x64xf32> to vector<2x1x1x64xf32>
    %250 = vector.shape_cast %249 : vector<2x1x1x64xf32> to vector<2x64xf32>
    %c0_169 = arith.constant 0 : index
    %c11_170 = arith.constant 11 : index
    %c0_171 = arith.constant 0 : index
    %c0_172 = arith.constant 0 : index
    %251 = vector.load %arg6[%c0_169, %c11_170, %c0_171, %c0_172] : memref<1x16x64x256xf32, #tpu.memory_space<vmem>>, vector<1x1x64x256xf32>
    %252 = vector.shape_cast %251 : vector<1x1x64x256xf32> to vector<64x256xf32>
    %cst_173 = arith.constant dense<0.000000e+00> : vector<2x256xf32>
    %253 = tpu.matmul %250, %252, %cst_173 {dimension_numbers = #tpu.dot_dimension_numbers<[1], [0], [0], [1], [0, 0, 1, 1], [], []>} : vector<2x64xf32>, vector<64x256xf32>, vector<2x256xf32> -> vector<2x256xf32>
    %254 = arith.addf %248, %253 : vector<2x256xf32>
    %255 = vector.extract_strided_slice %181 {offsets = [0, 3, 0, 0], sizes = [2, 1, 1, 64], strides = [1, 1, 1, 1]} : vector<2x4x7x64xf32> to vector<2x1x1x64xf32>
    %256 = vector.shape_cast %255 : vector<2x1x1x64xf32> to vector<2x64xf32>
    %c0_174 = arith.constant 0 : index
    %c12_175 = arith.constant 12 : index
    %c0_176 = arith.constant 0 : index
    %c0_177 = arith.constant 0 : index
    %257 = vector.load %arg6[%c0_174, %c12_175, %c0_176, %c0_177] : memref<1x16x64x256xf32, #tpu.memory_space<vmem>>, vector<1x1x64x256xf32>
    %258 = vector.shape_cast %257 : vector<1x1x64x256xf32> to vector<64x256xf32>
    %cst_178 = arith.constant dense<0.000000e+00> : vector<2x256xf32>
    %259 = tpu.matmul %256, %258, %cst_178 {dimension_numbers = #tpu.dot_dimension_numbers<[1], [0], [0], [1], [0, 0, 1, 1], [], []>} : vector<2x64xf32>, vector<64x256xf32>, vector<2x256xf32> -> vector<2x256xf32>
    %260 = arith.addf %254, %259 : vector<2x256xf32>
    %261 = vector.extract_strided_slice %181 {offsets = [0, 3, 2, 0], sizes = [2, 1, 1, 64], strides = [1, 1, 1, 1]} : vector<2x4x7x64xf32> to vector<2x1x1x64xf32>
    %262 = vector.shape_cast %261 : vector<2x1x1x64xf32> to vector<2x64xf32>
    %c0_179 = arith.constant 0 : index
    %c13_180 = arith.constant 13 : index
    %c0_181 = arith.constant 0 : index
    %c0_182 = arith.constant 0 : index
    %263 = vector.load %arg6[%c0_179, %c13_180, %c0_181, %c0_182] : memref<1x16x64x256xf32, #tpu.memory_space<vmem>>, vector<1x1x64x256xf32>
    %264 = vector.shape_cast %263 : vector<1x1x64x256xf32> to vector<64x256xf32>
    %cst_183 = arith.constant dense<0.000000e+00> : vector<2x256xf32>
    %265 = tpu.matmul %262, %264, %cst_183 {dimension_numbers = #tpu.dot_dimension_numbers<[1], [0], [0], [1], [0, 0, 1, 1], [], []>} : vector<2x64xf32>, vector<64x256xf32>, vector<2x256xf32> -> vector<2x256xf32>
    %266 = arith.addf %260, %265 : vector<2x256xf32>
    %267 = vector.extract_strided_slice %181 {offsets = [0, 3, 4, 0], sizes = [2, 1, 1, 64], strides = [1, 1, 1, 1]} : vector<2x4x7x64xf32> to vector<2x1x1x64xf32>
    %268 = vector.shape_cast %267 : vector<2x1x1x64xf32> to vector<2x64xf32>
    %c0_184 = arith.constant 0 : index
    %c14_185 = arith.constant 14 : index
    %c0_186 = arith.constant 0 : index
    %c0_187 = arith.constant 0 : index
    %269 = vector.load %arg6[%c0_184, %c14_185, %c0_186, %c0_187] : memref<1x16x64x256xf32, #tpu.memory_space<vmem>>, vector<1x1x64x256xf32>
    %270 = vector.shape_cast %269 : vector<1x1x64x256xf32> to vector<64x256xf32>
    %cst_188 = arith.constant dense<0.000000e+00> : vector<2x256xf32>
    %271 = tpu.matmul %268, %270, %cst_188 {dimension_numbers = #tpu.dot_dimension_numbers<[1], [0], [0], [1], [0, 0, 1, 1], [], []>} : vector<2x64xf32>, vector<64x256xf32>, vector<2x256xf32> -> vector<2x256xf32>
    %272 = arith.addf %266, %271 : vector<2x256xf32>
    %273 = vector.extract_strided_slice %181 {offsets = [0, 3, 6, 0], sizes = [2, 1, 1, 64], strides = [1, 1, 1, 1]} : vector<2x4x7x64xf32> to vector<2x1x1x64xf32>
    %274 = vector.shape_cast %273 : vector<2x1x1x64xf32> to vector<2x64xf32>
    %c0_189 = arith.constant 0 : index
    %c15_190 = arith.constant 15 : index
    %c0_191 = arith.constant 0 : index
    %c0_192 = arith.constant 0 : index
    %275 = vector.load %arg6[%c0_189, %c15_190, %c0_191, %c0_192] : memref<1x16x64x256xf32, #tpu.memory_space<vmem>>, vector<1x1x64x256xf32>
    %276 = vector.shape_cast %275 : vector<1x1x64x256xf32> to vector<64x256xf32>
    %cst_193 = arith.constant dense<0.000000e+00> : vector<2x256xf32>
    %277 = tpu.matmul %274, %276, %cst_193 {dimension_numbers = #tpu.dot_dimension_numbers<[1], [0], [0], [1], [0, 0, 1, 1], [], []>} : vector<2x64xf32>, vector<64x256xf32>, vector<2x256xf32> -> vector<2x256xf32>
    %278 = arith.addf %272, %277 : vector<2x256xf32>
    %c0_194 = arith.constant 0 : index
    %c0_195 = arith.constant 0 : index
    %c0_196 = arith.constant 0 : index
    %279 = vector.load %arg7[%c0_194, %c0_195, %c0_196] : memref<1x1x256xf32, #tpu.memory_space<vmem>>, vector<1x1x256xf32>
    %280 = vector.shape_cast %279 : vector<1x1x256xf32> to vector<1x256xf32>
    %281 = vector.broadcast %280 : vector<1x256xf32> to vector<2x256xf32>
    %282 = arith.addf %278, %281 : vector<2x256xf32>
    %c0_197 = arith.constant 0 : index
    %c0_198 = arith.constant 0 : index
    %c0_199 = arith.constant 0 : index
    %283 = vector.load %arg8[%c0_197, %c0_198, %c0_199] : memref<1x256x10xf32, #tpu.memory_space<vmem>>, vector<1x256x10xf32>
    %284 = vector.shape_cast %283 : vector<1x256x10xf32> to vector<256x10xf32>
    %cst_200 = arith.constant dense<0.000000e+00> : vector<2x10xf32>
    %285 = tpu.matmul %282, %284, %cst_200 {dimension_numbers = #tpu.dot_dimension_numbers<[1], [0], [0], [1], [0, 0, 1, 1], [], []>} : vector<2x256xf32>, vector<256x10xf32>, vector<2x10xf32> -> vector<2x10xf32>
    %c0_201 = arith.constant 0 : index
    %c0_202 = arith.constant 0 : index
    %c0_203 = arith.constant 0 : index
    %286 = vector.load %arg9[%c0_201, %c0_202, %c0_203] : memref<1x1x10xf32, #tpu.memory_space<vmem>>, vector<1x1x10xf32>
    %287 = vector.shape_cast %286 : vector<1x1x10xf32> to vector<1x10xf32>
    %288 = vector.broadcast %287 : vector<1x10xf32> to vector<2x10xf32>
    %289 = arith.addf %285, %288 : vector<2x10xf32>
    %cst_204 = arith.constant dense<0xFF800000> : vector<2xf32>
    %290 = vector.multi_reduction <maximumf>, %289, %cst_204 [1] : vector<2x10xf32> to vector<2xf32>
    %291 = vector.shape_cast %290 : vector<2xf32> to vector<2x1xf32>
    %292 = vector.broadcast %291 : vector<2x1xf32> to vector<2x10xf32>
    %293 = arith.subf %289, %292 : vector<2x10xf32>
    %294 = math.exp %293 : vector<2x10xf32>
    %cst_205 = arith.constant dense<0.000000e+00> : vector<2xf32>
    %295 = vector.multi_reduction <add>, %294, %cst_205 [1] : vector<2x10xf32> to vector<2xf32>
    %296 = vector.shape_cast %295 : vector<2xf32> to vector<2x1xf32>
    %297 = vector.broadcast %296 : vector<2x1xf32> to vector<2x10xf32>
    %298 = arith.divf %294, %297 : vector<2x10xf32>
    %c0_206 = arith.constant 0 : index
    %c0_207 = arith.constant 0 : index
    %c0_208 = arith.constant 0 : index
    %299 = vector.load %arg10[%c0_206, %c0_207, %c0_208] : memref<1x2x10xf32, #tpu.memory_space<vmem>>, vector<1x2x10xf32>
    %300 = vector.shape_cast %299 : vector<1x2x10xf32> to vector<2x10xf32>
    %301 = vector.shape_cast %298 : vector<2x10xf32> to vector<1x2x10xf32>
    tpu.vector_store %arg10[%c0_206, %c0_207, %c0_208], %301 {strides = array<i32>} : memref<1x2x10xf32, #tpu.memory_space<vmem>>, vector<1x2x10xf32>,
    return
  }
  func.func @transform_0(%arg0: i32) -> (i32, i32) {
    %c0_i32 = arith.constant 0 : i32
    %c0_i32_0 = arith.constant 0 : i32
    %c0_i32_1 = arith.constant 0 : i32
    return %c0_i32, %c0_i32_0 : i32, i32
  }
  func.func @transform_1(%arg0: i32) -> (i32, i32, i32) {
    %c0_i32 = arith.constant 0 : i32
    %c0_i32_0 = arith.constant 0 : i32
    %c0_i32_1 = arith.constant 0 : i32
    return %arg0, %c0_i32, %c0_i32_0 : i32, i32, i32
  }
  func.func @transform_2(%arg0: i32) -> (i32, i32, i32) {
    %c0_i32 = arith.constant 0 : i32
    %c0_i32_0 = arith.constant 0 : i32
    %c0_i32_1 = arith.constant 0 : i32
    return %arg0, %c0_i32, %c0_i32_0 : i32, i32, i32
  }
  func.func @transform_3(%arg0: i32) -> (i32, i32, i32, i32) {
    %c0_i32 = arith.constant 0 : i32
    %c0_i32_0 = arith.constant 0 : i32
    %c0_i32_1 = arith.constant 0 : i32
    %c0_i32_2 = arith.constant 0 : i32
    return %arg0, %c0_i32, %c0_i32_0, %c0_i32_1 : i32, i32, i32, i32
  }
  func.func @transform_4(%arg0: i32) -> (i32, i32, i32) {
    %c0_i32 = arith.constant 0 : i32
    %c0_i32_0 = arith.constant 0 : i32
    %c0_i32_1 = arith.constant 0 : i32
    return %arg0, %c0_i32, %c0_i32_0 : i32, i32, i32
  }
  func.func @transform_5(%arg0: i32) -> (i32, i32, i32, i32) {
    %c0_i32 = arith.constant 0 : i32
    %c0_i32_0 = arith.constant 0 : i32
    %c0_i32_1 = arith.constant 0 : i32
    %c0_i32_2 = arith.constant 0 : i32
    return %arg0, %c0_i32, %c0_i32_0, %c0_i32_1 : i32, i32, i32, i32
  }
  func.func @transform_6(%arg0: i32) -> (i32, i32, i32) {
    %c0_i32 = arith.constant 0 : i32
    %c0_i32_0 = arith.constant 0 : i32
    %c0_i32_1 = arith.constant 0 : i32
    return %arg0, %c0_i32, %c0_i32_0 : i32, i32, i32
  }
  func.func @transform_7(%arg0: i32) -> (i32, i32, i32) {
    %c0_i32 = arith.constant 0 : i32
    %c0_i32_0 = arith.constant 0 : i32
    %c0_i32_1 = arith.constant 0 : i32
    return %arg0, %c0_i32, %c0_i32_0 : i32, i32, i32
  }
  func.func @transform_8(%arg0: i32) -> (i32, i32, i32) {
    %c0_i32 = arith.constant 0 : i32
    %c0_i32_0 = arith.constant 0 : i32
    %c0_i32_1 = arith.constant 0 : i32
    return %arg0, %c0_i32, %c0_i32_0 : i32, i32, i32
  }
  func.func @transform_9(%arg0: i32) -> (i32, i32, i32) {
    %c0_i32 = arith.constant 0 : i32
    %c0_i32_0 = arith.constant 0 : i32
    %c0_i32_1 = arith.constant 0 : i32
    return %arg0, %c0_i32, %c0_i32_0 : i32, i32, i32
  }
}

</mosaic_0001>

<bundles_post_ra>
// kernel: model_gpu_forward.1
= control target key start
LH: loop header
LB: loop body
LE: loop exit
PB: predicated region body
PF: predicated region fallthrough
CT: control target
= control target key end

     0   :  { %s7115_s30 = smov 0   ;;  %s11195_s0 = inlined_call_operand.vmem [shape: f32[1536,32], index: 0, kind: input, shape index: {}]   ;;  %s11196_s1 = inlined_call_operand.vmem [shape: f32[2,32,32], index: 1, kind: input, shape index: {}]   ;;  %s11197_s2 = inlined_call_operand.vmem [shape: f32[2,1,32], index: 2, kind: input, shape index: {}]   ;;  %s11198_s3 = inlined_call_operand.vmem [shape: f32[2,25,32,64], index: 3, kind: input, shape index: {}]   ;;  %s11199_s4 = inlined_call_operand.vmem [shape: f32[2,1,64], index: 4, kind: input, shape index: {}]   ;;  %s11200_s5 = inlined_call_operand.vmem [shape: f32[2,16,64,256], index: 5, kind: input, shape index: {}]   ;;  %s11201_s6 = inlined_call_operand.vmem [shape: f32[2,1,256], index: 6, kind: input, shape index: {}]   ;;  %s11202_s7 = inlined_call_operand.vmem [shape: f32[2,256,10], index: 7, kind: input, shape index: {}]   ;;  %s11203_s8 = inlined_call_operand.vmem [shape: f32[2,1,10], index: 8, kind: input, shape index: {}]   ;;  %s11204_s9 = inlined_call_operand.vmem [shape: f32[2,2,10], index: 9, kind: output, shape index: {}]  }
   0x1 LB: > { %s6048_s10 = sadd.s32 4294967295, %s7063_s30   ;;  %p6052_p0 = scmp.ge.s32.totalorder %s7063_s30, 1  ;;  %s7063_s30 = sphi %s7115_s30, %s19_s30  }
   0x2   : > { %p350_p1 = scmp.lt.s32.totalorder %s7063_s30, 3 }
   0x4   : > { %p351_p2 = pnand %p6052_p0, %p350_p1 }
   0x6   : > { %354 = sbr.rel (%p351_p2) target bundleno = 3283 (0xcd3), region = 56 }
   0xb   : > { %p413_p3 = scmp.lt.s32.totalorder %s6048_s10, 1  ;;  %v450_v4 = vld [vmem:[%s11195_s0] sm:$0xff]  ;;  %vm646_vm0 = vcmask 261120   ;;  %v451_v5 = vld [vmem:[%s11195_s0 + $0x8] sm:$0xff]  ;;  %v452_v6 = vld [vmem:[%s11195_s0 + $0x10] sm:$0xff]  ;;  %vm2048_vm1 = vcmask 1046528  }
   0xc   : > { %v453_v7 = vld [vmem:[%s11195_s0 + $0x18] sm:$0xff]  ;;  %v454_v8 = vld [vmem:[%s11195_s0 + $0x20] sm:$0xff]  ;;  %v455_v9 = vld [vmem:[%s11195_s0 + $0x28] sm:$0xff]  ;;  %vm2296_vm2 = vcmask 1045504   ;;  %vm2630_vm3 = vcmask 1043456   ;;  %vm2463_vm4 = vcmask 1044480  }
   0xd   : > { %s11830_s10 = smov (!%p413_p3, %s6048_s10), 1  ;;  %v456_v10 = vld [vmem:[%s11195_s0 + $0x30] sm:$0xff]  ;;  %v457_v11 = vld [vmem:[%s11195_s0 + $0x38] sm:$0xff]  ;;  %v458_v12 = vld [vmem:[%s11195_s0 + $0x40] sm:$0xff]  ;;  %vm4729_vm5 = vcmask 523264   ;;  %vm4823_vm6 = vcmask 1041409  }
   0xe   : > { %s7024_s11 = sshll.u32 %s11830_s10, 5  ;;  %s7130_s14 = scalar_lea.vmem %s11197_s2, %s11830_s10  ;;  %v459_v13 = vld [vmem:[%s11195_s0 + $0x48] sm:$0xff]  ;;  %v460_v14 = vld [vmem:[%s11195_s0 + $0x50] sm:$0xff]  ;;  %v461_v15 = vld [vmem:[%s11195_s0 + $0x58] sm:$0xff]  ;;  %vm5894_vm7 = vcmask 74752  }
   0xf   : > { %s417_s17 = scalar_lea.vmem %s11196_s1, %s7024_s11  ;;  %s428_s20 = scalar_lea.vmem %s11199_s4, %s11830_s10  ;;  %v462_v16 = vld [vmem:[%s11195_s0 + $0x60] sm:$0xff]  ;;  %v463_v17 = vld [vmem:[%s11195_s0 + $0x68] sm:$0xff]  ;;  %v464_v18 = vld [vmem:[%s11195_s0 + $0x70] sm:$0xff] }
  0x10   : > { %v645_v0 = vld [vmem:[%s417_s17 + $0x18] sm:$0xff]  ;;  %v644_v1 = vld [vmem:[%s417_s17 + $0x10] sm:$0xff]  ;;  %v643_v2 = vld [vmem:[%s417_s17 + $0x8] sm:$0xff]  ;;  %s7025_s21 = sshll.u32 %s11830_s10, 11  ;;  %s445_s27 = scalar_lea.vmem %s11203_s8, %s11830_s10 }
  0x11   : > { %1235 = vmatpush.msra.mxu0 %v645_v0  ;;  %7027 = vmatpush.msra.mxu1 %v645_v0  ;;  %v642_v3 = vld [vmem:[%s417_s17] sm:$0xff]  ;;  %v465_v19 = vld [vmem:[%s11195_s0 + $0x78] sm:$0xff]  ;;  %v467_v23 = vld [vmem:[%s11195_s0 + $0x88] sm:$0xff]  ;;  %s7039_s17 = smul.u32 800, %s11830_s10  ;;  %s10625_s23 = scalar_lea.vmem %s11200_s5, %s7025_s21 }
  0x12   : > { %v466_v21 = vld [vmem:[%s11195_s0 + $0x80] sm:$0xff]  ;;  %v468_v25 = vld [vmem:[%s11195_s0 + $0x90] sm:$0xff]  ;;  %v469_v27 = vld [vmem:[%s11195_s0 + $0x98] sm:$0xff]  ;;  %s7026_s28 = sshll.u32 %s11830_s10, 8  ;;  %s6058_s13 = sshll.u32 %s11830_s10, 1 }
  0x13   : > { %1236 = vmatpush.msra.mxu0 %v644_v1  ;;  %7028 = vmatpush.msra.mxu1 %v644_v1  ;;  %v470_v29 = vld [vmem:[%s11195_s0 + $0xa0] sm:$0xff]  ;;  %v471_v31 = vld [vmem:[%s11195_s0 + $0xa8] sm:$0xff]  ;;  %v472_v33 = vld [vmem:[%s11195_s0 + $0xb0] sm:$0xff]  ;;  %s8049_s25 = scalar_lea.vmem %s11198_s3, %s7039_s17  ;;  %s11116_s12 = scalar_lea.vmem %s11202_s7, %s7026_s28 }
  0x14   : > { %v473_v35 = vld [vmem:[%s11195_s0 + $0xb8] sm:$0xff]  ;;  %v474_v37 = vld [vmem:[%s11195_s0 + $0xc0] sm:$0xff]  ;;  %v475_v39 = vld [vmem:[%s11195_s0 + $0xc8] sm:$0xff]  ;;  %s437_s17 = scalar_lea.vmem %s11201_s6, %s6058_s13  ;;  %s449_s21 = scalar_lea.vmem %s11204_s9, %s6058_s13 }
  0x15   : > { %1237 = vmatpush.msra.mxu0 %v643_v2  ;;  %7029 = vmatpush.msra.mxu1 %v643_v2  ;;  %v476_v41 = vld [vmem:[%s11195_s0 + $0xd0] sm:$0xff]  ;;  %v477_v43 = vld [vmem:[%s11195_s0 + $0xd8] sm:$0xff]  ;;  %v478_v45 = vld [vmem:[%s11195_s0 + $0xe0] sm:$0xff] }
  0x16   : > { %v479_v47 = vld [vmem:[%s11195_s0 + $0xe8] sm:$0xff]  ;;  %v480_v49 = vld [vmem:[%s11195_s0 + $0xf0] sm:$0xff]  ;;  %v481_v51 = vld [vmem:[%s11195_s0 + $0xf8] sm:$0xff] }
  0x17   : > { %1238 = vmatpush.msra.mxu0 %v642_v3  ;;  %7030 = vmatpush.msra.mxu1 %v642_v3  ;;  %v482_v53 = vld [vmem:[%s11195_s0 + $0x100] sm:$0xff]  ;;  %v483_v55 = vld [vmem:[%s11195_s0 + $0x108] sm:$0xff]  ;;  %v484_v57 = vld [vmem:[%s11195_s0 + $0x110] sm:$0xff] }
  0x18   : > { %6062 = vmatmul.msk.f32.vlgmr.msra.gmra.mxu0 %vm646_vm0, %v450_v4  ;;  %v485_v59 = vld [vmem:[%s11195_s0 + $0x118] sm:$0xff]  ;;  %v486_v61 = vld [vmem:[%s11195_s0 + $0x120] sm:$0xff]  ;;  %v487_v63 = vld [vmem:[%s11195_s0 + $0x128] sm:$0xff] }
  0x19   : > { %v488_v1 = vld [vmem:[%s11195_s0 + $0x130] sm:$0xff]  ;;  %v489_v3 = vld [vmem:[%s11195_s0 + $0x138] sm:$0xff] }
  0x20   : > { %6063 = vmatmul.msk.f32.gmra.mxu0 %vm646_vm0, %v451_v5  ;;  %v490_v5 = vld [vmem:[%s11195_s0 + $0x140] sm:$0xff] }
  0x28   : > { %6064 = vmatmul.msk.f32.gmra.mxu0 %vm646_vm0, %v452_v6 }
  0x30   : > { %6065 = vmatmul.msk.f32.gmra.mxu0 %vm646_vm0, %v453_v7  ;;  %v491_v7 = vld [vmem:[%s11195_s0 + $0x148] sm:$0xff] }
  0x38   : > { %6066 = vmatmul.msk.f32.gmra.mxu0 %vm646_vm0, %v454_v8 }
  0x40   : > { %6067 = vmatmul.msk.f32.gmra.mxu0 %vm646_vm0, %v455_v9  ;;  %v492_v9 = vld [vmem:[%s11195_s0 + $0x150] sm:$0xff] }
  0x48   : > { %6068 = vmatmul.msk.f32.gmra.mxu0 %vm646_vm0, %v456_v10 }
  0x50   : > { %6069 = vmatmul.msk.f32.gmra.mxu0 %vm646_vm0, %v457_v11  ;;  %v493_v11 = vld [vmem:[%s11195_s0 + $0x158] sm:$0xff] }
  0x58   : > { %6070 = vmatmul.msk.f32.gmra.mxu0 %vm646_vm0, %v458_v12 }
  0x60   : > { %6071 = vmatmul.msk.f32.gmra.mxu0 %vm646_vm0, %v459_v13  ;;  %v494_v13 = vld [vmem:[%s11195_s0 + $0x160] sm:$0xff] }
  0x68   : > { %6072 = vmatmul.msk.f32.gmra.mxu0 %vm646_vm0, %v460_v14 }
  0x70   : > { %6073 = vmatmul.msk.f32.gmra.mxu0 %vm646_vm0, %v461_v15  ;;  %v495_v15 = vld [vmem:[%s11195_s0 + $0x168] sm:$0xff] }
  0x78   : > { %6074 = vmatmul.msk.f32.gmra.mxu0 %vm646_vm0, %v462_v16 }
  0x80   : > { %6075 = vmatmul.msk.f32.gmra.mxu0 %vm646_vm0, %v463_v17  ;;  %v496_v17 = vld [vmem:[%s11195_s0 + $0x170] sm:$0xff] }
  0x88   : > { %6076 = vmatmul.msk.f32.gmra.mxu0 %vm646_vm0, %v464_v18 }
  0x90   : > { %6077 = vmatmul.msk.f32.gmra.mxu0 %vm646_vm0, %v465_v19  ;;  %v497_v19 = vld [vmem:[%s11195_s0 + $0x178] sm:$0xff] }
  0x95   : > { %v7203_v20 = vpop.f32.mrf.mxu0 }
  0x98   : > { %6078 = vmatmul.msk.f32.gmra.mxu0 %vm646_vm0, %v466_v21 }
  0x9d   : > { %v7209_v22 = vpop.f32.mrf.mxu0 }
  0xa0   : > { %6079 = vmatmul.msk.f32.gmra.mxu0 %vm646_vm0, %v467_v23  ;;  %v498_v23 = vld [vmem:[%s11195_s0 + $0x180] sm:$0xff] }
  0xa5   : > { %v7215_v24 = vpop.f32.mrf.mxu0 }
  0xa8   : > { %6080 = vmatmul.msk.f32.gmra.mxu0 %vm646_vm0, %v468_v25 }
  0xad   : > { %v7221_v26 = vpop.f32.mrf.mxu0 }
  0xb0   : > { %6081 = vmatmul.msk.f32.gmra.mxu0 %vm646_vm0, %v469_v27  ;;  %v499_v27 = vld [vmem:[%s11195_s0 + $0x188] sm:$0xff] }
  0xb5   : > { %v7227_v28 = vpop.f32.mrf.mxu0 }
  0xb8   : > { %6082 = vmatmul.msk.f32.gmra.mxu0 %vm646_vm0, %v470_v29 }
  0xbd   : > { %v7233_v30 = vpop.f32.mrf.mxu0 }
  0xc0   : > { %6083 = vmatmul.msk.f32.gmra.mxu0 %vm646_vm0, %v471_v31  ;;  %v500_v31 = vld [vmem:[%s11195_s0 + $0x190] sm:$0xff] }
  0xc5   : > { %v7239_v32 = vpop.f32.mrf.mxu0 }
  0xc8   : > { %6084 = vmatmul.msk.f32.gmra.mxu0 %vm646_vm0, %v472_v33 }
  0xcd   : > { %v7245_v34 = vpop.f32.mrf.mxu0 }
  0xd0   : > { %6085 = vmatmul.msk.f32.gmra.mxu0 %vm646_vm0, %v473_v35  ;;  %v501_v35 = vld [vmem:[%s11195_s0 + $0x198] sm:$0xff] }
  0xd5   : > { %v7251_v36 = vpop.f32.mrf.mxu0 }
  0xd8   : > { %6086 = vmatmul.msk.f32.gmra.mxu0 %vm646_vm0, %v474_v37 }
  0xdd   : > { %v7257_v38 = vpop.f32.mrf.mxu0 }
  0xe0   : > { %6087 = vmatmul.msk.f32.gmra.mxu0 %vm646_vm0, %v475_v39  ;;  %v502_v39 = vld [vmem:[%s11195_s0 + $0x1a0] sm:$0xff] }
  0xe5   : > { %v7263_v40 = vpop.f32.mrf.mxu0 }
  0xe8   : > { %6088 = vmatmul.msk.f32.gmra.mxu0 %vm646_vm0, %v476_v41 }
  0xed   : > { %v7269_v42 = vpop.f32.mrf.mxu0 }
  0xf0   : > { %6089 = vmatmul.msk.f32.gmra.mxu0 %vm646_vm0, %v477_v43  ;;  %v503_v43 = vld [vmem:[%s11195_s0 + $0x1a8] sm:$0xff] }
  0xf5   : > { %v7275_v44 = vpop.f32.mrf.mxu0 }
  0xf8   : > { %6090 = vmatmul.msk.f32.gmra.mxu0 %vm646_vm0, %v478_v45 }
  0xfd   : > { %v7281_v46 = vpop.f32.mrf.mxu0 }
 0x100   : > { %6091 = vmatmul.msk.f32.gmra.mxu0 %vm646_vm0, %v479_v47  ;;  %v504_v47 = vld [vmem:[%s11195_s0 + $0x1b0] sm:$0xff] }
 0x105   : > { %v7287_v48 = vpop.f32.mrf.mxu0 }
 0x106   : > { %11375 = vst [vmem:[#allocation2_spill] sm:$0xff] %v7287_v48 }
 0x108   : > { %6092 = vmatmul.msk.f32.gmra.mxu0 %vm646_vm0, %v480_v49 }
 0x10d   : > { %v7293_v50 = vpop.f32.mrf.mxu0 }
 0x10e   : > { %11376 = vst [vmem:[#allocation3_spill] sm:$0xff] %v7293_v50 }
 0x110   : > { %6093 = vmatmul.msk.f32.gmra.mxu0 %vm646_vm0, %v481_v51  ;;  %v505_v51 = vld [vmem:[%s11195_s0 + $0x1b8] sm:$0xff] }
 0x115   : > { %v7299_v52 = vpop.f32.mrf.mxu0 }
 0x116   : > { %11377 = vst [vmem:[#allocation4_spill] sm:$0xff] %v7299_v52 }
 0x118   : > { %6094 = vmatmul.msk.f32.gmra.mxu0 %vm646_vm0, %v482_v53 }
 0x11d   : > { %v7305_v54 = vpop.f32.mrf.mxu0 }
 0x11e   : > { %11378 = vst [vmem:[#allocation5_spill] sm:$0xff] %v7305_v54 }
 0x120   : > { %6095 = vmatmul.msk.f32.gmra.mxu0 %vm646_vm0, %v483_v55  ;;  %v506_v55 = vld [vmem:[%s11195_s0 + $0x1c0] sm:$0xff] }
 0x125   : > { %v7311_v56 = vpop.f32.mrf.mxu0 }
 0x126   : > { %11379 = vst [vmem:[#allocation6_spill] sm:$0xff] %v7311_v56 }
 0x128   : > { %6096 = vmatmul.msk.f32.gmra.mxu0 %vm646_vm0, %v484_v57 }
 0x12d   : > { %v7317_v58 = vpop.f32.mrf.mxu0 }
 0x12e   : > { %11380 = vst [vmem:[#allocation7_spill] sm:$0xff] %v7317_v58 }
 0x130   : > { %6097 = vmatmul.msk.f32.gmra.mxu0 %vm646_vm0, %v485_v59  ;;  %v507_v59 = vld [vmem:[%s11195_s0 + $0x1c8] sm:$0xff] }
 0x135   : > { %v7323_v60 = vpop.f32.mrf.mxu0 }
 0x136   : > { %11381 = vst [vmem:[#allocation8_spill] sm:$0xff] %v7323_v60 }
 0x138   : > { %6098 = vmatmul.msk.f32.gmra.mxu0 %vm646_vm0, %v486_v61 }
 0x13d   : > { %v7329_v62 = vpop.f32.mrf.mxu0 }
 0x13e   : > { %11382 = vst [vmem:[#allocation9_spill] sm:$0xff] %v7329_v62 }
 0x140   : > { %6099 = vmatmul.msk.f32.gmra.mxu0 %vm646_vm0, %v487_v63  ;;  %v508_v63 = vld [vmem:[%s11195_s0 + $0x1d0] sm:$0xff] }
 0x145   : > { %v7335_v0 = vpop.f32.mrf.mxu0 }
 0x146   : > { %11383 = vst [vmem:[#allocation10_spill] sm:$0xff] %v7335_v0 }
 0x148   : > { %6100 = vmatmul.msk.f32.gmra.mxu0 %vm646_vm0, %v488_v1 }
 0x14d   : > { %v7341_v2 = vpop.f32.mrf.mxu0 }
 0x14e   : > { %11384 = vst [vmem:[#allocation11_spill] sm:$0xff] %v7341_v2 }
 0x150   : > { %6101 = vmatmul.msk.f32.gmra.mxu0 %vm646_vm0, %v489_v3  ;;  %v509_v3 = vld [vmem:[%s11195_s0 + $0x1d8] sm:$0xff] }
 0x155   : > { %v7347_v4 = vpop.f32.mrf.mxu0 }
 0x156   : > { %11385 = vst [vmem:[#allocation12_spill] sm:$0xff] %v7347_v4 }
 0x158   : > { %6102 = vmatmul.msk.f32.gmra.mxu0 %vm646_vm0, %v490_v5 }
 0x15d   : > { %v7353_v6 = vpop.f32.mrf.mxu0 }
 0x15e   : > { %11386 = vst [vmem:[#allocation13_spill] sm:$0xff] %v7353_v6 }
 0x160   : > { %6103 = vmatmul.msk.f32.gmra.mxu0 %vm646_vm0, %v491_v7  ;;  %v510_v7 = vld [vmem:[%s11195_s0 + $0x1e0] sm:$0xff] }
 0x165   : > { %v7359_v8 = vpop.f32.mrf.mxu0 }
 0x166   : > { %11387 = vst [vmem:[#allocation14_spill] sm:$0xff] %v7359_v8 }
 0x168   : > { %6104 = vmatmul.msk.f32.gmra.mxu0 %vm646_vm0, %v492_v9 }
 0x16d   : > { %v7365_v10 = vpop.f32.mrf.mxu0 }
 0x16e   : > { %11388 = vst [vmem:[#allocation15_spill] sm:$0xff] %v7365_v10 }
 0x170   : > { %6105 = vmatmul.msk.f32.gmra.mxu0 %vm646_vm0, %v493_v11  ;;  %v511_v11 = vld [vmem:[%s11195_s0 + $0x1e8] sm:$0xff] }
 0x175   : > { %v7371_v12 = vpop.f32.mrf.mxu0 }
 0x176   : > { %11389 = vst [vmem:[#allocation16_spill] sm:$0xff] %v7371_v12 }
 0x178   : > { %6106 = vmatmul.msk.f32.gmra.mxu0 %vm646_vm0, %v494_v13 }
 0x17d   : > { %v7377_v14 = vpop.f32.mrf.mxu0 }
 0x17e   : > { %11390 = vst [vmem:[#allocation17_spill] sm:$0xff] %v7377_v14 }
 0x180   : > { %6107 = vmatmul.msk.f32.gmra.mxu0 %vm646_vm0, %v495_v15  ;;  %v512_v15 = vld [vmem:[%s11195_s0 + $0x1f0] sm:$0xff] }
 0x185   : > { %v7383_v16 = vpop.f32.mrf.mxu0 }
 0x188   : > { %6108 = vmatmul.msk.f32.gmra.mxu0 %vm646_vm0, %v496_v17 }
 0x18d   : > { %v7389_v18 = vpop.f32.mrf.mxu0 }
 0x18e   : > { %11391 = vst [vmem:[#allocation18_spill] sm:$0xff] %v7389_v18 }
 0x190   : > { %6109 = vmatmul.msk.f32.gmra.mxu0 %vm646_vm0, %v497_v19  ;;  %v513_v19 = vld [vmem:[%s11195_s0 + $0x1f8] sm:$0xff] }
 0x195   : > { %v7395_v21 = vpop.f32.mrf.mxu0 }
 0x198   : > { %6110 = vmatmul.msk.f32.gmra.mxu0 %vm646_vm0, %v498_v23 }
 0x19d   : > { %v7401_v25 = vpop.f32.mrf.mxu0 }
 0x19e   : > { %11392 = vst [vmem:[#allocation19_spill] sm:$0xff] %v7401_v25  ;;  %v616_v25 = vld [vmem:[%s11195_s0 + $0x530] sm:$0xff] }
 0x19f   : > { %6228 = vmatmul.msk.f32.vlgmr.msra.gmra.mxu1 %vm646_vm0, %v616_v25  ;;  %v566_v25 = vld [vmem:[%s11195_s0 + $0x3a0] sm:$0xff] }
 0x1a0   : > { %6111 = vmatmul.msk.f32.gmra.mxu0 %vm646_vm0, %v499_v27  ;;  %v514_v27 = vld [vmem:[%s11195_s0 + $0x200] sm:$0xff] }
 0x1a5   : > { %v7407_v29 = vpop.f32.mrf.mxu0 }
 0x1a8   : > { %6112 = vmatmul.msk.f32.gmra.mxu0 %vm646_vm0, %v500_v31 }
 0x1ad   : > { %v7413_v33 = vpop.f32.mrf.mxu0 }
 0x1ae   : > { %11393 = vst [vmem:[#allocation20_spill] sm:$0xff] %v7413_v33 }
 0x1b0   : > { %6113 = vmatmul.msk.f32.gmra.mxu0 %vm646_vm0, %v501_v35  ;;  %v515_v35 = vld [vmem:[%s11195_s0 + $0x208] sm:$0xff] }
 0x1b5   : > { %v7419_v37 = vpop.f32.mrf.mxu0 }
 0x1b8   : > { %6114 = vmatmul.msk.f32.gmra.mxu0 %vm646_vm0, %v502_v39 }
 0x1bd   : > { %v7425_v41 = vpop.f32.mrf.mxu0 }
 0x1be   : > { %11394 = vst [vmem:[#allocation21_spill] sm:$0xff] %v7425_v41 }
 0x1c0   : > { %6115 = vmatmul.msk.f32.gmra.mxu0 %vm646_vm0, %v503_v43  ;;  %v516_v43 = vld [vmem:[%s11195_s0 + $0x210] sm:$0xff] }
 0x1c5   : > { %v7431_v45 = vpop.f32.mrf.mxu0 }
 0x1c8   : > { %6116 = vmatmul.msk.f32.gmra.mxu0 %vm646_vm0, %v504_v47 }
 0x1cd   : > { %v7437_v49 = vpop.f32.mrf.mxu0 }
 0x1ce   : > { %11395 = vst [vmem:[#allocation22_spill] sm:$0xff] %v7437_v49 }
 0x1d0   : > { %6117 = vmatmul.msk.f32.gmra.mxu0 %vm646_vm0, %v505_v51  ;;  %v517_v51 = vld [vmem:[%s11195_s0 + $0x218] sm:$0xff] }
 0x1d5   : > { %v7443_v53 = vpop.f32.mrf.mxu0 }
 0x1d6   : > { %11396 = vst [vmem:[#allocation23_spill] sm:$0xff] %v7443_v53 }
 0x1d8   : > { %6118 = vmatmul.msk.f32.gmra.mxu0 %vm646_vm0, %v506_v55 }
 0x1dd   : > { %v7449_v57 = vpop.f32.mrf.mxu0 }
 0x1de   : > { %11397 = vst [vmem:[#allocation24_spill] sm:$0xff] %v7449_v57 }
 0x1e0   : > { %6119 = vmatmul.msk.f32.gmra.mxu0 %vm646_vm0, %v507_v59  ;;  %v518_v59 = vld [vmem:[%s11195_s0 + $0x220] sm:$0xff] }
 0x1e5   : > { %v7455_v61 = vpop.f32.mrf.mxu0 }
 0x1e6   : > { %11398 = vst [vmem:[#allocation25_spill] sm:$0xff] %v7455_v61 }
 0x1e8   : > { %6120 = vmatmul.msk.f32.gmra.mxu0 %vm646_vm0, %v508_v63 }
 0x1ed   : > { %v7461_v1 = vpop.f32.mrf.mxu0 }
 0x1ee   : > { %11399 = vst [vmem:[#allocation26_spill] sm:$0xff] %v7461_v1 }
 0x1f0   : > { %6121 = vmatmul.msk.f32.gmra.mxu0 %vm646_vm0, %v509_v3  ;;  %v519_v3 = vld [vmem:[%s11195_s0 + $0x228] sm:$0xff] }
 0x1f5   : > { %v7467_v5 = vpop.f32.mrf.mxu0 }
 0x1f6   : > { %11400 = vst [vmem:[#allocation27_spill] sm:$0xff] %v7467_v5 }
 0x1f8   : > { %6122 = vmatmul.msk.f32.gmra.mxu0 %vm646_vm0, %v510_v7 }
 0x1fd   : > { %v7473_v9 = vpop.f32.mrf.mxu0 }
 0x1fe   : > { %11401 = vst [vmem:[#allocation28_spill] sm:$0xff] %v7473_v9 }
 0x200   : > { %6123 = vmatmul.msk.f32.gmra.mxu0 %vm646_vm0, %v511_v11  ;;  %v520_v11 = vld [vmem:[%s11195_s0 + $0x230] sm:$0xff] }
 0x205   : > { %v7479_v13 = vpop.f32.mrf.mxu0 }
 0x206   : > { %11402 = vst [vmem:[#allocation29_spill] sm:$0xff] %v7479_v13 }
 0x208   : > { %6124 = vmatmul.msk.f32.gmra.mxu0 %vm646_vm0, %v512_v15 }
 0x20d   : > { %v7485_v17 = vpop.f32.mrf.mxu0 }
 0x20e   : > { %11403 = vst [vmem:[#allocation30_spill] sm:$0xff] %v7485_v17 }
 0x210   : > { %6125 = vmatmul.msk.f32.gmra.mxu0 %vm646_vm0, %v513_v19  ;;  %v521_v19 = vld [vmem:[%s11195_s0 + $0x238] sm:$0xff] }
 0x215   : > { %v7491_v23 = vpop.f32.mrf.mxu0 }
 0x218   : > { %6126 = vmatmul.msk.f32.gmra.mxu0 %vm646_vm0, %v514_v27 }
 0x21d   : > { %v7497_v31 = vpop.f32.mrf.mxu0 }
 0x220   : > { %6127 = vmatmul.msk.f32.gmra.mxu0 %vm646_vm0, %v515_v35  ;;  %v522_v35 = vld [vmem:[%s11195_s0 + $0x240] sm:$0xff] }
 0x225   : > { %v7503_v39 = vpop.f32.mrf.mxu0 }
 0x228   : > { %6128 = vmatmul.msk.f32.gmra.mxu0 %vm646_vm0, %v516_v43 }
 0x22d   : > { %v7509_v47 = vpop.f32.mrf.mxu0 }
 0x230   : > { %6129 = vmatmul.msk.f32.gmra.mxu0 %vm646_vm0, %v517_v51  ;;  %v523_v51 = vld [vmem:[%s11195_s0 + $0x248] sm:$0xff] }
 0x235   : > { %v7515_v55 = vpop.f32.mrf.mxu0 }
 0x238   : > { %6130 = vmatmul.msk.f32.gmra.mxu0 %vm646_vm0, %v518_v59 }
 0x23d   : > { %v7521_v63 = vpop.f32.mrf.mxu0 }
 0x240   : > { %6131 = vmatmul.msk.f32.gmra.mxu0 %vm646_vm0, %v519_v3  ;;  %v524_v3 = vld [vmem:[%s11195_s0 + $0x250] sm:$0xff] }
 0x245   : > { %v7527_v7 = vpop.f32.mrf.mxu0 }
 0x248   : > { %6132 = vmatmul.msk.f32.gmra.mxu0 %vm646_vm0, %v520_v11 }
 0x24d   : > { %v7533_v15 = vpop.f32.mrf.mxu0 }
 0x250   : > { %6133 = vmatmul.msk.f32.gmra.mxu0 %vm646_vm0, %v521_v19  ;;  %v525_v19 = vld [vmem:[%s11195_s0 + $0x258] sm:$0xff] }
 0x255   : > { %v7539_v27 = vpop.f32.mrf.mxu0 }
 0x258   : > { %6134 = vmatmul.msk.f32.gmra.mxu0 %vm646_vm0, %v522_v35 }
 0x25d   : > { %v7545_v43 = vpop.f32.mrf.mxu0 }
 0x260   : > { %6135 = vmatmul.msk.f32.gmra.mxu0 %vm646_vm0, %v523_v51  ;;  %v526_v51 = vld [vmem:[%s11195_s0 + $0x260] sm:$0xff] }
 0x265   : > { %v7551_v59 = vpop.f32.mrf.mxu0 }
 0x268   : > { %6136 = vmatmul.msk.f32.gmra.mxu0 %vm646_vm0, %v524_v3  ;;  %v527_v3 = vld [vmem:[%s11195_s0 + $0x268] sm:$0xff] }
 0x26d   : > { %v7557_v11 = vpop.f32.mrf.mxu0 }
 0x270   : > { %6137 = vmatmul.msk.f32.gmra.mxu0 %vm646_vm0, %v525_v19  ;;  %v528_v19 = vld [vmem:[%s11195_s0 + $0x270] sm:$0xff] }
 0x275   : > { %v7563_v35 = vpop.f32.mrf.mxu0 }
 0x278   : > { %6138 = vmatmul.msk.f32.gmra.mxu0 %vm646_vm0, %v526_v51  ;;  %v529_v51 = vld [vmem:[%s11195_s0 + $0x278] sm:$0xff] }
 0x27d   : > { %v7569_v17 = vpop.f32.mrf.mxu0 }
 0x280   : > { %6139 = vmatmul.msk.f32.gmra.mxu0 %vm646_vm0, %v527_v3  ;;  %v530_v3 = vld [vmem:[%s11195_s0 + $0x280] sm:$0xff] }
 0x285   : > { %v7575_v2 = vpop.f32.mrf.mxu0 }
 0x288   : > { %6140 = vmatmul.msk.f32.gmra.mxu0 %vm646_vm0, %v528_v19  ;;  %v531_v19 = vld [vmem:[%s11195_s0 + $0x288] sm:$0xff] }
 0x28d   : > { %v7581_v13 = vpop.f32.mrf.mxu0 }
 0x28e   : > { %11404 = vst [vmem:[#allocation31_spill] sm:$0xff] %v7581_v13 }
 0x290   : > { %6141 = vmatmul.msk.f32.gmra.mxu0 %vm646_vm0, %v529_v51  ;;  %v532_v51 = vld [vmem:[%s11195_s0 + $0x290] sm:$0xff] }
 0x295   : > { %v7587_v0 = vpop.f32.mrf.mxu0 }
 0x296   : > { %11405 = vst [vmem:[#allocation32_spill] sm:$0xff] %v7587_v0 }
 0x298   : > { %6142 = vmatmul.msk.f32.gmra.mxu0 %vm646_vm0, %v530_v3  ;;  %v533_v3 = vld [vmem:[%s11195_s0 + $0x298] sm:$0xff] }
 0x29d   : > { %v7593_v5 = vpop.f32.mrf.mxu0 }
 0x29e   : > { %11406 = vst [vmem:[#allocation33_spill] sm:$0xff] %v7593_v5 }
 0x2a0   : > { %6143 = vmatmul.msk.f32.gmra.mxu0 %vm646_vm0, %v531_v19  ;;  %v534_v19 = vld [vmem:[%s11195_s0 + $0x2a0] sm:$0xff] }
 0x2a5   : > { %v7599_v9 = vpop.f32.mrf.mxu0 }
 0x2a6   : > { %11407 = vst [vmem:[#allocation34_spill] sm:$0xff] %v7599_v9 }
 0x2a8   : > { %6144 = vmatmul.msk.f32.gmra.mxu0 %vm646_vm0, %v532_v51  ;;  %v535_v51 = vld [vmem:[%s11195_s0 + $0x2a8] sm:$0xff] }
 0x2ad   : > { %v7605_v60 = vpop.f32.mrf.mxu0 }
 0x2ae   : > { %11408 = vst [vmem:[#allocation35_spill] sm:$0xff] %v7605_v60 }
 0x2b0   : > { %6145 = vmatmul.msk.f32.gmra.mxu0 %vm646_vm0, %v533_v3  ;;  %v536_v3 = vld [vmem:[%s11195_s0 + $0x2b0] sm:$0xff] }
 0x2b5   : > { %v7611_v62 = vpop.f32.mrf.mxu0 }
 0x2b6   : > { %11409 = vst [vmem:[#allocation36_spill] sm:$0xff] %v7611_v62 }
 0x2b8   : > { %6146 = vmatmul.msk.f32.gmra.mxu0 %vm646_vm0, %v534_v19  ;;  %v537_v19 = vld [vmem:[%s11195_s0 + $0x2b8] sm:$0xff] }
 0x2bd   : > { %v7617_v1 = vpop.f32.mrf.mxu0 }
 0x2be   : > { %11410 = vst [vmem:[#allocation37_spill] sm:$0xff] %v7617_v1 }
 0x2c0   : > { %6147 = vmatmul.msk.f32.gmra.mxu0 %vm646_vm0, %v535_v51  ;;  %v538_v51 = vld [vmem:[%s11195_s0 + $0x2c0] sm:$0xff] }
 0x2c5   : > { %v7623_v61 = vpop.f32.mrf.mxu0 }
 0x2c6   : > { %11411 = vst [vmem:[#allocation38_spill] sm:$0xff] %v7623_v61 }
 0x2c8   : > { %6148 = vmatmul.msk.f32.gmra.mxu0 %vm646_vm0, %v536_v3  ;;  %v539_v3 = vld [vmem:[%s11195_s0 + $0x2c8] sm:$0xff] }
 0x2cd   : > { %v7629_v62 = vpop.f32.mrf.mxu0 }
 0x2ce   : > { %11412 = vst [vmem:[#allocation39_spill] sm:$0xff] %v7629_v62 }
 0x2d0   : > { %6149 = vmatmul.msk.f32.gmra.mxu0 %vm646_vm0, %v537_v19  ;;  %v540_v19 = vld [vmem:[%s11195_s0 + $0x2d0] sm:$0xff] }
 0x2d5   : > { %v7635_v1 = vpop.f32.mrf.mxu0 }
 0x2d6   : > { %11413 = vst [vmem:[#allocation40_spill] sm:$0xff] %v7635_v1 }
 0x2d8   : > { %6150 = vmatmul.msk.f32.gmra.mxu0 %vm646_vm0, %v538_v51  ;;  %v541_v51 = vld [vmem:[%s11195_s0 + $0x2d8] sm:$0xff] }
 0x2dd   : > { %v7641_v61 = vpop.f32.mrf.mxu0 }
 0x2de   : > { %11414 = vst [vmem:[#allocation41_spill] sm:$0xff] %v7641_v61 }
 0x2e0   : > { %6151 = vmatmul.msk.f32.gmra.mxu0 %vm646_vm0, %v539_v3  ;;  %v542_v3 = vld [vmem:[%s11195_s0 + $0x2e0] sm:$0xff] }
 0x2e5   : > { %v7647_v62 = vpop.f32.mrf.mxu0 }
 0x2e6   : > { %11415 = vst [vmem:[#allocation42_spill] sm:$0xff] %v7647_v62 }
 0x2e8   : > { %6152 = vmatmul.msk.f32.gmra.mxu0 %vm646_vm0, %v540_v19  ;;  %v543_v19 = vld [vmem:[%s11195_s0 + $0x2e8] sm:$0xff] }
 0x2ed   : > { %v7653_v58 = vpop.f32.mrf.mxu0 }
 0x2ee   : > { %11416 = vst [vmem:[#allocation43_spill] sm:$0xff] %v7653_v58 }
 0x2f0   : > { %6153 = vmatmul.msk.f32.gmra.mxu0 %vm646_vm0, %v541_v51  ;;  %v544_v51 = vld [vmem:[%s11195_s0 + $0x2f0] sm:$0xff] }
 0x2f5   : > { %v7659_v60 = vpop.f32.mrf.mxu0 }
 0x2f6   : > { %11417 = vst [vmem:[#allocation44_spill] sm:$0xff] %v7659_v60 }
 0x2f8   : > { %6154 = vmatmul.msk.f32.gmra.mxu0 %vm646_vm0, %v542_v3  ;;  %v545_v3 = vld [vmem:[%s11195_s0 + $0x2f8] sm:$0xff] }
 0x2fd   : > { %v7665_v56 = vpop.f32.mrf.mxu0 }
 0x2fe   : > { %11418 = vst [vmem:[#allocation45_spill] sm:$0xff] %v7665_v56 }
 0x300   : > { %6155 = vmatmul.msk.f32.gmra.mxu0 %vm646_vm0, %v543_v19  ;;  %v546_v19 = vld [vmem:[%s11195_s0 + $0x300] sm:$0xff] }
 0x305   : > { %v7671_v9 = vpop.f32.mrf.mxu0 }
 0x308   : > { %6156 = vmatmul.msk.f32.gmra.mxu0 %vm646_vm0, %v544_v51  ;;  %v547_v51 = vld [vmem:[%s11195_s0 + $0x308] sm:$0xff] }
 0x30d   : > { %v7677_v57 = vpop.f32.mrf.mxu0 }
 0x30e   : > { %11419 = vst [vmem:[#allocation46_spill] sm:$0xff] %v7677_v57 }
 0x310   : > { %6157 = vmatmul.msk.f32.gmra.mxu0 %vm646_vm0, %v545_v3  ;;  %v548_v3 = vld [vmem:[%s11195_s0 + $0x310] sm:$0xff] }
 0x315   : > { %v7683_v54 = vpop.f32.mrf.mxu0 }
 0x318   : > { %6158 = vmatmul.msk.f32.gmra.mxu0 %vm646_vm0, %v546_v19  ;;  %v549_v19 = vld [vmem:[%s11195_s0 + $0x318] sm:$0xff] }
 0x31d   : > { %v7689_v5 = vpop.f32.mrf.mxu0 }
 0x31e   : > { %11420 = vst [vmem:[#allocation47_spill] sm:$0xff] %v7689_v5  ;;  %v617_v5 = vld [vmem:[%s11195_s0 + $0x538] sm:$0xff] }
 0x31f   : > { %6229 = vmatmul.msk.f32.gmra.mxu1 %vm646_vm0, %v617_v5  ;;  %v567_v5 = vld [vmem:[%s11195_s0 + $0x3a8] sm:$0xff] }
 0x320   : > { %6159 = vmatmul.msk.f32.gmra.mxu0 %vm646_vm0, %v547_v51  ;;  %v550_v51 = vld [vmem:[%s11195_s0 + $0x320] sm:$0xff] }
 0x325   : > { %v7695_v53 = vpop.f32.mrf.mxu0 }
 0x328   : > { %6160 = vmatmul.msk.f32.gmra.mxu0 %vm646_vm0, %v548_v3  ;;  %v551_v3 = vld [vmem:[%s11195_s0 + $0x328] sm:$0xff] }
 0x32d   : > { %v7701_v52 = vpop.f32.mrf.mxu0 }
 0x32e   : > { %11421 = vst [vmem:[#allocation48_spill] sm:$0xff] %v7701_v52 }
 0x330   : > { %6161 = vmatmul.msk.f32.gmra.mxu0 %vm646_vm0, %v549_v19  ;;  %v552_v19 = vld [vmem:[%s11195_s0 + $0x330] sm:$0xff] }
 0x335   : > { %v7707_v0 = vpop.f32.mrf.mxu0 }
 0x338   : > { %6162 = vmatmul.msk.f32.gmra.mxu0 %vm646_vm0, %v550_v51  ;;  %v553_v51 = vld [vmem:[%s11195_s0 + $0x338] sm:$0xff] }
 0x33d   : > { %v7713_v49 = vpop.f32.mrf.mxu0 }
 0x33e   : > { %11422 = vst [vmem:[#allocation49_spill] sm:$0xff] %v7713_v49 }
 0x340   : > { %6163 = vmatmul.msk.f32.gmra.mxu0 %vm646_vm0, %v551_v3  ;;  %v554_v3 = vld [vmem:[%s11195_s0 + $0x340] sm:$0xff] }
 0x345   : > { %v7719_v41 = vpop.f32.mrf.mxu0 }
 0x348   : > { %6164 = vmatmul.msk.f32.gmra.mxu0 %vm646_vm0, %v552_v19  ;;  %v555_v19 = vld [vmem:[%s11195_s0 + $0x348] sm:$0xff] }
 0x34d   : > { %v7725_v33 = vpop.f32.mrf.mxu0 }
 0x34e   : > { %11423 = vst [vmem:[#allocation50_spill] sm:$0xff] %v7725_v33 }
 0x350   : > { %6165 = vmatmul.msk.f32.gmra.mxu0 %vm646_vm0, %v553_v51  ;;  %v556_v51 = vld [vmem:[%s11195_s0 + $0x350] sm:$0xff] }
 0x355   : > { %v7731_v49 = vpop.f32.mrf.mxu0 }
 0x356   : > { %11424 = vst [vmem:[#allocation51_spill] sm:$0xff] %v7731_v49 }
 0x358   : > { %6166 = vmatmul.msk.f32.gmra.mxu0 %vm646_vm0, %v554_v3  ;;  %v557_v3 = vld [vmem:[%s11195_s0 + $0x358] sm:$0xff] }
 0x35d   : > { %v7737_v52 = vpop.f32.mrf.mxu0 }
 0x35e   : > { %11425 = vst [vmem:[#allocation52_spill] sm:$0xff] %v7737_v52 }
 0x360   : > { %6167 = vmatmul.msk.f32.gmra.mxu0 %vm646_vm0, %v555_v19  ;;  %v558_v19 = vld [vmem:[%s11195_s0 + $0x360] sm:$0xff] }
 0x365   : > { %v7743_v33 = vpop.f32.mrf.mxu0 }
 0x366   : > { %11426 = vst [vmem:[#allocation53_spill] sm:$0xff] %v7743_v33 }
 0x368   : > { %6168 = vmatmul.msk.f32.gmra.mxu0 %vm646_vm0, %v556_v51  ;;  %v559_v51 = vld [vmem:[%s11195_s0 + $0x368] sm:$0xff] }
 0x36d   : > { %v7749_v49 = vpop.f32.mrf.mxu0 }
 0x36e   : > { %11427 = vst [vmem:[#allocation54_spill] sm:$0xff] %v7749_v49 }
 0x370   : > { %6169 = vmatmul.msk.f32.gmra.mxu0 %vm646_vm0, %v557_v3  ;;  %v560_v3 = vld [vmem:[%s11195_s0 + $0x370] sm:$0xff] }
 0x375   : > { %v7755_v52 = vpop.f32.mrf.mxu0 }
 0x376   : > { %11428 = vst [vmem:[#allocation55_spill] sm:$0xff] %v7755_v52 }
 0x378   : > { %6170 = vmatmul.msk.f32.gmra.mxu0 %vm646_vm0, %v558_v19  ;;  %v561_v19 = vld [vmem:[%s11195_s0 + $0x378] sm:$0xff] }
 0x37d   : > { %v7761_v33 = vpop.f32.mrf.mxu0 }
 0x37e   : > { %11429 = vst [vmem:[#allocation56_spill] sm:$0xff] %v7761_v33 }
 0x380   : > { %6171 = vmatmul.msk.f32.gmra.mxu0 %vm646_vm0, %v559_v51  ;;  %v562_v51 = vld [vmem:[%s11195_s0 + $0x380] sm:$0xff] }
 0x385   : > { %v7767_v49 = vpop.f32.mrf.mxu0 }
 0x386   : > { %11430 = vst [vmem:[#allocation57_spill] sm:$0xff] %v7767_v49 }
 0x388   : > { %6172 = vmatmul.msk.f32.gmra.mxu0 %vm646_vm0, %v560_v3  ;;  %v563_v3 = vld [vmem:[%s11195_s0 + $0x388] sm:$0xff] }
 0x38d   : > { %v7773_v52 = vpop.f32.mrf.mxu0 }
 0x38e   : > { %11431 = vst [vmem:[#allocation58_spill] sm:$0xff] %v7773_v52 }
 0x390   : > { %6173 = vmatmul.msk.f32.gmra.mxu0 %vm646_vm0, %v561_v19  ;;  %v564_v19 = vld [vmem:[%s11195_s0 + $0x390] sm:$0xff] }
 0x395   : > { %v7779_v33 = vpop.f32.mrf.mxu0 }
 0x398   : > { %6174 = vmatmul.msk.f32.gmra.mxu0 %vm646_vm0, %v562_v51 }
 0x39d   : > { %v7785_v49 = vpop.f32.mrf.mxu0 }
 0x3a0   : > { %6175 = vmatmul.msk.f32.gmra.mxu0 %vm646_vm0, %v563_v3  ;;  %v565_v3 = vld [vmem:[%s11195_s0 + $0x398] sm:$0xff] }
 0x3a5   : > { %v7791_v52 = vpop.f32.mrf.mxu0 }
 0x3a8   : > { %6176 = vmatmul.msk.f32.gmra.mxu0 %vm646_vm0, %v564_v19  ;;  %v618_v19 = vld [vmem:[%s11195_s0 + $0x540] sm:$0xff] }
 0x3a9   : > { %6230 = vmatmul.msk.f32.gmra.mxu1 %vm646_vm0, %v618_v19  ;;  %v620_v19 = vld [vmem:[%s11195_s0 + $0x550] sm:$0xff] }
 0x3ad   : > { %v7801_v51 = vpop.f32.mrf.mxu0 }
 0x3b0   : > { %6177 = vmatmul.msk.f32.gmra.mxu0 %vm646_vm0, %v565_v3  ;;  %v619_v3 = vld [vmem:[%s11195_s0 + $0x548] sm:$0xff] }
 0x3b1   : > { %6231 = vmatmul.msk.f32.gmra.mxu1 %vm646_vm0, %v619_v3  ;;  %v621_v3 = vld [vmem:[%s11195_s0 + $0x558] sm:$0xff] }
 0x3b5   : > { %v7811_v18 = vpop.f32.mrf.mxu0 }
 0x3b8   : > { %6178 = vmatmul.msk.f32.gmra.mxu0 %vm646_vm0, %v566_v25  ;;  %v568_v25 = vld [vmem:[%s11195_s0 + $0x3b0] sm:$0xff] }
 0x3b9   : > { %6232 = vmatmul.msk.f32.gmra.mxu1 %vm646_vm0, %v620_v19  ;;  %v622_v19 = vld [vmem:[%s11195_s0 + $0x560] sm:$0xff] }
 0x3bd   : > { %v7821_v57 = vpop.f32.mrf.mxu0 }
 0x3c0   : > { %6179 = vmatmul.msk.f32.gmra.mxu0 %vm646_vm0, %v567_v5  ;;  %v569_v5 = vld [vmem:[%s11195_s0 + $0x3b8] sm:$0xff] }
 0x3c1   : > { %6233 = vmatmul.msk.f32.gmra.mxu1 %vm646_vm0, %v621_v3  ;;  %v623_v3 = vld [vmem:[%s11195_s0 + $0x568] sm:$0xff] }
 0x3c5   : > { %v7831_v14 = vpop.f32.mrf.mxu0 }
 0x3c8   : > { %6180 = vmatmul.msk.f32.gmra.mxu0 %vm646_vm0, %v568_v25  ;;  %v570_v25 = vld [vmem:[%s11195_s0 + $0x3c0] sm:$0xff] }
 0x3c9   : > { %6234 = vmatmul.msk.f32.gmra.mxu1 %vm646_vm0, %v622_v19  ;;  %v624_v19 = vld [vmem:[%s11195_s0 + $0x570] sm:$0xff] }
 0x3cd   : > { %v7841_v56 = vpop.f32.mrf.mxu0 }
 0x3d0   : > { %6181 = vmatmul.msk.f32.gmra.mxu0 %vm646_vm0, %v569_v5  ;;  %v571_v5 = vld [vmem:[%s11195_s0 + $0x3c8] sm:$0xff] }
 0x3d1   : > { %6235 = vmatmul.msk.f32.gmra.mxu1 %vm646_vm0, %v623_v3  ;;  %v625_v3 = vld [vmem:[%s11195_s0 + $0x578] sm:$0xff] }
 0x3d5   : > { %v7851_v12 = vpop.f32.mrf.mxu0 }
 0x3d8   : > { %6182 = vmatmul.msk.f32.gmra.mxu0 %vm646_vm0, %v570_v25  ;;  %v572_v25 = vld [vmem:[%s11195_s0 + $0x3d0] sm:$0xff] }
 0x3d9   : > { %6236 = vmatmul.msk.f32.gmra.mxu1 %vm646_vm0, %v624_v19  ;;  %v626_v19 = vld [vmem:[%s11195_s0 + $0x580] sm:$0xff] }
 0x3dd   : > { %v7861_v60 = vpop.f32.mrf.mxu0 }
 0x3e0   : > { %6183 = vmatmul.msk.f32.gmra.mxu0 %vm646_vm0, %v571_v5  ;;  %v573_v5 = vld [vmem:[%s11195_s0 + $0x3d8] sm:$0xff] }
 0x3e1   : > { %6237 = vmatmul.msk.f32.gmra.mxu1 %vm646_vm0, %v625_v3  ;;  %v627_v3 = vld [vmem:[%s11195_s0 + $0x588] sm:$0xff] }
 0x3e5   : > { %v7871_v10 = vpop.f32.mrf.mxu0 }
 0x3e8   : > { %6184 = vmatmul.msk.f32.gmra.mxu0 %vm646_vm0, %v572_v25  ;;  %v574_v25 = vld [vmem:[%s11195_s0 + $0x3e0] sm:$0xff] }
 0x3e9   : > { %6238 = vmatmul.msk.f32.gmra.mxu1 %vm646_vm0, %v626_v19  ;;  %v628_v19 = vld [vmem:[%s11195_s0 + $0x590] sm:$0xff] }
 0x3ed   : > { %v7881_v58 = vpop.f32.mrf.mxu0 }
 0x3f0   : > { %6185 = vmatmul.msk.f32.gmra.mxu0 %vm646_vm0, %v573_v5  ;;  %v575_v5 = vld [vmem:[%s11195_s0 + $0x3e8] sm:$0xff] }
 0x3f1   : > { %6239 = vmatmul.msk.f32.gmra.mxu1 %vm646_vm0, %v627_v3  ;;  %v629_v3 = vld [vmem:[%s11195_s0 + $0x598] sm:$0xff] }
 0x3f5   : > { %v7891_v8 = vpop.f32.mrf.mxu0 }
 0x3f8   : > { %6186 = vmatmul.msk.f32.gmra.mxu0 %vm646_vm0, %v574_v25  ;;  %v576_v25 = vld [vmem:[%s11195_s0 + $0x3f0] sm:$0xff] }
 0x3f9   : > { %6240 = vmatmul.msk.f32.gmra.mxu1 %vm646_vm0, %v628_v19  ;;  %v630_v19 = vld [vmem:[%s11195_s0 + $0x5a0] sm:$0xff] }
 0x3fd   : > { %v7901_v62 = vpop.f32.mrf.mxu0 }
 0x400   : > { %6187 = vmatmul.msk.f32.gmra.mxu0 %vm646_vm0, %v575_v5  ;;  %v577_v5 = vld [vmem:[%s11195_s0 + $0x3f8] sm:$0xff] }
 0x401   : > { %6241 = vmatmul.msk.f32.gmra.mxu1 %vm646_vm0, %v629_v3  ;;  %v631_v3 = vld [vmem:[%s11195_s0 + $0x5a8] sm:$0xff] }
 0x405   : > { %v7911_v6 = vpop.f32.mrf.mxu0 }
 0x406   : > { %11432 = vst [vmem:[#allocation59_spill] sm:$0xff] %v7911_v6  ;;  %v8097_v6 = vld [vmem:[%s7130_s14] ss:$0 sm:$0xff] }
 0x408   : > { %6188 = vmatmul.msk.f32.gmra.mxu0 %vm646_vm0, %v576_v25  ;;  %v578_v25 = vld [vmem:[%s11195_s0 + $0x400] sm:$0xff] }
 0x409   : > { %6242 = vmatmul.msk.f32.gmra.mxu1 %vm646_vm0, %v630_v19  ;;  %v7956_v19 = vpop.f32.mrf.mxu1 }
 0x40a   : > { %11437 = vst [vmem:[#allocation64_spill] sm:$0xff] %v7956_v19  ;;  %v633_v19 = vld [vmem:[%s11195_s0 + $0x5b8] sm:$0xff] }
 0x40d   : > { %v7921_v61 = vpop.f32.mrf.mxu0 }
 0x40e   : > { %11433 = vst [vmem:[#allocation60_spill] sm:$0xff] %v7921_v61 }
 0x410   : > { %6189 = vmatmul.msk.f32.gmra.mxu0 %vm646_vm0, %v577_v5  ;;  %v579_v5 = vld [vmem:[%s11195_s0 + $0x408] sm:$0xff] }
 0x411   : > { %6243 = vmatmul.msk.f32.gmra.mxu1 %vm646_vm0, %v631_v3  ;;  %v7968_v3 = vpop.f32.mrf.mxu1 }
 0x412   : > { %11439 = vst [vmem:[#allocation66_spill] sm:$0xff] %v7968_v3  ;;  %v634_v3 = vld [vmem:[%s11195_s0 + $0x5c0] sm:$0xff] }
 0x415   : > { %v7931_v50 = vpop.f32.mrf.mxu0 }
 0x416   : > { %11434 = vst [vmem:[#allocation61_spill] sm:$0xff] %v7931_v50 }
 0x418   : > { %6190 = vmatmul.msk.f32.gmra.mxu0 %vm646_vm0, %v578_v25  ;;  %v580_v25 = vld [vmem:[%s11195_s0 + $0x410] sm:$0xff] }
 0x41d   : > { %v7941_v61 = vpop.f32.mrf.mxu0 }
 0x41e   : > { %11435 = vst [vmem:[#allocation62_spill] sm:$0xff] %v7941_v61  ;;  %v632_v61 = vld [vmem:[%s11195_s0 + $0x5b0] sm:$0xff] }
 0x41f   : > { %6244 = vmatmul.msk.f32.gmra.mxu1 %vm646_vm0, %v632_v61  ;;  %v582_v61 = vld [vmem:[%s11195_s0 + $0x420] sm:$0xff] }
 0x420   : > { %6191 = vmatmul.msk.f32.gmra.mxu0 %vm646_vm0, %v579_v5  ;;  %v581_v5 = vld [vmem:[%s11195_s0 + $0x418] sm:$0xff] }
 0x425   : > { %v7951_v50 = vpop.f32.mrf.mxu0 }
 0x426   : > { %11436 = vst [vmem:[#allocation63_spill] sm:$0xff] %v7951_v50 }
 0x427   : > { %6245 = vmatmul.msk.f32.gmra.mxu1 %vm646_vm0, %v633_v19  ;;  %v583_v19 = vld [vmem:[%s11195_s0 + $0x428] sm:$0xff] }
 0x428   : > { %6192 = vmatmul.msk.f32.gmra.mxu0 %vm646_vm0, %v580_v25  ;;  %v7980_v25 = vpop.f32.mrf.mxu1 }
 0x429   : > { %11441 = vst [vmem:[#allocation68_spill] sm:$0xff] %v7980_v25 }
 0x42d   : > { %v7963_v13 = vpop.f32.mrf.mxu0 }
 0x42e   : > { %11438 = vst [vmem:[#allocation65_spill] sm:$0xff] %v7963_v13 }
 0x42f   : > { %6246 = vmatmul.msk.f32.gmra.mxu1 %vm646_vm0, %v634_v3  ;;  %v584_v3 = vld [vmem:[%s11195_s0 + $0x430] sm:$0xff] }
 0x430   : > { %6193 = vmatmul.msk.f32.gmra.mxu0 %vm646_vm0, %v581_v5  ;;  %v635_v5 = vld [vmem:[%s11195_s0 + $0x5c8] sm:$0xff] }
 0x435   : > { %v7975_v50 = vpop.f32.mrf.mxu0 }
 0x436   : > { %11440 = vst [vmem:[#allocation67_spill] sm:$0xff] %v7975_v50  ;;  %v7997_v50 = vpop.f32.mrf.mxu1 }
 0x437   : > { %6247 = vmatmul.msk.f32.gmra.mxu1 %vm646_vm0, %v635_v5  ;;  %11443 = vst [vmem:[#allocation70_spill] sm:$0xff] %v7997_v50 }
 0x438   : > { %6194 = vmatmul.msk.f32.gmra.mxu0 %vm646_vm0, %v582_v61  ;;  %v636_v61 = vld [vmem:[%s11195_s0 + $0x5d0] sm:$0xff] }
 0x43d   : > { %v7987_v13 = vpop.f32.mrf.mxu0 }
 0x43e   : > { %11442 = vst [vmem:[#allocation69_spill] sm:$0xff] %v7987_v13  ;;  %v637_v13 = vld [vmem:[%s11195_s0 + $0x5d8] sm:$0xff] }
 0x43f   : > { %6248 = vmatmul.msk.f32.gmra.mxu1 %vm646_vm0, %v636_v61 }
 0x440   : > { %6195 = vmatmul.msk.f32.gmra.mxu0 %vm646_vm0, %v583_v19  ;;  %v8009_v19 = vpop.f32.mrf.mxu1 }
 0x441   : > { %11445 = vst [vmem:[#allocation72_spill] sm:$0xff] %v8009_v19 }
 0x445   : > { %v7999_v4 = vpop.f32.mrf.mxu0 }
 0x446   : > { %11444 = vst [vmem:[#allocation71_spill] sm:$0xff] %v7999_v4  ;;  %v585_v4 = vld [vmem:[%s11195_s0 + $0x438] sm:$0xff] }
 0x447   : > { %6249 = vmatmul.msk.f32.gmra.mxu1 %vm646_vm0, %v637_v13  ;;  %v587_v13 = vld [vmem:[%s11195_s0 + $0x448] sm:$0xff] }
 0x448   : > { %6196 = vmatmul.msk.f32.gmra.mxu0 %vm646_vm0, %v584_v3  ;;  %v586_v3 = vld [vmem:[%s11195_s0 + $0x440] sm:$0xff]  ;;  %v8026_v61 = vpop.f32.mrf.mxu1 }
 0x449   : > { %11448 = vst [vmem:[#allocation75_spill] sm:$0xff] %v8026_v61  ;;  %v639_v61 = vld [vmem:[%s11195_s0 + $0x5e8] sm:$0xff] }
 0x44d   : > { %v8011_v5 = vpop.f32.mrf.mxu0 }
 0x44e   : > { %11446 = vst [vmem:[#allocation73_spill] sm:$0xff] %v8011_v5  ;;  %v638_v5 = vld [vmem:[%s11195_s0 + $0x5e0] sm:$0xff] }
 0x44f   : > { %6250 = vmatmul.msk.f32.gmra.mxu1 %vm646_vm0, %v638_v5  ;;  %v2015_v5 = vld [vmem:[%s8049_s25 + $0x18] sm:$0xff] }
 0x450   : > { %6197 = vmatmul.msk.f32.gmra.mxu0 %vm646_vm0, %v585_v4  ;;  %v8039_v19 = vpop.f32.mrf.mxu1  ;;  %7031 = vmatpush.msra.mxu3 %v2015_v5 }
 0x451   : > { %11450 = vst [vmem:[#allocation77_spill] sm:$0xff] %v8039_v19  ;;  %v588_v19 = vld [vmem:[%s11195_s0 + $0x450] sm:$0xff]  ;;  %2243 = vmatpush.msra.mxu2 %v2015_v5 }
 0x455   : > { %v8021_v50 = vpop.f32.mrf.mxu0 }
 0x456   : > { %11447 = vst [vmem:[#allocation74_spill] sm:$0xff] %v8021_v50  ;;  %v589_v50 = vld [vmem:[%s11195_s0 + $0x458] sm:$0xff] }
 0x457   : > { %6251 = vmatmul.msk.f32.gmra.mxu1 %vm646_vm0, %v639_v61  ;;  %v640_v61 = vld [vmem:[%s11195_s0 + $0x5f0] sm:$0xff] }
 0x458   : > { %6198 = vmatmul.msk.f32.gmra.mxu0 %vm646_vm0, %v586_v3  ;;  %v8064_v1 = vpop.f32.mrf.mxu1 }
 0x459   : > { %11452 = vst [vmem:[#allocation79_spill] sm:$0xff] %v8064_v1  ;;  %v591_v1 = vld [vmem:[%s11195_s0 + $0x468] sm:$0xff] }
 0x45d   : > { %v8034_v4 = vpop.f32.mrf.mxu0 }
 0x45e   : > { %11449 = vst [vmem:[#allocation76_spill] sm:$0xff] %v8034_v4  ;;  %v2013_v4 = vld [vmem:[%s8049_s25 + $0x8] sm:$0xff] }
 0x45f   : > { %6252 = vmatmul.msk.f32.gmra.mxu1 %vm646_vm0, %v640_v61 }
 0x460   : > { %6199 = vmatmul.msk.f32.gmra.mxu0 %vm646_vm0, %v587_v13  ;;  %v2014_v13 = vld [vmem:[%s8049_s25 + $0x10] sm:$0xff] }
 0x461   : > { %7032 = vmatpush.msra.mxu3 %v2014_v13  ;;  %2244 = vmatpush.msra.mxu2 %v2014_v13  ;;  %v1762_v13 = vpop.f32.mrf.mxu1 }
 0x463   : > { %7033 = vmatpush.msra.mxu3 %v2013_v4  ;;  %2245 = vmatpush.msra.mxu2 %v2013_v4 }
 0x465   : > { %v8052_v3 = vpop.f32.mrf.mxu0 }
 0x466   : > { %11451 = vst [vmem:[#allocation78_spill] sm:$0xff] %v8052_v3  ;;  %v2012_v3 = vld [vmem:[%s8049_s25] sm:$0xff] }
 0x467   : > { %7034 = vmatpush.msra.mxu3 %v2012_v3  ;;  %2246 = vmatpush.msra.mxu2 %v2012_v3  ;;  %v590_v3 = vld [vmem:[%s11195_s0 + $0x460] sm:$0xff] }
 0x468   : > { %6200 = vmatmul.msk.f32.gmra.mxu0 %vm646_vm0, %v588_v19  ;;  %v641_v19 = vld [vmem:[%s11195_s0 + $0x5f8] sm:$0xff] }
 0x469   : > { %6253 = vmatmul.msk.f32.gmra.mxu1 %vm646_vm0, %v641_v19  ;;  %v592_v19 = vld [vmem:[%s11195_s0 + $0x470] sm:$0xff] }
 0x46d   : > { %v8067_v5 = vpop.f32.mrf.mxu0 }
 0x46e   : > { %11453 = vst [vmem:[#allocation80_spill] sm:$0xff] %v8067_v5  ;;  %v8088_v5 = vpop.f32.mrf.mxu1 }
 0x46f   : > { %11456 = vst [vmem:[#allocation83_spill] sm:$0xff] %v8088_v5  ;;  %v593_v5 = vld [vmem:[%s11195_s0 + $0x478] sm:$0xff] }
 0x470   : > { %6201 = vmatmul.msk.f32.gmra.mxu0 %vm646_vm0, %v589_v50 }
 0x475   : > { %v8077_v4 = vpop.f32.mrf.mxu0 }
 0x476   : > { %11454 = vst [vmem:[#allocation81_spill] sm:$0xff] %v8077_v4  ;;  %v1846_v4 = vmax.f32 %v7383_v16, %v7671_v9 }
 0x478   : > { %6202 = vmatmul.msk.f32.gmra.mxu0 %vm646_vm0, %v590_v3  ;;  %v1768_v3 = vpop.f32.mrf.mxu1 }
 0x47d   : > { %v8083_v61 = vpop.f32.mrf.mxu0 }
 0x47e   : > { %11455 = vst [vmem:[#allocation82_spill] sm:$0xff] %v8083_v61 }
 0x480   : > { %6203 = vmatmul.msk.f32.gmra.mxu0 %vm646_vm0, %v591_v1  ;;  %v8111_v16 = vpop.f32.mrf.mxu1 }
 0x485   : > { %v1618_v50 = vpop.f32.mrf.mxu0 }
 0x486   : > { %v1894_v25 = vmax.f32 %v1618_v50, %v1762_v13  ;;  %v1848_v13 = vmax.f32 %v7395_v21, %v7683_v54  ;;  %v596_v21 = vld [vmem:[%s11195_s0 + $0x490] sm:$0xff] }
 0x488   : > { %v1942_v61 = vmax.f32 %v1846_v4, %v1894_v25  ;;  %6204 = vmatmul.msk.f32.gmra.mxu0 %vm646_vm0, %v592_v19  ;;  %v594_v25 = vld [vmem:[%s11195_s0 + $0x480] sm:$0xff]  ;;  %v1774_v19 = vpop.f32.mrf.mxu1 }
 0x48a   : > { %v8101_v48 = vadd.f32 %v8097_v6, %v1942_v61 }
 0x48c   : > { %11457 = vst [vmem:[#allocation84_spill] sm:$0xff] %v8101_v48  ;;  %6285 = vmatmul.msk.f32.vlgmr.msra.gmra.mxu3 %vm646_vm0, %v8101_v48  ;;  %v595_v48 = vld [vmem:[%s11195_s0 + $0x488] sm:$0xff] }
 0x48d   : > { %v8105_v1 = vpop.f32.mrf.mxu0 }
 0x490   : > { %6205 = vmatmul.msk.f32.gmra.mxu0 %vm646_vm0, %v593_v5 }
 0x495   : > { %v1624_v9 = vpop.f32.mrf.mxu0 }
 0x496   : > { %v1896_v4 = vmax.f32 %v1624_v9, %v1768_v3  ;;  %v8133_v3 = vpop.f32.mrf.mxu1  ;;  %v1850_v9 = vmax.f32 %v7407_v29, %v7695_v53  ;;  %v598_v53 = vld [vmem:[%s11195_s0 + $0x4a0] sm:$0xff] }
 0x498   : > { %v1944_v61 = vmax.f32 %v1848_v13, %v1896_v4  ;;  %6206 = vmatmul.msk.f32.gmra.mxu0 %vm646_vm0, %v594_v25 }
 0x49a   : > { %v8120_v50 = vadd.f32 %v8097_v6, %v1944_v61  ;;  %v597_v61 = vld [vmem:[%s11195_s0 + $0x498] sm:$0xff] }
 0x49c   : > { %11458 = vst [vmem:[#allocation85_spill] sm:$0xff] %v8120_v50  ;;  %6286 = vmatmul.msk.f32.gmra.mxu3 %vm646_vm0, %v8120_v50 }
 0x49d   : > { %v8124_v5 = vpop.f32.mrf.mxu0 }
 0x49e   : > { %v1780_v50 = vpop.f32.mrf.mxu1 }
 0x4a0   : > { %6207 = vmatmul.msk.f32.gmra.mxu0 %vm646_vm0, %v595_v48 }
 0x4a5   : > { %v1630_v54 = vpop.f32.mrf.mxu0 }
 0x4a6   : > { %v1898_v25 = vmax.f32 %v1630_v54, %v1774_v19  ;;  %v1852_v19 = vmax.f32 %v7419_v37, %v7707_v0 }
 0x4a8   : > { %v1946_v13 = vmax.f32 %v1850_v9, %v1898_v25  ;;  %6208 = vmatmul.msk.f32.gmra.mxu0 %vm646_vm0, %v596_v21  ;;  %v8155_v9 = vpop.f32.mrf.mxu1 }
 0x4aa   : > { %v8139_v4 = vadd.f32 %v8097_v6, %v1946_v13 }
 0x4ac   : > { %11459 = vst [vmem:[#allocation86_spill] sm:$0xff] %v8139_v4  ;;  %6287 = vmatmul.msk.f32.gmra.mxu3 %vm646_vm0, %v8139_v4 }
 0x4ad   : > { %v8143_v48 = vpop.f32.mrf.mxu0 }
 0x4b0   : > { %6209 = vmatmul.msk.f32.gmra.mxu0 %vm646_vm0, %v597_v61  ;;  %v599_v61 = vld [vmem:[%s11195_s0 + $0x4a8] sm:$0xff]  ;;  %v1786_v0 = vpop.f32.mrf.mxu1 }
 0x4b5   : > { %v1636_v29 = vpop.f32.mrf.mxu0 }
 0x4b6   : > { %v1900_v54 = vmax.f32 %v1636_v29, %v1780_v50  ;;  %v600_v50 = vld [vmem:[%s11195_s0 + $0x4b0] sm:$0xff]  ;;  %v1854_v29 = vmax.f32 %v7431_v45, %v7719_v41  ;;  %v602_v41 = vld [vmem:[%s11195_s0 + $0x4c0] sm:$0xff] }
 0x4b8   : > { %v1948_v21 = vmax.f32 %v1852_v19, %v1900_v54  ;;  %6210 = vmatmul.msk.f32.gmra.mxu0 %vm646_vm0, %v598_v53 }
 0x4ba   : > { %v8158_v25 = vadd.f32 %v8097_v6, %v1948_v21 }
 0x4bc   : > { %11460 = vst [vmem:[#allocation87_spill] sm:$0xff] %v8158_v25  ;;  %6288 = vmatmul.msk.f32.gmra.mxu3 %vm646_vm0, %v8158_v25 }
 0x4bd   : > { %v8162_v13 = vpop.f32.mrf.mxu0 }
 0x4c0   : > { %6211 = vmatmul.msk.f32.gmra.mxu0 %vm646_vm0, %v599_v61  ;;  %v601_v61 = vld [vmem:[%s11195_s0 + $0x4b8] sm:$0xff] }
 0x4c5   : > { %v1642_v37 = vpop.f32.mrf.mxu0 }
 0x4c6   : > { %v1902_v53 = vmax.f32 %v1642_v37, %v1786_v0  ;;  %v603_v0 = vld [vmem:[%s11195_s0 + $0x4c8] sm:$0xff] }
 0x4c8   : > { %v1950_v19 = vmax.f32 %v1854_v29, %v1902_v53  ;;  %6212 = vmatmul.msk.f32.gmra.mxu0 %vm646_vm0, %v600_v50  ;;  %v604_v50 = vld [vmem:[%s11195_s0 + $0x4d0] sm:$0xff]  ;;  %v605_v53 = vld [vmem:[%s11195_s0 + $0x4d8] sm:$0xff] }
 0x4ca   : > { %v8175_v54 = vadd.f32 %v8097_v6, %v1950_v19 }
 0x4cc   : > { %11461 = vst [vmem:[#allocation88_spill] sm:$0xff] %v8175_v54  ;;  %6289 = vmatmul.msk.f32.gmra.mxu3 %vm646_vm0, %v8175_v54  ;;  %v6290_v54 = vld [vmem:[%s8049_s25 + $0x40] sm:$0xff] }
 0x4cd   : > { %v8179_v21 = vpop.f32.mrf.mxu0 }
 0x4ce   : > { %11462 = vst [vmem:[#allocation89_spill] sm:$0xff] %v8179_v21 }
 0x4d0   : > { %6213 = vmatmul.msk.f32.gmra.mxu0 %vm646_vm0, %v601_v61  ;;  %v606_v61 = vld [vmem:[%s11195_s0 + $0x4e0] sm:$0xff] }
 0x4d5   : > { %v8185_v25 = vpop.f32.mrf.mxu0 }
 0x4d6   : > { %11463 = vst [vmem:[#allocation90_spill] sm:$0xff] %v8185_v25  ;;  %v6254_v25 = vld [vmem:[%s8049_s25 + $0x20] sm:$0xff] }
 0x4d8   : > { %6214 = vmatmul.msk.f32.gmra.mxu0 %vm646_vm0, %v602_v41 }
 0x4dd   : > { %v8191_v45 = vpop.f32.mrf.mxu0 }
 0x4de   : > { %11464 = vst [vmem:[#allocation91_spill] sm:$0xff] %v8191_v45  ;;  %v608_v45 = vld [vmem:[%s11195_s0 + $0x4f0] sm:$0xff] }
 0x4e0   : > { %6215 = vmatmul.msk.f32.gmra.mxu0 %vm646_vm0, %v603_v0  ;;  %v607_v0 = vld [vmem:[%s11195_s0 + $0x4e8] sm:$0xff] }
 0x4e5   : > { %v8197_v37 = vpop.f32.mrf.mxu0 }
 0x4e6   : > { %11465 = vst [vmem:[#allocation92_spill] sm:$0xff] %v8197_v37  ;;  %v6255_v37 = vld [vmem:[%s8049_s25 + $0x28] sm:$0xff] }
 0x4e8   : > { %6216 = vmatmul.msk.f32.gmra.mxu0 %vm646_vm0, %v604_v50  ;;  %v6257_v50 = vld [vmem:[%s8049_s25 + $0x38] sm:$0xff] }
 0x4e9   : > { %2146 = vmatpush.msrb.mxu1 %v6257_v50  ;;  %v1816_v50 = vmax.f32 %v7203_v20, %v7491_v23 }
 0x4ed   : > { %v8203_v29 = vpop.f32.mrf.mxu0 }
 0x4ee   : > { %11466 = vst [vmem:[#allocation93_spill] sm:$0xff] %v8203_v29  ;;  %v6293_v29 = vld [vmem:[%s8049_s25 + $0x58] sm:$0xff] }
 0x4ef   : > { %2394 = vmatpush.msrb.mxu3 %v6293_v29 }
 0x4f0   : > { %6217 = vmatmul.msk.f32.gmra.mxu0 %vm646_vm0, %v605_v53  ;;  %v6256_v53 = vld [vmem:[%s8049_s25 + $0x30] sm:$0xff] }
 0x4f1   : > { %2147 = vmatpush.msrb.mxu1 %v6256_v53 }
 0x4f3   : > { %2148 = vmatpush.msrb.mxu1 %v6255_v37 }
 0x4f5   : > { %v8209_v19 = vpop.f32.mrf.mxu0  ;;  %2149 = vmatpush.msrb.mxu1 %v6254_v25 }
 0x4f6   : > { %11467 = vst [vmem:[#allocation94_spill] sm:$0xff] %v8209_v19  ;;  %v6292_v19 = vld [vmem:[%s8049_s25 + $0x50] sm:$0xff] }
 0x4f7   : > { %2395 = vmatpush.msrb.mxu3 %v6292_v19  ;;  %v609_v19 = vld [vmem:[%s11195_s0 + $0x4f8] sm:$0xff] }
 0x4f8   : > { %6218 = vmatmul.msk.f32.gmra.mxu0 %vm646_vm0, %v606_v61  ;;  %v6291_v61 = vld [vmem:[%s8049_s25 + $0x48] sm:$0xff] }
 0x4f9   : > { %2396 = vmatpush.msrb.mxu3 %v6291_v61  ;;  %v611_v61 = vld [vmem:[%s11195_s0 + $0x508] sm:$0xff] }
 0x4fb   : > { %2397 = vmatpush.msrb.mxu3 %v6290_v54 }
 0x4fd   : > { %v8215_v41 = vpop.f32.mrf.mxu0 }
 0x4fe   : > { %11468 = vst [vmem:[#allocation95_spill] sm:$0xff] %v8215_v41 }
 0x500   : > { %6219 = vmatmul.msk.f32.gmra.mxu0 %vm646_vm0, %v607_v0  ;;  %v610_v0 = vld [vmem:[%s11195_s0 + $0x500] sm:$0xff] }
 0x505   : > { %v8227_v41 = vpop.f32.mrf.mxu0 }
 0x506   : > { %11469 = vst [vmem:[#allocation96_spill] sm:$0xff] %v8227_v41 }
 0x508   : > { %6220 = vmatmul.msk.f32.gmra.mxu0 %vm646_vm0, %v608_v45 }
 0x50d   : > { %v8235_v29 = vpop.f32.mrf.mxu0 }
 0x50e   : > { %11470 = vst [vmem:[#allocation97_spill] sm:$0xff] %v8235_v29 }
 0x510   : > { %6221 = vmatmul.msk.f32.gmra.mxu0 %vm646_vm0, %v609_v19  ;;  %v1817_v19 = vmax.f32 %v7209_v22, %v7497_v31  ;;  %v612_v22 = vld [vmem:[%s11195_s0 + $0x510] sm:$0xff] }
 0x515   : > { %v1672_v37 = vpop.f32.mrf.mxu0 }
 0x516   : > { %v1864_v25 = vmax.f32 %v7779_v33, %v1672_v37  ;;  %v1818_v33 = vmax.f32 %v7215_v24, %v7503_v39 }
 0x518   : > { %v1912_v54 = vmax.f32 %v1816_v50, %v1864_v25  ;;  %6222 = vmatmul.msk.f32.gmra.mxu0 %vm646_vm0, %v610_v0 }
 0x51a   : > { %v1964_v45 = vadd.f32 %v8097_v6, %v1912_v54 }
 0x51c   : > { %6274 = vmatmul.msk.f32.vlgmr.msra.gmra.mxu2 %vm646_vm0, %v1964_v45  ;;  %v2049_v37 = vrot.slane %v1964_v45, 1  ;;  %v2297_v0 = vrot.slane %v1964_v45, 2  ;;  %v2631_v50 = vrot.slane %v1964_v45, 4 }
 0x51d   : > { %v1675_v53 = vpop.f32.mrf.mxu0 }
 0x51e   : > { %v1865_v29 = vmax.f32 %v7785_v49, %v1675_v53  ;;  %v2464_v49 = vrot.slane %v1964_v45, 3 }
 0x520   : > { %v1913_v20 = vmax.f32 %v1817_v19, %v1865_v29  ;;  %6223 = vmatmul.msk.f32.gmra.mxu0 %vm646_vm0, %v611_v61 }
 0x522   : > { %v1965_v23 = vadd.f32 %v8097_v6, %v1913_v20 }
 0x524   : > { %v2465_v25 = vrot.slane %v1965_v23, 3  ;;  %v2050_v54 = vrot.slane %v1965_v23, 1  ;;  %v2298_v41 = vrot.slane %v1965_v23, 2  ;;  %v2632_v21 = vrot.slane %v1965_v23, 4 }
 0x525   : > { %v1678_v4 = vpop.f32.mrf.mxu0 }
 0x526   : > { %v1866_v24 = vmax.f32 %v7791_v52, %v1678_v4  ;;  %v2051_v31 = vsel %vm2048_vm1, %v2049_v37, %v2050_v54  ;;  %v2299_v39 = vsel %vm2296_vm2, %v2297_v0, %v2298_v41  ;;  %v8267_v29 = vsel %vm2630_vm3, %v2631_v50, %v2632_v21  ;;  %v613_v4 = vld [vmem:[%s11195_s0 + $0x518] sm:$0xff] }
 0x527   : > { %6258 = vmatmul.msk.f32.vlgmr.msrb.gmra.mxu1 %vm646_vm0, %v2051_v31  ;;  %6294 = vmatmul.msk.f32.vlgmr.msrb.gmra.mxu3 %vm646_vm0, %v2299_v39  ;;  %v8272_v53 = vsel %vm2463_vm4, %v2464_v49, %v2465_v25  ;;  %v1819_v21 = vmax.f32 %v7221_v26, %v7509_v47  ;;  %v614_v26 = vld [vmem:[%s11195_s0 + $0x520] sm:$0xff]  ;;  %v1820_v47 = vmax.f32 %v7227_v28, %v7515_v55 }
 0x528   : > { %v1914_v61 = vmax.f32 %v1818_v33, %v1866_v24  ;;  %6224 = vmatmul.msk.f32.gmra.mxu0 %vm646_vm0, %v612_v22  ;;  %v1821_v55 = vmax.f32 %v7233_v30, %v7521_v63  ;;  %v1822_v30 = vmax.f32 %v7239_v32, %v7527_v7 }
 0x52a   : > { %v8276_v45 = vadd.f32 %v8097_v6, %v1914_v61 }
 0x52c   : > { %6275 = vmatmul.msk.f32.gmra.mxu2 %vm646_vm0, %v8276_v45  ;;  %v2052_v33 = vrot.slane %v8276_v45, 1  ;;  %v2300_v37 = vrot.slane %v8276_v45, 2 }
 0x52d   : > { %v1681_v52 = vpop.f32.mrf.mxu0 }
 0x52e   : > { %v1867_v41 = vmax.f32 %v7801_v51, %v1681_v52 }
 0x530   : > { %v1915_v19 = vmax.f32 %v1819_v21, %v1867_v41  ;;  %6225 = vmatmul.msk.f32.gmra.mxu0 %vm646_vm0, %v613_v4 }
 0x532   : > { %v8288_v20 = vadd.f32 %v8097_v6, %v1915_v19 }
 0x534   : > { %v2053_v23 = vrot.slane %v8288_v20, 1  ;;  %v2301_v0 = vrot.slane %v8288_v20, 2 }
 0x535   : > { %v1684_v50 = vpop.f32.mrf.mxu0 }
 0x536   : > { %v1868_v51 = vmax.f32 %v7811_v18, %v1684_v50  ;;  %v8301_v25 = vsel %vm2048_vm1, %v2052_v33, %v2053_v23  ;;  %v8304_v54 = vsel %vm2296_vm2, %v2300_v37, %v2301_v0  ;;  %v615_v18 = vld [vmem:[%s11195_s0 + $0x528] sm:$0xff] }
 0x537   : > { %6259 = vmatmul.msk.f32.gmra.mxu1 %vm646_vm0, %v8301_v25  ;;  %6295 = vmatmul.msk.f32.gmra.mxu3 %vm646_vm0, %v8304_v54 }
 0x538   : > { %v1916_v22 = vmax.f32 %v1820_v47, %v1868_v51  ;;  %6226 = vmatmul.msk.f32.gmra.mxu0 %vm646_vm0, %v614_v26 }
 0x53a   : > { %v8312_v49 = vadd.f32 %v8097_v6, %v1916_v22 }
 0x53c   : > { %11471 = vst [vmem:[#allocation98_spill] sm:$0xff] %v8312_v49  ;;  %6276 = vmatmul.msk.f32.gmra.mxu2 %vm646_vm0, %v8312_v49  ;;  %v2055_v61 = vrot.slane %v8312_v49, 1  ;;  %v2303_v4 = vrot.slane %v8312_v49, 2 }
 0x53d   : > { %v1687_v28 = vpop.f32.mrf.mxu0 }
 0x53e   : > { %v1869_v24 = vmax.f32 %v7821_v57, %v1687_v28  ;;  %v1824_v28 = vmax.f32 %v7251_v36, %v7539_v27 }
 0x540   : > { %v1917_v31 = vmax.f32 %v1821_v55, %v1869_v24  ;;  %6227 = vmatmul.msk.f32.gmra.mxu0 %vm646_vm0, %v615_v18 }
 0x542   : > { %v8324_v39 = vadd.f32 %v8097_v6, %v1917_v31 }
 0x544   : > { %v2056_v52 = vrot.slane %v8324_v39, 1  ;;  %v2304_v21 = vrot.slane %v8324_v39, 2 }
 0x545   : > { %v1690_v41 = vpop.f32.mrf.mxu0 }
 0x546   : > { %v1870_v57 = vmax.f32 %v7831_v14, %v1690_v41  ;;  %v8334_v63 = vsel %vm2048_vm1, %v2055_v61, %v2056_v52  ;;  %v8337_v19 = vsel %vm2296_vm2, %v2303_v4, %v2304_v21  ;;  %v1823_v14 = vmax.f32 %v7245_v34, %v7533_v15 }
 0x547   : > { %11472 = vst [vmem:[#allocation99_spill] sm:$0xff] %v8337_v19  ;;  %6260 = vmatmul.msk.f32.gmra.mxu1 %vm646_vm0, %v8334_v63  ;;  %6296 = vmatmul.msk.f32.gmra.mxu3 %vm646_vm0, %v8337_v19 }
 0x548   : > { %v1918_v33 = vmax.f32 %v1822_v30, %v1870_v57  ;;  %v1826_v30 = vmax.f32 %v7263_v40, %v7551_v59 }
 0x54a   : > { %v8344_v23 = vadd.f32 %v8097_v6, %v1918_v33 }
 0x54c   : > { %11473 = vst [vmem:[#allocation100_spill] sm:$0xff] %v8344_v23  ;;  %6277 = vmatmul.msk.f32.gmra.mxu2 %vm646_vm0, %v8344_v23  ;;  %v2058_v50 = vrot.slane %v8344_v23, 1  ;;  %v2306_v47 = vrot.slane %v8344_v23, 2 }
 0x54d   : > { %v1693_v32 = vpop.f32.mrf.mxu0 }
 0x54e   : > { %v1871_v7 = vmax.f32 %v7841_v56, %v1693_v32 }
 0x550   : > { %v1919_v37 = vmax.f32 %v1823_v14, %v1871_v7 }
 0x552   : > { %v8352_v0 = vadd.f32 %v8097_v6, %v1919_v37 }
 0x554   : > { %v2059_v26 = vrot.slane %v8352_v0, 1  ;;  %v2307_v51 = vrot.slane %v8352_v0, 2 }
 0x555   : > { %v1696_v22 = vpop.f32.mrf.mxu0 }
 0x556   : > { %v1872_v34 = vmax.f32 %v7851_v12, %v1696_v22  ;;  %v8362_v56 = vsel %vm2048_vm1, %v2058_v50, %v2059_v26  ;;  %v8365_v15 = vsel %vm2296_vm2, %v2306_v47, %v2307_v51  ;;  %v1825_v12 = vmax.f32 %v7257_v38, %v7545_v43 }
 0x557   : > { %11474 = vst [vmem:[#allocation101_spill] sm:$0xff] %v8362_v56  ;;  %6261 = vmatmul.msk.f32.gmra.mxu1 %vm646_vm0, %v8362_v56  ;;  %6297 = vmatmul.msk.f32.gmra.mxu3 %vm646_vm0, %v8365_v15  ;;  %v1828_v51 = vmax.f32 %v7275_v44, %v7563_v35 }
 0x558   : > { %11475 = vst [vmem:[#allocation102_spill] sm:$0xff] %v8365_v15  ;;  %v1920_v18 = vmax.f32 %v1824_v28, %v1872_v34  ;;  %v6333_v34 = vld [vmem:[%s8049_s25 + $0x98] sm:$0xff] }
 0x559   : > { %2728 = vmatpush.msrb.mxu2 %v6333_v34  ;;  %v11494_v34 = vld [vmem:[#allocation31_spill] sm:$0xff] }
 0x55a   : > { %v8372_v55 = vadd.f32 %v8097_v6, %v1920_v18 }
 0x55c   : > { %11476 = vst [vmem:[#allocation103_spill] sm:$0xff] %v8372_v55  ;;  %6278 = vmatmul.msk.f32.gmra.mxu2 %vm646_vm0, %v8372_v55  ;;  %v2061_v61 = vrot.slane %v8372_v55, 1  ;;  %v2309_v4 = vrot.slane %v8372_v55, 2 }
 0x55d   : > { %v1699_v36 = vpop.f32.mrf.mxu0 }
 0x55e   : > { %v1873_v27 = vmax.f32 %v7861_v60, %v1699_v36 }
 0x560   : > { %v1921_v24 = vmax.f32 %v1825_v12, %v1873_v27  ;;  %v8439_v12 = vpop.f32.mrf.mxu1 }
 0x562   : > { %v8380_v31 = vadd.f32 %v8097_v6, %v1921_v24 }
 0x564   : > { %v2062_v52 = vrot.slane %v8380_v31, 1  ;;  %v2310_v21 = vrot.slane %v8380_v31, 2 }
 0x565   : > { %v1702_v41 = vpop.f32.mrf.mxu0 }
 0x566   : > { %v1874_v38 = vmax.f32 %v7871_v10, %v1702_v41  ;;  %v8390_v60 = vsel %vm2048_vm1, %v2061_v61, %v2062_v52  ;;  %v8393_v43 = vsel %vm2296_vm2, %v2309_v4, %v2310_v21  ;;  %v1827_v10 = vmax.f32 %v7269_v42, %v7557_v11 }
 0x567   : > { %11477 = vst [vmem:[#allocation104_spill] sm:$0xff] %v8390_v60  ;;  %6262 = vmatmul.msk.f32.gmra.mxu1 %vm646_vm0, %v8390_v60  ;;  %6298 = vmatmul.msk.f32.gmra.mxu3 %vm646_vm0, %v8393_v43 }
 0x568   : > { %11478 = vst [vmem:[#allocation105_spill] sm:$0xff] %v8393_v43  ;;  %v1922_v57 = vmax.f32 %v1826_v30, %v1874_v38  ;;  %v6332_v38 = vld [vmem:[%s8049_s25 + $0x90] sm:$0xff] }
 0x569   : > { %2729 = vmatpush.msrb.mxu2 %v6332_v38  ;;  %v11500_v38 = vld [vmem:[#allocation78_spill] sm:$0xff] }
 0x56a   : > { %v8400_v33 = vadd.f32 %v8097_v6, %v1922_v57 }
 0x56c   : > { %11479 = vst [vmem:[#allocation106_spill] sm:$0xff] %v8400_v33  ;;  %6279 = vmatmul.msk.f32.gmra.mxu2 %vm646_vm0, %v8400_v33  ;;  %v2064_v7 = vrot.slane %v8400_v33, 1  ;;  %v2312_v50 = vrot.slane %v8400_v33, 2 }
 0x56d   : > { %v1705_v40 = vpop.f32.mrf.mxu0 }
 0x56e   : > { %v1875_v59 = vmax.f32 %v7881_v58, %v1705_v40  ;;  %v6331_v40 = vld [vmem:[%s8049_s25 + $0x88] sm:$0xff] }
 0x56f   : > { %2730 = vmatpush.msrb.mxu2 %v6331_v40 }
 0x570   : > { %v1923_v32 = vmax.f32 %v1827_v10, %v1875_v59  ;;  %v11487_v10 = vld [vmem:[#allocation68_spill] sm:$0xff] }
 0x572   : > { %v8408_v14 = vadd.f32 %v8097_v6, %v1923_v32 }
 0x574   : > { %v2065_v37 = vrot.slane %v8408_v14, 1  ;;  %v2313_v26 = vrot.slane %v8408_v14, 2 }
 0x575   : > { %v1708_v47 = vpop.f32.mrf.mxu0 }
 0x576   : > { %v1876_v42 = vmax.f32 %v7891_v8, %v1708_v47  ;;  %v8418_v58 = vsel %vm2048_vm1, %v2064_v7, %v2065_v37  ;;  %v8421_v11 = vsel %vm2296_vm2, %v2312_v50, %v2313_v26  ;;  %v1829_v8 = vmax.f32 %v7281_v46, %v7569_v17  ;;  %v11483_v46 = vld [vmem:[#allocation2_spill] sm:$0xff]  ;;  %v11484_v17 = vld [vmem:[#allocation59_spill] sm:$0xff]  ;;  %v11490_v37 = vld [vmem:[#allocation40_spill] sm:$0xff] }
 0x577   : > { %11480 = vst [vmem:[#allocation107_spill] sm:$0xff] %v8418_v58  ;;  %6263 = vmatmul.msk.f32.gmra.mxu1 %vm646_vm0, %v8418_v58  ;;  %6299 = vmatmul.msk.f32.gmra.mxu3 %vm646_vm0, %v8421_v11  ;;  %v6330_v7 = vld [vmem:[%s8049_s25 + $0x80] sm:$0xff]  ;;  %v11491_v50 = vld [vmem:[#allocation12_spill] sm:$0xff] }
 0x578   : > { %11481 = vst [vmem:[#allocation108_spill] sm:$0xff] %v8421_v11  ;;  %v1924_v22 = vmax.f32 %v1828_v51, %v1876_v42  ;;  %v1840_v26 = vmax.f32 %v11491_v50, %v11490_v37  ;;  %v11492_v47 = vld [vmem:[#allocation70_spill] sm:$0xff]  ;;  %v11493_v51 = vld [vmem:[#allocation76_spill] sm:$0xff]  ;;  %2731 = vmatpush.msrb.mxu2 %v6330_v7 }
 0x579   : > { %v1889_v42 = vmax.f32 %v11493_v51, %v11492_v47 }
 0x57a   : > { %v8428_v28 = vadd.f32 %v8097_v6, %v1924_v22 }
 0x57c   : > { %11482 = vst [vmem:[#allocation109_spill] sm:$0xff] %v8428_v28  ;;  %6280 = vmatmul.msk.f32.gmra.mxu2 %vm646_vm0, %v8428_v28  ;;  %v2067_v27 = vrot.slane %v8428_v28, 1  ;;  %v2315_v61 = vrot.slane %v8428_v28, 2 }
 0x57d   : > { %v1711_v44 = vpop.f32.mrf.mxu0 }
 0x57e   : > { %v1877_v35 = vmax.f32 %v7901_v62, %v1711_v44  ;;  %v1830_v62 = vmax.f32 %v11483_v46, %v7575_v2  ;;  %v11488_v2 = vld [vmem:[#allocation74_spill] sm:$0xff]  ;;  %v11495_v44 = vld [vmem:[#allocation3_spill] sm:$0xff] }
 0x57f   : > { %v1888_v59 = vmax.f32 %v11488_v2, %v11487_v10  ;;  %v11501_v10 = vld [vmem:[#allocation42_spill] sm:$0xff] }
 0x580   : > { %v1925_v18 = vmax.f32 %v1829_v8, %v1877_v35  ;;  %v1831_v8 = vmax.f32 %v11495_v44, %v11494_v34  ;;  %v11502_v2 = vld [vmem:[#allocation14_spill] sm:$0xff] }
 0x581   : > { %v1936_v35 = vmax.f32 %v1840_v26, %v1888_v59  ;;  %v1842_v59 = vmax.f32 %v11502_v2, %v11501_v10  ;;  %v11512_v2 = vld [vmem:[#allocation44_spill] sm:$0xff] }
 0x582   : > { %v8437_v36 = vadd.f32 %v8097_v6, %v1925_v18  ;;  %v8474_v18 = vpop.f32.mrf.mxu1 }
 0x584   : > { %v2068_v24 = vrot.slane %v8437_v36, 1  ;;  %v2316_v52 = vrot.slane %v8437_v36, 2 }
 0x585   : > { %v1714_v4 = vpop.f32.mrf.mxu0 }
 0x586   : > { %v1878_v21 = vmax.f32 %v11484_v17, %v1714_v4  ;;  %v8449_v41 = vsel %vm2048_vm1, %v2067_v27, %v2068_v24  ;;  %v8452_v30 = vsel %vm2296_vm2, %v2315_v61, %v2316_v52  ;;  %v11496_v27 = vld [vmem:[#allocation60_spill] sm:$0xff]  ;;  %v11497_v61 = vld [vmem:[#allocation41_spill] sm:$0xff]  ;;  %v8480_v17 = vadd.f32 %v8097_v6, %v1936_v35  ;;  %v11507_v35 = vld [vmem:[#allocation43_spill] sm:$0xff] }
 0x587   : > { %11485 = vst [vmem:[#allocation2_spill] sm:$0xff] %v8449_v41  ;;  %6264 = vmatmul.msk.f32.gmra.mxu1 %vm646_vm0, %v8449_v41  ;;  %6300 = vmatmul.msk.f32.gmra.mxu3 %vm646_vm0, %v8452_v30  ;;  %v11498_v52 = vld [vmem:[#allocation13_spill] sm:$0xff] }
 0x588   : > { %11486 = vst [vmem:[#allocation59_spill] sm:$0xff] %v8452_v30  ;;  %v1926_v57 = vmax.f32 %v1830_v62, %v1878_v21  ;;  %v1841_v4 = vmax.f32 %v11498_v52, %v11497_v61  ;;  %v11499_v21 = vld [vmem:[#allocation72_spill] sm:$0xff]  ;;  %v2073_v10 = vrot.slane %v8480_v17, 1 }
 0x58a   : > { %v8463_v32 = vadd.f32 %v8097_v6, %v1926_v57  ;;  %v1937_v62 = vmax.f32 %v1841_v4, %v1889_v42  ;;  %v1890_v57 = vmax.f32 %v11500_v38, %v11499_v21  ;;  %v11503_v42 = vld [vmem:[#allocation75_spill] sm:$0xff]  ;;  %v8512_v61 = vpop.f32.mrf.mxu1  ;;  %v11511_v21 = vld [vmem:[#allocation81_spill] sm:$0xff] }
 0x58b   : > { %11509 = vst [vmem:[#allocation12_spill] sm:$0xff] %v8512_v61 }
 0x58c   : > { %11489 = vst [vmem:[#allocation68_spill] sm:$0xff] %v8463_v32  ;;  %6281 = vmatmul.msk.f32.gmra.mxu2 %vm646_vm0, %v8463_v32  ;;  %v2070_v7 = vrot.slane %v8463_v32, 1  ;;  %v2318_v50 = vrot.slane %v8463_v32, 2  ;;  %v8496_v47 = vadd.f32 %v8097_v6, %v1937_v62  ;;  %v1938_v51 = vmax.f32 %v1842_v59, %v1890_v57  ;;  %v11510_v62 = vld [vmem:[#allocation77_spill] sm:$0xff]  ;;  %v11513_v59 = vld [vmem:[#allocation16_spill] sm:$0xff] }
 0x58d   : > { %v1717_v22 = vpop.f32.mrf.mxu0  ;;  %v1892_v38 = vmax.f32 %v11511_v21, %v11510_v62 }
 0x58e   : > { %v1879_v24 = vmax.f32 %v11496_v27, %v1717_v22  ;;  %v11504_v22 = vld [vmem:[#allocation80_spill] sm:$0xff]  ;;  %v11508_v27 = vld [vmem:[#allocation15_spill] sm:$0xff]  ;;  %v2074_v52 = vrot.slane %v8496_v47, 1  ;;  %v8516_v4 = vadd.f32 %v8097_v6, %v1938_v51  ;;  %v2322_v57 = vrot.slane %v8496_v47, 2 }
 0x58f   : > { %v1891_v34 = vmax.f32 %v11504_v22, %v11503_v42  ;;  %v11514_v42 = vld [vmem:[#allocation79_spill] sm:$0xff]  ;;  %v11515_v22 = vld [vmem:[#allocation82_spill] sm:$0xff] }
 0x590   : > { %v1927_v46 = vmax.f32 %v1831_v8, %v1879_v24  ;;  %v1843_v24 = vmax.f32 %v11508_v27, %v11507_v35  ;;  %v11516_v27 = vld [vmem:[#allocation45_spill] sm:$0xff] }
 0x592   : > { %v8485_v40 = vadd.f32 %v8097_v6, %v1927_v46  ;;  %v1939_v46 = vmax.f32 %v1843_v24, %v1891_v34  ;;  %v1893_v34 = vmax.f32 %v11515_v22, %v11514_v42  ;;  %v11517_v24 = vld [vmem:[#allocation17_spill] sm:$0xff]  ;;  %v11522_v42 = vld [vmem:[#allocation46_spill] sm:$0xff] }
 0x593   : > { %v1845_v62 = vmax.f32 %v11517_v24, %v11516_v27  ;;  %v11523_v22 = vld [vmem:[#allocation18_spill] sm:$0xff] }
 0x594   : > { %6282 = vmatmul.msk.f32.gmra.mxu2 %vm646_vm0, %v8480_v17  ;;  %v2071_v37 = vrot.slane %v8485_v40, 1  ;;  %v2319_v26 = vrot.slane %v8485_v40, 2 }
 0x596   : > { %v8501_v44 = vsel %vm2048_vm1, %v2070_v7, %v2071_v37  ;;  %v8504_v8 = vsel %vm2296_vm2, %v2318_v50, %v2319_v26  ;;  %v1844_v7 = vmax.f32 %v11513_v59, %v11512_v2  ;;  %v2321_v37 = vrot.slane %v8480_v17, 2 }
 0x597   : > { %11505 = vst [vmem:[#allocation74_spill] sm:$0xff] %v8501_v44  ;;  %6265 = vmatmul.msk.f32.gmra.mxu1 %vm646_vm0, %v8501_v44  ;;  %6301 = vmatmul.msk.f32.gmra.mxu3 %vm646_vm0, %v8504_v8  ;;  %v2075_v50 = vsel %vm2048_vm1, %v2073_v10, %v2074_v52  ;;  %v8529_v26 = vadd.f32 %v8097_v6, %v1939_v46  ;;  %v8541_v10 = vpop.f32.mrf.mxu1  ;;  %v2324_v2 = vrot.slane %v8516_v4, 2  ;;  %v2473_v44 = vrot.slane %v8344_v23, 3 }
 0x598   : > { %11506 = vst [vmem:[#allocation40_spill] sm:$0xff] %v8504_v8  ;;  %v1940_v51 = vmax.f32 %v1844_v7, %v1892_v38  ;;  %v2323_v35 = vsel %vm2296_vm2, %v2321_v37, %v2322_v57  ;;  %v1941_v52 = vmax.f32 %v1845_v62, %v1893_v34  ;;  %v2076_v57 = vrot.slane %v8516_v4, 1  ;;  %v11520_v7 = vld [vmem:[#allocation83_spill] sm:$0xff] }
 0x599   : > { %11519 = vst [vmem:[#allocation76_spill] sm:$0xff] %v8541_v10  ;;  %v2077_v46 = vrot.slane %v8529_v26, 1  ;;  %v2325_v38 = vrot.slane %v8529_v26, 2  ;;  %v1895_v37 = vmax.f32 %v8105_v1, %v11520_v7  ;;  %v1847_v34 = vmax.f32 %v11523_v22, %v11522_v42  ;;  %v11527_v7 = vld [vmem:[#allocation47_spill] sm:$0xff] }
 0x59a   : > { %v8539_v21 = vadd.f32 %v8097_v6, %v1940_v51  ;;  %v8550_v59 = vadd.f32 %v8097_v6, %v1941_v52  ;;  %v2634_v22 = vrot.slane %v8276_v45, 4 }
 0x59b   : > { %v8558_v51 = vsel %vm2296_vm2, %v2324_v2, %v2325_v38  ;;  %v1897_v38 = vmax.f32 %v8124_v5, %v8111_v16 }
 0x59c   : > { %6283 = vmatmul.msk.f32.gmra.mxu2 %vm646_vm0, %v8516_v4  ;;  %11518 = vst [vmem:[#allocation70_spill] sm:$0xff] %v8539_v21  ;;  %v2080_v27 = vrot.slane %v8550_v59, 1  ;;  %v2328_v1 = vrot.slane %v8550_v59, 2  ;;  %v2079_v62 = vrot.slane %v8539_v21, 1  ;;  %v2327_v52 = vrot.slane %v8539_v21, 2 }
 0x59e   : > { %v8583_v2 = vsel %vm2296_vm2, %v2327_v52, %v2328_v1 }
 0x59f   : > { %6266 = vmatmul.msk.f32.gmra.mxu1 %vm646_vm0, %v2075_v50  ;;  %6302 = vmatmul.msk.f32.gmra.mxu3 %vm646_vm0, %v2323_v35  ;;  %v8555_v50 = vsel %vm2048_vm1, %v2076_v57, %v2077_v46  ;;  %v1943_v35 = vmax.f32 %v1847_v34, %v1895_v37  ;;  %v8568_v24 = vpop.f32.mrf.mxu1  ;;  %v8580_v57 = vsel %vm2048_vm1, %v2079_v62, %v2080_v27  ;;  %v11528_v37 = vld [vmem:[#allocation19_spill] sm:$0xff]  ;;  %v11530_v27 = vld [vmem:[#allocation84_spill] sm:$0xff] }
 0x5a0   : > { %11521 = vst [vmem:[#allocation31_spill] sm:$0xff] %v8555_v50  ;;  %v1849_v42 = vmax.f32 %v11528_v37, %v11527_v7  ;;  %v2082_v1 = vrot.slane %v11530_v27, 1  ;;  %v2330_v62 = vrot.slane %v11530_v27, 2 }
 0x5a1   : > { %11524 = vst [vmem:[#allocation3_spill] sm:$0xff] %v8568_v24  ;;  %v8575_v46 = vadd.f32 %v8097_v6, %v1943_v35  ;;  %v8627_v24 = vpop.f32.mrf.mxu3 }
 0x5a2   : > { %11525 = vst [vmem:[#allocation60_spill] sm:$0xff] %v8580_v57  ;;  %v1945_v16 = vmax.f32 %v1849_v42, %v1897_v38  ;;  %v1899_v38 = vmax.f32 %v8143_v48, %v8133_v3  ;;  %v2638_v42 = vrot.slane %v8324_v39, 4  ;;  %v6353_v3 = vld [vmem:[%s8049_s25 + $0xb8] sm:$0xff]  ;;  %v11534_v48 = vld [vmem:[#allocation48_spill] sm:$0xff] }
 0x5a3   : > { %11526 = vst [vmem:[#allocation41_spill] sm:$0xff] %v8583_v2  ;;  %v2083_v5 = vrot.slane %v8575_v46, 1  ;;  %v2331_v34 = vrot.slane %v8575_v46, 2  ;;  %2820 = vmatpush.msra.mxu3 %v6353_v3  ;;  %v6351_v3 = vld [vmem:[%s8049_s25 + $0xa8] sm:$0xff] }
 0x5a4   : > { %6284 = vmatmul.msk.f32.gmra.mxu2 %vm646_vm0, %v8539_v21  ;;  %v8603_v52 = vadd.f32 %v8097_v6, %v1945_v16  ;;  %v11535_v16 = vld [vmem:[#allocation20_spill] sm:$0xff]  ;;  %11536 = vst [vmem:[#allocation14_spill] sm:$0xff] %v8627_v24  ;;  %v6350_v24 = vld [vmem:[%s8049_s25 + $0xa0] sm:$0xff] }
 0x5a5   : > { %v8613_v37 = vsel %vm2296_vm2, %v2330_v62, %v2331_v34  ;;  %v6312_v34 = vld [vmem:[%s8049_s25 + $0x70] sm:$0xff] }
 0x5a6   : > { %11533 = vst [vmem:[#allocation42_spill] sm:$0xff] %v8613_v37  ;;  %v2086_v10 = vrot.slane %v8603_v52, 1 }
 0x5a7   : > { %6267 = vmatmul.msk.f32.gmra.mxu1 %vm646_vm0, %v8555_v50  ;;  %6303 = vmatmul.msk.f32.gmra.mxu3 %vm646_vm0, %v8558_v51  ;;  %v8607_v7 = vpop.f32.mrf.mxu1  ;;  %v8741_v50 = vpop.f32.mrf.mxu2 }
 0x5a8   : > { %11531 = vst [vmem:[#allocation72_spill] sm:$0xff] %v8607_v7  ;;  %v1851_v7 = vmax.f32 %v11535_v16, %v11534_v48  ;;  %v11538_v48 = vld [vmem:[#allocation85_spill] sm:$0xff] }
 0x5a9   : > { %v2085_v16 = vrot.slane %v11538_v48, 1 }
 0x5aa   : > { %v1947_v62 = vmax.f32 %v1851_v7, %v1899_v38  ;;  %v2333_v38 = vrot.slane %v11538_v48, 2  ;;  %v6310_v7 = vld [vmem:[%s8049_s25 + $0x60] sm:$0xff] }
 0x5ac   : > { %6334 = vmatmul.msk.f32.vlgmr.msrb.gmra.mxu2 %vm646_vm0, %v8267_v29  ;;  %v2635_v29 = vrot.slane %v8288_v20, 4 }
 0x5ae   : > { %v8596_v35 = vsel %vm2630_vm3, %v2634_v22, %v2635_v29  ;;  %v8610_v29 = vsel %vm2048_vm1, %v2082_v1, %v2083_v5  ;;  %v6313_v22 = vld [vmem:[%s8049_s25 + $0x78] sm:$0xff]  ;;  %v2637_v5 = vrot.slane %v8312_v49, 4  ;;  %v6352_v1 = vld [vmem:[%s8049_s25 + $0xb0] sm:$0xff] }
 0x5af   : > { %6268 = vmatmul.msk.f32.gmra.mxu1 %vm646_vm0, %v8580_v57  ;;  %6304 = vmatmul.msk.f32.gmra.mxu3 %vm646_vm0, %v8583_v2  ;;  %11529 = vst [vmem:[#allocation13_spill] sm:$0xff] %v8596_v35  ;;  %v8643_v57 = vadd.f32 %v8097_v6, %v1947_v62  ;;  %v11541_v62 = vld [vmem:[#allocation49_spill] sm:$0xff] }
 0x5b0   : > { %11532 = vst [vmem:[#allocation78_spill] sm:$0xff] %v8610_v29  ;;  %2561 = vmatpush.msra.mxu1 %v6313_v22  ;;  %2821 = vmatpush.msra.mxu3 %v6352_v1  ;;  %v6311_v22 = vld [vmem:[%s8049_s25 + $0x68] sm:$0xff]  ;;  %v2641_v1 = vrot.slane %v8352_v0, 4 }
 0x5b2   : > { %2562 = vmatpush.msra.mxu1 %v6312_v34  ;;  %2822 = vmatpush.msra.mxu3 %v6351_v3 }
 0x5b4   : > { %6335 = vmatmul.msk.f32.gmra.mxu2 %vm646_vm0, %v8596_v35  ;;  %v2334_v35 = vrot.slane %v8603_v52, 2  ;;  %2563 = vmatpush.msra.mxu1 %v6311_v22  ;;  %v11542_v22 = vld [vmem:[#allocation21_spill] sm:$0xff] }
 0x5b5   : > { %v1853_v3 = vmax.f32 %v11542_v22, %v11541_v62  ;;  %2823 = vmatpush.msra.mxu3 %v6350_v24 }
 0x5b6   : > { %v8651_v34 = vsel %vm2296_vm2, %v2333_v38, %v2334_v35  ;;  %2564 = vmatpush.msra.mxu1 %v6310_v7  ;;  %v2089_v35 = vrot.slane %v8643_v57, 1  ;;  %v11546_v7 = vld [vmem:[#allocation86_spill] sm:$0xff] }
 0x5b7   : > { %6269 = vmatmul.msk.f32.gmra.mxu1 %vm646_vm0, %v8610_v29  ;;  %6305 = vmatmul.msk.f32.gmra.mxu3 %vm646_vm0, %v8613_v37  ;;  %v8632_v29 = vsel %vm2630_vm3, %v2637_v5, %v2638_v42  ;;  %v1901_v42 = vmax.f32 %v8162_v13, %v8155_v9  ;;  %v8648_v5 = vsel %vm2048_vm1, %v2085_v16, %v2086_v10  ;;  %v2640_v9 = vrot.slane %v8344_v23, 4  ;;  %v8663_v10 = vpop.f32.mrf.mxu3  ;;  %v11581_v37 = vld [vmem:[#allocation61_spill] sm:$0xff] }
 0x5b8   : > { %11537 = vst [vmem:[#allocation75_spill] sm:$0xff] %v8632_v29  ;;  %v2337_v16 = vrot.slane %v8643_v57, 2  ;;  %v2088_v62 = vrot.slane %v11546_v7, 1  ;;  %v2336_v22 = vrot.slane %v11546_v7, 2 }
 0x5b9   : > { %11539 = vst [vmem:[#allocation80_spill] sm:$0xff] %v8648_v5  ;;  %v1949_v13 = vmax.f32 %v1853_v3, %v1901_v42  ;;  %v8668_v38 = vsel %vm2630_vm3, %v2640_v9, %v2641_v1  ;;  %v11547_v42 = vld [vmem:[#allocation89_spill] sm:$0xff]  ;;  %v2644_v1 = vrot.slane %v8380_v31, 4  ;;  %v11550_v9 = vld [vmem:[#allocation50_spill] sm:$0xff] }
 0x5ba   : > { %11540 = vst [vmem:[#allocation43_spill] sm:$0xff] %v8651_v34  ;;  %v1903_v3 = vmax.f32 %v11547_v42, %v8439_v12 }
 0x5bb   : > { %11544 = vst [vmem:[#allocation77_spill] sm:$0xff] %v8663_v10  ;;  %v8675_v24 = vadd.f32 %v8097_v6, %v1949_v13  ;;  %v8683_v10 = vsel %vm2296_vm2, %v2336_v22, %v2337_v16  ;;  %v11551_v13 = vld [vmem:[#allocation22_spill] sm:$0xff] }
 0x5bc   : > { %6336 = vmatmul.msk.f32.gmra.mxu2 %vm646_vm0, %v8632_v29  ;;  %v8660_v29 = vpop.f32.mrf.mxu1  ;;  %11545 = vst [vmem:[#allocation81_spill] sm:$0xff] %v8668_v38 }
 0x5bd   : > { %11543 = vst [vmem:[#allocation15_spill] sm:$0xff] %v8660_v29  ;;  %v8680_v29 = vsel %vm2048_vm1, %v2088_v62, %v2089_v35  ;;  %v2092_v16 = vrot.slane %v8675_v24, 1  ;;  %v2340_v22 = vrot.slane %v8675_v24, 2 }
 0x5be   : > { %11548 = vst [vmem:[#allocation44_spill] sm:$0xff] %v8680_v29 }
 0x5bf   : > { %6270 = vmatmul.msk.f32.gmra.mxu1 %vm646_vm0, %v8648_v5  ;;  %6306 = vmatmul.msk.f32.gmra.mxu3 %vm646_vm0, %v8651_v34  ;;  %11549 = vst [vmem:[#allocation16_spill] sm:$0xff] %v8683_v10  ;;  %v2643_v5 = vrot.slane %v8372_v55, 4  ;;  %v8695_v62 = vpop.f32.mrf.mxu3 }
 0x5c0   : > { %11553 = vst [vmem:[#allocation82_spill] sm:$0xff] %v8695_v62 }
 0x5c1   : > { %v8700_v42 = vsel %vm2630_vm3, %v2643_v5, %v2644_v1  ;;  %v2647_v5 = vrot.slane %v8408_v14, 4  ;;  %v6393_v1 = vld [vmem:[%s8049_s25 + $0xf8] sm:$0xff] }
 0x5c2   : > { %11554 = vst [vmem:[#allocation45_spill] sm:$0xff] %v8700_v42  ;;  %3014 = vmatpush.msra.mxu2 %v6393_v1 }
 0x5c4   : > { %6337 = vmatmul.msk.f32.gmra.mxu2 %vm646_vm0, %v8668_v38  ;;  %v1855_v38 = vmax.f32 %v11551_v13, %v11550_v9  ;;  %v8693_v35 = vpop.f32.mrf.mxu1 }
 0x5c5   : > { %11552 = vst [vmem:[#allocation79_spill] sm:$0xff] %v8693_v35 }
 0x5c6   : > { %v1951_v12 = vmax.f32 %v1855_v38, %v1903_v3 }
 0x5c7   : > { %6271 = vmatmul.msk.f32.gmra.mxu1 %vm646_vm0, %v8680_v29  ;;  %6307 = vmatmul.msk.f32.gmra.mxu3 %vm646_vm0, %v8683_v10  ;;  %v11555_v29 = vld [vmem:[#allocation87_spill] sm:$0xff] }
 0x5c8   : > { %v2091_v9 = vrot.slane %v11555_v29, 1  ;;  %v2339_v13 = vrot.slane %v11555_v29, 2  ;;  %v8707_v38 = vadd.f32 %v8097_v6, %v1951_v12  ;;  %v8722_v6 = vpop.f32.mrf.mxu3 }
 0x5c9   : > { %11558 = vst [vmem:[#allocation46_spill] sm:$0xff] %v8722_v6 }
 0x5ca   : > { %v8710_v3 = vsel %vm2048_vm1, %v2091_v9, %v2092_v16  ;;  %v8713_v35 = vsel %vm2296_vm2, %v2339_v13, %v2340_v22  ;;  %v2095_v12 = vrot.slane %v8707_v38, 1  ;;  %v2343_v16 = vrot.slane %v8707_v38, 2  ;;  %v11561_v13 = vld [vmem:[#allocation88_spill] sm:$0xff] }
 0x5cb   : > { %11556 = vst [vmem:[#allocation17_spill] sm:$0xff] %v8710_v3  ;;  %v2342_v1 = vrot.slane %v11561_v13, 2 }
 0x5cc   : > { %6338 = vmatmul.msk.f32.gmra.mxu2 %vm646_vm0, %v8700_v42  ;;  %11557 = vst [vmem:[#allocation83_spill] sm:$0xff] %v8713_v35  ;;  %v2646_v42 = vrot.slane %v8400_v33, 4  ;;  %v8729_v9 = vpop.f32.mrf.mxu1 }
 0x5cd   : > { %11560 = vst [vmem:[#allocation47_spill] sm:$0xff] %v8729_v9  ;;  %v8739_v6 = vsel %vm2296_vm2, %v2342_v1, %v2343_v16  ;;  %v8758_v16 = vpop.f32.mrf.mxu2  ;;  %v2653_v1 = vrot.slane %v8485_v40, 4 }
 0x5ce   : > { %v8727_v22 = vsel %vm2630_vm3, %v2646_v42, %v2647_v5  ;;  %11563 = vst [vmem:[#allocation48_spill] sm:$0xff] %v8739_v6  ;;  %v2650_v42 = vrot.slane %v8437_v36, 4  ;;  %v2649_v5 = vrot.slane %v8428_v28, 4 }
 0x5cf   : > { %6272 = vmatmul.msk.f32.gmra.mxu1 %vm646_vm0, %v8710_v3  ;;  %6308 = vmatmul.msk.f32.gmra.mxu3 %vm646_vm0, %v8713_v35  ;;  %11559 = vst [vmem:[#allocation18_spill] sm:$0xff] %v8727_v22  ;;  %v2094_v3 = vrot.slane %v11561_v13, 1 }
 0x5d0   : > { %v8749_v9 = vpop.f32.mrf.mxu3 }
 0x5d1   : > { %v8736_v62 = vsel %vm2048_vm1, %v2094_v3, %v2095_v12  ;;  %11564 = vst [vmem:[#allocation20_spill] sm:$0xff] %v8749_v9  ;;  %v8752_v3 = vsel %vm2630_vm3, %v2649_v5, %v2650_v42  ;;  %v2468_v42 = vrot.slane %v8288_v20, 3  ;;  %v2656_v20 = vrot.slane %v8496_v47, 4 }
 0x5d2   : > { %11562 = vst [vmem:[#allocation19_spill] sm:$0xff] %v8736_v62 }
 0x5d3   : > { %11565 = vst [vmem:[#allocation49_spill] sm:$0xff] %v8752_v3 }
 0x5d4   : > { %6339 = vmatmul.msk.f32.gmra.mxu2 %vm646_vm0, %v8727_v22  ;;  %v8754_v12 = vpop.f32.mrf.mxu1  ;;  %v2652_v22 = vrot.slane %v8463_v32, 4 }
 0x5d6   : > { %v8770_v5 = vsel %vm2630_vm3, %v2652_v22, %v2653_v1  ;;  %v2655_v22 = vrot.slane %v8480_v17, 4 }
 0x5d7   : > { %6273 = vmatmul.msk.f32.gmra.mxu1 %vm646_vm0, %v8736_v62  ;;  %6309 = vmatmul.msk.f32.gmra.mxu3 %vm646_vm0, %v8739_v6  ;;  %11566 = vst [vmem:[#allocation21_spill] sm:$0xff] %v8770_v5  ;;  %v8780_v6 = vpop.f32.mrf.mxu2 }
 0x5d8   : > { %v8766_v9 = vpop.f32.mrf.mxu3 }
 0x5dc   : > { %6340 = vmatmul.msk.f32.gmra.mxu2 %vm646_vm0, %v8752_v3  ;;  %v8772_v3 = vpop.f32.mrf.mxu1 }
 0x5df   : > { %6314 = vmatmul.msk.f32.vlgmr.msra.gmra.mxu1 %vm646_vm0, %v8272_v53  ;;  %6354 = vmatmul.msk.f32.vlgmr.msra.gmra.mxu3 %vm646_vm0, %v8276_v45  ;;  %v2467_v53 = vrot.slane %v8276_v45, 3  ;;  %v2471_v45 = vrot.slane %v8324_v39, 3  ;;  %v8799_v61 = vpop.f32.mrf.mxu2  ;;  %v2659_v39 = vrot.slane %v8529_v26, 4 }
 0x5e0   : > { %v8788_v1 = vpop.f32.mrf.mxu3 }
 0x5e1   : > { %v8778_v62 = vsel %vm2463_vm4, %v2467_v53, %v2468_v42  ;;  %v2657_v42 = vsel %vm2630_vm3, %v2655_v22, %v2656_v20  ;;  %v6392_v20 = vld [vmem:[%s8049_s25 + $0xf0] sm:$0xff]  ;;  %v2658_v22 = vrot.slane %v8516_v4, 4 }
 0x5e2   : > { %3015 = vmatpush.msra.mxu2 %v6392_v20 }
 0x5e4   : > { %6341 = vmatmul.msk.f32.gmra.mxu2 %vm646_vm0, %v8770_v5  ;;  %v8792_v53 = vpop.f32.mrf.mxu1  ;;  %v2470_v5 = vrot.slane %v8312_v49, 3 }
 0x5e6   : > { %v8797_v35 = vsel %vm2463_vm4, %v2470_v5, %v2471_v45  ;;  %v8812_v5 = vsel %vm2630_vm3, %v2658_v22, %v2659_v39  ;;  %v2661_v39 = vrot.slane %v8539_v21, 4 }
 0x5e7   : > { %6315 = vmatmul.msk.f32.gmra.mxu1 %vm646_vm0, %v8778_v62  ;;  %6355 = vmatmul.msk.f32.gmra.mxu3 %vm646_vm0, %v8312_v49  ;;  %v2474_v49 = vrot.slane %v8352_v0, 3  ;;  %11567 = vst [vmem:[#allocation89_spill] sm:$0xff] %v8812_v5  ;;  %v8822_v20 = vpop.f32.mrf.mxu2  ;;  %v2662_v0 = vrot.slane %v8550_v59, 4 }
 0x5e8   : > { %11569 = vst [vmem:[#allocation22_spill] sm:$0xff] %v8822_v20 }
 0x5e9   : > { %v8820_v10 = vsel %vm2463_vm4, %v2473_v44, %v2474_v49  ;;  %v2476_v44 = vrot.slane %v8372_v55, 3 }
 0x5ea   : > { %11568 = vst [vmem:[#allocation50_spill] sm:$0xff] %v8820_v10 }
 0x5ec   : > { %6342 = vmatmul.msk.f32.gmra.mxu2 %vm646_vm0, %v2657_v42  ;;  %v8808_v42 = vpop.f32.mrf.mxu3  ;;  %v8814_v45 = vpop.f32.mrf.mxu1 }
 0x5ef   : > { %6316 = vmatmul.msk.f32.gmra.mxu1 %vm646_vm0, %v8797_v35  ;;  %6356 = vmatmul.msk.f32.gmra.mxu3 %vm646_vm0, %v8344_v23  ;;  %v8834_v23 = vsel %vm2630_vm3, %v2661_v39, %v2662_v0  ;;  %v8844_v34 = vpop.f32.mrf.mxu2  ;;  %v2664_v0 = vrot.slane %v11530_v27, 4 }
 0x5f0   : > { %11570 = vst [vmem:[#allocation110_spill] sm:$0xff] %v8834_v23 }
 0x5f1   : > { %11572 = vst [vmem:[#allocation112_spill] sm:$0xff] %v8844_v34 }
 0x5f4   : > { %6343 = vmatmul.msk.f32.gmra.mxu2 %vm646_vm0, %v8812_v5  ;;  %v8830_v22 = vpop.f32.mrf.mxu3  ;;  %v2477_v5 = vrot.slane %v8380_v31, 3  ;;  %v8836_v49 = vpop.f32.mrf.mxu1  ;;  %v2665_v31 = vrot.slane %v8575_v46, 4 }
 0x5f6   : > { %v8842_v41 = vsel %vm2463_vm4, %v2476_v44, %v2477_v5  ;;  %v8856_v5 = vsel %vm2630_vm3, %v2664_v0, %v2665_v31  ;;  %v6391_v31 = vld [vmem:[%s8049_s25 + $0xe8] sm:$0xff]  ;;  %v2667_v0 = vrot.slane %v11538_v48, 4 }
 0x5f7   : > { %6317 = vmatmul.msk.f32.gmra.mxu1 %vm646_vm0, %v8820_v10  ;;  %6357 = vmatmul.msk.f32.gmra.mxu3 %vm646_vm0, %v8372_v55  ;;  %11571 = vst [vmem:[#allocation111_spill] sm:$0xff] %v8842_v41  ;;  %v2479_v55 = vrot.slane %v8400_v33, 3 }
 0x5f8   : > { %11574 = vst [vmem:[#allocation114_spill] sm:$0xff] %v8856_v5  ;;  %3016 = vmatpush.msra.mxu2 %v6391_v31 }
 0x5fc   : > { %6344 = vmatmul.msk.f32.gmra.mxu2 %vm646_vm0, %v8834_v23  ;;  %v8852_v39 = vpop.f32.mrf.mxu3  ;;  %v2480_v23 = vrot.slane %v8408_v14, 3  ;;  %v8858_v44 = vpop.f32.mrf.mxu1  ;;  %v2668_v14 = vrot.slane %v8603_v52, 4 }
 0x5fd   : > { %11573 = vst [vmem:[#allocation113_spill] sm:$0xff] %v8852_v39 }
 0x5fe   : > { %11575 = vst [vmem:[#allocation115_spill] sm:$0xff] %v8858_v44  ;;  %v8864_v34 = vsel %vm2463_vm4, %v2479_v55, %v2480_v23  ;;  %v2483_v23 = vrot.slane %v8437_v36, 3  ;;  %v8879_v55 = vsel %vm2630_vm3, %v2667_v0, %v2668_v14  ;;  %v11584_v36 = vld [vmem:[#allocation4_spill] sm:$0xff]  ;;  %v2671_v0 = vrot.slane %v8643_v57, 4 }
 0x5ff   : > { %6318 = vmatmul.msk.f32.gmra.mxu1 %vm646_vm0, %v8842_v41  ;;  %6358 = vmatmul.msk.f32.gmra.mxu3 %vm646_vm0, %v8400_v33  ;;  %11576 = vst [vmem:[#allocation116_spill] sm:$0xff] %v8864_v34  ;;  %v8866_v58 = vpop.f32.mrf.mxu2  ;;  %v6390_v33 = vld [vmem:[%s8049_s25 + $0xe0] sm:$0xff] }
 0x600   : > { %11577 = vst [vmem:[#allocation117_spill] sm:$0xff] %v8866_v58  ;;  %3017 = vmatpush.msra.mxu2 %v6390_v33  ;;  %v2486_v33 = vrot.slane %v8485_v40, 3  ;;  %v2674_v40 = vrot.slane %v8675_v24, 4 }
 0x601   : > { %11579 = vst [vmem:[#allocation119_spill] sm:$0xff] %v8879_v55 }
 0x604   : > { %6345 = vmatmul.msk.f32.gmra.mxu2 %vm646_vm0, %v8856_v5  ;;  %v1720_v5 = vpop.f32.mrf.mxu0  ;;  %v8875_v44 = vpop.f32.mrf.mxu3 }
 0x605   : > { %11578 = vst [vmem:[#allocation118_spill] sm:$0xff] %v8875_v44  ;;  %v8882_v58 = vpop.f32.mrf.mxu1  ;;  %v1880_v31 = vmax.f32 %v11581_v37, %v1720_v5  ;;  %v11583_v44 = vld [vmem:[#allocation32_spill] sm:$0xff]  ;;  %v2670_v37 = vrot.slane %v11546_v7, 4 }
 0x606   : > { %11580 = vst [vmem:[#allocation120_spill] sm:$0xff] %v8882_v58  ;;  %v1832_v20 = vmax.f32 %v11584_v36, %v11583_v44  ;;  %v8909_v36 = vld [vmem:[%s7130_s14] ss:$0 sm:$0xff] }
 0x607   : > { %6319 = vmatmul.msk.f32.gmra.mxu1 %vm646_vm0, %v8864_v34  ;;  %6359 = vmatmul.msk.f32.gmra.mxu3 %vm646_vm0, %v8428_v28  ;;  %v2482_v34 = vrot.slane %v8428_v28, 3 }
 0x609   : > { %v8889_v39 = vsel %vm2463_vm4, %v2482_v34, %v2483_v23  ;;  %v8903_v34 = vsel %vm2630_vm3, %v2670_v37, %v2671_v0  ;;  %v2485_v23 = vrot.slane %v8463_v32, 3  ;;  %v2673_v37 = vrot.slane %v11555_v29, 4 }
 0x60a   : > { %11582 = vst [vmem:[#allocation61_spill] sm:$0xff] %v8889_v39 }
 0x60b   : > { %11586 = vst [vmem:[#allocation4_spill] sm:$0xff] %v8903_v34 }
 0x60c   : > { %6346 = vmatmul.msk.f32.gmra.mxu2 %vm646_vm0, %v8879_v55  ;;  %v1928_v55 = vmax.f32 %v1832_v20, %v1880_v31  ;;  %v8899_v5 = vpop.f32.mrf.mxu3  ;;  %v8915_v20 = vsel %vm2463_vm4, %v2485_v23, %v2486_v33  ;;  %v8927_v33 = vsel %vm2630_vm3, %v2673_v37, %v2674_v40  ;;  %v2492_v40 = vrot.slane %v8529_v26, 3 }
 0x60d   : > { %11585 = vst [vmem:[#allocation32_spill] sm:$0xff] %v8899_v5 }
 0x60e   : > { %v8912_v28 = vadd.f32 %v8909_v36, %v1928_v55  ;;  %11588 = vst [vmem:[#allocation122_spill] sm:$0xff] %v8915_v20 }
 0x60f   : > { %v2269_v14 = vpop.f32.mrf.mxu2  ;;  %6320 = vmatmul.msk.f32.gmra.mxu1 %vm646_vm0, %v8889_v39  ;;  %6360 = vmatmul.msk.f32.gmra.mxu3 %vm646_vm0, %v8463_v32  ;;  %v2489_v32 = vrot.slane %v8496_v47, 3  ;;  %11589 = vst [vmem:[#allocation123_spill] sm:$0xff] %v8927_v33  ;;  %v2677_v47 = vrot.slane %v8707_v38, 4 }
 0x610   : > { %11587 = vst [vmem:[#allocation121_spill] sm:$0xff] %v8912_v28 }
 0x614   : > { %v2172_v44 = vpop.f32.mrf.mxu1  ;;  %6347 = vmatmul.msk.f32.gmra.mxu2 %vm646_vm0, %v8903_v34 }
 0x615   : > { %v2270_v0 = vadd.f32 %v2269_v14, %v2172_v44 }
 0x617   : > { %v2272_v31 = vpop.f32.mrf.mxu2  ;;  %6321 = vmatmul.msk.f32.gmra.mxu1 %vm646_vm0, %v8915_v20  ;;  %6361 = vmatmul.msk.f32.gmra.mxu3 %vm646_vm0, %v8912_v28  ;;  %v2488_v20 = vrot.slane %v8480_v17, 3 }
 0x619   : > { %v2490_v5 = vsel %vm2463_vm4, %v2488_v20, %v2489_v32 }
 0x61a   : > { %v2420_v34 = vpop.f32.mrf.mxu3 }
 0x61b   : > { %v8924_v55 = vadd.f32 %v2420_v34, %v2270_v0  ;;  %v2676_v34 = vrot.slane %v11561_v13, 4 }
 0x61c   : > { %v2175_v23 = vpop.f32.mrf.mxu1  ;;  %6348 = vmatmul.msk.f32.gmra.mxu2 %vm646_vm0, %v8927_v33  ;;  %v11599_v33 = vld [vmem:[#allocation51_spill] sm:$0xff] }
 0x61d   : > { %v2273_v14 = vadd.f32 %v2272_v31, %v2175_v23  ;;  %v8942_v17 = vsel %vm2630_vm3, %v2676_v34, %v2677_v47  ;;  %v2495_v23 = vrot.slane %v8550_v59, 3 }
 0x61e   : > { %11590 = vst [vmem:[#allocation124_spill] sm:$0xff] %v8942_v17 }
 0x61f   : > { %v2275_v58 = vpop.f32.mrf.mxu2  ;;  %6322 = vmatmul.msk.f32.gmra.mxu1 %vm646_vm0, %v2490_v5  ;;  %6362 = vmatmul.msk.f32.gmra.mxu3 %vm646_vm0, %v8516_v4  ;;  %v2491_v5 = vrot.slane %v8516_v4, 3  ;;  %v2494_v4 = vrot.slane %v8539_v21, 3 }
 0x621   : > { %v8948_v20 = vsel %vm2463_vm4, %v2491_v5, %v2492_v40  ;;  %v8961_v34 = vsel %vm2463_vm4, %v2494_v4, %v2495_v23  ;;  %v2497_v5 = vrot.slane %v11530_v27, 3  ;;  %v6372_v4 = vld [vmem:[%s8049_s25 + $0xd0] sm:$0xff] }
 0x622   : > { %v2423_v44 = vpop.f32.mrf.mxu3  ;;  %11591 = vst [vmem:[#allocation125_spill] sm:$0xff] %v8961_v34 }
 0x623   : > { %v8939_v0 = vadd.f32 %v2423_v44, %v2273_v14 }
 0x624   : > { %v2178_v32 = vpop.f32.mrf.mxu1  ;;  %6349 = vmatmul.msk.f32.gmra.mxu2 %vm646_vm0, %v8942_v17 }
 0x625   : > { %v2276_v26 = vadd.f32 %v2275_v58, %v2178_v32 }
 0x627   : > { %v2278_v31 = vpop.f32.mrf.mxu2  ;;  %6323 = vmatmul.msk.f32.gmra.mxu1 %vm646_vm0, %v8948_v20  ;;  %6363 = vmatmul.msk.f32.gmra.mxu3 %vm646_vm0, %v8539_v21 }
 0x62a   : > { %v2426_v37 = vpop.f32.mrf.mxu3 }
 0x62b   : > { %v8955_v47 = vadd.f32 %v2426_v37, %v2276_v26  ;;  %v6413_v37 = vld [vmem:[%s8049_s25 + $0x118] sm:$0xff] }
 0x62c   : > { %v2181_v14 = vpop.f32.mrf.mxu1  ;;  %6394 = vmatmul.msk.f32.vlgmr.msra.gmra.mxu2 %vm646_vm0, %v8304_v54  ;;  %v2498_v54 = vrot.slane %v8575_v46, 3  ;;  %v6373_v46 = vld [vmem:[%s8049_s25 + $0xd8] sm:$0xff]  ;;  %3110 = vmatpush.msrb.mxu3 %v6413_v37  ;;  %v6410_v37 = vld [vmem:[%s8049_s25 + $0x100] sm:$0xff] }
 0x62d   : > { %v2279_v59 = vadd.f32 %v2278_v31, %v2181_v14  ;;  %2918 = vmatpush.msrb.mxu1 %v6373_v46  ;;  %v2501_v14 = vrot.slane %v8603_v52, 3  ;;  %v6370_v46 = vld [vmem:[%s8049_s25 + $0xc0] sm:$0xff] }
 0x62e   : > { %v8978_v26 = vsel %vm2463_vm4, %v2497_v5, %v2498_v54  ;;  %v2500_v54 = vrot.slane %v11538_v48, 3  ;;  %v6371_v5 = vld [vmem:[%s8049_s25 + $0xc8] sm:$0xff] }
 0x62f   : > { %6324 = vmatmul.msk.f32.gmra.mxu1 %vm646_vm0, %v8961_v34  ;;  %v8965_v58 = vpop.f32.mrf.mxu2  ;;  %6364 = vmatmul.msk.f32.gmra.mxu3 %vm646_vm0, %v11530_v27  ;;  %11592 = vst [vmem:[#allocation126_spill] sm:$0xff] %v8978_v26  ;;  %v1723_v27 = vpop.f32.mrf.mxu0 }
 0x630   : > { %2919 = vmatpush.msrb.mxu1 %v6372_v4  ;;  %v9003_v17 = vsel %vm2463_vm4, %v2500_v54, %v2501_v14  ;;  %v2503_v14 = vrot.slane %v11546_v7, 3 }
 0x631   : > { %11593 = vst [vmem:[#allocation127_spill] sm:$0xff] %v9003_v17 }
 0x632   : > { %v2429_v44 = vpop.f32.mrf.mxu3  ;;  %2920 = vmatpush.msrb.mxu1 %v6371_v5 }
 0x633   : > { %v8970_v40 = vadd.f32 %v2429_v44, %v2279_v59  ;;  %v6412_v59 = vld [vmem:[%s8049_s25 + $0x110] sm:$0xff] }
 0x634   : > { %v8972_v32 = vpop.f32.mrf.mxu1  ;;  %6395 = vmatmul.msk.f32.gmra.mxu2 %vm646_vm0, %v8337_v19  ;;  %3111 = vmatpush.msrb.mxu3 %v6412_v59  ;;  %v6411_v19 = vld [vmem:[%s8049_s25 + $0x108] sm:$0xff]  ;;  %v2504_v59 = vrot.slane %v8643_v57, 3 }
 0x635   : > { %2921 = vmatpush.msrb.mxu1 %v6370_v46  ;;  %v2507_v46 = vrot.slane %v8675_v24, 3 }
 0x636   : > { %3112 = vmatpush.msrb.mxu3 %v6411_v19  ;;  %v9020_v54 = vsel %vm2463_vm4, %v2503_v14, %v2504_v59  ;;  %v2506_v59 = vrot.slane %v11555_v29, 3  ;;  %v11597_v14 = vld [vmem:[#allocation90_spill] sm:$0xff] }
 0x637   : > { %6325 = vmatmul.msk.f32.gmra.mxu1 %vm646_vm0, %v8978_v26  ;;  %v8982_v31 = vpop.f32.mrf.mxu2  ;;  %6365 = vmatmul.msk.f32.gmra.mxu3 %vm646_vm0, %v11538_v48  ;;  %11594 = vst [vmem:[#allocation128_spill] sm:$0xff] %v9020_v54 }
 0x638   : > { %3113 = vmatpush.msrb.mxu3 %v6410_v37 }
 0x63a   : > { %v8988_v23 = vpop.f32.mrf.mxu3 }
 0x63c   : > { %v8993_v44 = vpop.f32.mrf.mxu1  ;;  %6396 = vmatmul.msk.f32.gmra.mxu2 %vm646_vm0, %v8365_v15  ;;  %v9039_v15 = vsel %vm2463_vm4, %v2506_v59, %v2507_v46  ;;  %v11601_v46 = vld [vmem:[#allocation62_spill] sm:$0xff] }
 0x63d   : > { %11598 = vst [vmem:[#allocation90_spill] sm:$0xff] %v9039_v15  ;;  %v1881_v59 = vmax.f32 %v11601_v46, %v1723_v27 }
 0x63f   : > { %6326 = vmatmul.msk.f32.gmra.mxu1 %vm646_vm0, %v9003_v17  ;;  %v9007_v52 = vpop.f32.mrf.mxu2  ;;  %6366 = vmatmul.msk.f32.gmra.mxu3 %vm646_vm0, %v11546_v7  ;;  %v11600_v7 = vld [vmem:[#allocation23_spill] sm:$0xff] }
 0x640   : > { %v1856_v48 = vmax.f32 %v11600_v7, %v11599_v33  ;;  %v2509_v7 = vrot.slane %v11561_v13, 3  ;;  %v11602_v33 = vld [vmem:[#allocation33_spill] sm:$0xff] }
 0x642   : > { %v9011_v4 = vpop.f32.mrf.mxu3 }
 0x644   : > { %v9014_v19 = vpop.f32.mrf.mxu1  ;;  %6397 = vmatmul.msk.f32.gmra.mxu2 %vm646_vm0, %v8393_v43  ;;  %v1904_v43 = vmax.f32 %v11597_v14, %v8474_v18  ;;  %v2510_v18 = vrot.slane %v8707_v38, 3 }
 0x647   : > { %6327 = vmatmul.msk.f32.gmra.mxu1 %vm646_vm0, %v9020_v54  ;;  %v9024_v5 = vpop.f32.mrf.mxu2  ;;  %6367 = vmatmul.msk.f32.gmra.mxu3 %vm646_vm0, %v11555_v29  ;;  %v1952_v29 = vmax.f32 %v1856_v48, %v1904_v43  ;;  %v9065_v43 = vsel %vm2463_vm4, %v2509_v7, %v2510_v18  ;;  %v2249_v48 = vadd.f32 %v8741_v50, %v8754_v12 }
 0x648   : > { %11605 = vst [vmem:[#allocation23_spill] sm:$0xff] %v9065_v43  ;;  %v2252_v12 = vadd.f32 %v8758_v16, %v8772_v3  ;;  %v2255_v3 = vadd.f32 %v8780_v6, %v8792_v53  ;;  %v6452_v6 = vld [vmem:[%s8049_s25 + $0x150] sm:$0xff]  ;;  %v2258_v53 = vadd.f32 %v8799_v61, %v8814_v45  ;;  %v11607_v61 = vld [vmem:[#allocation22_spill] sm:$0xff] }
 0x649   : > { %v2261_v45 = vadd.f32 %v11607_v61, %v8836_v49  ;;  %v11612_v49 = vld [vmem:[#allocation115_spill] sm:$0xff] }
 0x64a   : > { %v9028_v57 = vpop.f32.mrf.mxu3 }
 0x64b   : > { %11595 = vst [vmem:[#allocation129_spill] sm:$0xff] %v9028_v57  ;;  %v9062_v57 = vadd.f32 %v8909_v36, %v1952_v29 }
 0x64c   : > { %v9031_v37 = vpop.f32.mrf.mxu1  ;;  %6398 = vmatmul.msk.f32.gmra.mxu2 %vm646_vm0, %v8421_v11  ;;  %v6453_v11 = vld [vmem:[%s8049_s25 + $0x158] sm:$0xff] }
 0x64d   : > { %11596 = vst [vmem:[#allocation130_spill] sm:$0xff] %v9031_v37  ;;  %3298 = vmatpush.msrb.mxu2 %v6453_v11  ;;  %v11603_v37 = vld [vmem:[#allocation5_spill] sm:$0xff] }
 0x64e   : > { %11604 = vst [vmem:[#allocation51_spill] sm:$0xff] %v9062_v57 }
 0x64f   : > { %6328 = vmatmul.msk.f32.gmra.mxu1 %vm646_vm0, %v9039_v15  ;;  %v9045_v24 = vpop.f32.mrf.mxu2  ;;  %6368 = vmatmul.msk.f32.gmra.mxu3 %vm646_vm0, %v11561_v13  ;;  %v1833_v15 = vmax.f32 %v11603_v37, %v11602_v33  ;;  %v2447_v37 = vadd.f32 %v8766_v9, %v2249_v48  ;;  %v2448_v33 = vadd.f32 %v8788_v1, %v2252_v12 }
 0x650   : > { %3299 = vmatpush.msrb.mxu2 %v6452_v6  ;;  %v11611_v6 = vld [vmem:[#allocation116_spill] sm:$0xff] }
 0x651   : > { %v1929_v11 = vmax.f32 %v1833_v15, %v1881_v59  ;;  %v2987_v59 = vrot.slane %v8912_v28, 2 }
 0x652   : > { %v9050_v21 = vpop.f32.mrf.mxu3 }
 0x653   : > { %v9078_v29 = vadd.f32 %v8909_v36, %v1929_v11 }
 0x654   : > { %v9054_v14 = vpop.f32.mrf.mxu1  ;;  %6399 = vmatmul.msk.f32.gmra.mxu2 %vm646_vm0, %v8452_v30 }
 0x655   : > { %v2988_v50 = vrot.slane %v9078_v29, 2 }
 0x657   : > { %6329 = vmatmul.msk.f32.gmra.mxu1 %vm646_vm0, %v9065_v43  ;;  %v9069_v27 = vpop.f32.mrf.mxu2  ;;  %6369 = vmatmul.msk.f32.gmra.mxu3 %vm646_vm0, %v9062_v57  ;;  %v9098_v48 = vsel %vm2296_vm2, %v2987_v59, %v2988_v50 }
 0x658   : > { %11606 = vst [vmem:[#allocation62_spill] sm:$0xff] %v9098_v48 }
 0x65a   : > { %v9075_v38 = vpop.f32.mrf.mxu3 }
 0x65c   : > { %v2566_v18 = vpop.f32.mrf.mxu1  ;;  %6400 = vmatmul.msk.f32.gmra.mxu2 %vm646_vm0, %v8504_v8 }
 0x65d   : > { %v2614_v15 = vadd.f32 %v2566_v18, %v2447_v37 }
 0x65f   : > { %v9083_v46 = vpop.f32.mrf.mxu2  ;;  %6374 = vmatmul.msk.f32.vlgmr.msrb.gmra.mxu1 %vm646_vm0, %v8301_v25  ;;  %6414 = vmatmul.msk.f32.vlgmr.msrb.gmra.mxu3 %vm646_vm0, %v8778_v62  ;;  %v2781_v9 = vadd.f32 %v8965_v58, %v2614_v15  ;;  %v2449_v58 = vadd.f32 %v8808_v42, %v2255_v3 }
 0x662   : > { %v2825_v7 = vpop.f32.mrf.mxu3 }
 0x663   : > { %v9095_v11 = vadd.f32 %v2825_v7, %v2781_v9  ;;  %v2450_v9 = vadd.f32 %v8830_v22, %v2258_v53 }
 0x664   : > { %v2569_v25 = vpop.f32.mrf.mxu1  ;;  %6401 = vmatmul.msk.f32.gmra.mxu2 %vm646_vm0, %v9098_v48  ;;  %v11626_v48 = vld [vmem:[#allocation52_spill] sm:$0xff] }
 0x665   : > { %v2615_v62 = vadd.f32 %v2569_v25, %v2448_v33  ;;  %v11608_v25 = vld [vmem:[#allocation113_spill] sm:$0xff] }
 0x667   : > { %v9102_v37 = vpop.f32.mrf.mxu2  ;;  %6375 = vmatmul.msk.f32.gmra.mxu1 %vm646_vm0, %v8334_v63  ;;  %6415 = vmatmul.msk.f32.gmra.mxu3 %vm646_vm0, %v8797_v35  ;;  %v2782_v16 = vadd.f32 %v8982_v31, %v2615_v62  ;;  %v2451_v62 = vadd.f32 %v11608_v25, %v2261_v45  ;;  %v11615_v45 = vld [vmem:[#allocation43_spill] sm:$0xff]  ;;  %v11616_v25 = vld [vmem:[#allocation2_spill] sm:$0xff] }
 0x66a   : > { %v2828_v1 = vpop.f32.mrf.mxu3 }
 0x66b   : > { %v9112_v18 = vadd.f32 %v2828_v1, %v2782_v16  ;;  %v11609_v1 = vld [vmem:[#allocation42_spill] sm:$0xff] }
 0x66c   : > { %v2572_v15 = vpop.f32.mrf.mxu1  ;;  %6402 = vmatmul.msk.f32.gmra.mxu2 %vm646_vm0, %v8558_v51 }
 0x66d   : > { %v2616_v50 = vadd.f32 %v2572_v15, %v2449_v58 }
 0x66f   : > { %v9116_v12 = vpop.f32.mrf.mxu2  ;;  %6376 = vmatmul.msk.f32.gmra.mxu1 %vm646_vm0, %v8362_v56  ;;  %6416 = vmatmul.msk.f32.gmra.mxu3 %vm646_vm0, %v8820_v10  ;;  %v2783_v42 = vadd.f32 %v9007_v52, %v2616_v50  ;;  %v11610_v50 = vld [vmem:[#allocation107_spill] sm:$0xff] }
 0x672   : > { %v2831_v31 = vpop.f32.mrf.mxu3 }
 0x673   : > { %v9127_v51 = vadd.f32 %v2831_v31, %v2783_v42 }
 0x674   : > { %v2575_v59 = vpop.f32.mrf.mxu1  ;;  %6403 = vmatmul.msk.f32.gmra.mxu2 %vm646_vm0, %v8583_v2  ;;  %v3083_v2 = vrot.slane %v8912_v28, 3 }
 0x675   : > { %v2617_v7 = vadd.f32 %v2575_v59, %v2450_v9  ;;  %v11614_v9 = vld [vmem:[#allocation118_spill] sm:$0xff] }
 0x677   : > { %v9131_v33 = vpop.f32.mrf.mxu2  ;;  %6377 = vmatmul.msk.f32.gmra.mxu1 %vm646_vm0, %v8390_v60  ;;  %6417 = vmatmul.msk.f32.gmra.mxu3 %vm646_vm0, %v8842_v41  ;;  %v2784_v22 = vadd.f32 %v9024_v5, %v2617_v7  ;;  %v11613_v5 = vld [vmem:[#allocation112_spill] sm:$0xff] }
 0x678   : > { %v2264_v53 = vadd.f32 %v11613_v5, %v11612_v49 }
 0x67a   : > { %v2834_v52 = vpop.f32.mrf.mxu3  ;;  %v2452_v59 = vadd.f32 %v11614_v9, %v2264_v53  ;;  %v11619_v53 = vld [vmem:[#allocation32_spill] sm:$0xff]  ;;  %v6450_v9 = vld [vmem:[%s8049_s25 + $0x140] sm:$0xff] }
 0x67b   : > { %v9141_v3 = vadd.f32 %v2834_v52, %v2784_v22 }
 0x67c   : > { %v2578_v16 = vpop.f32.mrf.mxu1  ;;  %6404 = vmatmul.msk.f32.gmra.mxu2 %vm646_vm0, %v11609_v1 }
 0x67d   : > { %v2618_v58 = vadd.f32 %v2578_v16, %v2451_v62  ;;  %v11617_v62 = vld [vmem:[#allocation120_spill] sm:$0xff]  ;;  %v11618_v16 = vld [vmem:[#allocation117_spill] sm:$0xff] }
 0x67f   : > { %v9145_v15 = vpop.f32.mrf.mxu2  ;;  %6378 = vmatmul.msk.f32.gmra.mxu1 %vm646_vm0, %v11610_v50  ;;  %6418 = vmatmul.msk.f32.gmra.mxu3 %vm646_vm0, %v11611_v6  ;;  %v2785_v42 = vadd.f32 %v9045_v24, %v2618_v58  ;;  %v6451_v24 = vld [vmem:[%s8049_s25 + $0x148] sm:$0xff]  ;;  %v2267_v58 = vadd.f32 %v11618_v16, %v11617_v62  ;;  %v11622_v62 = vld [vmem:[#allocation122_spill] sm:$0xff]  ;;  %v2892_v16 = vrot.slane %v9078_v29, 1 }
 0x680   : > { %3300 = vmatpush.msrb.mxu2 %v6451_v24  ;;  %v11621_v24 = vld [vmem:[#allocation74_spill] sm:$0xff] }
 0x682   : > { %v2837_v31 = vpop.f32.mrf.mxu3  ;;  %3301 = vmatpush.msrb.mxu2 %v6450_v9 }
 0x683   : > { %v9155_v7 = vadd.f32 %v2837_v31, %v2785_v42  ;;  %v2453_v42 = vadd.f32 %v11619_v53, %v2267_v58  ;;  %v3084_v58 = vrot.slane %v9078_v29, 3 }
 0x684   : > { %v2581_v61 = vpop.f32.mrf.mxu1  ;;  %6405 = vmatmul.msk.f32.gmra.mxu2 %vm646_vm0, %v11615_v45 }
 0x685   : > { %v2619_v22 = vadd.f32 %v2581_v61, %v2452_v59  ;;  %v11620_v61 = vld [vmem:[#allocation16_spill] sm:$0xff] }
 0x687   : > { %v9159_v52 = vpop.f32.mrf.mxu2  ;;  %6379 = vmatmul.msk.f32.gmra.mxu1 %vm646_vm0, %v11616_v25  ;;  %6419 = vmatmul.msk.f32.gmra.mxu3 %vm646_vm0, %v8889_v39  ;;  %v2786_v49 = vadd.f32 %v9069_v27, %v2619_v22 }
 0x68a   : > { %v2840_v5 = vpop.f32.mrf.mxu3 }
 0x68b   : > { %v9170_v31 = vadd.f32 %v2840_v5, %v2786_v49  ;;  %v11623_v49 = vld [vmem:[#allocation12_spill] sm:$0xff]  ;;  %v11624_v5 = vld [vmem:[#allocation91_spill] sm:$0xff] }
 0x68c   : > { %v2584_v59 = vpop.f32.mrf.mxu1  ;;  %6406 = vmatmul.msk.f32.gmra.mxu2 %vm646_vm0, %v11620_v61  ;;  %v1905_v53 = vmax.f32 %v11624_v5, %v11623_v49  ;;  %v2891_v61 = vrot.slane %v8912_v28, 1  ;;  %v9199_v49 = vsel %vm2463_vm4, %v3083_v2, %v3084_v58  ;;  %v11630_v2 = vld [vmem:[#allocation48_spill] sm:$0xff] }
 0x68d   : > { %v2620_v45 = vadd.f32 %v2584_v59, %v2453_v42  ;;  %v11625_v59 = vld [vmem:[#allocation83_spill] sm:$0xff]  ;;  %11629 = vst [vmem:[#allocation5_spill] sm:$0xff] %v9199_v49 }
 0x68e   : > { %v9196_v30 = vsel %vm2048_vm1, %v2891_v61, %v2892_v16 }
 0x68f   : > { %v9175_v1 = vpop.f32.mrf.mxu2  ;;  %6380 = vmatmul.msk.f32.gmra.mxu1 %vm646_vm0, %v11621_v24  ;;  %6420 = vmatmul.msk.f32.gmra.mxu3 %vm646_vm0, %v11622_v62  ;;  %v2787_v27 = vadd.f32 %v9083_v46, %v2620_v45  ;;  %v11627_v46 = vld [vmem:[#allocation24_spill] sm:$0xff]  ;;  %11628 = vst [vmem:[#allocation33_spill] sm:$0xff] %v9196_v30 }
 0x690   : > { %v1857_v45 = vmax.f32 %v11627_v46, %v11626_v48  ;;  %v2990_v46 = vrot.slane %v9062_v57, 2 }
 0x692   : > { %v2843_v22 = vpop.f32.mrf.mxu3 }
 0x693   : > { %v9186_v42 = vadd.f32 %v2843_v22, %v2787_v27  ;;  %v1953_v27 = vmax.f32 %v1857_v45, %v1905_v53 }
 0x694   : > { %v2587_v9 = vpop.f32.mrf.mxu1  ;;  %6407 = vmatmul.msk.f32.gmra.mxu2 %vm646_vm0, %v11625_v59 }
 0x695   : > { %v2621_v8 = vadd.f32 %v2587_v9, %v8924_v55  ;;  %v9209_v55 = vadd.f32 %v8909_v36, %v1953_v27  ;;  %v11631_v9 = vld [vmem:[#allocation31_spill] sm:$0xff] }
 0x697   : > { %v9201_v22 = vpop.f32.mrf.mxu2  ;;  %6381 = vmatmul.msk.f32.gmra.mxu1 %vm646_vm0, %v9196_v30  ;;  %6421 = vmatmul.msk.f32.gmra.mxu3 %vm646_vm0, %v9199_v49  ;;  %v2788_v5 = vadd.f32 %v9102_v37, %v2621_v8  ;;  %v2991_v37 = vrot.slane %v9209_v55, 2 }
 0x69a   : > { %v2846_v48 = vpop.f32.mrf.mxu3 }
 0x69b   : > { %v9211_v61 = vadd.f32 %v2846_v48, %v2788_v5  ;;  %v9228_v5 = vsel %vm2296_vm2, %v2990_v46, %v2991_v37  ;;  %v11634_v37 = vld [vmem:[#allocation98_spill] sm:$0xff] }
 0x69c   : > { %v2590_v16 = vpop.f32.mrf.mxu1  ;;  %6408 = vmatmul.msk.f32.gmra.mxu2 %vm646_vm0, %v11630_v2  ;;  %11632 = vst [vmem:[#allocation22_spill] sm:$0xff] %v9228_v5  ;;  %v11638_v2 = vld [vmem:[#allocation80_spill] sm:$0xff] }
 0x69d   : > { %v2622_v58 = vadd.f32 %v2590_v16, %v8939_v0 }
 0x69f   : > { %v9216_v53 = vpop.f32.mrf.mxu2  ;;  %6382 = vmatmul.msk.f32.gmra.mxu1 %vm646_vm0, %v11631_v9  ;;  %6422 = vmatmul.msk.f32.gmra.mxu3 %vm646_vm0, %v8948_v20  ;;  %v2789_v8 = vadd.f32 %v9116_v12, %v2622_v58  ;;  %v11633_v20 = vld [vmem:[#allocation60_spill] sm:$0xff] }
 0x6a2   : > { %v2849_v45 = vpop.f32.mrf.mxu3 }
 0x6a3   : > { %v9225_v27 = vadd.f32 %v2849_v45, %v2789_v8 }
 0x6a4   : > { %v2593_v0 = vpop.f32.mrf.mxu1  ;;  %6409 = vmatmul.msk.f32.gmra.mxu2 %vm646_vm0, %v9228_v5 }
 0x6a5   : > { %v2623_v48 = vadd.f32 %v2593_v0, %v8955_v47  ;;  %v11635_v47 = vld [vmem:[#allocation78_spill] sm:$0xff] }
 0x6a6   : > { %v11636_v0 = vld [vmem:[#allocation14_spill] sm:$0xff] }
 0x6a7   : > { %v9233_v16 = vpop.f32.mrf.mxu2  ;;  %6383 = vmatmul.msk.f32.gmra.mxu1 %vm646_vm0, %v11633_v20  ;;  %6423 = vmatmul.msk.f32.gmra.mxu3 %vm646_vm0, %v8961_v34  ;;  %v2790_v12 = vadd.f32 %v9131_v33, %v2623_v48  ;;  %v2282_v48 = vadd.f32 %v11636_v0, %v8972_v32 }
 0x6aa   : > { %v2852_v58 = vpop.f32.mrf.mxu3 }
 0x6ab   : > { %v9240_v9 = vadd.f32 %v2852_v58, %v2790_v12  ;;  %v2458_v58 = vadd.f32 %v8988_v23, %v2282_v48  ;;  %v6433_v23 = vld [vmem:[%s8049_s25 + $0x138] sm:$0xff]  ;;  %v6432_v48 = vld [vmem:[%s8049_s25 + $0x130] sm:$0xff] }
 0x6ac   : > { %v2596_v8 = vpop.f32.mrf.mxu1  ;;  %6454 = vmatmul.msk.f32.vlgmr.msrb.gmra.mxu2 %vm646_vm0, %v11634_v37  ;;  %v11637_v37 = vld [vmem:[#allocation100_spill] sm:$0xff]  ;;  %3206 = vmatpush.msra.mxu1 %v6433_v23  ;;  %v6431_v23 = vld [vmem:[%s8049_s25 + $0x128] sm:$0xff] }
 0x6ad   : > { %v2624_v46 = vadd.f32 %v2596_v8, %v8970_v40 }
 0x6ae   : > { %3207 = vmatpush.msra.mxu1 %v6432_v48  ;;  %v11643_v48 = vld [vmem:[#allocation129_spill] sm:$0xff] }
 0x6af   : > { %6384 = vmatmul.msk.f32.gmra.mxu1 %vm646_vm0, %v11635_v47  ;;  %v9247_v45 = vpop.f32.mrf.mxu2  ;;  %6424 = vmatmul.msk.f32.gmra.mxu3 %vm646_vm0, %v8978_v26  ;;  %v2791_v33 = vadd.f32 %v9145_v15, %v2624_v46  ;;  %v6473_v15 = vld [vmem:[%s8049_s25 + $0x178] sm:$0xff] }
 0x6b0   : > { %3396 = vmatpush.msra.mxu3 %v6473_v15  ;;  %v11639_v46 = vld [vmem:[#allocation77_spill] sm:$0xff]  ;;  %v6471_v15 = vld [vmem:[%s8049_s25 + $0x168] sm:$0xff]  ;;  %3208 = vmatpush.msra.mxu1 %v6431_v23  ;;  %v11644_v23 = vld [vmem:[#allocation106_spill] sm:$0xff] }
 0x6b2   : > { %v2855_v12 = vpop.f32.mrf.mxu3 }
 0x6b3   : > { %v9255_v40 = vadd.f32 %v2855_v12, %v2791_v33  ;;  %v2285_v33 = vadd.f32 %v11639_v46, %v8993_v44  ;;  %v6472_v12 = vld [vmem:[%s8049_s25 + $0x170] sm:$0xff]  ;;  %v6430_v44 = vld [vmem:[%s8049_s25 + $0x120] sm:$0xff] }
 0x6b4   : > { %v2599_v8 = vpop.f32.mrf.mxu1  ;;  %6455 = vmatmul.msk.f32.gmra.mxu2 %vm646_vm0, %v11637_v37  ;;  %3397 = vmatpush.msra.mxu3 %v6472_v12  ;;  %v6470_v46 = vld [vmem:[%s8049_s25 + $0x160] sm:$0xff] }
 0x6b5   : > { %v2625_v5 = vadd.f32 %v2599_v8, %v2458_v58  ;;  %v2459_v58 = vadd.f32 %v9011_v4, %v2285_v33  ;;  %3209 = vmatpush.msra.mxu1 %v6430_v44  ;;  %v11647_v44 = vld [vmem:[#allocation130_spill] sm:$0xff] }
 0x6b6   : > { %3398 = vmatpush.msra.mxu3 %v6471_v15 }
 0x6b7   : > { %6385 = vmatmul.msk.f32.gmra.mxu1 %vm646_vm0, %v11638_v2  ;;  %v9261_v59 = vpop.f32.mrf.mxu2  ;;  %6425 = vmatmul.msk.f32.gmra.mxu3 %vm646_vm0, %v9003_v17  ;;  %v2792_v32 = vadd.f32 %v9159_v52, %v2625_v5  ;;  %v11640_v5 = vld [vmem:[#allocation103_spill] sm:$0xff]  ;;  %v11641_v17 = vld [vmem:[#allocation44_spill] sm:$0xff] }
 0x6b8   : > { %3399 = vmatpush.msra.mxu3 %v6470_v46  ;;  %v11648_v46 = vld [vmem:[#allocation46_spill] sm:$0xff] }
 0x6ba   : > { %v2858_v0 = vpop.f32.mrf.mxu3 }
 0x6bb   : > { %v9273_v8 = vadd.f32 %v2858_v0, %v2792_v32  ;;  %v11642_v32 = vld [vmem:[#allocation82_spill] sm:$0xff] }
 0x6bc   : > { %v2602_v52 = vpop.f32.mrf.mxu1  ;;  %6456 = vmatmul.msk.f32.gmra.mxu2 %vm646_vm0, %v11640_v5  ;;  %v2288_v33 = vadd.f32 %v11642_v32, %v9014_v19  ;;  %v11645_v5 = vld [vmem:[#allocation17_spill] sm:$0xff] }
 0x6bd   : > { %v2626_v37 = vadd.f32 %v2602_v52, %v2459_v58 }
 0x6be   : > { %v2460_v12 = vadd.f32 %v11643_v48, %v2288_v33 }
 0x6bf   : > { %6386 = vmatmul.msk.f32.gmra.mxu1 %vm646_vm0, %v11641_v17  ;;  %v9283_v26 = vpop.f32.mrf.mxu2  ;;  %6426 = vmatmul.msk.f32.gmra.mxu3 %vm646_vm0, %v9020_v54  ;;  %v2793_v4 = vadd.f32 %v9175_v1, %v2626_v37  ;;  %v11646_v37 = vld [vmem:[#allocation90_spill] sm:$0xff] }
 0x6c2   : > { %v2861_v0 = vpop.f32.mrf.mxu3 }
 0x6c3   : > { %v9291_v58 = vadd.f32 %v2861_v0, %v2793_v4  ;;  %v2291_v4 = vadd.f32 %v11648_v46, %v11647_v44  ;;  %v2895_v46 = vrot.slane %v9209_v55, 1 }
 0x6c4   : > { %v2605_v52 = vpop.f32.mrf.mxu1  ;;  %6457 = vmatmul.msk.f32.gmra.mxu2 %vm646_vm0, %v11644_v23  ;;  %v11650_v23 = vld [vmem:[#allocation19_spill] sm:$0xff] }
 0x6c5   : > { %v2627_v15 = vadd.f32 %v2605_v52, %v2460_v12  ;;  %v2461_v33 = vadd.f32 %v9050_v21, %v2291_v4  ;;  %v11649_v12 = vld [vmem:[#allocation109_spill] sm:$0xff]  ;;  %v11651_v21 = vld [vmem:[#allocation20_spill] sm:$0xff]  ;;  %v3087_v4 = vrot.slane %v9209_v55, 3 }
 0x6c7   : > { %6387 = vmatmul.msk.f32.gmra.mxu1 %vm646_vm0, %v11645_v5  ;;  %v9297_v1 = vpop.f32.mrf.mxu2  ;;  %6427 = vmatmul.msk.f32.gmra.mxu3 %vm646_vm0, %v11646_v37  ;;  %v2794_v19 = vadd.f32 %v9201_v22, %v2627_v15  ;;  %v6513_v15 = vld [vmem:[%s8049_s25 + $0x1b8] sm:$0xff] }
 0x6c8   : > { %3588 = vmatpush.msra.mxu2 %v6513_v15 }
 0x6ca   : > { %v2864_v32 = vpop.f32.mrf.mxu3 }
 0x6cb   : > { %v9305_v0 = vadd.f32 %v2864_v32, %v2794_v19  ;;  %v2294_v19 = vadd.f32 %v11651_v21, %v9054_v14 }
 0x6cc   : > { %v2608_v48 = vpop.f32.mrf.mxu1  ;;  %6458 = vmatmul.msk.f32.gmra.mxu2 %vm646_vm0, %v11649_v12  ;;  %v11652_v12 = vld [vmem:[#allocation68_spill] sm:$0xff] }
 0x6cd   : > { %v2628_v52 = vadd.f32 %v2608_v48, %v2461_v33  ;;  %v2462_v32 = vadd.f32 %v9075_v38, %v2294_v19  ;;  %v11655_v19 = vld [vmem:[#allocation63_spill] sm:$0xff] }
 0x6cf   : > { %6388 = vmatmul.msk.f32.gmra.mxu1 %vm646_vm0, %v11650_v23  ;;  %v9311_v54 = vpop.f32.mrf.mxu2  ;;  %6428 = vmatmul.msk.f32.gmra.mxu3 %vm646_vm0, %v9065_v43  ;;  %v2795_v22 = vadd.f32 %v9216_v53, %v2628_v52  ;;  %v2894_v53 = vrot.slane %v9062_v57, 1  ;;  %v3086_v52 = vrot.slane %v9062_v57, 3  ;;  %v1726_v43 = vpop.f32.mrf.mxu0 }
 0x6d1   : > { %v9329_v14 = vsel %vm2048_vm1, %v2894_v53, %v2895_v46  ;;  %v9332_v21 = vsel %vm2463_vm4, %v3086_v52, %v3087_v4  ;;  %v11656_v46 = vld [vmem:[#allocation34_spill] sm:$0xff] }
 0x6d2   : > { %v2867_v44 = vpop.f32.mrf.mxu3  ;;  %11653 = vst [vmem:[#allocation113_spill] sm:$0xff] %v9329_v14  ;;  %v11657_v53 = vld [vmem:[#allocation6_spill] sm:$0xff] }
 0x6d3   : > { %v9322_v33 = vadd.f32 %v2867_v44, %v2795_v22  ;;  %11654 = vst [vmem:[#allocation115_spill] sm:$0xff] %v9332_v21  ;;  %v1882_v44 = vmax.f32 %v11655_v19, %v1726_v43  ;;  %v1834_v4 = vmax.f32 %v11657_v53, %v11656_v46  ;;  %v11661_v53 = vld [vmem:[#allocation81_spill] sm:$0xff] }
 0x6d4   : > { %v2611_v48 = vpop.f32.mrf.mxu1  ;;  %6459 = vmatmul.msk.f32.gmra.mxu2 %vm646_vm0, %v11652_v12 }
 0x6d5   : > { %v2629_v15 = vadd.f32 %v2611_v48, %v2462_v32  ;;  %v1930_v37 = vmax.f32 %v1834_v4, %v1882_v44 }
 0x6d7   : > { %6389 = vmatmul.msk.f32.gmra.mxu1 %vm646_vm0, %v9329_v14  ;;  %v9336_v38 = vpop.f32.mrf.mxu2  ;;  %6429 = vmatmul.msk.f32.gmra.mxu3 %vm646_vm0, %v9332_v21  ;;  %v2796_v22 = vadd.f32 %v9233_v16, %v2629_v15  ;;  %v11658_v21 = vld [vmem:[#allocation13_spill] sm:$0xff]  ;;  %v9357_v16 = vadd.f32 %v8909_v36, %v1930_v37 }
 0x6da   : > { %v2870_v32 = vpop.f32.mrf.mxu3 }
 0x6db   : > { %v9342_v48 = vadd.f32 %v2870_v32, %v2796_v22  ;;  %v11660_v32 = vld [vmem:[#allocation70_spill] sm:$0xff] }
 0x6dc   : > { %v2923_v52 = vpop.f32.mrf.mxu1  ;;  %6460 = vmatmul.msk.f32.gmra.mxu2 %vm646_vm0, %v8912_v28 }
 0x6dd   : > { %v2971_v12 = vadd.f32 %v2923_v52, %v9095_v11 }
 0x6df   : > { %v9349_v34 = vpop.f32.mrf.mxu2  ;;  %6434 = vmatmul.msk.f32.vlgmr.msra.gmra.mxu1 %vm646_vm0, %v11658_v21  ;;  %6474 = vmatmul.msk.f32.vlgmr.msra.gmra.mxu3 %vm646_vm0, %v8334_v63  ;;  %v3067_v43 = vadd.f32 %v9247_v45, %v2971_v12  ;;  %v11659_v21 = vld [vmem:[#allocation75_spill] sm:$0xff] }
 0x6e2   : > { %v3115_v15 = vpop.f32.mrf.mxu3 }
 0x6e3   : > { %v9359_v22 = vadd.f32 %v3115_v15, %v3067_v43 }
 0x6e4   : > { %v2926_v19 = vpop.f32.mrf.mxu1  ;;  %6461 = vmatmul.msk.f32.gmra.mxu2 %vm646_vm0, %v9357_v16 }
 0x6e5   : > { %v2972_v11 = vadd.f32 %v2926_v19, %v9112_v18  ;;  %v11662_v19 = vld [vmem:[#allocation84_spill] sm:$0xff] }
 0x6e7   : > { %v9364_v44 = vpop.f32.mrf.mxu2  ;;  %6435 = vmatmul.msk.f32.gmra.mxu1 %vm646_vm0, %v11659_v21  ;;  %6475 = vmatmul.msk.f32.gmra.mxu3 %vm646_vm0, %v8362_v56  ;;  %v3068_v63 = vadd.f32 %v9261_v59, %v2972_v11  ;;  %v6512_v59 = vld [vmem:[%s8049_s25 + $0x1b0] sm:$0xff] }
 0x6e8   : > { %3589 = vmatpush.msra.mxu2 %v6512_v59  ;;  %v11665_v59 = vld [vmem:[#allocation18_spill] sm:$0xff] }
 0x6ea   : > { %v3118_v45 = vpop.f32.mrf.mxu3 }
 0x6eb   : > { %v9371_v37 = vadd.f32 %v3118_v45, %v3068_v63  ;;  %v11663_v63 = vld [vmem:[#allocation45_spill] sm:$0xff] }
 0x6ec   : > { %v2929_v12 = vpop.f32.mrf.mxu1  ;;  %6462 = vmatmul.msk.f32.gmra.mxu2 %vm646_vm0, %v11660_v32 }
 0x6ed   : > { %v2973_v46 = vadd.f32 %v2929_v12, %v9127_v51 }
 0x6ef   : > { %v9376_v18 = vpop.f32.mrf.mxu2  ;;  %6436 = vmatmul.msk.f32.gmra.mxu1 %vm646_vm0, %v11661_v53  ;;  %6476 = vmatmul.msk.f32.gmra.mxu3 %vm646_vm0, %v8390_v60  ;;  %v3069_v4 = vadd.f32 %v9283_v26, %v2973_v46  ;;  %v11664_v46 = vld [vmem:[#allocation85_spill] sm:$0xff] }
 0x6f2   : > { %v3121_v52 = vpop.f32.mrf.mxu3 }
 0x6f3   : > { %v9384_v43 = vadd.f32 %v3121_v52, %v3069_v4 }
 0x6f4   : > { %v2932_v15 = vpop.f32.mrf.mxu1  ;;  %6463 = vmatmul.msk.f32.gmra.mxu2 %vm646_vm0, %v11662_v19 }
 0x6f5   : > { %v2974_v51 = vadd.f32 %v2932_v15, %v9141_v3  ;;  %v1729_v15 = vpop.f32.mrf.mxu0 }
 0x6f7   : > { %v9389_v11 = vpop.f32.mrf.mxu2  ;;  %6437 = vmatmul.msk.f32.gmra.mxu1 %vm646_vm0, %v11663_v63  ;;  %6477 = vmatmul.msk.f32.gmra.mxu3 %vm646_vm0, %v11610_v50  ;;  %v3070_v26 = vadd.f32 %v9297_v1, %v2974_v51  ;;  %v11668_v50 = vld [vmem:[#allocation49_spill] sm:$0xff] }
 0x6fa   : > { %v3124_v45 = vpop.f32.mrf.mxu3 }
 0x6fb   : > { %v9396_v12 = vadd.f32 %v3124_v45, %v3070_v26  ;;  %v11666_v45 = vld [vmem:[#allocation86_spill] sm:$0xff] }
 0x6fc   : > { %v2935_v32 = vpop.f32.mrf.mxu1  ;;  %6464 = vmatmul.msk.f32.gmra.mxu2 %vm646_vm0, %v11664_v46 }
 0x6fd   : > { %v2975_v4 = vadd.f32 %v2935_v32, %v9155_v7  ;;  %v11667_v32 = vld [vmem:[#allocation65_spill] sm:$0xff] }
 0x6fe   : > { %v1883_v46 = vmax.f32 %v11667_v32, %v1729_v15  ;;  %v6510_v15 = vld [vmem:[%s8049_s25 + $0x1a0] sm:$0xff]  ;;  %v11671_v32 = vld [vmem:[#allocation87_spill] sm:$0xff] }
 0x6ff   : > { %v9401_v3 = vpop.f32.mrf.mxu2  ;;  %6438 = vmatmul.msk.f32.gmra.mxu1 %vm646_vm0, %v11665_v59  ;;  %6478 = vmatmul.msk.f32.gmra.mxu3 %vm646_vm0, %v11616_v25  ;;  %v3071_v1 = vadd.f32 %v9311_v54, %v2975_v4  ;;  %v6511_v4 = vld [vmem:[%s8049_s25 + $0x1a8] sm:$0xff] }
 0x700   : > { %3590 = vmatpush.msra.mxu2 %v6511_v4 }
 0x702   : > { %v3127_v52 = vpop.f32.mrf.mxu3  ;;  %3591 = vmatpush.msra.mxu2 %v6510_v15 }
 0x703   : > { %v9408_v51 = vadd.f32 %v3127_v52, %v3071_v1  ;;  %v11669_v1 = vld [vmem:[#allocation35_spill] sm:$0xff] }
 0x704   : > { %v2938_v26 = vpop.f32.mrf.mxu1  ;;  %6465 = vmatmul.msk.f32.gmra.mxu2 %vm646_vm0, %v11666_v45  ;;  %v11670_v52 = vld [vmem:[#allocation7_spill] sm:$0xff] }
 0x705   : > { %v2976_v7 = vadd.f32 %v2938_v26, %v9170_v31  ;;  %v1835_v25 = vmax.f32 %v11670_v52, %v11669_v1  ;;  %v3369_v1 = vrot.slane %v9357_v16, 1 }
 0x707   : > { %v9414_v19 = vpop.f32.mrf.mxu2  ;;  %6439 = vmatmul.msk.f32.gmra.mxu1 %vm646_vm0, %v11668_v50  ;;  %6479 = vmatmul.msk.f32.gmra.mxu3 %vm646_vm0, %v11621_v24  ;;  %v3072_v54 = vadd.f32 %v9336_v38, %v2976_v7  ;;  %v1931_v45 = vmax.f32 %v1835_v25, %v1883_v46  ;;  %v11672_v7 = vld [vmem:[#allocation21_spill] sm:$0xff]  ;;  %v3180_v46 = vrot.slane %v9078_v29, 4 }
 0x709   : > { %v9431_v24 = vadd.f32 %v8909_v36, %v1931_v45  ;;  %v3179_v45 = vrot.slane %v8912_v28, 4 }
 0x70a   : > { %v3130_v60 = vpop.f32.mrf.mxu3 }
 0x70b   : > { %v9424_v31 = vadd.f32 %v3130_v60, %v3072_v54  ;;  %v3370_v54 = vrot.slane %v9431_v24, 1  ;;  %v9450_v15 = vsel %vm2630_vm3, %v3179_v45, %v3180_v46  ;;  %v11677_v46 = vld [vmem:[#allocation53_spill] sm:$0xff] }
 0x70c   : > { %v2941_v26 = vpop.f32.mrf.mxu1  ;;  %6466 = vmatmul.msk.f32.gmra.mxu2 %vm646_vm0, %v11671_v32  ;;  %11673 = vst [vmem:[#allocation112_spill] sm:$0xff] %v9450_v15  ;;  %v11678_v45 = vld [vmem:[#allocation25_spill] sm:$0xff] }
 0x70d   : > { %v2977_v56 = vadd.f32 %v2941_v26, %v9186_v42  ;;  %v11675_v26 = vld [vmem:[#allocation76_spill] sm:$0xff] }
 0x70f   : > { %v9433_v38 = vpop.f32.mrf.mxu2  ;;  %6440 = vmatmul.msk.f32.gmra.mxu1 %vm646_vm0, %v11672_v7  ;;  %6480 = vmatmul.msk.f32.gmra.mxu3 %vm646_vm0, %v9196_v30  ;;  %v3073_v60 = vadd.f32 %v9349_v34, %v2977_v56  ;;  %v9453_v56 = vsel %vm2048_vm1, %v3369_v1, %v3370_v54  ;;  %v1858_v54 = vmax.f32 %v11678_v45, %v11677_v46 }
 0x710   : > { %11674 = vst [vmem:[#allocation118_spill] sm:$0xff] %v9453_v56 }
 0x712   : > { %v3133_v25 = vpop.f32.mrf.mxu3 }
 0x713   : > { %v9442_v42 = vadd.f32 %v3133_v25, %v3073_v60  ;;  %v11676_v60 = vld [vmem:[#allocation92_spill] sm:$0xff] }
 0x714   : > { %v2944_v4 = vpop.f32.mrf.mxu1  ;;  %6467 = vmatmul.msk.f32.gmra.mxu2 %vm646_vm0, %v11561_v13  ;;  %v1906_v25 = vmax.f32 %v11676_v60, %v11675_v26 }
 0x715   : > { %v2978_v52 = vadd.f32 %v2944_v4, %v9211_v61 }
 0x716   : > { %v1954_v32 = vmax.f32 %v1858_v54, %v1906_v25 }
 0x717   : > { %v9455_v34 = vpop.f32.mrf.mxu2  ;;  %6441 = vmatmul.msk.f32.gmra.mxu1 %vm646_vm0, %v9450_v15  ;;  %6481 = vmatmul.msk.f32.gmra.mxu3 %vm646_vm0, %v9453_v56  ;;  %v3074_v29 = vadd.f32 %v9364_v44, %v2978_v52  ;;  %v11679_v56 = vld [vmem:[#allocation89_spill] sm:$0xff] }
 0x718   : > { %v9479_v52 = vadd.f32 %v8909_v36, %v1954_v32 }
 0x71a   : > { %v3136_v61 = vpop.f32.mrf.mxu3  ;;  %11680 = vst [vmem:[#allocation120_spill] sm:$0xff] %v9479_v52 }
 0x71b   : > { %v9464_v4 = vadd.f32 %v3136_v61, %v3074_v29  ;;  %v11682_v61 = vld [vmem:[#allocation114_spill] sm:$0xff] }
 0x71c   : > { %v2947_v1 = vpop.f32.mrf.mxu1  ;;  %6468 = vmatmul.msk.f32.gmra.mxu2 %vm646_vm0, %v9062_v57 }
 0x71d   : > { %v2979_v13 = vadd.f32 %v2947_v1, %v9225_v27 }
 0x71f   : > { %v9471_v28 = vpop.f32.mrf.mxu2  ;;  %6442 = vmatmul.msk.f32.gmra.mxu1 %vm646_vm0, %v11679_v56  ;;  %6482 = vmatmul.msk.f32.gmra.mxu3 %vm646_vm0, %v11633_v20  ;;  %v3075_v44 = vadd.f32 %v9376_v18, %v2979_v13  ;;  %v11681_v56 = vld [vmem:[#allocation110_spill] sm:$0xff] }
 0x722   : > { %v3139_v29 = vpop.f32.mrf.mxu3 }
 0x723   : > { %v9481_v26 = vadd.f32 %v3139_v29, %v3075_v44  ;;  %v6493_v29 = vld [vmem:[%s8049_s25 + $0x198] sm:$0xff] }
 0x724   : > { %v2950_v60 = vpop.f32.mrf.mxu1  ;;  %6469 = vmatmul.msk.f32.gmra.mxu2 %vm646_vm0, %v9479_v52  ;;  %3492 = vmatpush.msrb.mxu1 %v6493_v29 }
 0x725   : > { %v2980_v27 = vadd.f32 %v2950_v60, %v9240_v9  ;;  %v6533_v60 = vld [vmem:[%s8049_s25 + $0x1d8] sm:$0xff] }
 0x726   : > { %3684 = vmatpush.msrb.mxu3 %v6533_v60 }
 0x727   : > { %v9486_v25 = vpop.f32.mrf.mxu2  ;;  %6443 = vmatmul.msk.f32.gmra.mxu1 %vm646_vm0, %v11681_v56  ;;  %6483 = vmatmul.msk.f32.gmra.mxu3 %vm646_vm0, %v11635_v47  ;;  %v3076_v13 = vadd.f32 %v9389_v11, %v2980_v27 }
 0x72a   : > { %v3142_v20 = vpop.f32.mrf.mxu3 }
 0x72b   : > { %v9493_v18 = vadd.f32 %v3142_v20, %v3076_v13  ;;  %v6532_v13 = vld [vmem:[%s8049_s25 + $0x1d0] sm:$0xff] }
 0x72c   : > { %v2953_v32 = vpop.f32.mrf.mxu1  ;;  %6514 = vmatmul.msk.f32.vlgmr.msra.gmra.mxu2 %vm646_vm0, %v8797_v35  ;;  %3685 = vmatpush.msrb.mxu3 %v6532_v13  ;;  %v11685_v13 = vld [vmem:[#allocation3_spill] sm:$0xff] }
 0x72d   : > { %v2981_v9 = vadd.f32 %v2953_v32, %v9255_v40  ;;  %v11683_v40 = vld [vmem:[#allocation119_spill] sm:$0xff] }
 0x72f   : > { %6444 = vmatmul.msk.f32.gmra.mxu1 %vm646_vm0, %v11682_v61  ;;  %v9500_v46 = vpop.f32.mrf.mxu2  ;;  %6484 = vmatmul.msk.f32.gmra.mxu3 %vm646_vm0, %v11638_v2  ;;  %v3077_v11 = vadd.f32 %v9401_v3, %v2981_v9  ;;  %v6491_v9 = vld [vmem:[%s8049_s25 + $0x188] sm:$0xff] }
 0x732   : > { %v3145_v45 = vpop.f32.mrf.mxu3 }
 0x733   : > { %v9505_v54 = vadd.f32 %v3145_v45, %v3077_v11  ;;  %v6531_v11 = vld [vmem:[%s8049_s25 + $0x1c8] sm:$0xff]  ;;  %v6490_v45 = vld [vmem:[%s8049_s25 + $0x180] sm:$0xff] }
 0x734   : > { %v2956_v1 = vpop.f32.mrf.mxu1  ;;  %6515 = vmatmul.msk.f32.gmra.mxu2 %vm646_vm0, %v8820_v10  ;;  %3686 = vmatpush.msrb.mxu3 %v6531_v11  ;;  %v11687_v11 = vld [vmem:[#allocation123_spill] sm:$0xff]  ;;  %v11704_v10 = vld [vmem:[#allocation90_spill] sm:$0xff] }
 0x735   : > { %v2982_v35 = vadd.f32 %v2956_v1, %v9273_v8  ;;  %v6492_v8 = vld [vmem:[%s8049_s25 + $0x190] sm:$0xff]  ;;  %v6530_v1 = vld [vmem:[%s8049_s25 + $0x1c0] sm:$0xff] }
 0x736   : > { %3493 = vmatpush.msrb.mxu1 %v6492_v8  ;;  %3687 = vmatpush.msrb.mxu3 %v6530_v1 }
 0x737   : > { %6445 = vmatmul.msk.f32.gmra.mxu1 %vm646_vm0, %v11683_v40  ;;  %v9512_v44 = vpop.f32.mrf.mxu2  ;;  %6485 = vmatmul.msk.f32.gmra.mxu3 %vm646_vm0, %v11641_v17  ;;  %v3078_v3 = vadd.f32 %v9414_v19, %v2982_v35  ;;  %v11684_v35 = vld [vmem:[#allocation4_spill] sm:$0xff] }
 0x738   : > { %3494 = vmatpush.msrb.mxu1 %v6491_v9 }
 0x73a   : > { %v3148_v27 = vpop.f32.mrf.mxu3  ;;  %3495 = vmatpush.msrb.mxu1 %v6490_v45  ;;  %v11689_v45 = vld [vmem:[#allocation26_spill] sm:$0xff] }
 0x73b   : > { %v9521_v20 = vadd.f32 %v3148_v27, %v3078_v3 }
 0x73c   : > { %v2959_v32 = vpop.f32.mrf.mxu1  ;;  %6516 = vmatmul.msk.f32.gmra.mxu2 %vm646_vm0, %v8842_v41 }
 0x73d   : > { %v2983_v19 = vadd.f32 %v2959_v32, %v9291_v58  ;;  %v11686_v32 = vld [vmem:[#allocation93_spill] sm:$0xff] }
 0x73e   : > { %v1907_v9 = vmax.f32 %v11686_v32, %v11685_v13 }
 0x73f   : > { %6446 = vmatmul.msk.f32.gmra.mxu1 %vm646_vm0, %v11684_v35  ;;  %v9532_v29 = vpop.f32.mrf.mxu2  ;;  %6486 = vmatmul.msk.f32.gmra.mxu3 %vm646_vm0, %v11645_v5  ;;  %v3079_v3 = vadd.f32 %v9433_v38, %v2983_v19  ;;  %v11688_v19 = vld [vmem:[#allocation54_spill] sm:$0xff] }
 0x740   : > { %v1859_v1 = vmax.f32 %v11689_v45, %v11688_v19  ;;  %v3183_v19 = vrot.slane %v9209_v55, 4 }
 0x742   : > { %v3151_v60 = vpop.f32.mrf.mxu3 }
 0x743   : > { %v9537_v27 = vadd.f32 %v3151_v60, %v3079_v3  ;;  %v1955_v3 = vmax.f32 %v1859_v1, %v1907_v9  ;;  %v6573_v9 = vld [vmem:[%s8049_s25 + $0x218] sm:$0xff]  ;;  %v3182_v1 = vrot.slane %v9062_v57, 4  ;;  %v11728_v57 = vld [vmem:[#allocation67_spill] sm:$0xff] }
 0x744   : > { %v2962_v58 = vpop.f32.mrf.mxu1  ;;  %6517 = vmatmul.msk.f32.gmra.mxu2 %vm646_vm0, %v11611_v6  ;;  %v11690_v6 = vld [vmem:[#allocation124_spill] sm:$0xff] }
 0x745   : > { %v2984_v8 = vadd.f32 %v2962_v58, %v9305_v0  ;;  %v9559_v32 = vadd.f32 %v8909_v36, %v1955_v3  ;;  %3874 = vmatpush.msrb.mxu2 %v6573_v9  ;;  %v3372_v3 = vrot.slane %v9479_v52, 1 }
 0x747   : > { %6447 = vmatmul.msk.f32.gmra.mxu1 %vm646_vm0, %v11687_v11  ;;  %v9546_v41 = vpop.f32.mrf.mxu2  ;;  %6487 = vmatmul.msk.f32.gmra.mxu3 %vm646_vm0, %v11650_v23  ;;  %v3080_v38 = vadd.f32 %v9455_v34, %v2984_v8 }
 0x74a   : > { %v3154_v60 = vpop.f32.mrf.mxu3 }
 0x74b   : > { %v9553_v0 = vadd.f32 %v3154_v60, %v3080_v38 }
 0x74c   : > { %v2965_v58 = vpop.f32.mrf.mxu1  ;;  %6518 = vmatmul.msk.f32.gmra.mxu2 %vm646_vm0, %v8889_v39  ;;  %v6571_v39 = vld [vmem:[%s8049_s25 + $0x208] sm:$0xff] }
 0x74d   : > { %v2985_v13 = vadd.f32 %v2965_v58, %v9322_v33  ;;  %v3373_v33 = vrot.slane %v9559_v32, 1 }
 0x74f   : > { %6448 = vmatmul.msk.f32.gmra.mxu1 %vm646_vm0, %v11690_v6  ;;  %v9563_v34 = vpop.f32.mrf.mxu2  ;;  %6488 = vmatmul.msk.f32.gmra.mxu3 %vm646_vm0, %v9329_v14  ;;  %v3081_v8 = vadd.f32 %v9471_v28, %v2985_v13  ;;  %v9579_v28 = vsel %vm2630_vm3, %v3182_v1, %v3183_v19  ;;  %v9582_v58 = vsel %vm2048_vm1, %v3372_v3, %v3373_v33  ;;  %v11693_v33 = vld [vmem:[#allocation99_spill] sm:$0xff]  ;;  %v3561_v1 = vrot.slane %v9357_v16, 3 }
 0x750   : > { %11691 = vst [vmem:[#allocation117_spill] sm:$0xff] %v9579_v28 }
 0x751   : > { %11692 = vst [vmem:[#allocation32_spill] sm:$0xff] %v9582_v58 }
 0x752   : > { %v3157_v38 = vpop.f32.mrf.mxu3 }
 0x753   : > { %v9571_v45 = vadd.f32 %v3157_v38, %v3081_v8 }
 0x754   : > { %v2968_v36 = vpop.f32.mrf.mxu1  ;;  %6519 = vmatmul.msk.f32.gmra.mxu2 %vm646_vm0, %v11622_v62 }
 0x755   : > { %v2986_v60 = vadd.f32 %v2968_v36, %v9342_v48 }
 0x757   : > { %6449 = vmatmul.msk.f32.gmra.mxu1 %vm646_vm0, %v9579_v28  ;;  %v3318_v55 = vpop.f32.mrf.mxu2  ;;  %6489 = vmatmul.msk.f32.gmra.mxu3 %vm646_vm0, %v9582_v58  ;;  %v3082_v13 = vadd.f32 %v9486_v25, %v2986_v60  ;;  %v3562_v25 = vrot.slane %v9431_v24, 3 }
 0x75a   : > { %v3160_v8 = vpop.f32.mrf.mxu3 }
 0x75b   : > { %v9589_v9 = vadd.f32 %v3160_v8, %v3082_v13  ;;  %v9606_v13 = vsel %vm2463_vm4, %v3561_v1, %v3562_v25  ;;  %v11696_v25 = vld [vmem:[#allocation125_spill] sm:$0xff] }
 0x75c   : > { %v3211_v38 = vpop.f32.mrf.mxu1  ;;  %6520 = vmatmul.msk.f32.gmra.mxu2 %vm646_vm0, %v9199_v49  ;;  %11694 = vst [vmem:[#allocation12_spill] sm:$0xff] %v9606_v13  ;;  %v11702_v49 = vld [vmem:[#allocation128_spill] sm:$0xff] }
 0x75d   : > { %v3259_v48 = vadd.f32 %v3211_v38, %v9359_v22 }
 0x75f   : > { %v9594_v19 = vpop.f32.mrf.mxu2  ;;  %6494 = vmatmul.msk.f32.vlgmr.msrb.gmra.mxu1 %vm646_vm0, %v11693_v33  ;;  %6534 = vmatmul.msk.f32.vlgmr.msrb.gmra.mxu3 %vm646_vm0, %v11659_v21  ;;  %v3351_v36 = vadd.f32 %v9500_v46, %v3259_v48  ;;  %v11695_v46 = vld [vmem:[#allocation102_spill] sm:$0xff] }
 0x762   : > { %v3401_v3 = vpop.f32.mrf.mxu3 }
 0x763   : > { %v9603_v60 = vadd.f32 %v3401_v3, %v3351_v36  ;;  %v11697_v3 = vld [vmem:[#allocation105_spill] sm:$0xff] }
 0x764   : > { %v3214_v22 = vpop.f32.mrf.mxu1  ;;  %6521 = vmatmul.msk.f32.gmra.mxu2 %vm646_vm0, %v9606_v13  ;;  %v11698_v13 = vld [vmem:[#allocation126_spill] sm:$0xff] }
 0x765   : > { %v3260_v8 = vadd.f32 %v3214_v22, %v9371_v37 }
 0x767   : > { %v9611_v21 = vpop.f32.mrf.mxu2  ;;  %6495 = vmatmul.msk.f32.gmra.mxu1 %vm646_vm0, %v11695_v46  ;;  %6535 = vmatmul.msk.f32.gmra.mxu3 %vm646_vm0, %v11661_v53  ;;  %v3352_v38 = vadd.f32 %v9512_v44, %v3260_v8  ;;  %v6572_v44 = vld [vmem:[%s8049_s25 + $0x210] sm:$0xff] }
 0x768   : > { %3875 = vmatpush.msrb.mxu2 %v6572_v44 }
 0x76a   : > { %v3404_v48 = vpop.f32.mrf.mxu3  ;;  %3876 = vmatpush.msrb.mxu2 %v6571_v39 }
 0x76b   : > { %v9618_v33 = vadd.f32 %v3404_v48, %v3352_v38 }
 0x76c   : > { %v3217_v36 = vpop.f32.mrf.mxu1  ;;  %6522 = vmatmul.msk.f32.gmra.mxu2 %vm646_vm0, %v11696_v25  ;;  %v11699_v25 = vld [vmem:[#allocation108_spill] sm:$0xff] }
 0x76d   : > { %v3261_v1 = vadd.f32 %v3217_v36, %v9384_v43 }
 0x76f   : > { %v9623_v37 = vpop.f32.mrf.mxu2  ;;  %6496 = vmatmul.msk.f32.gmra.mxu1 %vm646_vm0, %v11697_v3  ;;  %6536 = vmatmul.msk.f32.gmra.mxu3 %vm646_vm0, %v11663_v63  ;;  %v3353_v22 = vadd.f32 %v9532_v29, %v3261_v1 }
 0x772   : > { %v3407_v8 = vpop.f32.mrf.mxu3 }
 0x773   : > { %v9631_v38 = vadd.f32 %v3407_v8, %v3353_v22  ;;  %v11700_v8 = vld [vmem:[#allocation127_spill] sm:$0xff] }
 0x774   : > { %v3220_v48 = vpop.f32.mrf.mxu1  ;;  %6523 = vmatmul.msk.f32.gmra.mxu2 %vm646_vm0, %v11698_v13  ;;  %v11701_v13 = vld [vmem:[#allocation59_spill] sm:$0xff] }
 0x775   : > { %v3262_v43 = vadd.f32 %v3220_v48, %v9396_v12 }
 0x777   : > { %v9636_v36 = vpop.f32.mrf.mxu2  ;;  %6497 = vmatmul.msk.f32.gmra.mxu1 %vm646_vm0, %v11699_v25  ;;  %6537 = vmatmul.msk.f32.gmra.mxu3 %vm646_vm0, %v11665_v59  ;;  %v3354_v29 = vadd.f32 %v9546_v41, %v3262_v43 }
 0x77a   : > { %v3410_v1 = vpop.f32.mrf.mxu3 }
 0x77b   : > { %v9643_v44 = vadd.f32 %v3410_v1, %v3354_v29 }
 0x77c   : > { %v3223_v22 = vpop.f32.mrf.mxu1  ;;  %6524 = vmatmul.msk.f32.gmra.mxu2 %vm646_vm0, %v11700_v8  ;;  %v11703_v8 = vld [vmem:[#allocation40_spill] sm:$0xff] }
 0x77d   : > { %v3263_v12 = vadd.f32 %v3223_v22, %v9408_v51 }
 0x77f   : > { %v9648_v48 = vpop.f32.mrf.mxu2  ;;  %6498 = vmatmul.msk.f32.gmra.mxu1 %vm646_vm0, %v11701_v13  ;;  %6538 = vmatmul.msk.f32.gmra.mxu3 %vm646_vm0, %v11668_v50  ;;  %v3355_v41 = vadd.f32 %v9563_v34, %v3263_v12 }
 0x782   : > { %v3413_v43 = vpop.f32.mrf.mxu3 }
 0x783   : > { %v9655_v29 = vadd.f32 %v3413_v43, %v3355_v41  ;;  %v6570_v41 = vld [vmem:[%s8049_s25 + $0x200] sm:$0xff] }
 0x784   : > { %v3226_v1 = vpop.f32.mrf.mxu1  ;;  %6525 = vmatmul.msk.f32.gmra.mxu2 %vm646_vm0, %v11702_v49  ;;  %v11705_v49 = vld [vmem:[#allocation62_spill] sm:$0xff] }
 0x785   : > { %v3264_v51 = vadd.f32 %v3226_v1, %v9424_v31  ;;  %3877 = vmatpush.msrb.mxu2 %v6570_v41  ;;  %v3465_v41 = vrot.slane %v9357_v16, 2 }
 0x787   : > { %v9660_v22 = vpop.f32.mrf.mxu2  ;;  %6499 = vmatmul.msk.f32.gmra.mxu1 %vm646_vm0, %v11703_v8  ;;  %6539 = vmatmul.msk.f32.gmra.mxu3 %vm646_vm0, %v11672_v7  ;;  %v3356_v62 = vadd.f32 %v3318_v55, %v3264_v51  ;;  %v3466_v55 = vrot.slane %v9431_v24, 2  ;;  %v3658_v51 = vrot.slane %v9431_v24, 4 }
 0x78a   : > { %v3416_v34 = vpop.f32.mrf.mxu3 }
 0x78b   : > { %v9667_v12 = vadd.f32 %v3416_v34, %v3356_v62 }
 0x78c   : > { %v3229_v43 = vpop.f32.mrf.mxu1  ;;  %6526 = vmatmul.msk.f32.gmra.mxu2 %vm646_vm0, %v11704_v10 }
 0x78d   : > { %v3265_v31 = vadd.f32 %v3229_v43, %v9442_v42  ;;  %v11706_v42 = vld [vmem:[#allocation23_spill] sm:$0xff]  ;;  %v3657_v43 = vrot.slane %v9357_v16, 4 }
 0x78f   : > { %v9673_v1 = vpop.f32.mrf.mxu2  ;;  %6500 = vmatmul.msk.f32.gmra.mxu1 %vm646_vm0, %v11705_v49  ;;  %6540 = vmatmul.msk.f32.gmra.mxu3 %vm646_vm0, %v9450_v15  ;;  %v3357_v39 = vadd.f32 %v9594_v19, %v3265_v31  ;;  %v9690_v15 = vsel %vm2296_vm2, %v3465_v41, %v3466_v55  ;;  %v9693_v19 = vsel %vm2630_vm3, %v3657_v43, %v3658_v51  ;;  %v11710_v41 = vld [vmem:[#allocation41_spill] sm:$0xff] }
 0x790   : > { %11707 = vst [vmem:[#allocation91_spill] sm:$0xff] %v9690_v15 }
 0x791   : > { %11708 = vst [vmem:[#allocation52_spill] sm:$0xff] %v9693_v19 }
 0x792   : > { %v3419_v62 = vpop.f32.mrf.mxu3 }
 0x793   : > { %v9682_v34 = vadd.f32 %v3419_v62, %v3357_v39 }
 0x794   : > { %v3232_v10 = vpop.f32.mrf.mxu1  ;;  %6527 = vmatmul.msk.f32.gmra.mxu2 %vm646_vm0, %v11706_v42 }
 0x795   : > { %v3266_v7 = vadd.f32 %v3232_v10, %v9464_v4  ;;  %v11709_v4 = vld [vmem:[#allocation115_spill] sm:$0xff] }
 0x797   : > { %v9695_v31 = vpop.f32.mrf.mxu2  ;;  %6501 = vmatmul.msk.f32.gmra.mxu1 %vm646_vm0, %v9690_v15  ;;  %6541 = vmatmul.msk.f32.gmra.mxu3 %vm646_vm0, %v9693_v19  ;;  %v3358_v24 = vadd.f32 %v9611_v21, %v3266_v7  ;;  %v3565_v7 = vrot.slane %v9559_v32, 3  ;;  %v3564_v21 = vrot.slane %v9479_v52, 3 }
 0x79a   : > { %v3422_v39 = vpop.f32.mrf.mxu3 }
 0x79b   : > { %v9702_v62 = vadd.f32 %v3422_v39, %v3358_v24 }
 0x79c   : > { %v3235_v10 = vpop.f32.mrf.mxu1  ;;  %6528 = vmatmul.msk.f32.gmra.mxu2 %vm646_vm0, %v11709_v4  ;;  %v9719_v4 = vsel %vm2463_vm4, %v3564_v21, %v3565_v7  ;;  %v11713_v21 = vld [vmem:[#allocation101_spill] sm:$0xff] }
 0x79d   : > { %v3267_v55 = vadd.f32 %v3235_v10, %v9481_v26  ;;  %11711 = vst [vmem:[#allocation24_spill] sm:$0xff] %v9719_v4 }
 0x79f   : > { %v9707_v51 = vpop.f32.mrf.mxu2  ;;  %6502 = vmatmul.msk.f32.gmra.mxu1 %vm646_vm0, %v11710_v41  ;;  %6542 = vmatmul.msk.f32.gmra.mxu3 %vm646_vm0, %v11681_v56  ;;  %v3359_v43 = vadd.f32 %v9623_v37, %v3267_v55  ;;  %v11712_v56 = vld [vmem:[#allocation42_spill] sm:$0xff] }
 0x7a2   : > { %v3425_v24 = vpop.f32.mrf.mxu3 }
 0x7a3   : > { %v9716_v39 = vadd.f32 %v3425_v24, %v3359_v43  ;;  %v11714_v24 = vld [vmem:[#allocation43_spill] sm:$0xff] }
 0x7a4   : > { %v3238_v26 = vpop.f32.mrf.mxu1  ;;  %6529 = vmatmul.msk.f32.gmra.mxu2 %vm646_vm0, %v9719_v4 }
 0x7a5   : > { %v3268_v10 = vadd.f32 %v3238_v26, %v9493_v18 }
 0x7a7   : > { %v9724_v41 = vpop.f32.mrf.mxu2  ;;  %6503 = vmatmul.msk.f32.gmra.mxu1 %vm646_vm0, %v11712_v56  ;;  %6543 = vmatmul.msk.f32.gmra.mxu3 %vm646_vm0, %v11682_v61  ;;  %v3360_v37 = vadd.f32 %v9636_v36, %v3268_v10  ;;  %v6591_v61 = vld [vmem:[%s8049_s25 + $0x228] sm:$0xff] }
 0x7aa   : > { %v3428_v55 = vpop.f32.mrf.mxu3 }
 0x7ab   : > { %v9731_v43 = vadd.f32 %v3428_v55, %v3360_v37 }
 0x7ac   : > { %v3241_v7 = vpop.f32.mrf.mxu1  ;;  %6574 = vmatmul.msk.f32.vlgmr.msrb.gmra.mxu2 %vm646_vm0, %v11713_v21  ;;  %v11715_v21 = vld [vmem:[#allocation104_spill] sm:$0xff] }
 0x7ad   : > { %v3269_v18 = vadd.f32 %v3241_v7, %v9505_v54  ;;  %v11716_v7 = vld [vmem:[#allocation16_spill] sm:$0xff] }
 0x7af   : > { %6504 = vmatmul.msk.f32.gmra.mxu1 %vm646_vm0, %v11714_v24  ;;  %v9738_v26 = vpop.f32.mrf.mxu2  ;;  %6544 = vmatmul.msk.f32.gmra.mxu3 %vm646_vm0, %v11683_v40  ;;  %v3361_v36 = vadd.f32 %v9648_v48, %v3269_v18  ;;  %v6553_v18 = vld [vmem:[%s8049_s25 + $0x1f8] sm:$0xff]  ;;  %v11717_v40 = vld [vmem:[#allocation107_spill] sm:$0xff] }
 0x7b0   : > { %3776 = vmatpush.msra.mxu1 %v6553_v18  ;;  %v6590_v18 = vld [vmem:[%s8049_s25 + $0x220] sm:$0xff] }
 0x7b2   : > { %v3431_v10 = vpop.f32.mrf.mxu3 }
 0x7b3   : > { %v9743_v37 = vadd.f32 %v3431_v10, %v3361_v36  ;;  %v6593_v36 = vld [vmem:[%s8049_s25 + $0x238] sm:$0xff] }
 0x7b4   : > { %v3244_v55 = vpop.f32.mrf.mxu1  ;;  %6575 = vmatmul.msk.f32.gmra.mxu2 %vm646_vm0, %v11715_v21  ;;  %3970 = vmatpush.msra.mxu3 %v6593_v36  ;;  %v11718_v36 = vld [vmem:[#allocation83_spill] sm:$0xff] }
 0x7b5   : > { %v3270_v54 = vadd.f32 %v3244_v55, %v9521_v20  ;;  %v6552_v20 = vld [vmem:[%s8049_s25 + $0x1f0] sm:$0xff] }
 0x7b6   : > { %v6592_v55 = vld [vmem:[%s8049_s25 + $0x230] sm:$0xff]  ;;  %3777 = vmatpush.msra.mxu1 %v6552_v20 }
 0x7b7   : > { %6505 = vmatmul.msk.f32.gmra.mxu1 %vm646_vm0, %v11716_v7  ;;  %v9750_v4 = vpop.f32.mrf.mxu2  ;;  %6545 = vmatmul.msk.f32.gmra.mxu3 %vm646_vm0, %v11684_v35  ;;  %v3362_v48 = vadd.f32 %v9660_v22, %v3270_v54  ;;  %v6551_v35 = vld [vmem:[%s8049_s25 + $0x1e8] sm:$0xff]  ;;  %v6550_v54 = vld [vmem:[%s8049_s25 + $0x1e0] sm:$0xff] }
 0x7b8   : > { %3971 = vmatpush.msra.mxu3 %v6592_v55  ;;  %3778 = vmatpush.msra.mxu1 %v6551_v35  ;;  %v11719_v35 = vld [vmem:[#allocation2_spill] sm:$0xff]  ;;  %v11720_v55 = vld [vmem:[#allocation48_spill] sm:$0xff] }
 0x7ba   : > { %v3434_v10 = vpop.f32.mrf.mxu3  ;;  %3972 = vmatpush.msra.mxu3 %v6591_v61  ;;  %3779 = vmatpush.msra.mxu1 %v6550_v54 }
 0x7bb   : > { %v9759_v21 = vadd.f32 %v3434_v10, %v3362_v48 }
 0x7bc   : > { %v3247_v42 = vpop.f32.mrf.mxu1  ;;  %6576 = vmatmul.msk.f32.gmra.mxu2 %vm646_vm0, %v11717_v40  ;;  %3973 = vmatpush.msra.mxu3 %v6590_v18 }
 0x7bd   : > { %v3271_v22 = vadd.f32 %v3247_v42, %v9537_v27  ;;  %v1732_v42 = vpop.f32.mrf.mxu0 }
 0x7bf   : > { %6506 = vmatmul.msk.f32.gmra.mxu1 %vm646_vm0, %v11718_v36  ;;  %v9770_v19 = vpop.f32.mrf.mxu2  ;;  %6546 = vmatmul.msk.f32.gmra.mxu3 %vm646_vm0, %v11687_v11  ;;  %v3363_v48 = vadd.f32 %v9673_v1, %v3271_v22 }
 0x7c2   : > { %v3437_v10 = vpop.f32.mrf.mxu3 }
 0x7c3   : > { %v9775_v20 = vadd.f32 %v3437_v10, %v3363_v48  ;;  %v11722_v48 = vld [vmem:[#allocation74_spill] sm:$0xff] }
 0x7c4   : > { %v3250_v27 = vpop.f32.mrf.mxu1  ;;  %6577 = vmatmul.msk.f32.gmra.mxu2 %vm646_vm0, %v11719_v35  ;;  %v11723_v10 = vld [vmem:[#allocation22_spill] sm:$0xff] }
 0x7c5   : > { %v3272_v61 = vadd.f32 %v3250_v27, %v9553_v0 }
 0x7c7   : > { %6507 = vmatmul.msk.f32.gmra.mxu1 %vm646_vm0, %v11720_v55  ;;  %v9782_v40 = vpop.f32.mrf.mxu2  ;;  %6547 = vmatmul.msk.f32.gmra.mxu3 %vm646_vm0, %v11690_v6  ;;  %v3364_v1 = vadd.f32 %v9695_v31, %v3272_v61  ;;  %v6633_v31 = vld [vmem:[%s8049_s25 + $0x278] sm:$0xff]  ;;  %v1735_v61 = vpop.f32.mrf.mxu0 }
 0x7c8   : > { %4162 = vmatpush.msra.mxu2 %v6633_v31  ;;  %v11724_v6 = vld [vmem:[#allocation69_spill] sm:$0xff] }
 0x7c9   : > { %v11727_v31 = vld [vmem:[#allocation9_spill] sm:$0xff] }
 0x7ca   : > { %v3440_v22 = vpop.f32.mrf.mxu3 }
 0x7cb   : > { %v9787_v54 = vadd.f32 %v3440_v22, %v3364_v1  ;;  %v3469_v22 = vrot.slane %v9559_v32, 2 }
 0x7cc   : > { %v3253_v18 = vpop.f32.mrf.mxu1  ;;  %6578 = vmatmul.msk.f32.gmra.mxu2 %vm646_vm0, %v11722_v48  ;;  %v3661_v48 = vrot.slane %v9559_v32, 4 }
 0x7cd   : > { %11721 = vst [vmem:[#allocation31_spill] sm:$0xff] %v9787_v54  ;;  %v3273_v0 = vadd.f32 %v3253_v18, %v9571_v45  ;;  %v1885_v45 = vmax.f32 %v11724_v6, %v1735_v61  ;;  %v1884_v54 = vmax.f32 %v11728_v57, %v1732_v42  ;;  %v11730_v61 = vld [vmem:[#allocation36_spill] sm:$0xff] }
 0x7cf   : > { %6508 = vmatmul.msk.f32.gmra.mxu1 %vm646_vm0, %v11723_v10  ;;  %v9794_v27 = vpop.f32.mrf.mxu2  ;;  %6548 = vmatmul.msk.f32.gmra.mxu3 %vm646_vm0, %v9579_v28  ;;  %v3365_v35 = vadd.f32 %v9707_v51, %v3273_v0  ;;  %v3468_v28 = vrot.slane %v9479_v52, 2  ;;  %v3660_v51 = vrot.slane %v9479_v52, 4  ;;  %v11726_v0 = vld [vmem:[#allocation37_spill] sm:$0xff] }
 0x7d0   : > { %v1837_v10 = vmax.f32 %v11727_v31, %v11726_v0 }
 0x7d1   : > { %v9814_v6 = vsel %vm2296_vm2, %v3468_v28, %v3469_v22  ;;  %v11732_v22 = vld [vmem:[#allocation118_spill] sm:$0xff] }
 0x7d2   : > { %v3443_v1 = vpop.f32.mrf.mxu3  ;;  %11729 = vst [vmem:[#allocation98_spill] sm:$0xff] %v9814_v6 }
 0x7d3   : > { %v9803_v18 = vadd.f32 %v3443_v1, %v3365_v35  ;;  %v9817_v35 = vsel %vm2630_vm3, %v3660_v51, %v3661_v48  ;;  %v11731_v1 = vld [vmem:[#allocation8_spill] sm:$0xff] }
 0x7d4   : > { %v3256_v11 = vpop.f32.mrf.mxu1  ;;  %6579 = vmatmul.msk.f32.gmra.mxu2 %vm646_vm0, %v9196_v30  ;;  %v1836_v30 = vmax.f32 %v11731_v1, %v11730_v61 }
 0x7d5   : > { %11725 = vst [vmem:[#allocation60_spill] sm:$0xff] %v9803_v18  ;;  %v3274_v32 = vadd.f32 %v3256_v11, %v9589_v9  ;;  %v1933_v18 = vmax.f32 %v1837_v10, %v1885_v45  ;;  %v9829_v9 = vld [vmem:[%s7130_s14] ss:$0 sm:$0xff] }
 0x7d6   : > { %v1932_v11 = vmax.f32 %v1836_v30, %v1884_v54  ;;  %v11733_v30 = vld [vmem:[#allocation100_spill] sm:$0xff] }
 0x7d7   : > { %6509 = vmatmul.msk.f32.gmra.mxu1 %vm646_vm0, %v9814_v6  ;;  %v9823_v52 = vpop.f32.mrf.mxu2  ;;  %6549 = vmatmul.msk.f32.gmra.mxu3 %vm646_vm0, %v9817_v35  ;;  %v3366_v57 = vadd.f32 %v9724_v41, %v3274_v32  ;;  %v9832_v42 = vadd.f32 %v9829_v9, %v1933_v18 }
 0x7d8   : > { %v9839_v45 = vadd.f32 %v9829_v9, %v1932_v11 }
 0x7d9   : > { %v3848_v54 = vrot.slane %v9832_v42, 1 }
 0x7da   : > { %v3446_v28 = vpop.f32.mrf.mxu3  ;;  %v3847_v18 = vrot.slane %v9839_v45, 1 }
 0x7db   : > { %v9834_v48 = vadd.f32 %v3446_v28, %v3366_v57 }
 0x7dc   : > { %v3497_v10 = vpop.f32.mrf.mxu1  ;;  %6580 = vmatmul.msk.f32.gmra.mxu2 %vm646_vm0, %v11732_v22  ;;  %v9854_v61 = vsel %vm2048_vm1, %v3847_v18, %v3848_v54 }
 0x7dd   : > { %v3545_v51 = vadd.f32 %v3497_v10, %v9603_v60  ;;  %11734 = vst [vmem:[#allocation78_spill] sm:$0xff] %v9854_v61 }
 0x7df   : > { %v9842_v0 = vpop.f32.mrf.mxu2  ;;  %6554 = vmatmul.msk.f32.vlgmr.msra.gmra.mxu1 %vm646_vm0, %v11733_v30  ;;  %6594 = vmatmul.msk.f32.vlgmr.msra.gmra.mxu3 %vm646_vm0, %v11695_v46  ;;  %v3641_v41 = vadd.f32 %v9738_v26, %v3545_v51  ;;  %v11735_v26 = vld [vmem:[#allocation103_spill] sm:$0xff]  ;;  %v11736_v30 = vld [vmem:[#allocation106_spill] sm:$0xff] }
 0x7e2   : > { %v3689_v31 = vpop.f32.mrf.mxu3 }
 0x7e3   : > { %v9851_v32 = vadd.f32 %v3689_v31, %v3641_v41 }
 0x7e4   : > { %v3500_v60 = vpop.f32.mrf.mxu1  ;;  %6581 = vmatmul.msk.f32.gmra.mxu2 %vm646_vm0, %v9854_v61  ;;  %v11745_v61 = vld [vmem:[#allocation94_spill] sm:$0xff] }
 0x7e5   : > { %v3546_v1 = vadd.f32 %v3500_v60, %v9618_v33  ;;  %v11737_v60 = vld [vmem:[#allocation109_spill] sm:$0xff] }
 0x7e7   : > { %v9859_v46 = vpop.f32.mrf.mxu2  ;;  %6555 = vmatmul.msk.f32.gmra.mxu1 %vm646_vm0, %v11735_v26  ;;  %6595 = vmatmul.msk.f32.gmra.mxu3 %vm646_vm0, %v11697_v3  ;;  %v3642_v57 = vadd.f32 %v9750_v4, %v3546_v1  ;;  %v6632_v4 = vld [vmem:[%s8049_s25 + $0x270] sm:$0xff] }
 0x7e8   : > { %4163 = vmatpush.msra.mxu2 %v6632_v4 }
 0x7ea   : > { %v3692_v11 = vpop.f32.mrf.mxu3 }
 0x7eb   : > { %v9866_v28 = vadd.f32 %v3692_v11, %v3642_v57 }
 0x7ec   : > { %v3503_v10 = vpop.f32.mrf.mxu1  ;;  %6582 = vmatmul.msk.f32.gmra.mxu2 %vm646_vm0, %v11635_v47 }
 0x7ed   : > { %v3547_v51 = vadd.f32 %v3503_v10, %v9631_v38 }
 0x7ef   : > { %v9871_v33 = vpop.f32.mrf.mxu2  ;;  %6556 = vmatmul.msk.f32.gmra.mxu1 %vm646_vm0, %v11736_v30  ;;  %6596 = vmatmul.msk.f32.gmra.mxu3 %vm646_vm0, %v11699_v25  ;;  %v3643_v41 = vadd.f32 %v9770_v19, %v3547_v51  ;;  %v11738_v51 = vld [vmem:[#allocation68_spill] sm:$0xff] }
 0x7f2   : > { %v3695_v54 = vpop.f32.mrf.mxu3 }
 0x7f3   : > { %v9879_v18 = vadd.f32 %v3695_v54, %v3643_v41 }
 0x7f4   : > { %v3506_v31 = vpop.f32.mrf.mxu1  ;;  %6583 = vmatmul.msk.f32.gmra.mxu2 %vm646_vm0, %v11638_v2  ;;  %v11744_v2 = vld [vmem:[#allocation72_spill] sm:$0xff] }
 0x7f5   : > { %v3548_v47 = vadd.f32 %v3506_v31, %v9643_v44 }
 0x7f7   : > { %v9884_v38 = vpop.f32.mrf.mxu2  ;;  %6557 = vmatmul.msk.f32.gmra.mxu1 %vm646_vm0, %v11737_v60  ;;  %6597 = vmatmul.msk.f32.gmra.mxu3 %vm646_vm0, %v11701_v13  ;;  %v3644_v19 = vadd.f32 %v9782_v40, %v3548_v47  ;;  %v11739_v47 = vld [vmem:[#allocation121_spill] sm:$0xff] }
 0x7fa   : > { %v3698_v1 = vpop.f32.mrf.mxu3 }
 0x7fb   : > { %v9891_v57 = vadd.f32 %v3698_v1, %v3644_v19 }
 0x7fc   : > { %v3509_v11 = vpop.f32.mrf.mxu1  ;;  %6584 = vmatmul.msk.f32.gmra.mxu2 %vm646_vm0, %v11641_v17 }
 0x7fd   : > { %v3549_v44 = vadd.f32 %v3509_v11, %v9655_v29 }
 0x7ff   : > { %v9896_v10 = vpop.f32.mrf.mxu2  ;;  %6558 = vmatmul.msk.f32.gmra.mxu1 %vm646_vm0, %v11738_v51  ;;  %6598 = vmatmul.msk.f32.gmra.mxu3 %vm646_vm0, %v11703_v8  ;;  %v3645_v40 = vadd.f32 %v9794_v27, %v3549_v44  ;;  %v6631_v27 = vld [vmem:[%s8049_s25 + $0x268] sm:$0xff]  ;;  %v6630_v44 = vld [vmem:[%s8049_s25 + $0x260] sm:$0xff] }
 0x800   : > { %4164 = vmatpush.msra.mxu2 %v6631_v27  ;;  %v11741_v27 = vld [vmem:[#allocation95_spill] sm:$0xff] }
 0x802   : > { %v3701_v41 = vpop.f32.mrf.mxu3  ;;  %4165 = vmatpush.msra.mxu2 %v6630_v44  ;;  %v3943_v44 = vrot.slane %v9839_v45, 2 }
 0x803   : > { %v9903_v4 = vadd.f32 %v3701_v41, %v3645_v40 }
 0x804   : > { %v3512_v54 = vpop.f32.mrf.mxu1  ;;  %6585 = vmatmul.msk.f32.gmra.mxu2 %vm646_vm0, %v11645_v5  ;;  %v11743_v5 = vld [vmem:[#allocation28_spill] sm:$0xff] }
 0x805   : > { %v3550_v29 = vadd.f32 %v3512_v54, %v9667_v12 }
 0x807   : > { %v9908_v31 = vpop.f32.mrf.mxu2  ;;  %6559 = vmatmul.msk.f32.gmra.mxu1 %vm646_vm0, %v11739_v47  ;;  %6599 = vmatmul.msk.f32.gmra.mxu3 %vm646_vm0, %v11705_v49  ;;  %v3646_v19 = vadd.f32 %v9823_v52, %v3550_v29  ;;  %v3944_v29 = vrot.slane %v9832_v42, 2 }
 0x809   : > { %v9943_v22 = vsel %vm2296_vm2, %v3943_v44, %v3944_v29 }
 0x80a   : > { %v3704_v1 = vpop.f32.mrf.mxu3 }
 0x80b   : > { %v9916_v11 = vadd.f32 %v3704_v1, %v3646_v19  ;;  %v11740_v19 = vld [vmem:[#allocation15_spill] sm:$0xff] }
 0x80c   : > { %v3515_v40 = vpop.f32.mrf.mxu1  ;;  %6586 = vmatmul.msk.f32.gmra.mxu2 %vm646_vm0, %v11650_v23  ;;  %v1909_v1 = vmax.f32 %v11741_v27, %v11740_v19  ;;  %v11746_v19 = vld [vmem:[#allocation55_spill] sm:$0xff] }
 0x80d   : > { %v3551_v12 = vadd.f32 %v3515_v40, %v9682_v34  ;;  %v11742_v40 = vld [vmem:[#allocation56_spill] sm:$0xff] }
 0x80e   : > { %v1861_v17 = vmax.f32 %v11743_v5, %v11742_v40  ;;  %v11748_v40 = vld [vmem:[#allocation84_spill] sm:$0xff] }
 0x80f   : > { %v9922_v41 = vpop.f32.mrf.mxu2  ;;  %6560 = vmatmul.msk.f32.gmra.mxu1 %vm646_vm0, %v9357_v16  ;;  %6600 = vmatmul.msk.f32.gmra.mxu3 %vm646_vm0, %v9690_v15  ;;  %v3647_v52 = vadd.f32 %v9842_v0, %v3551_v12  ;;  %v1908_v0 = vmax.f32 %v11745_v61, %v11744_v2 }
 0x810   : > { %v1957_v27 = vmax.f32 %v1861_v17, %v1909_v1 }
 0x812   : > { %v3707_v54 = vpop.f32.mrf.mxu3 }
 0x813   : > { %v9932_v23 = vadd.f32 %v3707_v54, %v3647_v52  ;;  %v11747_v52 = vld [vmem:[#allocation27_spill] sm:$0xff] }
 0x814   : > { %v3518_v34 = vpop.f32.mrf.mxu1  ;;  %6587 = vmatmul.msk.f32.gmra.mxu2 %vm646_vm0, %v9329_v14  ;;  %v1860_v54 = vmax.f32 %v11747_v52, %v11746_v19 }
 0x815   : > { %v3552_v12 = vadd.f32 %v3518_v34, %v9702_v62  ;;  %v9955_v62 = vadd.f32 %v9829_v9, %v1957_v27 }
 0x816   : > { %v1956_v2 = vmax.f32 %v1860_v54, %v1908_v0 }
 0x817   : > { %v9947_v15 = vpop.f32.mrf.mxu2  ;;  %6561 = vmatmul.msk.f32.gmra.mxu1 %vm646_vm0, %v9839_v45  ;;  %6601 = vmatmul.msk.f32.gmra.mxu3 %vm646_vm0, %v9943_v22  ;;  %v3648_v5 = vadd.f32 %v9859_v46, %v3552_v12  ;;  %v3851_v0 = vrot.slane %v9955_v62, 1 }
 0x818   : > { %v9962_v17 = vadd.f32 %v9829_v9, %v1956_v2 }
 0x81a   : > { %v3710_v61 = vpop.f32.mrf.mxu3  ;;  %v3850_v12 = vrot.slane %v9962_v17, 1 }
 0x81b   : > { %v9957_v29 = vadd.f32 %v3710_v61, %v3648_v5 }
 0x81c   : > { %v3521_v34 = vpop.f32.mrf.mxu1  ;;  %6588 = vmatmul.msk.f32.gmra.mxu2 %vm646_vm0, %v9582_v58  ;;  %v9977_v54 = vsel %vm2048_vm1, %v3850_v12, %v3851_v0 }
 0x81d   : > { %v3553_v1 = vadd.f32 %v3521_v34, %v9716_v39  ;;  %11749 = vst [vmem:[#allocation14_spill] sm:$0xff] %v9977_v54 }
 0x81f   : > { %v9965_v44 = vpop.f32.mrf.mxu2  ;;  %6562 = vmatmul.msk.f32.gmra.mxu1 %vm646_vm0, %v11748_v40  ;;  %6602 = vmatmul.msk.f32.gmra.mxu3 %vm646_vm0, %v11712_v56  ;;  %v3649_v46 = vadd.f32 %v9871_v33, %v3553_v1  ;;  %v11750_v56 = vld [vmem:[#allocation85_spill] sm:$0xff]  ;;  %v11751_v1 = vld [vmem:[#allocation86_spill] sm:$0xff] }
 0x822   : > { %v3713_v19 = vpop.f32.mrf.mxu3 }
 0x823   : > { %v9974_v52 = vadd.f32 %v3713_v19, %v3649_v46 }
 0x824   : > { %v3524_v39 = vpop.f32.mrf.mxu1  ;;  %6589 = vmatmul.msk.f32.gmra.mxu2 %vm646_vm0, %v9977_v54  ;;  %v11756_v54 = vld [vmem:[#allocation22_spill] sm:$0xff] }
 0x825   : > { %v3554_v27 = vadd.f32 %v3524_v39, %v9731_v43  ;;  %v6613_v39 = vld [vmem:[%s8049_s25 + $0x258] sm:$0xff] }
 0x826   : > { %4066 = vmatpush.msrb.mxu1 %v6613_v39  ;;  %v11753_v39 = vld [vmem:[#allocation88_spill] sm:$0xff] }
 0x827   : > { %v9982_v5 = vpop.f32.mrf.mxu2  ;;  %6563 = vmatmul.msk.f32.gmra.mxu1 %vm646_vm0, %v11750_v56  ;;  %6603 = vmatmul.msk.f32.gmra.mxu3 %vm646_vm0, %v11714_v24  ;;  %v3650_v33 = vadd.f32 %v9884_v38, %v3554_v27  ;;  %v6653_v27 = vld [vmem:[%s8049_s25 + $0x298] sm:$0xff] }
 0x828   : > { %4254 = vmatpush.msrb.mxu3 %v6653_v27 }
 0x82a   : > { %v3716_v2 = vpop.f32.mrf.mxu3 }
 0x82b   : > { %v9989_v61 = vadd.f32 %v3716_v2, %v3650_v33  ;;  %v6652_v2 = vld [vmem:[%s8049_s25 + $0x290] sm:$0xff] }
 0x82c   : > { %v3527_v34 = vpop.f32.mrf.mxu1  ;;  %6634 = vmatmul.msk.f32.vlgmr.msra.gmra.mxu2 %vm646_vm0, %v11661_v53  ;;  %4255 = vmatpush.msrb.mxu3 %v6652_v2  ;;  %v11754_v2 = vld [vmem:[#allocation31_spill] sm:$0xff] }
 0x82d   : > { %v3555_v43 = vadd.f32 %v3527_v34, %v9743_v37  ;;  %v11752_v37 = vld [vmem:[#allocation87_spill] sm:$0xff] }
 0x82f   : > { %6564 = vmatmul.msk.f32.gmra.mxu1 %vm646_vm0, %v11751_v1  ;;  %v9996_v40 = vpop.f32.mrf.mxu2  ;;  %6604 = vmatmul.msk.f32.gmra.mxu3 %vm646_vm0, %v11716_v7  ;;  %v3651_v38 = vadd.f32 %v9896_v10, %v3555_v43 }
 0x832   : > { %v3719_v46 = vpop.f32.mrf.mxu3 }
 0x833   : > { %v10001_v0 = vadd.f32 %v3719_v46, %v3651_v38  ;;  %v6611_v38 = vld [vmem:[%s8049_s25 + $0x248] sm:$0xff] }
 0x834   : > { %v3530_v12 = vpop.f32.mrf.mxu1  ;;  %6635 = vmatmul.msk.f32.gmra.mxu2 %vm646_vm0, %v11663_v63  ;;  %v6651_v46 = vld [vmem:[%s8049_s25 + $0x288] sm:$0xff]  ;;  %v11774_v63 = vld [vmem:[#allocation124_spill] sm:$0xff] }
 0x835   : > { %v3556_v53 = vadd.f32 %v3530_v12, %v9759_v21  ;;  %v6612_v21 = vld [vmem:[%s8049_s25 + $0x250] sm:$0xff]  ;;  %4256 = vmatpush.msrb.mxu3 %v6651_v46  ;;  %v6610_v12 = vld [vmem:[%s8049_s25 + $0x240] sm:$0xff] }
 0x836   : > { %4067 = vmatpush.msrb.mxu1 %v6612_v21 }
 0x837   : > { %6565 = vmatmul.msk.f32.gmra.mxu1 %vm646_vm0, %v11752_v37  ;;  %v10008_v19 = vpop.f32.mrf.mxu2  ;;  %6605 = vmatmul.msk.f32.gmra.mxu3 %vm646_vm0, %v11718_v36  ;;  %v3652_v10 = vadd.f32 %v9908_v31, %v3556_v53  ;;  %v6650_v53 = vld [vmem:[%s8049_s25 + $0x280] sm:$0xff] }
 0x838   : > { %4068 = vmatpush.msrb.mxu1 %v6611_v38  ;;  %4257 = vmatpush.msrb.mxu3 %v6650_v53  ;;  %v11755_v38 = vld [vmem:[#allocation51_spill] sm:$0xff] }
 0x83a   : > { %v3722_v33 = vpop.f32.mrf.mxu3  ;;  %4069 = vmatpush.msrb.mxu1 %v6610_v12 }
 0x83b   : > { %v10017_v34 = vadd.f32 %v3722_v33, %v3652_v10 }
 0x83c   : > { %v3533_v43 = vpop.f32.mrf.mxu1  ;;  %6636 = vmatmul.msk.f32.gmra.mxu2 %vm646_vm0, %v11665_v59 }
 0x83d   : > { %v3557_v31 = vadd.f32 %v3533_v43, %v9775_v20 }
 0x83f   : > { %6566 = vmatmul.msk.f32.gmra.mxu1 %vm646_vm0, %v11753_v39  ;;  %v10028_v27 = vpop.f32.mrf.mxu2  ;;  %6606 = vmatmul.msk.f32.gmra.mxu3 %vm646_vm0, %v11720_v55  ;;  %v3653_v10 = vadd.f32 %v9922_v41, %v3557_v31 }
 0x842   : > { %v3725_v33 = vpop.f32.mrf.mxu3 }
 0x843   : > { %v10033_v21 = vadd.f32 %v3725_v33, %v3653_v10  ;;  %v11757_v10 = vld [vmem:[#allocation21_spill] sm:$0xff]  ;;  %v11758_v33 = vld [vmem:[#allocation60_spill] sm:$0xff] }
 0x844   : > { %v3536_v20 = vpop.f32.mrf.mxu1  ;;  %6637 = vmatmul.msk.f32.gmra.mxu2 %vm646_vm0, %v11668_v50  ;;  %v11760_v50 = vld [vmem:[#allocation112_spill] sm:$0xff] }
 0x845   : > { %v3558_v43 = vadd.f32 %v3536_v20, %v11754_v2  ;;  %v11759_v20 = vld [vmem:[#allocation120_spill] sm:$0xff] }
 0x847   : > { %6567 = vmatmul.msk.f32.gmra.mxu1 %vm646_vm0, %v11755_v38  ;;  %v10040_v46 = vpop.f32.mrf.mxu2  ;;  %6607 = vmatmul.msk.f32.gmra.mxu3 %vm646_vm0, %v11756_v54  ;;  %v3654_v41 = vadd.f32 %v9947_v15, %v3558_v43  ;;  %v6693_v15 = vld [vmem:[%s8049_s25 + $0x2d8] sm:$0xff]  ;;  %v11778_v54 = vld [vmem:[#allocation10_spill] sm:$0xff] }
 0x848   : > { %4448 = vmatpush.msrb.mxu2 %v6693_v15 }
 0x84a   : > { %v3728_v31 = vpop.f32.mrf.mxu3 }
 0x84b   : > { %v10045_v12 = vadd.f32 %v3728_v31, %v3654_v41  ;;  %v3947_v41 = vrot.slane %v9955_v62, 2 }
 0x84c   : > { %v3539_v53 = vpop.f32.mrf.mxu1  ;;  %6638 = vmatmul.msk.f32.gmra.mxu2 %vm646_vm0, %v11757_v10 }
 0x84d   : > { %v3559_v58 = vadd.f32 %v3539_v53, %v11758_v33  ;;  %v3946_v53 = vrot.slane %v9962_v17, 2 }
 0x84f   : > { %6568 = vmatmul.msk.f32.gmra.mxu1 %vm646_vm0, %v11759_v20  ;;  %v10052_v2 = vpop.f32.mrf.mxu2  ;;  %6608 = vmatmul.msk.f32.gmra.mxu3 %vm646_vm0, %v9814_v6  ;;  %v3655_v14 = vadd.f32 %v9965_v44, %v3559_v58  ;;  %v10066_v59 = vsel %vm2296_vm2, %v3946_v53, %v3947_v41  ;;  %v11763_v41 = vld [vmem:[#allocation50_spill] sm:$0xff] }
 0x850   : > { %11761 = vst [vmem:[#allocation77_spill] sm:$0xff] %v10066_v59  ;;  %v11777_v6 = vld [vmem:[#allocation38_spill] sm:$0xff] }
 0x852   : > { %v3731_v43 = vpop.f32.mrf.mxu3 }
 0x853   : > { %v10059_v31 = vadd.f32 %v3731_v43, %v3655_v14 }
 0x854   : > { %v3542_v10 = vpop.f32.mrf.mxu1  ;;  %6639 = vmatmul.msk.f32.gmra.mxu2 %vm646_vm0, %v11760_v50  ;;  %v11762_v50 = vld [vmem:[#allocation52_spill] sm:$0xff] }
 0x855   : > { %v3560_v33 = vadd.f32 %v3542_v10, %v9834_v48 }
 0x857   : > { %6569 = vmatmul.msk.f32.gmra.mxu1 %vm646_vm0, %v9962_v17  ;;  %v3894_v58 = vpop.f32.mrf.mxu2  ;;  %6609 = vmatmul.msk.f32.gmra.mxu3 %vm646_vm0, %v10066_v59  ;;  %v3656_v14 = vadd.f32 %v9982_v5, %v3560_v33  ;;  %v4136_v5 = vrot.slane %v9832_v42, 4  ;;  %v4135_v33 = vrot.slane %v9839_v45, 4 }
 0x85a   : > { %v3734_v44 = vpop.f32.mrf.mxu3 }
 0x85b   : > { %v10073_v15 = vadd.f32 %v3734_v44, %v3656_v14 }
 0x85c   : > { %v3781_v43 = vpop.f32.mrf.mxu1  ;;  %6640 = vmatmul.msk.f32.gmra.mxu2 %vm646_vm0, %v11762_v50  ;;  %v10090_v50 = vsel %vm2630_vm3, %v4135_v33, %v4136_v5  ;;  %v11766_v33 = vld [vmem:[#allocation114_spill] sm:$0xff] }
 0x85d   : > { %v3829_v48 = vadd.f32 %v3781_v43, %v9851_v32  ;;  %11764 = vst [vmem:[#allocation82_spill] sm:$0xff] %v10090_v50 }
 0x85f   : > { %v10078_v10 = vpop.f32.mrf.mxu2  ;;  %6614 = vmatmul.msk.f32.vlgmr.msrb.gmra.mxu1 %vm646_vm0, %v11763_v41  ;;  %6654 = vmatmul.msk.f32.vlgmr.msrb.gmra.mxu3 %vm646_vm0, %v11735_v26  ;;  %v3927_v53 = vadd.f32 %v9996_v40, %v3829_v48  ;;  %v11765_v40 = vld [vmem:[#allocation111_spill] sm:$0xff] }
 0x862   : > { %v3975_v14 = vpop.f32.mrf.mxu3 }
 0x863   : > { %v10087_v44 = vadd.f32 %v3975_v14, %v3927_v53 }
 0x864   : > { %v3784_v32 = vpop.f32.mrf.mxu1  ;;  %6641 = vmatmul.msk.f32.gmra.mxu2 %vm646_vm0, %v10090_v50  ;;  %v11768_v50 = vld [vmem:[#allocation119_spill] sm:$0xff] }
 0x865   : > { %v3830_v43 = vadd.f32 %v3784_v32, %v9866_v28  ;;  %v11767_v32 = vld [vmem:[#allocation116_spill] sm:$0xff] }
 0x867   : > { %v10095_v26 = vpop.f32.mrf.mxu2  ;;  %6615 = vmatmul.msk.f32.gmra.mxu1 %vm646_vm0, %v11765_v40  ;;  %6655 = vmatmul.msk.f32.gmra.mxu3 %vm646_vm0, %v11736_v30  ;;  %v3928_v48 = vadd.f32 %v10008_v19, %v3830_v43  ;;  %v6692_v19 = vld [vmem:[%s8049_s25 + $0x2d0] sm:$0xff] }
 0x868   : > { %4449 = vmatpush.msrb.mxu2 %v6692_v19  ;;  %v11770_v19 = vld [vmem:[#allocation4_spill] sm:$0xff] }
 0x86a   : > { %v3978_v41 = vpop.f32.mrf.mxu3 }
 0x86b   : > { %v10102_v53 = vadd.f32 %v3978_v41, %v3928_v48 }
 0x86c   : > { %v3787_v5 = vpop.f32.mrf.mxu1  ;;  %6642 = vmatmul.msk.f32.gmra.mxu2 %vm646_vm0, %v11766_v33  ;;  %v11769_v33 = vld [vmem:[#allocation61_spill] sm:$0xff] }
 0x86d   : > { %v3831_v14 = vadd.f32 %v3787_v5, %v9879_v18 }
 0x86f   : > { %v10107_v28 = vpop.f32.mrf.mxu2  ;;  %6616 = vmatmul.msk.f32.gmra.mxu1 %vm646_vm0, %v11767_v32  ;;  %6656 = vmatmul.msk.f32.gmra.mxu3 %vm646_vm0, %v11737_v60  ;;  %v3929_v30 = vadd.f32 %v10028_v27, %v3831_v14 }
 0x872   : > { %v3981_v43 = vpop.f32.mrf.mxu3 }
 0x873   : > { %v10115_v48 = vadd.f32 %v3981_v43, %v3929_v30 }
 0x874   : > { %v3790_v41 = vpop.f32.mrf.mxu1  ;;  %6643 = vmatmul.msk.f32.gmra.mxu2 %vm646_vm0, %v11768_v50  ;;  %v6691_v50 = vld [vmem:[%s8049_s25 + $0x2c8] sm:$0xff] }
 0x875   : > { %v3832_v18 = vadd.f32 %v3790_v41, %v9891_v57  ;;  %v11771_v41 = vld [vmem:[#allocation122_spill] sm:$0xff]  ;;  %4450 = vmatpush.msrb.mxu2 %v6691_v50  ;;  %v11779_v50 = vld [vmem:[#allocation12_spill] sm:$0xff] }
 0x877   : > { %v10120_v5 = vpop.f32.mrf.mxu2  ;;  %6617 = vmatmul.msk.f32.gmra.mxu1 %vm646_vm0, %v11769_v33  ;;  %6657 = vmatmul.msk.f32.gmra.mxu3 %vm646_vm0, %v11738_v51  ;;  %v3930_v60 = vadd.f32 %v10040_v46, %v3832_v18 }
 0x87a   : > { %v3984_v27 = vpop.f32.mrf.mxu3 }
 0x87b   : > { %v10127_v14 = vadd.f32 %v3984_v27, %v3930_v60  ;;  %v11772_v27 = vld [vmem:[#allocation123_spill] sm:$0xff] }
 0x87c   : > { %v3793_v30 = vpop.f32.mrf.mxu1  ;;  %6644 = vmatmul.msk.f32.gmra.mxu2 %vm646_vm0, %v11770_v19  ;;  %v11773_v19 = vld [vmem:[#allocation5_spill] sm:$0xff] }
 0x87d   : > { %v3833_v57 = vadd.f32 %v3793_v30, %v9903_v4 }
 0x87f   : > { %v10132_v43 = vpop.f32.mrf.mxu2  ;;  %6618 = vmatmul.msk.f32.gmra.mxu1 %vm646_vm0, %v11771_v41  ;;  %6658 = vmatmul.msk.f32.gmra.mxu3 %vm646_vm0, %v11739_v47  ;;  %v3931_v51 = vadd.f32 %v10052_v2, %v3833_v57 }
 0x882   : > { %v3987_v46 = vpop.f32.mrf.mxu3 }
 0x883   : > { %v10139_v18 = vadd.f32 %v3987_v46, %v3931_v51  ;;  %v6690_v51 = vld [vmem:[%s8049_s25 + $0x2c0] sm:$0xff] }
 0x884   : > { %v3796_v60 = vpop.f32.mrf.mxu1  ;;  %6645 = vmatmul.msk.f32.gmra.mxu2 %vm646_vm0, %v11772_v27 }
 0x885   : > { %v3834_v4 = vadd.f32 %v3796_v60, %v9916_v11  ;;  %v11775_v11 = vld [vmem:[#allocation64_spill] sm:$0xff]  ;;  %v11776_v60 = vld [vmem:[#allocation71_spill] sm:$0xff]  ;;  %4451 = vmatpush.msrb.mxu2 %v6690_v51  ;;  %v11780_v51 = vld [vmem:[#allocation117_spill] sm:$0xff] }
 0x886   : > { %v1886_v27 = vmax.f32 %v11776_v60, %v11775_v11  ;;  %v4040_v11 = vrot.slane %v9832_v42, 3 }
 0x887   : > { %v10144_v30 = vpop.f32.mrf.mxu2  ;;  %6619 = vmatmul.msk.f32.gmra.mxu1 %vm646_vm0, %v11773_v19  ;;  %6659 = vmatmul.msk.f32.gmra.mxu3 %vm646_vm0, %v9357_v16  ;;  %v3932_v47 = vadd.f32 %v3894_v58, %v3834_v4  ;;  %v1838_v16 = vmax.f32 %v11778_v54, %v11777_v6  ;;  %v4039_v6 = vrot.slane %v9839_v45, 3 }
 0x88a   : > { %v3990_v2 = vpop.f32.mrf.mxu3 }
 0x88b   : > { %v10151_v57 = vadd.f32 %v3990_v2, %v3932_v47  ;;  %v1934_v47 = vmax.f32 %v1838_v16, %v1886_v27 }
 0x88c   : > { %v3799_v46 = vpop.f32.mrf.mxu1  ;;  %6646 = vmatmul.msk.f32.gmra.mxu2 %vm646_vm0, %v11774_v63  ;;  %v10179_v63 = vsel %vm2463_vm4, %v4039_v6, %v4040_v11 }
 0x88d   : > { %v3835_v59 = vadd.f32 %v3799_v46, %v9932_v23  ;;  %v10175_v54 = vadd.f32 %v9829_v9, %v1934_v47 }
 0x88f   : > { %v10161_v58 = vpop.f32.mrf.mxu2  ;;  %6620 = vmatmul.msk.f32.gmra.mxu1 %vm646_vm0, %v11779_v50  ;;  %6660 = vmatmul.msk.f32.gmra.mxu3 %vm646_vm0, %v9839_v45  ;;  %v3933_v4 = vadd.f32 %v10078_v10, %v3835_v59 }
 0x892   : > { %v3993_v2 = vpop.f32.mrf.mxu3 }
 0x893   : > { %v10169_v60 = vadd.f32 %v3993_v2, %v3933_v4  ;;  %v11781_v4 = vld [vmem:[#allocation126_spill] sm:$0xff]  ;;  %v4138_v2 = vrot.slane %v9962_v17, 4 }
 0x894   : > { %v3802_v23 = vpop.f32.mrf.mxu1  ;;  %6647 = vmatmul.msk.f32.gmra.mxu2 %vm646_vm0, %v11780_v51 }
 0x895   : > { %v3836_v46 = vadd.f32 %v3802_v23, %v9957_v29 }
 0x897   : > { %v10181_v59 = vpop.f32.mrf.mxu2  ;;  %6621 = vmatmul.msk.f32.gmra.mxu1 %vm646_vm0, %v10179_v63  ;;  %6661 = vmatmul.msk.f32.gmra.mxu3 %vm646_vm0, %v10175_v54  ;;  %v3934_v42 = vadd.f32 %v10095_v26, %v3836_v46  ;;  %v4139_v26 = vrot.slane %v9955_v62, 4 }
 0x899   : > { %v10205_v6 = vsel %vm2630_vm3, %v4138_v2, %v4139_v26 }
 0x89a   : > { %v3996_v10 = vpop.f32.mrf.mxu3 }
 0x89b   : > { %v10188_v45 = vadd.f32 %v3996_v10, %v3934_v42 }
 0x89c   : > { %v3805_v27 = vpop.f32.mrf.mxu1  ;;  %6648 = vmatmul.msk.f32.gmra.mxu2 %vm646_vm0, %v9817_v35 }
 0x89d   : > { %v3837_v29 = vadd.f32 %v3805_v27, %v9974_v52 }
 0x89f   : > { %v10193_v16 = vpop.f32.mrf.mxu2  ;;  %6622 = vmatmul.msk.f32.gmra.mxu1 %vm646_vm0, %v11781_v4  ;;  %6662 = vmatmul.msk.f32.gmra.mxu3 %vm646_vm0, %v11750_v56  ;;  %v3935_v47 = vadd.f32 %v10107_v28, %v3837_v29  ;;  %v11782_v56 = vld [vmem:[#allocation127_spill] sm:$0xff]  ;;  %v11783_v4 = vld [vmem:[#allocation128_spill] sm:$0xff] }
 0x8a2   : > { %v3999_v11 = vpop.f32.mrf.mxu3 }
 0x8a3   : > { %v10202_v23 = vadd.f32 %v3999_v11, %v3935_v47 }
 0x8a4   : > { %v3808_v52 = vpop.f32.mrf.mxu1  ;;  %6649 = vmatmul.msk.f32.gmra.mxu2 %vm646_vm0, %v10205_v6 }
 0x8a5   : > { %v3838_v46 = vadd.f32 %v3808_v52, %v9989_v61  ;;  %v6713_v52 = vld [vmem:[%s8049_s25 + $0x2f8] sm:$0xff] }
 0x8a6   : > { %4544 = vmatpush.msra.mxu3 %v6713_v52  ;;  %v11786_v52 = vld [vmem:[#allocation115_spill] sm:$0xff] }
 0x8a7   : > { %v10210_v42 = vpop.f32.mrf.mxu2  ;;  %6623 = vmatmul.msk.f32.gmra.mxu1 %vm646_vm0, %v11782_v56  ;;  %6663 = vmatmul.msk.f32.gmra.mxu3 %vm646_vm0, %v11751_v1  ;;  %v3936_v28 = vadd.f32 %v10120_v5, %v3838_v46  ;;  %v6712_v46 = vld [vmem:[%s8049_s25 + $0x2f0] sm:$0xff] }
 0x8a8   : > { %4545 = vmatpush.msra.mxu3 %v6712_v46 }
 0x8aa   : > { %v4002_v10 = vpop.f32.mrf.mxu3 }
 0x8ab   : > { %v10217_v27 = vadd.f32 %v4002_v10, %v3936_v28 }
 0x8ac   : > { %v3811_v29 = vpop.f32.mrf.mxu1  ;;  %6694 = vmatmul.msk.f32.vlgmr.msrb.gmra.mxu2 %vm646_vm0, %v11697_v3 }
 0x8ad   : > { %v3839_v61 = vadd.f32 %v3811_v29, %v10001_v0  ;;  %v11784_v0 = vld [vmem:[#allocation90_spill] sm:$0xff]  ;;  %v6711_v29 = vld [vmem:[%s8049_s25 + $0x2e8] sm:$0xff] }
 0x8ae   : > { %4546 = vmatpush.msra.mxu3 %v6711_v29  ;;  %v11789_v29 = vld [vmem:[#allocation57_spill] sm:$0xff] }
 0x8af   : > { %6624 = vmatmul.msk.f32.gmra.mxu1 %vm646_vm0, %v11783_v4  ;;  %v10224_v47 = vpop.f32.mrf.mxu2  ;;  %6664 = vmatmul.msk.f32.gmra.mxu3 %vm646_vm0, %v11752_v37  ;;  %v3937_v1 = vadd.f32 %v10132_v43, %v3839_v61  ;;  %v6673_v43 = vld [vmem:[%s8049_s25 + $0x2b8] sm:$0xff]  ;;  %v6670_v61 = vld [vmem:[%s8049_s25 + $0x2a0] sm:$0xff] }
 0x8b0   : > { %4352 = vmatpush.msra.mxu1 %v6673_v43 }
 0x8b2   : > { %v4005_v5 = vpop.f32.mrf.mxu3 }
 0x8b3   : > { %v10229_v26 = vadd.f32 %v4005_v5, %v3937_v1  ;;  %v6710_v1 = vld [vmem:[%s8049_s25 + $0x2e0] sm:$0xff]  ;;  %v11785_v5 = vld [vmem:[#allocation23_spill] sm:$0xff] }
 0x8b4   : > { %v3814_v2 = vpop.f32.mrf.mxu1  ;;  %6695 = vmatmul.msk.f32.gmra.mxu2 %vm646_vm0, %v11699_v25  ;;  %4547 = vmatpush.msra.mxu3 %v6710_v1  ;;  %v11791_v1 = vld [vmem:[#allocation24_spill] sm:$0xff] }
 0x8b5   : > { %v3840_v3 = vadd.f32 %v3814_v2, %v10017_v34  ;;  %v6672_v34 = vld [vmem:[%s8049_s25 + $0x2b0] sm:$0xff] }
 0x8b6   : > { %4353 = vmatpush.msra.mxu1 %v6672_v34 }
 0x8b7   : > { %6625 = vmatmul.msk.f32.gmra.mxu1 %vm646_vm0, %v11784_v0  ;;  %v10236_v11 = vpop.f32.mrf.mxu2  ;;  %6665 = vmatmul.msk.f32.gmra.mxu3 %vm646_vm0, %v11753_v39  ;;  %v3938_v37 = vadd.f32 %v10144_v30, %v3840_v3  ;;  %v6671_v39 = vld [vmem:[%s8049_s25 + $0x2a8] sm:$0xff] }
 0x8b8   : > { %4354 = vmatpush.msra.mxu1 %v6671_v39 }
 0x8ba   : > { %v4008_v25 = vpop.f32.mrf.mxu3  ;;  %4355 = vmatpush.msra.mxu1 %v6670_v61 }
 0x8bb   : > { %v10245_v28 = vadd.f32 %v4008_v25, %v3938_v37 }
 0x8bc   : > { %v3817_v10 = vpop.f32.mrf.mxu1  ;;  %6696 = vmatmul.msk.f32.gmra.mxu2 %vm646_vm0, %v11701_v13 }
 0x8bd   : > { %v3841_v30 = vadd.f32 %v3817_v10, %v10033_v21 }
 0x8bf   : > { %6626 = vmatmul.msk.f32.gmra.mxu1 %vm646_vm0, %v11785_v5  ;;  %v10256_v2 = vpop.f32.mrf.mxu2  ;;  %6666 = vmatmul.msk.f32.gmra.mxu3 %vm646_vm0, %v11755_v38  ;;  %v3939_v3 = vadd.f32 %v10161_v58, %v3841_v30  ;;  %v11790_v30 = vld [vmem:[#allocation29_spill] sm:$0xff] }
 0x8c0   : > { %v1862_v61 = vmax.f32 %v11790_v30, %v11789_v29  ;;  %v11795_v29 = vld [vmem:[#allocation39_spill] sm:$0xff] }
 0x8c2   : > { %v4011_v13 = vpop.f32.mrf.mxu3 }
 0x8c3   : > { %v10261_v37 = vadd.f32 %v4011_v13, %v3939_v3  ;;  %v6733_v3 = vld [vmem:[%s8049_s25 + $0x318] sm:$0xff] }
 0x8c4   : > { %v3820_v21 = vpop.f32.mrf.mxu1  ;;  %6697 = vmatmul.msk.f32.gmra.mxu2 %vm646_vm0, %v11703_v8  ;;  %v11787_v8 = vld [vmem:[#allocation79_spill] sm:$0xff]  ;;  %7035 = vmatpush.msrb.mxu3 %v6733_v3 }
 0x8c5   : > { %v3842_v43 = vadd.f32 %v3820_v21, %v10045_v12  ;;  %v11788_v12 = vld [vmem:[#allocation96_spill] sm:$0xff]  ;;  %4640 = vmatpush.msra.mxu2 %v6733_v3  ;;  %v11792_v21 = vld [vmem:[#allocation66_spill] sm:$0xff] }
 0x8c6   : > { %v1910_v10 = vmax.f32 %v11788_v12, %v11787_v8  ;;  %v11794_v8 = vld [vmem:[#allocation91_spill] sm:$0xff]  ;;  %v4042_v12 = vrot.slane %v9962_v17, 3 }
 0x8c7   : > { %6627 = vmatmul.msk.f32.gmra.mxu1 %vm646_vm0, %v11786_v52  ;;  %v10268_v25 = vpop.f32.mrf.mxu2  ;;  %6667 = vmatmul.msk.f32.gmra.mxu3 %vm646_vm0, %v11759_v20  ;;  %v3940_v38 = vadd.f32 %v10181_v59, %v3842_v43  ;;  %v11793_v43 = vld [vmem:[#allocation73_spill] sm:$0xff] }
 0x8ca   : > { %v4014_v58 = vpop.f32.mrf.mxu3 }
 0x8cb   : > { %v10273_v34 = vadd.f32 %v4014_v58, %v3940_v38  ;;  %v1887_v38 = vmax.f32 %v11793_v43, %v11792_v21  ;;  %v11797_v43 = vld [vmem:[#allocation104_spill] sm:$0xff] }
 0x8cc   : > { %v3823_v46 = vpop.f32.mrf.mxu1  ;;  %6698 = vmatmul.msk.f32.gmra.mxu2 %vm646_vm0, %v11705_v49  ;;  %v1958_v49 = vmax.f32 %v1862_v61, %v1910_v10 }
 0x8cd   : > { %v3843_v39 = vadd.f32 %v3823_v46, %v10059_v31  ;;  %v4043_v31 = vrot.slane %v9955_v62, 3 }
 0x8ce   : > { %v10301_v30 = vadd.f32 %v9829_v9, %v1958_v49 }
 0x8cf   : > { %6628 = vmatmul.msk.f32.gmra.mxu1 %vm646_vm0, %v11791_v1  ;;  %v10284_v20 = vpop.f32.mrf.mxu2  ;;  %6668 = vmatmul.msk.f32.gmra.mxu3 %vm646_vm0, %v9962_v17  ;;  %v3941_v59 = vadd.f32 %v10193_v16, %v3843_v39  ;;  %v11796_v16 = vld [vmem:[#allocation11_spill] sm:$0xff]  ;;  %v10305_v62 = vsel %vm2463_vm4, %v4042_v12, %v4043_v31 }
 0x8d0   : > { %v1839_v39 = vmax.f32 %v11796_v16, %v11795_v29 }
 0x8d2   : > { %v4017_v13 = vpop.f32.mrf.mxu3  ;;  %v1935_v61 = vmax.f32 %v1839_v39, %v1887_v38 }
 0x8d3   : > { %v10293_v58 = vadd.f32 %v4017_v13, %v3941_v59 }
 0x8d4   : > { %v3826_v46 = vpop.f32.mrf.mxu1  ;;  %6699 = vmatmul.msk.f32.gmra.mxu2 %vm646_vm0, %v11794_v8  ;;  %v10315_v49 = vadd.f32 %v9829_v9, %v1935_v61 }
 0x8d5   : > { %v3844_v10 = vadd.f32 %v3826_v46, %v10073_v15  ;;  %v4421_v46 = vrot.slane %v10175_v54, 2 }
 0x8d6   : > { %v4422_v38 = vrot.slane %v10315_v49, 2 }
 0x8d7   : > { %6629 = vmatmul.msk.f32.gmra.mxu1 %vm646_vm0, %v10305_v62  ;;  %v10309_v59 = vpop.f32.mrf.mxu2  ;;  %6669 = vmatmul.msk.f32.gmra.mxu3 %vm646_vm0, %v10301_v30  ;;  %v3942_v17 = vadd.f32 %v10210_v42, %v3844_v10 }
 0x8da   : > { %v4020_v3 = vpop.f32.mrf.mxu3 }
 0x8db   : > { %v10317_v13 = vadd.f32 %v4020_v3, %v3942_v17  ;;  %v11799_v3 = vld [vmem:[#allocation2_spill] sm:$0xff] }
 0x8dc   : > { %v4071_v15 = vpop.f32.mrf.mxu1  ;;  %6700 = vmatmul.msk.f32.gmra.mxu2 %vm646_vm0, %v9943_v22  ;;  %v4423_v22 = vsel %vm2296_vm2, %v4421_v46, %v4422_v38 }
 0x8dd   : > { %v4119_v31 = vadd.f32 %v4071_v15, %v10087_v44 }
 0x8df   : > { %v10322_v21 = vpop.f32.mrf.mxu2  ;;  %6674 = vmatmul.msk.f32.vlgmr.msra.gmra.mxu1 %vm646_vm0, %v11797_v43  ;;  %6714 = vmatmul.msk.f32.vlgmr.msra.gmra.mxu3 %vm646_vm0, %v11765_v40  ;;  %v4215_v42 = vadd.f32 %v10224_v47, %v4119_v31  ;;  %v11798_v40 = vld [vmem:[#allocation107_spill] sm:$0xff] }
 0x8e2   : > { %v4259_v8 = vpop.f32.mrf.mxu3 }
 0x8e3   : > { %v10331_v12 = vadd.f32 %v4259_v8, %v4215_v42  ;;  %v11800_v42 = vld [vmem:[#allocation74_spill] sm:$0xff]  ;;  %v11801_v8 = vld [vmem:[#allocation33_spill] sm:$0xff] }
 0x8e4   : > { %v4074_v44 = vpop.f32.mrf.mxu1  ;;  %6701 = vmatmul.msk.f32.gmra.mxu2 %vm646_vm0, %v4423_v22 }
 0x8e5   : > { %v4120_v29 = vadd.f32 %v4074_v44, %v10102_v53 }
 0x8e7   : > { %v10336_v16 = vpop.f32.mrf.mxu2  ;;  %6675 = vmatmul.msk.f32.gmra.mxu1 %vm646_vm0, %v11798_v40  ;;  %6715 = vmatmul.msk.f32.gmra.mxu3 %vm646_vm0, %v11767_v32  ;;  %v4216_v47 = vadd.f32 %v10236_v11, %v4120_v29  ;;  %v6732_v11 = vld [vmem:[%s8049_s25 + $0x310] sm:$0xff]  ;;  %v11802_v29 = vld [vmem:[#allocation118_spill] sm:$0xff] }
 0x8e8   : > { %4641 = vmatpush.msra.mxu2 %v6732_v11  ;;  %7036 = vmatpush.msrb.mxu3 %v6732_v11  ;;  %v4518_v11 = vrot.slane %v10315_v49, 3 }
 0x8ea   : > { %v4262_v39 = vpop.f32.mrf.mxu3 }
 0x8eb   : > { %v10343_v10 = vadd.f32 %v4262_v39, %v4216_v47  ;;  %v6730_v39 = vld [vmem:[%s8049_s25 + $0x300] sm:$0xff] }
 0x8ec   : > { %v4077_v61 = vpop.f32.mrf.mxu1  ;;  %6702 = vmatmul.msk.f32.gmra.mxu2 %vm646_vm0, %v11714_v24 }
 0x8ed   : > { %v4121_v17 = vadd.f32 %v4077_v61, %v10115_v48  ;;  %v11803_v61 = vld [vmem:[#allocation22_spill] sm:$0xff] }
 0x8ef   : > { %v10348_v53 = vpop.f32.mrf.mxu2  ;;  %6676 = vmatmul.msk.f32.gmra.mxu1 %vm646_vm0, %v11799_v3  ;;  %6716 = vmatmul.msk.f32.gmra.mxu3 %vm646_vm0, %v11769_v33  ;;  %v4217_v32 = vadd.f32 %v10256_v2, %v4121_v17 }
 0x8f2   : > { %v4265_v15 = vpop.f32.mrf.mxu3 }
 0x8f3   : > { %v10356_v31 = vadd.f32 %v4265_v15, %v4217_v32  ;;  %v4326_v32 = vrot.slane %v10315_v49, 1  ;;  %v11805_v15 = vld [vmem:[#allocation47_spill] sm:$0xff] }
 0x8f4   : > { %v4080_v43 = vpop.f32.mrf.mxu1  ;;  %6703 = vmatmul.msk.f32.gmra.mxu2 %vm646_vm0, %v11716_v7 }
 0x8f5   : > { %v4122_v24 = vadd.f32 %v4080_v43, %v10127_v14  ;;  %v11806_v43 = vld [vmem:[#allocation97_spill] sm:$0xff] }
 0x8f7   : > { %v10361_v48 = vpop.f32.mrf.mxu2  ;;  %6677 = vmatmul.msk.f32.gmra.mxu1 %vm646_vm0, %v11800_v42  ;;  %6717 = vmatmul.msk.f32.gmra.mxu3 %vm646_vm0, %v11771_v41  ;;  %v4218_v33 = vadd.f32 %v10268_v25, %v4122_v24  ;;  %v1911_v24 = vmax.f32 %v11806_v43, %v11805_v15  ;;  %v11812_v43 = vld [vmem:[#allocation44_spill] sm:$0xff] }
 0x8fa   : > { %v4268_v2 = vpop.f32.mrf.mxu3 }
 0x8fb   : > { %v10368_v38 = vadd.f32 %v4268_v2, %v4218_v33  ;;  %v11807_v33 = vld [vmem:[#allocation98_spill] sm:$0xff]  ;;  %v4325_v2 = vrot.slane %v10175_v54, 1 }
 0x8fc   : > { %v4083_v46 = vpop.f32.mrf.mxu1  ;;  %6704 = vmatmul.msk.f32.gmra.mxu2 %vm646_vm0, %v11718_v36 }
 0x8fd   : > { %v4123_v7 = vadd.f32 %v4083_v46, %v10139_v18  ;;  %v11808_v46 = vld [vmem:[#allocation58_spill] sm:$0xff] }
 0x8ff   : > { %v10373_v14 = vpop.f32.mrf.mxu2  ;;  %6678 = vmatmul.msk.f32.gmra.mxu1 %vm646_vm0, %v11801_v8  ;;  %6718 = vmatmul.msk.f32.gmra.mxu3 %vm646_vm0, %v11773_v19  ;;  %v4219_v41 = vadd.f32 %v10284_v20, %v4123_v7  ;;  %v6731_v20 = vld [vmem:[%s8049_s25 + $0x308] sm:$0xff] }
 0x900   : > { %4642 = vmatpush.msra.mxu2 %v6731_v20  ;;  %7037 = vmatpush.msrb.mxu3 %v6731_v20 }
 0x902   : > { %v4271_v25 = vpop.f32.mrf.mxu3  ;;  %7038 = vmatpush.msrb.mxu3 %v6730_v39  ;;  %4643 = vmatpush.msra.mxu2 %v6730_v39 }
 0x903   : > { %v10380_v22 = vadd.f32 %v4271_v25, %v4219_v41  ;;  %v4327_v41 = vsel %vm2048_vm1, %v4325_v2, %v4326_v32 }
 0x904   : > { %v4086_v44 = vpop.f32.mrf.mxu1  ;;  %6705 = vmatmul.msk.f32.gmra.mxu2 %vm646_vm0, %v11720_v55 }
 0x905   : > { %v4124_v36 = vadd.f32 %v4086_v44, %v10151_v57 }
 0x907   : > { %v10385_v18 = vpop.f32.mrf.mxu2  ;;  %6679 = vmatmul.msk.f32.gmra.mxu1 %vm646_vm0, %v11802_v29  ;;  %6719 = vmatmul.msk.f32.gmra.mxu3 %vm646_vm0, %v11779_v50  ;;  %v4220_v19 = vadd.f32 %v10309_v59, %v4124_v36  ;;  %v11804_v50 = vld [vmem:[#allocation78_spill] sm:$0xff] }
 0x90a   : > { %v4274_v40 = vpop.f32.mrf.mxu3 }
 0x90b   : > { %v10393_v47 = vadd.f32 %v4274_v40, %v4220_v19 }
 0x90c   : > { %v4089_v55 = vpop.f32.mrf.mxu1  ;;  %6706 = vmatmul.msk.f32.gmra.mxu2 %vm646_vm0, %v11803_v61 }
 0x90d   : > { %v4125_v57 = vadd.f32 %v4089_v55, %v10169_v60 }
 0x90f   : > { %v10399_v17 = vpop.f32.mrf.mxu2  ;;  %6680 = vmatmul.msk.f32.gmra.mxu1 %vm646_vm0, %v11804_v50  ;;  %6720 = vmatmul.msk.f32.gmra.mxu3 %vm646_vm0, %v10179_v63  ;;  %v4221_v59 = vadd.f32 %v10322_v21, %v4125_v57  ;;  %v4517_v63 = vrot.slane %v10175_v54, 3  ;;  %v11809_v21 = vld [vmem:[#allocation30_spill] sm:$0xff]  ;;  %v11811_v57 = vld [vmem:[#allocation80_spill] sm:$0xff]  ;;  %v4424_v50 = vrot.slane %v10301_v30, 2 }
 0x910   : > { %v1863_v7 = vmax.f32 %v11809_v21, %v11808_v46  ;;  %v11815_v21 = vld [vmem:[#allocation18_spill] sm:$0xff] }
 0x911   : > { %v4519_v25 = vsel %vm2463_vm4, %v4517_v63, %v4518_v11  ;;  %v11814_v63 = vld [vmem:[#allocation17_spill] sm:$0xff] }
 0x912   : > { %v4277_v3 = vpop.f32.mrf.mxu3  ;;  %v1959_v44 = vmax.f32 %v1863_v7, %v1911_v24 }
 0x913   : > { %v10410_v60 = vadd.f32 %v4277_v3, %v4221_v59 }
 0x914   : > { %v4092_v42 = vpop.f32.mrf.mxu1  ;;  %6707 = vmatmul.msk.f32.gmra.mxu2 %vm646_vm0, %v11807_v33  ;;  %v10425_v20 = vadd.f32 %v9829_v9, %v1959_v44  ;;  %v11813_v33 = vld [vmem:[#allocation45_spill] sm:$0xff] }
 0x915   : > { %v4126_v8 = vadd.f32 %v4092_v42, %v10188_v45  ;;  %v11810_v45 = vld [vmem:[#allocation77_spill] sm:$0xff] }
 0x916   : > { %v4425_v9 = vrot.slane %v10425_v20, 2 }
 0x917   : > { %v4206_v36 = vpop.f32.mrf.mxu2  ;;  %6681 = vmatmul.msk.f32.gmra.mxu1 %vm646_vm0, %v4327_v41  ;;  %6721 = vmatmul.msk.f32.gmra.mxu3 %vm646_vm0, %v4519_v25  ;;  %v4222_v29 = vadd.f32 %v10336_v16, %v4126_v8  ;;  %v11816_v8 = vld [vmem:[#allocation19_spill] sm:$0xff]  ;;  %v11817_v25 = vld [vmem:[#allocation49_spill] sm:$0xff] }
 0x918   : > { %v4426_v32 = vsel %vm2296_vm2, %v4424_v50, %v4425_v9 }
 0x91a   : > { %v4280_v19 = vpop.f32.mrf.mxu3 }
 0x91b   : > { %v10427_v40 = vadd.f32 %v4280_v19, %v4222_v29  ;;  %v11818_v29 = vld [vmem:[#allocation113_spill] sm:$0xff] }
 0x91c   : > { %v4095_v39 = vpop.f32.mrf.mxu1  ;;  %6708 = vmatmul.msk.f32.gmra.mxu2 %vm646_vm0, %v11810_v45 }
 0x91d   : > { %v4127_v55 = vadd.f32 %v4095_v39, %v10202_v23  ;;  %v11819_v39 = vld [vmem:[#allocation21_spill] sm:$0xff] }
 0x91f   : > { %v4209_v61 = vpop.f32.mrf.mxu2  ;;  %6682 = vmatmul.msk.f32.gmra.mxu1 %vm646_vm0, %v11811_v57  ;;  %6722 = vmatmul.msk.f32.gmra.mxu3 %vm646_vm0, %v11782_v56  ;;  %v4223_v16 = vadd.f32 %v10348_v53, %v4127_v55  ;;  %v11820_v55 = vld [vmem:[#allocation32_spill] sm:$0xff] }
 0x922   : > { %v4283_v59 = vpop.f32.mrf.mxu3 }
 0x923   : > { %v10439_v3 = vadd.f32 %v4283_v59, %v4223_v16  ;;  %v11821_v16 = vld [vmem:[#allocation112_spill] sm:$0xff] }
 0x924   : > { %v4098_v11 = vpop.f32.mrf.mxu1  ;;  %6709 = vmatmul.msk.f32.gmra.mxu2 %vm646_vm0, %v4426_v32  ;;  %v4521_v32 = vrot.slane %v10425_v20, 3 }
 0x925   : > { %v4128_v23 = vadd.f32 %v4098_v11, %v10217_v27 }
 0x927   : > { %v4212_v15 = vpop.f32.mrf.mxu2  ;;  %6683 = vmatmul.msk.f32.gmra.mxu1 %vm646_vm0, %v11812_v43  ;;  %6723 = vmatmul.msk.f32.gmra.mxu3 %vm646_vm0, %v11783_v4  ;;  %v4224_v56 = vadd.f32 %v10361_v48, %v4128_v23  ;;  %v11823_v23 = vld [vmem:[#allocation52_spill] sm:$0xff] }
 0x92a   : > { %v4286_v53 = vpop.f32.mrf.mxu3 }
 0x92b   : > { %v10449_v24 = vadd.f32 %v4286_v53, %v4224_v56 }
 0x92c   : > { %v4101_v42 = vpop.f32.mrf.mxu1  ;;  %6734 = vmatmul.msk.f32.vlgmr.msra.gmra.mxu2 %vm646_vm0, %v11813_v33 }
 0x92d   : > { %v4129_v2 = vadd.f32 %v4101_v42, %v10229_v26 }
 0x92f   : > { %6684 = vmatmul.msk.f32.gmra.mxu1 %vm646_vm0, %v11814_v63  ;;  %v4453_v27 = vpop.f32.mrf.mxu2  ;;  %6724 = vmatmul.msk.f32.gmra.mxu3 %vm646_vm0, %v11784_v0  ;;  %v10459_v4 = vadd.f32 %v10373_v14, %v4129_v2  ;;  %v11824_v63 = vld [vmem:[#allocation82_spill] sm:$0xff] }
 0x932   : > { %v10461_v48 = vpop.f32.mrf.mxu3 }
 0x934   : > { %v4104_v46 = vpop.f32.mrf.mxu1  ;;  %6735 = vmatmul.msk.f32.gmra.mxu2 %vm646_vm0, %v11815_v21 }
 0x935   : > { %v4130_v7 = vadd.f32 %v4104_v46, %v10245_v28 }
 0x937   : > { %6685 = vmatmul.msk.f32.gmra.mxu1 %vm646_vm0, %v11816_v8  ;;  %v4456_v26 = vpop.f32.mrf.mxu2  ;;  %6725 = vmatmul.msk.f32.gmra.mxu3 %vm646_vm0, %v11785_v5  ;;  %v10471_v0 = vadd.f32 %v10385_v18, %v4130_v7  ;;  %v4613_v7 = vrot.slane %v10175_v54, 4 }
 0x93a   : > { %v10473_v14 = vpop.f32.mrf.mxu3 }
 0x93c   : > { %v4107_v41 = vpop.f32.mrf.mxu1  ;;  %6736 = vmatmul.msk.f32.gmra.mxu2 %vm646_vm0, %v11817_v25 }
 0x93d   : > { %v4131_v44 = vadd.f32 %v4107_v41, %v10261_v37  ;;  %v4617_v41 = vrot.slane %v10425_v20, 4 }
 0x93f   : > { %6686 = vmatmul.msk.f32.gmra.mxu1 %vm646_vm0, %v11818_v29  ;;  %v4459_v28 = vpop.f32.mrf.mxu2  ;;  %6726 = vmatmul.msk.f32.gmra.mxu3 %vm646_vm0, %v11786_v52  ;;  %v10483_v5 = vadd.f32 %v10399_v17, %v4131_v44 }
 0x942   : > { %v10485_v18 = vpop.f32.mrf.mxu3 }
 0x944   : > { %v4110_v19 = vpop.f32.mrf.mxu1  ;;  %6737 = vmatmul.msk.f32.gmra.mxu2 %vm646_vm0, %v11819_v39  ;;  %v11825_v39 = vld [vmem:[#allocation119_spill] sm:$0xff] }
 0x945   : > { %v4132_v45 = vadd.f32 %v4110_v19, %v10273_v34  ;;  %v11822_v34 = vld [vmem:[#allocation14_spill] sm:$0xff] }
 0x947   : > { %6687 = vmatmul.msk.f32.gmra.mxu1 %vm646_vm0, %v11820_v55  ;;  %v4462_v37 = vpop.f32.mrf.mxu2  ;;  %6727 = vmatmul.msk.f32.gmra.mxu3 %vm646_vm0, %v11791_v1  ;;  %v10494_v57 = vadd.f32 %v4206_v36, %v4132_v45  ;;  %v4329_v36 = vrot.slane %v10425_v20, 1 }
 0x94a   : > { %v10496_v52 = vpop.f32.mrf.mxu3 }
 0x94c   : > { %v4113_v17 = vpop.f32.mrf.mxu1  ;;  %6738 = vmatmul.msk.f32.gmra.mxu2 %vm646_vm0, %v11821_v16 }
 0x94d   : > { %v4133_v9 = vadd.f32 %v4113_v17, %v10293_v58  ;;  %v4328_v58 = vrot.slane %v10301_v30, 1 }
 0x94f   : > { %v10501_v50 = vadd.f32 %v4209_v61, %v4133_v9  ;;  %6688 = vmatmul.msk.f32.gmra.mxu1 %vm646_vm0, %v11822_v34  ;;  %v4465_v59 = vpop.f32.mrf.mxu2  ;;  %6728 = vmatmul.msk.f32.gmra.mxu3 %vm646_vm0, %v10305_v62  ;;  %v4520_v61 = vrot.slane %v10301_v30, 3  ;;  %v4330_v56 = vsel %vm2048_vm1, %v4328_v58, %v4329_v36 }
 0x951   : > { %v4522_v62 = vsel %vm2463_vm4, %v4520_v61, %v4521_v32  ;;  %v11827_v32 = vld [vmem:[#allocation123_spill] sm:$0xff]  ;;  %v11828_v61 = vld [vmem:[#allocation124_spill] sm:$0xff] }
 0x952   : > { %v10507_v1 = vpop.f32.mrf.mxu3 }
 0x954   : > { %v4116_v11 = vpop.f32.mrf.mxu1  ;;  %6739 = vmatmul.msk.f32.gmra.mxu2 %vm646_vm0, %v11823_v23 }
 0x955   : > { %v4134_v43 = vadd.f32 %v4116_v11, %v10317_v13 }
 0x957   : > { %v10518_v53 = vadd.f32 %v4212_v15, %v4134_v43  ;;  %6689 = vmatmul.msk.f32.gmra.mxu1 %vm646_vm0, %v4330_v56  ;;  %v4468_v42 = vpop.f32.mrf.mxu2  ;;  %6729 = vmatmul.msk.f32.gmra.mxu3 %vm646_vm0, %v4522_v62  ;;  %v4614_v15 = vrot.slane %v10315_v49, 4 }
 0x959   : > { %v4615_v25 = vsel %vm2630_vm3, %v4613_v7, %v4614_v15 }
 0x95a   : > { %v10522_v33 = vpop.f32.mrf.mxu3 }
 0x95c   : > { %v4357_v2 = vpop.f32.mrf.mxu1  ;;  %6740 = vmatmul.msk.f32.gmra.mxu2 %vm646_vm0, %v11824_v63 }
 0x95d   : > { %v4405_v46 = vadd.f32 %v4357_v2, %v10331_v12  ;;  %v4616_v12 = vrot.slane %v10301_v30, 4 }
 0x95f   : > { %v4501_v13 = vadd.f32 %v4453_v27, %v4405_v46  ;;  %v10527_v21 = vpop.f32.mrf.mxu2  ;;  %6748 = vmatmul.msk.f32.vlgmr.msrb.gmra.mxu3 %vm646_vm0, %v10205_v6  ;;  %v4618_v29 = vsel %vm2630_vm3, %v4616_v12, %v4617_v41 }
 0x962   : > { %v4549_v8 = vpop.f32.mrf.mxu3 }
 0x964   : > { %v4360_v44 = vpop.f32.mrf.mxu1  ;;  %6741 = vmatmul.msk.f32.gmra.mxu2 %vm646_vm0, %v4615_v25 }
 0x965   : > { %v4406_v27 = vadd.f32 %v4360_v44, %v10343_v10  ;;  %v11826_v10 = vld [vmem:[#allocation4_spill] sm:$0xff]  ;;  %v4597_v44 = vadd.f32 %v4549_v8, %v4501_v13 }
 0x967   : > { %v4502_v19 = vadd.f32 %v4456_v26, %v4406_v27  ;;  %v10539_v6 = vpop.f32.mrf.mxu2  ;;  %6749 = vmatmul.msk.f32.gmra.mxu3 %vm646_vm0, %v4618_v29  ;;  %v10609_v27 = vld [vmem:[%s428_s20] ss:$0 sm:$0xff] }
 0x96a   : > { %v4552_v54 = vpop.f32.mrf.mxu3 }
 0x96c   : > { %v4363_v49 = vpop.f32.mrf.mxu1  ;;  %6742 = vmatmul.msk.f32.gmra.mxu2 %vm646_vm0, %v11825_v39 }
 0x96d   : > { %v4407_v20 = vadd.f32 %v4363_v49, %v10356_v31  ;;  %v4598_v49 = vadd.f32 %v4552_v54, %v4502_v19  ;;  %v6764_v54 = vld [vmem:[%s10625_s23 + $0xf0] sm:$0xff] }
 0x96e   : > { %4835 = vmatpush.msrb.mxu2 %v6764_v54  ;;  %v6759_v54 = vld [vmem:[%s10625_s23 + $0xc8] sm:$0xff] }
 0x96f   : > { %v4503_v45 = vadd.f32 %v4459_v28, %v4407_v20  ;;  %v10545_v55 = vpop.f32.mrf.mxu2 }
 0x972   : > { %v4555_v30 = vpop.f32.mrf.mxu3 }
 0x974   : > { %v4366_v17 = vpop.f32.mrf.mxu1  ;;  %6743 = vmatmul.msk.f32.gmra.mxu2 %vm646_vm0, %v11826_v10 }
 0x975   : > { %v4408_v26 = vadd.f32 %v4366_v17, %v10368_v38 }
 0x977   : > { %v4504_v16 = vadd.f32 %v4462_v37, %v4408_v26  ;;  %v10550_v9 = vpop.f32.mrf.mxu2 }
 0x97a   : > { %v4558_v34 = vpop.f32.mrf.mxu3 }
 0x97c   : > { %v4369_v36 = vpop.f32.mrf.mxu1  ;;  %6744 = vmatmul.msk.f32.gmra.mxu2 %vm646_vm0, %v11827_v32 }
 0x97d   : > { %v4409_v31 = vadd.f32 %v4369_v36, %v10380_v22 }
 0x97f   : > { %v10555_v28 = vadd.f32 %v4465_v59, %v4409_v31  ;;  %v10557_v11 = vpop.f32.mrf.mxu2  ;;  %v4599_v31 = vadd.f32 %v4555_v30, %v4503_v45  ;;  %v6762_v30 = vld [vmem:[%s10625_s23 + $0xe0] sm:$0xff] }
 0x980   : > { %4836 = vmatpush.msrb.mxu2 %v6762_v30  ;;  %v6751_v30 = vld [vmem:[%s10625_s23 + $0x88] sm:$0xff] }
 0x982   : > { %v10559_v23 = vpop.f32.mrf.mxu3 }
 0x984   : > { %v4372_v58 = vpop.f32.mrf.mxu1  ;;  %6745 = vmatmul.msk.f32.gmra.mxu2 %vm646_vm0, %v11828_v61 }
 0x985   : > { %v4410_v38 = vadd.f32 %v4372_v58, %v10393_v47 }
 0x987   : > { %v10564_v37 = vadd.f32 %v4468_v42, %v4410_v38  ;;  %v10566_v43 = vpop.f32.mrf.mxu2 }
 0x98a   : > { %v10568_v56 = vpop.f32.mrf.mxu3 }
 0x98c   : > { %v4375_v62 = vpop.f32.mrf.mxu1  ;;  %6746 = vmatmul.msk.f32.gmra.mxu2 %vm646_vm0, %v11780_v51 }
 0x98d   : > { %v10573_v22 = vadd.f32 %v4375_v62, %v10410_v60  ;;  %v4600_v62 = vadd.f32 %v4558_v34, %v4504_v16 }
 0x98f   : > { %v10575_v59 = vpop.f32.mrf.mxu2 }
 0x992   : > { %v10577_v2 = vpop.f32.mrf.mxu3 }
 0x994   : > { %v4378_v63 = vpop.f32.mrf.mxu1  ;;  %6747 = vmatmul.msk.f32.gmra.mxu2 %vm646_vm0, %v9817_v35 }
 0x995   : > { %v10582_v47 = vadd.f32 %v4378_v63, %v10427_v40 }
 0x997   : > { %v10584_v42 = vpop.f32.mrf.mxu2 }
 0x99a   : > { %v10586_v46 = vpop.f32.mrf.mxu3 }
 0x99c   : > { %v10588_v51 = vpop.f32.mrf.mxu1 }
 0x99f   : > { %v10590_v60 = vpop.f32.mrf.mxu2 }
 0x9a2   : > { %v10592_v15 = vpop.f32.mrf.mxu3 }
 0x9a4   : > { %v10594_v7 = vpop.f32.mrf.mxu1 }
 0x9a7   : > { %v10596_v41 = vpop.f32.mrf.mxu2 }
 0x9aa   : > { %v10598_v25 = vpop.f32.mrf.mxu3 }
 0x9ac   : > { %v10600_v35 = vpop.f32.mrf.mxu1 }
 0x9af   : > { %v4645_v40 = vpop.f32.mrf.mxu2 }
 0x9b0   : > { %v4693_v29 = vadd.f32 %v4645_v40, %v4597_v44 }
 0x9b2   : > { %v10602_v12 = vpop.f32.mrf.mxu3  ;;  %v4713_v20 = vadd.f32 %v10609_v27, %v4693_v29  ;;  %v6765_v29 = vld [vmem:[%s10625_s23 + $0xf8] sm:$0xff] }
 0x9b3   : > { %4855 = vmatpush.msra.mxu3 %v6765_v29  ;;  %v6753_v29 = vld [vmem:[%s10625_s23 + $0x98] sm:$0xff] }
 0x9b4   : > { %v10612_v17 = vpop.f32.mrf.mxu1  ;;  %v4730_v8 = vsel %vm4729_vm5, %v4713_v20, -inf }
 0x9b7   : > { %v4648_v39 = vpop.f32.mrf.mxu2 }
 0x9b8   : > { %v4694_v10 = vadd.f32 %v4648_v39, %v4598_v49  ;;  %v6763_v39 = vld [vmem:[%s10625_s23 + $0xe8] sm:$0xff] }
 0x9b9   : > { %4856 = vmatpush.msra.mxu3 %v6763_v39  ;;  %v4602_v39 = vadd.f32 %v10568_v56, %v10564_v37  ;;  %v4796_v56 = vld [vmem:[%s10625_s23 + $0x50] sm:$0xff] }
 0x9ba   : > { %v4714_v26 = vadd.f32 %v10609_v27, %v4694_v10  ;;  %v10615_v13 = vpop.f32.mrf.mxu3  ;;  %v6760_v10 = vld [vmem:[%s10625_s23 + $0xd0] sm:$0xff] }
 0x9bb   : > { %4837 = vmatpush.msrb.mxu2 %v6760_v10  ;;  %v4800_v10 = vld [vmem:[%s10625_s23 + $0x70] sm:$0xff] }
 0x9bc   : > { %v4731_v36 = vsel %vm4729_vm5, %v4714_v26, -inf  ;;  %v10628_v58 = vpop.f32.mrf.mxu1  ;;  %v6761_v26 = vld [vmem:[%s10625_s23 + $0xd8] sm:$0xff] }
 0x9bd   : > { %v10620_v32 = vmax.f32 %v4730_v8, %v4731_v36  ;;  %4857 = vmatpush.msra.mxu3 %v6761_v26  ;;  %v4601_v36 = vadd.f32 %v10559_v23, %v10555_v28  ;;  %v6755_v28 = vld [vmem:[%s10625_s23 + $0xa8] sm:$0xff]  ;;  %v6752_v23 = vld [vmem:[%s10625_s23 + $0x90] sm:$0xff]  ;;  %v4801_v26 = vld [vmem:[%s10625_s23 + $0x78] sm:$0xff] }
 0x9bf   : > { %v4651_v19 = vpop.f32.mrf.mxu2  ;;  %4858 = vmatpush.msra.mxu3 %v6759_v54  ;;  %v4798_v54 = vld [vmem:[%s10625_s23 + $0x60] sm:$0xff] }
 0x9c0   : > { %v4695_v38 = vadd.f32 %v4651_v19, %v4599_v31  ;;  %v6758_v19 = vld [vmem:[%s10625_s23 + $0xc0] sm:$0xff] }
 0x9c1   : > { %4838 = vmatpush.msrb.mxu2 %v6758_v19 }
 0x9c2   : > { %v10630_v61 = vpop.f32.mrf.mxu3  ;;  %v4715_v40 = vadd.f32 %v10609_v27, %v4695_v38 }
 0x9c4   : > { %v4733_v16 = vsel %vm4729_vm5, %v4715_v40, -inf  ;;  %v10640_v34 = vpop.f32.mrf.mxu1 }
 0x9c7   : > { %v4654_v63 = vpop.f32.mrf.mxu2 }
 0x9c8   : > { %v4696_v44 = vadd.f32 %v4654_v63, %v4600_v62  ;;  %v6756_v62 = vld [vmem:[%s10625_s23 + $0xb0] sm:$0xff]  ;;  %v6757_v63 = vld [vmem:[%s10625_s23 + $0xb8] sm:$0xff] }
 0x9c9   : > { %4839 = vmatpush.msrb.mxu2 %v6756_v62  ;;  %4859 = vmatpush.msra.mxu3 %v6757_v63  ;;  %v4797_v63 = vld [vmem:[%s10625_s23 + $0x58] sm:$0xff] }
 0x9ca   : > { %v4716_v49 = vadd.f32 %v10609_v27, %v4696_v44  ;;  %v10635_v45 = vpop.f32.mrf.mxu3  ;;  %v6754_v44 = vld [vmem:[%s10625_s23 + $0xa0] sm:$0xff] }
 0x9cb   : > { %4840 = vmatpush.msrb.mxu2 %v6754_v44  ;;  %4860 = vmatpush.msra.mxu3 %v6755_v28  ;;  %v4507_v44 = vadd.f32 %v10527_v21, %v10573_v22 }
 0x9cc   : > { %v4734_v20 = vsel %vm4729_vm5, %v4716_v49, -inf  ;;  %v6750_v49 = vld [vmem:[%s10625_s23 + $0x80] sm:$0xff] }
 0x9cd   : > { %v10645_v8 = vmax.f32 %v4733_v16, %v4734_v20  ;;  %4841 = vmatpush.msrb.mxu2 %v6752_v23  ;;  %4861 = vmatpush.msra.mxu3 %v6753_v29  ;;  %v4399_v16 = vpop.f32.mrf.mxu1  ;;  %v4321_v23 = vadd.f32 %v10507_v1, %v10501_v50  ;;  %v4322_v50 = vadd.f32 %v10522_v33, %v10518_v53  ;;  %v4790_v1 = vld [vmem:[%s10625_s23 + $0x20] sm:$0xff] }
 0x9cf   : > { %v4657_v31 = vpop.f32.mrf.mxu2  ;;  %4842 = vmatpush.msrb.mxu2 %v6750_v49  ;;  %4862 = vmatpush.msra.mxu3 %v6751_v30  ;;  %v4794_v49 = vld [vmem:[%s10625_s23 + $0x40] sm:$0xff]  ;;  %v4795_v30 = vld [vmem:[%s10625_s23 + $0x48] sm:$0xff]  ;;  %v4419_v21 = vadd.f32 %v4399_v16, %v4321_v23 }
 0x9d0   : > { %v4697_v38 = vadd.f32 %v4657_v31, %v4601_v36  ;;  %v4799_v31 = vld [vmem:[%s10625_s23 + $0x68] sm:$0xff] }
 0x9d1   : > { %4879 = vmatpush.msra.mxu2 %v4800_v10  ;;  %4899 = vmatpush.msrb.mxu3 %v4801_v26  ;;  %v4793_v10 = vld [vmem:[%s10625_s23 + $0x38] sm:$0xff]  ;;  %v4515_v16 = vadd.f32 %v10590_v60, %v4419_v21 }
 0x9d2   : > { %v10653_v40 = vpop.f32.mrf.mxu3  ;;  %v4717_v36 = vadd.f32 %v10609_v27, %v4697_v38 }
 0x9d3   : > { %4880 = vmatpush.msra.mxu2 %v4798_v54  ;;  %4900 = vmatpush.msrb.mxu3 %v4799_v31  ;;  %v4788_v31 = vld [vmem:[%s10625_s23 + $0x10] sm:$0xff]  ;;  %v4611_v53 = vadd.f32 %v10653_v40, %v4515_v16 }
 0x9d4   : > { %v4736_v38 = vsel %vm4729_vm5, %v4717_v36, -inf }
 0x9d5   : > { %4881 = vmatpush.msra.mxu2 %v4796_v56  ;;  %4901 = vmatpush.msrb.mxu3 %v4797_v63  ;;  %v4402_v26 = vpop.f32.mrf.mxu1  ;;  %v4508_v56 = vadd.f32 %v10539_v6, %v10582_v47  ;;  %v4786_v63 = vld [vmem:[%s10625_s23] sm:$0xff]  ;;  %v6892_v6 = vld [vmem:[%s10625_s23 + $0x470] sm:$0xff] }
 0x9d6   : > { %v4420_v54 = vadd.f32 %v4402_v26, %v4322_v50  ;;  %5327 = vmatpush.msrb.mxu1 %v6892_v6 }
 0x9d7   : > { %v4660_v20 = vpop.f32.mrf.mxu2  ;;  %4882 = vmatpush.msra.mxu2 %v4794_v49  ;;  %4902 = vmatpush.msrb.mxu3 %v4795_v30  ;;  %v4604_v33 = vadd.f32 %v10586_v46, %v4508_v56  ;;  %v4413_v30 = vadd.f32 %v10588_v51, %v10439_v3  ;;  %v6886_v51 = vld [vmem:[%s10625_s23 + $0x440] sm:$0xff] }
 0x9d8   : > { %v4698_v19 = vadd.f32 %v4660_v20, %v4602_v39  ;;  %v4603_v39 = vadd.f32 %v10577_v2, %v4507_v44  ;;  %v4792_v20 = vld [vmem:[%s10625_s23 + $0x30] sm:$0xff]  ;;  %v4787_v44 = vld [vmem:[%s10625_s23 + $0x8] sm:$0xff]  ;;  %v4516_v60 = vadd.f32 %v10596_v41, %v4420_v54  ;;  %v6882_v56 = vld [vmem:[%s10625_s23 + $0x420] sm:$0xff] }
 0x9d9   : > { %4883 = vmatpush.msra.mxu2 %v4792_v20  ;;  %4903 = vmatpush.msrb.mxu3 %v4793_v10  ;;  %v6888_v10 = vld [vmem:[%s10625_s23 + $0x450] sm:$0xff]  ;;  %v4509_v3 = vadd.f32 %v10545_v55, %v4413_v30 }
 0x9da   : > { %v4718_v62 = vadd.f32 %v10609_v27, %v4698_v19  ;;  %v4594_v37 = vpop.f32.mrf.mxu3  ;;  %v4791_v19 = vld [vmem:[%s10625_s23 + $0x28] sm:$0xff]  ;;  %v6884_v54 = vld [vmem:[%s10625_s23 + $0x430] sm:$0xff] }
 0x9db   : > { %4884 = vmatpush.msra.mxu2 %v4790_v1  ;;  %4904 = vmatpush.msrb.mxu3 %v4791_v19  ;;  %v4612_v47 = vadd.f32 %v4594_v37, %v4516_v60 }
 0x9dc   : > { %v4737_v28 = vsel %vm4729_vm5, %v4718_v62, -inf  ;;  %v4789_v62 = vld [vmem:[%s10625_s23 + $0x18] sm:$0xff] }
 0x9dd   : > { %v10677_v29 = vmax.f32 %v4736_v38, %v4737_v28  ;;  %4885 = vmatpush.msra.mxu2 %v4788_v31  ;;  %4905 = vmatpush.msrb.mxu3 %v4789_v62  ;;  %v4605_v31 = vadd.f32 %v10592_v15, %v4509_v3 }
 0x9df   : > { %v4663_v22 = vpop.f32.mrf.mxu2  ;;  %4886 = vmatpush.msra.mxu2 %v4786_v63  ;;  %4906 = vmatpush.msrb.mxu3 %v4787_v44  ;;  %v6880_v44 = vld [vmem:[%s10625_s23 + $0x410] sm:$0xff] }
 0x9e0   : > { %v4699_v36 = vadd.f32 %v4663_v22, %v4603_v39  ;;  %v6890_v39 = vld [vmem:[%s10625_s23 + $0x460] sm:$0xff] }
 0x9e1   : > { %5328 = vmatpush.msrb.mxu1 %v6890_v39 }
 0x9e2   : > { %v4687_v2 = vpop.f32.mrf.mxu3  ;;  %v4719_v23 = vadd.f32 %v10609_v27, %v4699_v36  ;;  %v4414_v36 = vadd.f32 %v10594_v7, %v10449_v24 }
 0x9e3   : > { %v4707_v38 = vadd.f32 %v4687_v2, %v4611_v53  ;;  %5329 = vmatpush.msrb.mxu1 %v6888_v10 }
 0x9e4   : > { %v4739_v22 = vsel %vm4729_vm5, %v4719_v23, -inf  ;;  %v4510_v63 = vadd.f32 %v10550_v9, %v4414_v36 }
 0x9e5   : > { %v4727_v21 = vadd.f32 %v10609_v27, %v4707_v38  ;;  %5330 = vmatpush.msrb.mxu1 %v6886_v51  ;;  %v6878_v38 = vld [vmem:[%s10625_s23 + $0x400] sm:$0xff] }
 0x9e6   : > { %v4606_v53 = vadd.f32 %v10598_v25, %v4510_v63 }
 0x9e7   : > { %v4666_v28 = vpop.f32.mrf.mxu2  ;;  %v4751_v50 = vsel %vm4729_vm5, %v4727_v21, -inf  ;;  %5331 = vmatpush.msrb.mxu1 %v6884_v54  ;;  %v6909_v21 = vld [vmem:[%s10625_s23 + $0x4e8] sm:$0xff] }
 0x9e8   : > { %v4700_v49 = vadd.f32 %v4666_v28, %v4604_v33 }
 0x9e9   : > { %5332 = vmatpush.msrb.mxu1 %v6882_v56 }
 0x9ea   : > { %v4720_v40 = vadd.f32 %v10609_v27, %v4700_v49  ;;  %v4690_v46 = vpop.f32.mrf.mxu3 }
 0x9eb   : > { %v4708_v41 = vadd.f32 %v4690_v46, %v4612_v47  ;;  %5333 = vmatpush.msrb.mxu1 %v6880_v44  ;;  %v6911_v47 = vld [vmem:[%s10625_s23 + $0x4f8] sm:$0xff]  ;;  %v6784_v44 = vld [vmem:[%s10625_s23 + $0x170] sm:$0xff] }
 0x9ec   : > { %v4740_v20 = vsel %vm4729_vm5, %v4720_v40, -inf }
 0x9ed   : > { %v4741_v37 = vmax.f32 %v4739_v22, %v4740_v20  ;;  %v4728_v26 = vadd.f32 %v10609_v27, %v4708_v41  ;;  %5334 = vmatpush.msrb.mxu1 %v6878_v38  ;;  %v4317_v22 = vadd.f32 %v10461_v48, %v10459_v4  ;;  %v4762_v20 = vrot.slane %v10620_v32, 1 }
 0x9ee   : > { %v4318_v4 = vadd.f32 %v10473_v14, %v10471_v0 }
 0x9ef   : > { %v4765_v1 = vrot.slane %v4741_v37, 1  ;;  %v4752_v19 = vsel %vm4729_vm5, %v4728_v26, -inf  ;;  %v4669_v2 = vpop.f32.mrf.mxu2  ;;  %5411 = vmatpush.msra.mxu1 %v6911_v47  ;;  %v4415_v26 = vadd.f32 %v10600_v35, %v4317_v22  ;;  %v4778_v48 = vmax.f32 %v10620_v32, %v4762_v20  ;;  %v6780_v47 = vld [vmem:[%s10625_s23 + $0x150] sm:$0xff]  ;;  %v6778_v22 = vld [vmem:[%s10625_s23 + $0x140] sm:$0xff]  ;;  %v6779_v20 = vld [vmem:[%s10625_s23 + $0x148] sm:$0xff] }
 0x9f0   : > { %v4753_v16 = vmax.f32 %v4751_v50, %v4752_v19  ;;  %v4701_v24 = vadd.f32 %v4669_v2, %v4605_v31  ;;  %v6905_v50 = vld [vmem:[%s10625_s23 + $0x4c8] sm:$0xff]  ;;  %v6903_v2 = vld [vmem:[%s10625_s23 + $0x4b8] sm:$0xff] }
 0x9f1   : > { %v4781_v62 = vmax.f32 %v4741_v37, %v4765_v1  ;;  %5412 = vmatpush.msra.mxu1 %v6909_v21  ;;  %v6907_v37 = vld [vmem:[%s10625_s23 + $0x4d8] sm:$0xff]  ;;  %v4511_v35 = vadd.f32 %v10557_v11, %v4415_v26  ;;  %v6901_v31 = vld [vmem:[%s10625_s23 + $0x4a8] sm:$0xff]  ;;  %v4928_v0 = vrot.slane %v4778_v48, 4  ;;  %v4992_v14 = vrot.slane %v4778_v48, 6 }
 0x9f2   : > { %v4769_v55 = vrot.slane %v4753_v16, 1  ;;  %v4721_v6 = vadd.f32 %v10609_v27, %v4701_v24  ;;  %v6899_v24 = vld [vmem:[%s10625_s23 + $0x498] sm:$0xff] }
 0x9f3   : > { %v5699_v33 = vrot.slane %v4781_v62, 4  ;;  %v5763_v60 = vrot.slane %v4781_v62, 6  ;;  %v5635_v30 = vrot.slane %v4781_v62, 2  ;;  %5413 = vmatpush.msra.mxu1 %v6907_v37 }
 0x9f4   : > { %v4785_v7 = vmax.f32 %v4753_v16, %v4769_v55  ;;  %v4742_v3 = vsel %vm4729_vm5, %v4721_v6, -inf  ;;  %v4416_v16 = vadd.f32 %v10612_v17, %v4318_v4  ;;  %v4821_v55 = vrot.slane %v4778_v48, 2 }
 0x9f5   : > { %5414 = vmatpush.msra.mxu1 %v6905_v50  ;;  %v6775_v50 = vld [vmem:[%s10625_s23 + $0x128] sm:$0xff] }
 0x9f6   : > { %v5572_v15 = vrot.slane %v4785_v7, 7  ;;  %v5700_v28 = vrot.slane %v4785_v7, 3  ;;  %v5764_v23 = vrot.slane %v4785_v7, 5  ;;  %v5636_v49 = vrot.slane %v4785_v7, 1 }
 0x9f7   : > { %v4672_v9 = vpop.f32.mrf.mxu2  ;;  %5415 = vmatpush.msra.mxu1 %v6903_v2  ;;  %v4512_v17 = vadd.f32 %v10566_v43, %v4416_v16  ;;  %v6782_v43 = vld [vmem:[%s10625_s23 + $0x160] sm:$0xff]  ;;  %v6771_v16 = vld [vmem:[%s10625_s23 + $0x108] sm:$0xff] }
 0x9f8   : > { %v4702_v40 = vadd.f32 %v4672_v9, %v4606_v53  ;;  %v10725_v25 = vsel %vm4823_vm6, %v5572_v15, %v4781_v62  ;;  %v10728_v46 = vsel %vm4823_vm6, %v5700_v28, %v5699_v33  ;;  %v10731_v39 = vsel %vm4823_vm6, %v5764_v23, %v5763_v60  ;;  %v6785_v53 = vld [vmem:[%s10625_s23 + $0x178] sm:$0xff]  ;;  %v6783_v28 = vld [vmem:[%s10625_s23 + $0x168] sm:$0xff] }
 0x9f9   : > { %v10735_v41 = vsel %vm4823_vm6, %v5636_v49, %v5635_v30  ;;  %v4607_v62 = vadd.f32 %v10602_v12, %v4511_v35  ;;  %5416 = vmatpush.msra.mxu1 %v6901_v31  ;;  %v4608_v15 = vadd.f32 %v10615_v13, %v4512_v17  ;;  %v6897_v23 = vld [vmem:[%s10625_s23 + $0x488] sm:$0xff]  ;;  %v6781_v30 = vld [vmem:[%s10625_s23 + $0x158] sm:$0xff]  ;;  %v4319_v13 = vadd.f32 %v10485_v18, %v10483_v5  ;;  %v6770_v35 = vld [vmem:[%s10625_s23 + $0x100] sm:$0xff] }
 0x9fa   : > { %v4722_v10 = vadd.f32 %v10609_v27, %v4702_v40  ;;  %v4763_v40 = vrot.slane %v10645_v8, 1  ;;  %v4320_v18 = vadd.f32 %v10496_v52, %v10494_v57  ;;  %v6772_v52 = vld [vmem:[%s10625_s23 + $0x110] sm:$0xff] }
 0x9fb   : > { %5417 = vmatpush.msra.mxu1 %v6899_v24  ;;  %v6801_v24 = vld [vmem:[%s10625_s23 + $0x1e8] sm:$0xff] }
 0x9fc   : > { %v4743_v51 = vsel %vm4729_vm5, %v4722_v10, -inf  ;;  %v4417_v10 = vadd.f32 %v10628_v58, %v4319_v13  ;;  %v6774_v58 = vld [vmem:[%s10625_s23 + $0x120] sm:$0xff]  ;;  %v4418_v57 = vadd.f32 %v10640_v34, %v4320_v18 }
 0x9fd   : > { %v4744_v36 = vmax.f32 %v4742_v3, %v4743_v51  ;;  %5418 = vmatpush.msra.mxu1 %v6897_v23  ;;  %v6776_v3 = vld [vmem:[%s10625_s23 + $0x130] sm:$0xff]  ;;  %v6777_v51 = vld [vmem:[%s10625_s23 + $0x138] sm:$0xff]  ;;  %v6792_v13 = vld [vmem:[%s10625_s23 + $0x1a0] sm:$0xff] }
 0x9ff   : > { %v4766_v1 = vrot.slane %v4744_v36, 1  ;;  %v4675_v19 = vpop.f32.mrf.mxu2 }
 0xa00   : > { %v4703_v7 = vadd.f32 %v4675_v19, %v4607_v62  ;;  %v6802_v62 = vld [vmem:[%s10625_s23 + $0x1f0] sm:$0xff] }
 0xa01   : > { %v4782_v54 = vmax.f32 %v4744_v36, %v4766_v1  ;;  %v4779_v36 = vmax.f32 %v10645_v8, %v4763_v40  ;;  %v4513_v1 = vadd.f32 %v10575_v59, %v4417_v10  ;;  %v6773_v8 = vld [vmem:[%s10625_s23 + $0x118] sm:$0xff] }
 0xa02   : > { %v4723_v6 = vadd.f32 %v10609_v27, %v4703_v7 }
 0xa03   : > { %v4822_v32 = vrot.slane %v4782_v54, 1  ;;  %v4867_v56 = vrot.slane %v4782_v54, 7  ;;  %v4929_v63 = vrot.slane %v4782_v54, 3  ;;  %v4993_v11 = vrot.slane %v4782_v54, 5 }
 0xa04   : > { %v4745_v37 = vsel %vm4729_vm5, %v4723_v6, -inf  ;;  %v4609_v2 = vadd.f32 %v10630_v61, %v4513_v1  ;;  %v5121_v54 = vrot.slane %v4779_v36, 2  ;;  %v5185_v31 = vrot.slane %v4779_v36, 4  ;;  %v6800_v61 = vld [vmem:[%s10625_s23 + $0x1e0] sm:$0xff]  ;;  %v6817_v1 = vld [vmem:[%s10625_s23 + $0x258] sm:$0xff] }
 0xa05   : > { %v4824_v12 = vsel %vm4823_vm6, %v4822_v32, %v4821_v55  ;;  %v4868_v33 = vsel %vm4823_vm6, %v4867_v56, %v4778_v48  ;;  %v10761_v60 = vsel %vm4823_vm6, %v4929_v63, %v4928_v0  ;;  %v10764_v38 = vsel %vm4823_vm6, %v4993_v11, %v4992_v14  ;;  %v6803_v55 = vld [vmem:[%s10625_s23 + $0x1f8] sm:$0xff] }
 0xa06   : > { %6766 = vmatmul.msk.f32.vlgmr.msrb.gmra.mxu2 %vm4729_vm5, %v4824_v12  ;;  %6767 = vmatmul.msk.f32.vlgmr.msra.gmra.mxu3 %vm4729_vm5, %v4824_v12  ;;  %v4514_v32 = vadd.f32 %v10584_v42, %v4418_v57  ;;  %v5249_v63 = vrot.slane %v4779_v36, 6  ;;  %v6798_v12 = vld [vmem:[%s10625_s23 + $0x1d0] sm:$0xff]  ;;  %v4764_v6 = vrot.slane %v10677_v29, 1  ;;  %v6944_v57 = vld [vmem:[%s10625_s23 + $0x5e0] sm:$0xff] }
 0xa07   : > { %4941 = vmatpush.msrb.mxu2 %v6784_v44  ;;  %4961 = vmatpush.msra.mxu3 %v6785_v53  ;;  %v4678_v49 = vpop.f32.mrf.mxu2 }
 0xa08   : > { %v4704_v9 = vadd.f32 %v4678_v49, %v4608_v15  ;;  %v4610_v42 = vadd.f32 %v10635_v45, %v4514_v32  ;;  %v6796_v45 = vld [vmem:[%s10625_s23 + $0x1c0] sm:$0xff]  ;;  %v6794_v49 = vld [vmem:[%s10625_s23 + $0x1b0] sm:$0xff] }
 0xa09   : > { %4942 = vmatpush.msrb.mxu2 %v6782_v43  ;;  %4962 = vmatpush.msra.mxu3 %v6783_v28  ;;  %v6797_v28 = vld [vmem:[%s10625_s23 + $0x1c8] sm:$0xff]  ;;  %v6936_v32 = vld [vmem:[%s10625_s23 + $0x5a0] sm:$0xff] }
 0xa0a   : > { %v4724_v21 = vadd.f32 %v10609_v27, %v4704_v9 }
 0xa0b   : > { %4943 = vmatpush.msrb.mxu2 %v6780_v47  ;;  %4963 = vmatpush.msra.mxu3 %v6781_v30 }
 0xa0c   : > { %v4746_v26 = vsel %vm4729_vm5, %v4724_v21, -inf  ;;  %v6790_v21 = vld [vmem:[%s10625_s23 + $0x190] sm:$0xff] }
 0xa0d   : > { %v4747_v5 = vmax.f32 %v4745_v37, %v4746_v26  ;;  %4944 = vmatpush.msrb.mxu2 %v6778_v22  ;;  %4964 = vmatpush.msra.mxu3 %v6779_v20  ;;  %v6791_v22 = vld [vmem:[%s10625_s23 + $0x198] sm:$0xff]  ;;  %v10838_v20 = vmax.f32 %v10677_v29, %v4764_v6  ;;  %v6788_v37 = vld [vmem:[%s10625_s23 + $0x180] sm:$0xff]  ;;  %v6789_v26 = vld [vmem:[%s10625_s23 + $0x188] sm:$0xff] }
 0xa0e   : > { %6768 = vmatmul.msk.f32.vlgmr.msra.gmra.mxu2 %vm4729_vm5, %v4868_v33  ;;  %6769 = vmatmul.msk.f32.vlgmr.msrb.gmra.mxu3 %vm4729_vm5, %v4868_v33  ;;  %v6799_v33 = vld [vmem:[%s10625_s23 + $0x1d8] sm:$0xff]  ;;  %v6833_v6 = vld [vmem:[%s10625_s23 + $0x2c8] sm:$0xff] }
 0xa0f   : > { %v4767_v4 = vrot.slane %v4747_v5, 1  ;;  %4945 = vmatpush.msrb.mxu2 %v6776_v3  ;;  %4965 = vmatpush.msra.mxu3 %v6777_v51  ;;  %v4681_v48 = vpop.f32.mrf.mxu2  ;;  %v6820_v3 = vld [vmem:[%s10625_s23 + $0x270] sm:$0xff]  ;;  %v6821_v51 = vld [vmem:[%s10625_s23 + $0x278] sm:$0xff]  ;;  %v5442_v18 = vrot.slane %v10838_v20, 4 }
 0xa10   : > { %v4705_v56 = vadd.f32 %v4681_v48, %v4609_v2  ;;  %v6812_v2 = vld [vmem:[%s10625_s23 + $0x230] sm:$0xff] }
 0xa11   : > { %v4783_v19 = vmax.f32 %v4747_v5, %v4767_v4  ;;  %4946 = vmatpush.msrb.mxu2 %v6774_v58  ;;  %4966 = vmatpush.msra.mxu3 %v6775_v50  ;;  %v6819_v58 = vld [vmem:[%s10625_s23 + $0x268] sm:$0xff]  ;;  %v6946_v4 = vld [vmem:[%s10625_s23 + $0x5f0] sm:$0xff] }
 0xa12   : > { %v4725_v15 = vadd.f32 %v10609_v27, %v4705_v56  ;;  %v6806_v56 = vld [vmem:[%s10625_s23 + $0x200] sm:$0xff] }
 0xa13   : > { %4947 = vmatpush.msrb.mxu2 %v6772_v52  ;;  %4967 = vmatpush.msra.mxu3 %v6773_v8  ;;  %v5058_v59 = vrot.slane %v4783_v19, 7  ;;  %v5122_v0 = vrot.slane %v4783_v19, 1  ;;  %v5186_v34 = vrot.slane %v4783_v19, 3  ;;  %v5250_v14 = vrot.slane %v4783_v19, 5  ;;  %v6814_v52 = vld [vmem:[%s10625_s23 + $0x240] sm:$0xff]  ;;  %v6815_v8 = vld [vmem:[%s10625_s23 + $0x248] sm:$0xff] }
 0xa14   : > { %v4748_v9 = vsel %vm4729_vm5, %v4725_v15, -inf  ;;  %v6942_v19 = vld [vmem:[%s10625_s23 + $0x5d0] sm:$0xff] }
 0xa15   : > { %4948 = vmatpush.msrb.mxu2 %v6770_v35  ;;  %4968 = vmatpush.msra.mxu3 %v6771_v16  ;;  %v10806_v11 = vsel %vm4823_vm6, %v5058_v59, %v4779_v36  ;;  %v10809_v17 = vsel %vm4823_vm6, %v5122_v0, %v5121_v54  ;;  %v10812_v7 = vsel %vm4823_vm6, %v5186_v34, %v5185_v31  ;;  %v6818_v36 = vld [vmem:[%s10625_s23 + $0x260] sm:$0xff]  ;;  %v6813_v35 = vld [vmem:[%s10625_s23 + $0x238] sm:$0xff]  ;;  %v6938_v59 = vld [vmem:[%s10625_s23 + $0x5b0] sm:$0xff] }
 0xa16   : > { %v10816_v44 = vsel %vm4823_vm6, %v5250_v14, %v5249_v63  ;;  %6786 = vmatmul.msk.f32.vlgmr.msrb.gmra.mxu2 %vm4729_vm5, %v10761_v60  ;;  %6787 = vmatmul.msk.f32.vlgmr.msra.gmra.mxu3 %vm4729_vm5, %v10761_v60  ;;  %v6795_v60 = vld [vmem:[%s10625_s23 + $0x1b8] sm:$0xff]  ;;  %v6940_v16 = vld [vmem:[%s10625_s23 + $0x5c0] sm:$0xff]  ;;  %v6808_v0 = vld [vmem:[%s10625_s23 + $0x210] sm:$0xff] }
 0xa17   : > { %5005 = vmatpush.msra.mxu2 %v6802_v62  ;;  %5025 = vmatpush.msrb.mxu3 %v6803_v55  ;;  %v4684_v53 = vpop.f32.mrf.mxu2  ;;  %v6810_v31 = vld [vmem:[%s10625_s23 + $0x220] sm:$0xff]  ;;  %v6811_v62 = vld [vmem:[%s10625_s23 + $0x228] sm:$0xff]  ;;  %v5378_v55 = vrot.slane %v10838_v20, 2  ;;  %v6809_v14 = vld [vmem:[%s10625_s23 + $0x218] sm:$0xff] }
 0xa18   : > { %v4706_v43 = vadd.f32 %v4684_v53, %v4610_v42  ;;  %v6807_v63 = vld [vmem:[%s10625_s23 + $0x208] sm:$0xff]  ;;  %v6839_v42 = vld [vmem:[%s10625_s23 + $0x2f8] sm:$0xff]  ;;  %v6932_v53 = vld [vmem:[%s10625_s23 + $0x580] sm:$0xff] }
 0xa19   : > { %5006 = vmatpush.msra.mxu2 %v6800_v61  ;;  %5026 = vmatpush.msrb.mxu3 %v6801_v24  ;;  %v6934_v61 = vld [vmem:[%s10625_s23 + $0x590] sm:$0xff] }
 0xa1a   : > { %v4726_v23 = vadd.f32 %v10609_v27, %v4706_v43  ;;  %v6793_v27 = vld [vmem:[%s10625_s23 + $0x1a8] sm:$0xff]  ;;  %v6838_v24 = vld [vmem:[%s10625_s23 + $0x2f0] sm:$0xff]  ;;  %v6965_v43 = vld [vmem:[%s10625_s23 + $0x678] sm:$0xff] }
 0xa1b   : > { %5007 = vmatpush.msra.mxu2 %v6798_v12  ;;  %5027 = vmatpush.msrb.mxu3 %v6799_v33  ;;  %v6836_v12 = vld [vmem:[%s10625_s23 + $0x2e0] sm:$0xff]  ;;  %v6837_v33 = vld [vmem:[%s10625_s23 + $0x2e8] sm:$0xff] }
 0xa1c   : > { %v4749_v47 = vsel %vm4729_vm5, %v4726_v23, -inf  ;;  %v6963_v23 = vld [vmem:[%s10625_s23 + $0x668] sm:$0xff] }
 0xa1d   : > { %5008 = vmatpush.msra.mxu2 %v6796_v45  ;;  %5028 = vmatpush.msrb.mxu3 %v6797_v28  ;;  %v4750_v30 = vmax.f32 %v4748_v9, %v4749_v47  ;;  %v5506_v45 = vrot.slane %v10838_v20, 6  ;;  %v6834_v28 = vld [vmem:[%s10625_s23 + $0x2d0] sm:$0xff]  ;;  %v6961_v9 = vld [vmem:[%s10625_s23 + $0x658] sm:$0xff] }
 0xa1e   : > { %v6830_v47 = vld [vmem:[%s10625_s23 + $0x2b0] sm:$0xff] }
 0xa1f   : > { %5009 = vmatpush.msra.mxu2 %v6794_v49  ;;  %5029 = vmatpush.msrb.mxu3 %v6795_v60  ;;  %v4768_v40 = vrot.slane %v4750_v30, 1  ;;  %v6832_v60 = vld [vmem:[%s10625_s23 + $0x2c0] sm:$0xff] }
 0xa21   : > { %5010 = vmatpush.msra.mxu2 %v6792_v13  ;;  %5030 = vmatpush.msrb.mxu3 %v6793_v27  ;;  %v10840_v10 = vmax.f32 %v4750_v30, %v4768_v40  ;;  %v6831_v30 = vld [vmem:[%s10625_s23 + $0x2b8] sm:$0xff]  ;;  %v6959_v13 = vld [vmem:[%s10625_s23 + $0x648] sm:$0xff]  ;;  %v6828_v27 = vld [vmem:[%s10625_s23 + $0x2a0] sm:$0xff] }
 0xa22   : > { %v6829_v40 = vld [vmem:[%s10625_s23 + $0x2a8] sm:$0xff] }
 0xa23   : > { %5011 = vmatpush.msra.mxu2 %v6790_v21  ;;  %5031 = vmatpush.msrb.mxu3 %v6791_v22  ;;  %v5315_v5 = vrot.slane %v10840_v10, 7  ;;  %v5443_v29 = vrot.slane %v10840_v10, 3  ;;  %v5379_v54 = vrot.slane %v10840_v10, 1  ;;  %v5507_v15 = vrot.slane %v10840_v10, 5  ;;  %v6957_v21 = vld [vmem:[%s10625_s23 + $0x638] sm:$0xff]  ;;  %v6826_v22 = vld [vmem:[%s10625_s23 + $0x290] sm:$0xff] }
 0xa24   : > { %v6955_v10 = vld [vmem:[%s10625_s23 + $0x628] sm:$0xff] }
 0xa25   : > { %5012 = vmatpush.msra.mxu2 %v6788_v37  ;;  %5032 = vmatpush.msrb.mxu3 %v6789_v26  ;;  %v10857_v50 = vsel %vm4823_vm6, %v5315_v5, %v10838_v20  ;;  %v10861_v48 = vsel %vm4823_vm6, %v5443_v29, %v5442_v18  ;;  %v10881_v34 = vsel %vm4823_vm6, %v5379_v54, %v5378_v55  ;;  %v6827_v20 = vld [vmem:[%s10625_s23 + $0x298] sm:$0xff]  ;;  %v6824_v37 = vld [vmem:[%s10625_s23 + $0x280] sm:$0xff]  ;;  %v6825_v26 = vld [vmem:[%s10625_s23 + $0x288] sm:$0xff] }
 0xa26   : > { %6804 = vmatmul.msk.f32.vlgmr.msra.gmra.mxu2 %vm4729_vm5, %v10764_v38  ;;  %6805 = vmatmul.msk.f32.vlgmr.msrb.gmra.mxu3 %vm4729_vm5, %v10764_v38  ;;  %v6816_v38 = vld [vmem:[%s10625_s23 + $0x250] sm:$0xff]  ;;  %v10906_v49 = vsel %vm4823_vm6, %v5507_v15, %v5506_v45  ;;  %v6857_v5 = vld [vmem:[%s10625_s23 + $0x378] sm:$0xff]  ;;  %v6951_v29 = vld [vmem:[%s10625_s23 + $0x608] sm:$0xff] }
 0xa27   : > { %5070 = vmatpush.msrb.mxu2 %v6820_v3  ;;  %5090 = vmatpush.msra.mxu3 %v6821_v51  ;;  %v6953_v3 = vld [vmem:[%s10625_s23 + $0x618] sm:$0xff]  ;;  %v6856_v51 = vld [vmem:[%s10625_s23 + $0x370] sm:$0xff]  ;;  %v6854_v18 = vld [vmem:[%s10625_s23 + $0x360] sm:$0xff] }
 0xa28   : > { %6894 = vmatmul.msk.f32.vlgmr.msrb.gmra.mxu1 %vm4729_vm5, %v10857_v50  ;;  %v6992_v54 = vld [vmem:[%s10625_s23 + $0x730] sm:$0xff]  ;;  %v6990_v55 = vld [vmem:[%s10625_s23 + $0x720] sm:$0xff]  ;;  %v6869_v15 = vld [vmem:[%s10625_s23 + $0x3c8] sm:$0xff] }
 0xa29   : > { %5071 = vmatpush.msrb.mxu2 %v6818_v36  ;;  %5091 = vmatpush.msra.mxu3 %v6819_v58  ;;  %v6855_v36 = vld [vmem:[%s10625_s23 + $0x368] sm:$0xff]  ;;  %v7000_v58 = vld [vmem:[%s10625_s23 + $0x770] sm:$0xff] }
 0xa2a   : > { %5519 = vmatpush.msrb.mxu1 %v6946_v4  ;;  %v6852_v4 = vld [vmem:[%s10625_s23 + $0x350] sm:$0xff] }
 0xa2b   : > { %5072 = vmatpush.msrb.mxu2 %v6816_v38  ;;  %5092 = vmatpush.msra.mxu3 %v6817_v1  ;;  %v6853_v38 = vld [vmem:[%s10625_s23 + $0x358] sm:$0xff]  ;;  %v6850_v1 = vld [vmem:[%s10625_s23 + $0x340] sm:$0xff]  ;;  %v6866_v45 = vld [vmem:[%s10625_s23 + $0x3b0] sm:$0xff] }
 0xa2c   : > { %5520 = vmatpush.msrb.mxu1 %v6944_v57  ;;  %v6851_v57 = vld [vmem:[%s10625_s23 + $0x348] sm:$0xff] }
 0xa2d   : > { %5073 = vmatpush.msrb.mxu2 %v6814_v52  ;;  %5093 = vmatpush.msra.mxu3 %v6815_v8  ;;  %v6996_v52 = vld [vmem:[%s10625_s23 + $0x750] sm:$0xff] }
 0xa2e   : > { %5521 = vmatpush.msrb.mxu1 %v6942_v19  ;;  %v6848_v8 = vld [vmem:[%s10625_s23 + $0x330] sm:$0xff]  ;;  %v6849_v19 = vld [vmem:[%s10625_s23 + $0x338] sm:$0xff] }
 0xa2f   : > { %5074 = vmatpush.msrb.mxu2 %v6812_v2  ;;  %5094 = vmatpush.msra.mxu3 %v6813_v35  ;;  %v6994_v2 = vld [vmem:[%s10625_s23 + $0x740] sm:$0xff] }
 0xa30   : > { %5522 = vmatpush.msrb.mxu1 %v6940_v16  ;;  %v6846_v35 = vld [vmem:[%s10625_s23 + $0x320] sm:$0xff]  ;;  %v6847_v16 = vld [vmem:[%s10625_s23 + $0x328] sm:$0xff] }
 0xa31   : > { %5075 = vmatpush.msrb.mxu2 %v6810_v31  ;;  %5095 = vmatpush.msra.mxu3 %v6811_v62  ;;  %v6844_v31 = vld [vmem:[%s10625_s23 + $0x310] sm:$0xff]  ;;  %v6845_v62 = vld [vmem:[%s10625_s23 + $0x318] sm:$0xff] }
 0xa32   : > { %6913 = vmatmul.msk.f32.vlgmr.msra.gmra.mxu1 %vm4729_vm5, %v10881_v34 }
 0xa33   : > { %5523 = vmatpush.msrb.mxu1 %v6938_v59  ;;  %5076 = vmatpush.msrb.mxu2 %v6808_v0  ;;  %v6842_v59 = vld [vmem:[%s10625_s23 + $0x300] sm:$0xff]  ;;  %v6843_v0 = vld [vmem:[%s10625_s23 + $0x308] sm:$0xff] }
 0xa34   : > { %5096 = vmatpush.msra.mxu3 %v6809_v14  ;;  %v6988_v14 = vld [vmem:[%s10625_s23 + $0x710] sm:$0xff] }
 0xa35   : > { %5524 = vmatpush.msrb.mxu1 %v6936_v32  ;;  %5077 = vmatpush.msrb.mxu2 %v6806_v56  ;;  %v6874_v32 = vld [vmem:[%s10625_s23 + $0x3f0] sm:$0xff]  ;;  %v6875_v56 = vld [vmem:[%s10625_s23 + $0x3f8] sm:$0xff] }
 0xa36   : > { %5097 = vmatpush.msra.mxu3 %v6807_v63  ;;  %6822 = vmatmul.msk.f32.vlgmr.msrb.gmra.mxu2 %vm4729_vm5, %v10806_v11  ;;  %v6986_v63 = vld [vmem:[%s10625_s23 + $0x700] sm:$0xff] }
 0xa37   : > { %5525 = vmatpush.msrb.mxu1 %v6934_v61  ;;  %6823 = vmatmul.msk.f32.vlgmr.msra.gmra.mxu3 %vm4729_vm5, %v10806_v11  ;;  %v6835_v11 = vld [vmem:[%s10625_s23 + $0x2d8] sm:$0xff]  ;;  %v6872_v61 = vld [vmem:[%s10625_s23 + $0x3e0] sm:$0xff] }
 0xa38   : > { %5134 = vmatpush.msra.mxu2 %v6838_v24  ;;  %5154 = vmatpush.msrb.mxu3 %v6839_v42  ;;  %v6873_v24 = vld [vmem:[%s10625_s23 + $0x3e8] sm:$0xff]  ;;  %v7019_v42 = vld [vmem:[%s10625_s23 + $0x7f8] sm:$0xff] }
 0xa39   : > { %5526 = vmatpush.msrb.mxu1 %v6932_v53  ;;  %v6870_v53 = vld [vmem:[%s10625_s23 + $0x3d0] sm:$0xff] }
 0xa3a   : > { %5135 = vmatpush.msra.mxu2 %v6836_v12  ;;  %5155 = vmatpush.msrb.mxu3 %v6837_v33  ;;  %v6871_v12 = vld [vmem:[%s10625_s23 + $0x3d8] sm:$0xff]  ;;  %v6868_v33 = vld [vmem:[%s10625_s23 + $0x3c0] sm:$0xff] }
 0xa3b   : > { %5604 = vmatpush.msra.mxu1 %v6965_v43  ;;  %v7015_v43 = vld [vmem:[%s10625_s23 + $0x7d8] sm:$0xff] }
 0xa3c   : > { %6948 = vmatmul.msk.f32.vlgmr.msrb.gmra.mxu1 %vm4729_vm5, %v10906_v49  ;;  %5136 = vmatpush.msra.mxu2 %v6834_v28  ;;  %v6867_v28 = vld [vmem:[%s10625_s23 + $0x3b8] sm:$0xff] }
 0xa3d   : > { %5156 = vmatpush.msrb.mxu3 %v6835_v11  ;;  %5605 = vmatpush.msra.mxu1 %v6963_v23  ;;  %v7013_v11 = vld [vmem:[%s10625_s23 + $0x7c8] sm:$0xff]  ;;  %v6864_v23 = vld [vmem:[%s10625_s23 + $0x3a0] sm:$0xff] }
 0xa3e   : > { %5137 = vmatpush.msra.mxu2 %v6832_v60  ;;  %v6865_v60 = vld [vmem:[%s10625_s23 + $0x3a8] sm:$0xff] }
 0xa3f   : > { %5157 = vmatpush.msrb.mxu3 %v6833_v6  ;;  %5606 = vmatpush.msra.mxu1 %v6961_v9  ;;  %v7011_v6 = vld [vmem:[%s10625_s23 + $0x7b8] sm:$0xff]  ;;  %v6862_v9 = vld [vmem:[%s10625_s23 + $0x390] sm:$0xff] }
 0xa40   : > { %5138 = vmatpush.msra.mxu2 %v6830_v47  ;;  %v6863_v47 = vld [vmem:[%s10625_s23 + $0x398] sm:$0xff] }
 0xa41   : > { %5158 = vmatpush.msrb.mxu3 %v6831_v30  ;;  %5607 = vmatpush.msra.mxu1 %v6959_v13  ;;  %v7009_v30 = vld [vmem:[%s10625_s23 + $0x7a8] sm:$0xff]  ;;  %v6860_v13 = vld [vmem:[%s10625_s23 + $0x380] sm:$0xff] }
 0xa42   : > { %5139 = vmatpush.msra.mxu2 %v6828_v27  ;;  %v6861_v27 = vld [vmem:[%s10625_s23 + $0x388] sm:$0xff] }
 0xa43   : > { %5159 = vmatpush.msrb.mxu3 %v6829_v40  ;;  %5608 = vmatpush.msra.mxu1 %v6957_v21  ;;  %v7007_v40 = vld [vmem:[%s10625_s23 + $0x798] sm:$0xff] }
 0xa44   : > { %5140 = vmatpush.msra.mxu2 %v6826_v22  ;;  %v6893_v21 = vld [vmem:[%s10625_s23 + $0x478] sm:$0xff]  ;;  %v6910_v22 = vld [vmem:[%s10625_s23 + $0x4f0] sm:$0xff] }
 0xa45   : > { %5160 = vmatpush.msrb.mxu3 %v6827_v20  ;;  %5609 = vmatpush.msra.mxu1 %v6955_v10  ;;  %v7005_v20 = vld [vmem:[%s10625_s23 + $0x788] sm:$0xff] }
 0xa46   : > { %5141 = vmatpush.msra.mxu2 %v6824_v37  ;;  %v6891_v10 = vld [vmem:[%s10625_s23 + $0x468] sm:$0xff]  ;;  %v6908_v37 = vld [vmem:[%s10625_s23 + $0x4e0] sm:$0xff] }
 0xa47   : > { %5161 = vmatpush.msrb.mxu3 %v6825_v26  ;;  %5610 = vmatpush.msra.mxu1 %v6953_v3  ;;  %v6889_v26 = vld [vmem:[%s10625_s23 + $0x458] sm:$0xff]  ;;  %v6906_v3 = vld [vmem:[%s10625_s23 + $0x4d0] sm:$0xff] }
 0xa48   : > { %6840 = vmatmul.msk.f32.vlgmr.msra.gmra.mxu2 %vm4729_vm5, %v10809_v17  ;;  %6841 = vmatmul.msk.f32.vlgmr.msrb.gmra.mxu3 %vm4729_vm5, %v10809_v17  ;;  %v6998_v17 = vld [vmem:[%s10625_s23 + $0x760] sm:$0xff] }
 0xa49   : > { %5198 = vmatpush.msrb.mxu2 %v6856_v51  ;;  %5218 = vmatpush.msra.mxu3 %v6857_v5  ;;  %v6887_v51 = vld [vmem:[%s10625_s23 + $0x448] sm:$0xff]  ;;  %v6885_v5 = vld [vmem:[%s10625_s23 + $0x438] sm:$0xff] }
 0xa4a   : > { %5611 = vmatpush.msra.mxu1 %v6951_v29  ;;  %v6902_v29 = vld [vmem:[%s10625_s23 + $0x4b0] sm:$0xff] }
 0xa4b   : > { %5199 = vmatpush.msrb.mxu2 %v6854_v18  ;;  %5219 = vmatpush.msra.mxu3 %v6855_v36  ;;  %v6883_v18 = vld [vmem:[%s10625_s23 + $0x428] sm:$0xff]  ;;  %v6900_v36 = vld [vmem:[%s10625_s23 + $0x4a0] sm:$0xff] }
 0xa4c   : > { %6967 = vmatmul.msk.f32.vlgmr.msra.gmra.mxu1 %vm4729_vm5, %v10725_v25 }
 0xa4d   : > { %5712 = vmatpush.msrb.mxu1 %v7000_v58  ;;  %5200 = vmatpush.msrb.mxu2 %v6852_v4  ;;  %v6881_v58 = vld [vmem:[%s10625_s23 + $0x418] sm:$0xff]  ;;  %v6898_v4 = vld [vmem:[%s10625_s23 + $0x490] sm:$0xff] }
 0xa4e   : > { %5220 = vmatpush.msra.mxu3 %v6853_v38  ;;  %v6879_v38 = vld [vmem:[%s10625_s23 + $0x408] sm:$0xff] }
 0xa4f   : > { %5713 = vmatpush.msrb.mxu1 %v6998_v17  ;;  %5201 = vmatpush.msrb.mxu2 %v6850_v1  ;;  %v6896_v17 = vld [vmem:[%s10625_s23 + $0x480] sm:$0xff]  ;;  %v6928_v1 = vld [vmem:[%s10625_s23 + $0x570] sm:$0xff] }
 0xa50   : > { %5221 = vmatpush.msra.mxu3 %v6851_v57  ;;  %v6929_v57 = vld [vmem:[%s10625_s23 + $0x578] sm:$0xff] }
 0xa51   : > { %5714 = vmatpush.msrb.mxu1 %v6996_v52  ;;  %5202 = vmatpush.msrb.mxu2 %v6848_v8  ;;  %v6926_v52 = vld [vmem:[%s10625_s23 + $0x560] sm:$0xff]  ;;  %v6927_v8 = vld [vmem:[%s10625_s23 + $0x568] sm:$0xff] }
 0xa52   : > { %5222 = vmatpush.msra.mxu3 %v6849_v19  ;;  %v6924_v19 = vld [vmem:[%s10625_s23 + $0x550] sm:$0xff] }
 0xa53   : > { %5715 = vmatpush.msrb.mxu1 %v6994_v2  ;;  %5203 = vmatpush.msrb.mxu2 %v6846_v35  ;;  %v6925_v2 = vld [vmem:[%s10625_s23 + $0x558] sm:$0xff]  ;;  %v6922_v35 = vld [vmem:[%s10625_s23 + $0x540] sm:$0xff] }
 0xa54   : > { %5223 = vmatpush.msra.mxu3 %v6847_v16  ;;  %v6923_v16 = vld [vmem:[%s10625_s23 + $0x548] sm:$0xff] }
 0xa55   : > { %5716 = vmatpush.msrb.mxu1 %v6992_v54  ;;  %5204 = vmatpush.msrb.mxu2 %v6844_v31  ;;  %v6918_v54 = vld [vmem:[%s10625_s23 + $0x520] sm:$0xff]  ;;  %v6919_v31 = vld [vmem:[%s10625_s23 + $0x528] sm:$0xff] }
 0xa56   : > { %5224 = vmatpush.msra.mxu3 %v6845_v62  ;;  %v6916_v62 = vld [vmem:[%s10625_s23 + $0x510] sm:$0xff] }
 0xa57   : > { %5717 = vmatpush.msrb.mxu1 %v6990_v55  ;;  %5205 = vmatpush.msrb.mxu2 %v6842_v59  ;;  %v6917_v55 = vld [vmem:[%s10625_s23 + $0x518] sm:$0xff]  ;;  %v6914_v59 = vld [vmem:[%s10625_s23 + $0x500] sm:$0xff] }
 0xa58   : > { %5225 = vmatpush.msra.mxu3 %v6843_v0  ;;  %6858 = vmatmul.msk.f32.vlgmr.msrb.gmra.mxu2 %vm4729_vm5, %v10812_v7  ;;  %v6915_v0 = vld [vmem:[%s10625_s23 + $0x508] sm:$0xff] }
 0xa59   : > { %5718 = vmatpush.msrb.mxu1 %v6988_v14  ;;  %6859 = vmatmul.msk.f32.vlgmr.msra.gmra.mxu3 %vm4729_vm5, %v10812_v7  ;;  %v7017_v7 = vld [vmem:[%s10625_s23 + $0x7e8] sm:$0xff]  ;;  %v6947_v14 = vld [vmem:[%s10625_s23 + $0x5f8] sm:$0xff] }
 0xa5a   : > { %5262 = vmatpush.msra.mxu2 %v6874_v32  ;;  %5282 = vmatpush.msrb.mxu3 %v6875_v56  ;;  %v6964_v32 = vld [vmem:[%s10625_s23 + $0x670] sm:$0xff]  ;;  %v6945_v56 = vld [vmem:[%s10625_s23 + $0x5e8] sm:$0xff] }
 0xa5b   : > { %5719 = vmatpush.msrb.mxu1 %v6986_v63  ;;  %v6962_v63 = vld [vmem:[%s10625_s23 + $0x660] sm:$0xff] }
 0xa5c   : > { %5263 = vmatpush.msra.mxu2 %v6872_v61  ;;  %5283 = vmatpush.msrb.mxu3 %v6873_v24  ;;  %v6943_v61 = vld [vmem:[%s10625_s23 + $0x5d8] sm:$0xff]  ;;  %v6960_v24 = vld [vmem:[%s10625_s23 + $0x650] sm:$0xff] }
 0xa5d   : > { %7002 = vmatmul.msk.f32.vlgmr.msrb.gmra.mxu1 %vm4729_vm5, %v10728_v46 }
 0xa5e   : > { %5796 = vmatpush.msra.mxu1 %v7019_v42  ;;  %5264 = vmatpush.msra.mxu2 %v6870_v53  ;;  %v6941_v42 = vld [vmem:[%s10625_s23 + $0x5c8] sm:$0xff]  ;;  %v6958_v53 = vld [vmem:[%s10625_s23 + $0x640] sm:$0xff] }
 0xa5f   : > { %5284 = vmatpush.msrb.mxu3 %v6871_v12  ;;  %v6939_v12 = vld [vmem:[%s10625_s23 + $0x5b8] sm:$0xff] }
 0xa60   : > { %5797 = vmatpush.msra.mxu1 %v7017_v7  ;;  %5265 = vmatpush.msra.mxu2 %v6868_v33  ;;  %v6937_v7 = vld [vmem:[%s10625_s23 + $0x5a8] sm:$0xff]  ;;  %v6954_v33 = vld [vmem:[%s10625_s23 + $0x620] sm:$0xff] }
 0xa61   : > { %5285 = vmatpush.msrb.mxu3 %v6869_v15  ;;  %v6935_v15 = vld [vmem:[%s10625_s23 + $0x598] sm:$0xff] }
 0xa62   : > { %5798 = vmatpush.msra.mxu1 %v7015_v43  ;;  %5266 = vmatpush.msra.mxu2 %v6866_v45  ;;  %v6952_v43 = vld [vmem:[%s10625_s23 + $0x610] sm:$0xff]  ;;  %v6933_v45 = vld [vmem:[%s10625_s23 + $0x588] sm:$0xff] }
 0xa63   : > { %5286 = vmatpush.msrb.mxu3 %v6867_v28  ;;  %v6950_v28 = vld [vmem:[%s10625_s23 + $0x600] sm:$0xff] }
 0xa64   : > { %5799 = vmatpush.msra.mxu1 %v7013_v11  ;;  %5267 = vmatpush.msra.mxu2 %v6864_v23  ;;  %v6982_v11 = vld [vmem:[%s10625_s23 + $0x6f0] sm:$0xff]  ;;  %v6983_v23 = vld [vmem:[%s10625_s23 + $0x6f8] sm:$0xff] }
 0xa65   : > { %5287 = vmatpush.msrb.mxu3 %v6865_v60  ;;  %v6980_v60 = vld [vmem:[%s10625_s23 + $0x6e0] sm:$0xff] }
 0xa66   : > { %5800 = vmatpush.msra.mxu1 %v7011_v6  ;;  %5268 = vmatpush.msra.mxu2 %v6862_v9  ;;  %v6981_v6 = vld [vmem:[%s10625_s23 + $0x6e8] sm:$0xff]  ;;  %v6978_v9 = vld [vmem:[%s10625_s23 + $0x6d0] sm:$0xff] }
 0xa67   : > { %5288 = vmatpush.msrb.mxu3 %v6863_v47  ;;  %v6979_v47 = vld [vmem:[%s10625_s23 + $0x6d8] sm:$0xff] }
 0xa68   : > { %5801 = vmatpush.msra.mxu1 %v7009_v30  ;;  %5269 = vmatpush.msra.mxu2 %v6860_v13  ;;  %v6976_v30 = vld [vmem:[%s10625_s23 + $0x6c0] sm:$0xff]  ;;  %v6977_v13 = vld [vmem:[%s10625_s23 + $0x6c8] sm:$0xff] }
 0xa69   : > { %5289 = vmatpush.msrb.mxu3 %v6861_v27  ;;  %6876 = vmatmul.msk.f32.vlgmr.msra.gmra.mxu2 %vm4729_vm5, %v10816_v44  ;;  %v6972_v27 = vld [vmem:[%s10625_s23 + $0x6a0] sm:$0xff] }
 0xa6a   : > { %5802 = vmatpush.msra.mxu1 %v7007_v40  ;;  %6877 = vmatmul.msk.f32.vlgmr.msrb.gmra.mxu3 %vm4729_vm5, %v10816_v44  ;;  %v6904_v44 = vld [vmem:[%s10625_s23 + $0x4c0] sm:$0xff]  ;;  %v6973_v40 = vld [vmem:[%s10625_s23 + $0x6a8] sm:$0xff] }
 0xa6b   : > { %5347 = vmatpush.msrb.mxu2 %v6893_v21  ;;  %5391 = vmatpush.msra.mxu3 %v6910_v22  ;;  %v6970_v21 = vld [vmem:[%s10625_s23 + $0x690] sm:$0xff]  ;;  %v6971_v22 = vld [vmem:[%s10625_s23 + $0x698] sm:$0xff] }
 0xa6c   : > { %5803 = vmatpush.msra.mxu1 %v7005_v20  ;;  %v6968_v20 = vld [vmem:[%s10625_s23 + $0x680] sm:$0xff] }
 0xa6d   : > { %5348 = vmatpush.msrb.mxu2 %v6891_v10  ;;  %5392 = vmatpush.msra.mxu3 %v6908_v37  ;;  %v6969_v10 = vld [vmem:[%s10625_s23 + $0x688] sm:$0xff]  ;;  %v7001_v37 = vld [vmem:[%s10625_s23 + $0x778] sm:$0xff] }
 0xa6e   : > { %7021 = vmatmul.msk.f32.vlgmr.msra.gmra.mxu1 %vm4729_vm5, %v10731_v39 }
 0xa6f   : > { %5349 = vmatpush.msrb.mxu2 %v6889_v26  ;;  %5393 = vmatpush.msra.mxu3 %v6906_v3  ;;  %v7018_v26 = vld [vmem:[%s10625_s23 + $0x7f0] sm:$0xff]  ;;  %v6999_v3 = vld [vmem:[%s10625_s23 + $0x768] sm:$0xff] }
 0xa71   : > { %5350 = vmatpush.msrb.mxu2 %v6887_v51  ;;  %5394 = vmatpush.msra.mxu3 %v6904_v44  ;;  %v7016_v51 = vld [vmem:[%s10625_s23 + $0x7e0] sm:$0xff]  ;;  %v6997_v44 = vld [vmem:[%s10625_s23 + $0x758] sm:$0xff] }
 0xa73   : > { %5351 = vmatpush.msrb.mxu2 %v6885_v5  ;;  %5395 = vmatpush.msra.mxu3 %v6902_v29  ;;  %v7014_v5 = vld [vmem:[%s10625_s23 + $0x7d0] sm:$0xff]  ;;  %v6995_v29 = vld [vmem:[%s10625_s23 + $0x748] sm:$0xff] }
 0xa75   : > { %5352 = vmatpush.msrb.mxu2 %v6883_v18  ;;  %5396 = vmatpush.msra.mxu3 %v6900_v36  ;;  %v7012_v18 = vld [vmem:[%s10625_s23 + $0x7c0] sm:$0xff]  ;;  %v6993_v36 = vld [vmem:[%s10625_s23 + $0x738] sm:$0xff] }
 0xa77   : > { %5353 = vmatpush.msrb.mxu2 %v6881_v58  ;;  %5397 = vmatpush.msra.mxu3 %v6898_v4  ;;  %v6991_v58 = vld [vmem:[%s10625_s23 + $0x728] sm:$0xff]  ;;  %v7008_v4 = vld [vmem:[%s10625_s23 + $0x7a0] sm:$0xff] }
 0xa79   : > { %5354 = vmatpush.msrb.mxu2 %v6879_v38  ;;  %5398 = vmatpush.msra.mxu3 %v6896_v17  ;;  %v6989_v38 = vld [vmem:[%s10625_s23 + $0x718] sm:$0xff]  ;;  %v7006_v17 = vld [vmem:[%s10625_s23 + $0x790] sm:$0xff] }
 0xa7a   : > { %6895 = vmatmul.msk.f32.vlgmr.msrb.gmra.mxu2 %vm4729_vm5, %v10857_v50  ;;  %6912 = vmatmul.msk.f32.vlgmr.msra.gmra.mxu3 %vm4729_vm5, %v10881_v34  ;;  %v6920_v50 = vld [vmem:[%s10625_s23 + $0x530] sm:$0xff]  ;;  %v6921_v34 = vld [vmem:[%s10625_s23 + $0x538] sm:$0xff] }
 0xa7b   : > { %5455 = vmatpush.msra.mxu2 %v6928_v1  ;;  %5475 = vmatpush.msrb.mxu3 %v6929_v57  ;;  %v6987_v1 = vld [vmem:[%s10625_s23 + $0x708] sm:$0xff]  ;;  %v7004_v57 = vld [vmem:[%s10625_s23 + $0x780] sm:$0xff] }
 0xa7d   : > { %5456 = vmatpush.msra.mxu2 %v6926_v52  ;;  %5476 = vmatpush.msrb.mxu3 %v6927_v8 }
 0xa7f   : > { %5457 = vmatpush.msra.mxu2 %v6924_v19  ;;  %5477 = vmatpush.msrb.mxu3 %v6925_v2 }
 0xa81   : > { %5458 = vmatpush.msra.mxu2 %v6922_v35  ;;  %5478 = vmatpush.msrb.mxu3 %v6923_v16 }
 0xa83   : > { %5459 = vmatpush.msra.mxu2 %v6920_v50  ;;  %5479 = vmatpush.msrb.mxu3 %v6921_v34 }
 0xa85   : > { %5460 = vmatpush.msra.mxu2 %v6918_v54  ;;  %5480 = vmatpush.msrb.mxu3 %v6919_v31  ;;  %v5833_v54 = vld [vmem:[%s11116_s12 + $0x78] sm:$0xff]  ;;  %v5832_v31 = vld [vmem:[%s11116_s12 + $0x70] sm:$0xff] }
 0xa87   : > { %5461 = vmatpush.msra.mxu2 %v6916_v62  ;;  %5481 = vmatpush.msrb.mxu3 %v6917_v55  ;;  %v5849_v62 = vld [vmem:[%s11116_s12 + $0xf8] sm:$0xff]  ;;  %v5848_v55 = vld [vmem:[%s11116_s12 + $0xf0] sm:$0xff] }
 0xa89   : > { %5462 = vmatpush.msra.mxu2 %v6914_v59  ;;  %5482 = vmatpush.msrb.mxu3 %v6915_v0  ;;  %v11096_v52 = vpop.f32.mrf.mxu2  ;;  %v11098_v8 = vpop.f32.mrf.mxu3  ;;  %v5831_v59 = vld [vmem:[%s11116_s12 + $0x68] sm:$0xff] }
 0xa8a   : > { %6930 = vmatmul.msk.f32.vlgmr.msra.gmra.mxu2 %vm4729_vm5, %v10861_v48  ;;  %6931 = vmatmul.msk.f32.vlgmr.msrb.gmra.mxu3 %vm4729_vm5, %v10861_v48  ;;  %v6956_v48 = vld [vmem:[%s10625_s23 + $0x630] sm:$0xff]  ;;  %v5847_v0 = vld [vmem:[%s11116_s12 + $0xe8] sm:$0xff] }
 0xa8b   : > { %5539 = vmatpush.msrb.mxu2 %v6947_v14  ;;  %5584 = vmatpush.msra.mxu3 %v6964_v32  ;;  %v5830_v14 = vld [vmem:[%s11116_s12 + $0x60] sm:$0xff] }
 0xa8c   : > { %v5846_v32 = vld [vmem:[%s11116_s12 + $0xe0] sm:$0xff] }
 0xa8d   : > { %5540 = vmatpush.msrb.mxu2 %v6945_v56  ;;  %5585 = vmatpush.msra.mxu3 %v6962_v63  ;;  %v5829_v56 = vld [vmem:[%s11116_s12 + $0x58] sm:$0xff] }
 0xa8e   : > { %v5845_v63 = vld [vmem:[%s11116_s12 + $0xd8] sm:$0xff] }
 0xa8f   : > { %5541 = vmatpush.msrb.mxu2 %v6943_v61  ;;  %5586 = vmatpush.msra.mxu3 %v6960_v24 }
 0xa91   : > { %5542 = vmatpush.msrb.mxu2 %v6941_v42  ;;  %5587 = vmatpush.msra.mxu3 %v6958_v53  ;;  %v11100_v19 = vpop.f32.mrf.mxu2  ;;  %v11102_v2 = vpop.f32.mrf.mxu3  ;;  %v5828_v42 = vld [vmem:[%s11116_s12 + $0x50] sm:$0xff] }
 0xa93   : > { %5543 = vmatpush.msrb.mxu2 %v6939_v12  ;;  %5588 = vmatpush.msra.mxu3 %v6956_v48  ;;  %v5827_v48 = vld [vmem:[%s11116_s12 + $0x48] sm:$0xff] }
 0xa95   : > { %5544 = vmatpush.msrb.mxu2 %v6937_v7  ;;  %5589 = vmatpush.msra.mxu3 %v6954_v33  ;;  %v5844_v7 = vld [vmem:[%s11116_s12 + $0xd0] sm:$0xff]  ;;  %v5826_v33 = vld [vmem:[%s11116_s12 + $0x40] sm:$0xff] }
 0xa97   : > { %5545 = vmatpush.msrb.mxu2 %v6935_v15  ;;  %5590 = vmatpush.msra.mxu3 %v6952_v43  ;;  %v5843_v15 = vld [vmem:[%s11116_s12 + $0xc8] sm:$0xff]  ;;  %v5825_v43 = vld [vmem:[%s11116_s12 + $0x38] sm:$0xff] }
 0xa99   : > { %5546 = vmatpush.msrb.mxu2 %v6933_v45  ;;  %5591 = vmatpush.msra.mxu3 %v6950_v28  ;;  %v11104_v35 = vpop.f32.mrf.mxu2  ;;  %v11106_v16 = vpop.f32.mrf.mxu3  ;;  %v5842_v45 = vld [vmem:[%s11116_s12 + $0xc0] sm:$0xff] }
 0xa9a   : > { %6949 = vmatmul.msk.f32.vlgmr.msrb.gmra.mxu2 %vm4729_vm5, %v10906_v49  ;;  %6966 = vmatmul.msk.f32.vlgmr.msra.gmra.mxu3 %vm4729_vm5, %v10725_v25  ;;  %v6974_v49 = vld [vmem:[%s10625_s23 + $0x6b0] sm:$0xff]  ;;  %v6975_v25 = vld [vmem:[%s10625_s23 + $0x6b8] sm:$0xff] }
 0xa9b   : > { %5648 = vmatpush.msra.mxu2 %v6982_v11  ;;  %5668 = vmatpush.msrb.mxu3 %v6983_v23  ;;  %v5824_v11 = vld [vmem:[%s11116_s12 + $0x30] sm:$0xff]  ;;  %v5841_v23 = vld [vmem:[%s11116_s12 + $0xb8] sm:$0xff] }
 0xa9d   : > { %5649 = vmatpush.msra.mxu2 %v6980_v60  ;;  %5669 = vmatpush.msrb.mxu3 %v6981_v6  ;;  %v5823_v60 = vld [vmem:[%s11116_s12 + $0x28] sm:$0xff]  ;;  %v5840_v6 = vld [vmem:[%s11116_s12 + $0xb0] sm:$0xff] }
 0xa9f   : > { %5650 = vmatpush.msra.mxu2 %v6978_v9  ;;  %5670 = vmatpush.msrb.mxu3 %v6979_v47 }
 0xaa1   : > { %5651 = vmatpush.msra.mxu2 %v6976_v30  ;;  %5671 = vmatpush.msrb.mxu3 %v6977_v13  ;;  %v5822_v30 = vld [vmem:[%s11116_s12 + $0x20] sm:$0xff]  ;;  %v5839_v13 = vld [vmem:[%s11116_s12 + $0xa8] sm:$0xff] }
 0xaa3   : > { %5652 = vmatpush.msra.mxu2 %v6974_v49  ;;  %5672 = vmatpush.msrb.mxu3 %v6975_v25  ;;  %v5821_v49 = vld [vmem:[%s11116_s12 + $0x18] sm:$0xff]  ;;  %v5838_v25 = vld [vmem:[%s11116_s12 + $0xa0] sm:$0xff] }
 0xaa5   : > { %5653 = vmatpush.msra.mxu2 %v6972_v27  ;;  %5673 = vmatpush.msrb.mxu3 %v6973_v40  ;;  %v5336_v28 = vpop.f32.mrf.mxu1  ;;  %v4889_v27 = vadd.f32 %v11100_v19, %v11096_v52 }
 0xaa7   : > { %5654 = vmatpush.msra.mxu2 %v6970_v21  ;;  %5674 = vmatpush.msrb.mxu3 %v6971_v22  ;;  %v5820_v21 = vld [vmem:[%s11116_s12 + $0x10] sm:$0xff]  ;;  %v5837_v22 = vld [vmem:[%s11116_s12 + $0x98] sm:$0xff] }
 0xaa9   : > { %5655 = vmatpush.msra.mxu2 %v6968_v20  ;;  %5675 = vmatpush.msrb.mxu3 %v6969_v10  ;;  %v11110_v50 = vpop.f32.mrf.mxu3 }
 0xaaa   : > { %6984 = vmatmul.msk.f32.vlgmr.msra.gmra.mxu2 %vm4729_vm5, %v10735_v41  ;;  %6985 = vmatmul.msk.f32.vlgmr.msrb.gmra.mxu3 %vm4729_vm5, %v10735_v41  ;;  %v7010_v41 = vld [vmem:[%s10625_s23 + $0x7b0] sm:$0xff] }
 0xaab   : > { %5732 = vmatpush.msrb.mxu2 %v7001_v37  ;;  %5776 = vmatpush.msra.mxu3 %v7018_v26  ;;  %v4973_v37 = vadd.f32 %v11104_v35, %v4889_v27  ;;  %v5819_v26 = vld [vmem:[%s11116_s12 + $0x8] sm:$0xff] }
 0xaad   : > { %5733 = vmatpush.msrb.mxu2 %v6999_v3  ;;  %5777 = vmatpush.msra.mxu3 %v7016_v51  ;;  %v5836_v3 = vld [vmem:[%s11116_s12 + $0x90] sm:$0xff]  ;;  %v4909_v51 = vadd.f32 %v11102_v2, %v11098_v8 }
 0xaaf   : > { %5734 = vmatpush.msrb.mxu2 %v6997_v44  ;;  %5778 = vmatpush.msra.mxu3 %v7014_v5  ;;  %v5420_v40 = vpop.f32.mrf.mxu1  ;;  %v5818_v5 = vld [vmem:[%s11116_s12] sm:$0xff] }
 0xab1   : > { %5735 = vmatpush.msrb.mxu2 %v6995_v29  ;;  %5779 = vmatpush.msra.mxu3 %v7012_v18  ;;  %v5835_v29 = vld [vmem:[%s11116_s12 + $0x88] sm:$0xff]  ;;  %v4974_v18 = vadd.f32 %v11106_v16, %v4909_v51 }
 0xab3   : > { %5736 = vmatpush.msrb.mxu2 %v6993_v36  ;;  %5780 = vmatpush.msra.mxu3 %v7010_v41  ;;  %v5834_v41 = vld [vmem:[%s11116_s12 + $0x80] sm:$0xff] }
 0xab5   : > { %5737 = vmatpush.msrb.mxu2 %v6991_v58  ;;  %5781 = vmatpush.msra.mxu3 %v7008_v4  ;;  %v5038_v58 = vadd.f32 %v11110_v50, %v4974_v18 }
 0xab7   : > { %5738 = vmatpush.msrb.mxu2 %v6989_v38  ;;  %5782 = vmatpush.msra.mxu3 %v7006_v17 }
 0xab9   : > { %5739 = vmatpush.msrb.mxu2 %v6987_v1  ;;  %5783 = vmatpush.msra.mxu3 %v7004_v57  ;;  %v5528_v52 = vpop.f32.mrf.mxu1 }
 0xaba   : > { %7003 = vmatmul.msk.f32.vlgmr.msrb.gmra.mxu2 %vm4729_vm5, %v10728_v46  ;;  %7020 = vmatmul.msk.f32.vlgmr.msra.gmra.mxu3 %vm4729_vm5, %v10731_v39  ;;  %v11108_v46 = vpop.f32.mrf.mxu2  ;;  %v11120_v34 = vpop.f32.mrf.mxu3 }
 0xabb   : > { %5854 = vmatpush.msra.mxu2 %v5833_v54  ;;  %5874 = vmatpush.msrb.mxu3 %v5849_v62  ;;  %v5037_v44 = vadd.f32 %v11108_v46, %v4973_v37  ;;  %v5103_v1 = vadd.f32 %v11120_v34, %v5038_v58 }
 0xabd   : > { %5855 = vmatpush.msra.mxu2 %v5832_v31  ;;  %5875 = vmatpush.msrb.mxu3 %v5848_v55 }
 0xabf   : > { %5856 = vmatpush.msra.mxu2 %v5831_v59  ;;  %5876 = vmatpush.msrb.mxu3 %v5847_v0 }
 0xac1   : > { %5857 = vmatpush.msra.mxu2 %v5830_v14  ;;  %5877 = vmatpush.msrb.mxu3 %v5846_v32 }
 0xac2   : > { %v11118_v39 = vpop.f32.mrf.mxu2 }
 0xac3   : > { %5858 = vmatpush.msra.mxu2 %v5829_v56  ;;  %5878 = vmatpush.msrb.mxu3 %v5845_v63  ;;  %v5102_v36 = vadd.f32 %v11118_v39, %v5037_v44 }
 0xac5   : > { %5859 = vmatpush.msra.mxu2 %v5828_v42  ;;  %5879 = vmatpush.msrb.mxu3 %v5844_v7 }
 0xac7   : > { %5860 = vmatpush.msra.mxu2 %v5827_v48  ;;  %5880 = vmatpush.msrb.mxu3 %v5843_v15 }
 0xac9   : > { %5861 = vmatpush.msra.mxu2 %v5826_v33  ;;  %5881 = vmatpush.msrb.mxu3 %v5842_v45  ;;  %v5613_v31 = vpop.f32.mrf.mxu1 }
 0xacb   : > { %v11132_v61 = vpop.f32.mrf.mxu2  ;;  %v11134_v24 = vpop.f32.mrf.mxu3  ;;  %5862 = vmatpush.msra.mxu2 %v5825_v43  ;;  %5882 = vmatpush.msrb.mxu3 %v5841_v23 }
 0xacc   : > { %v5166_v4 = vadd.f32 %v11132_v61, %v5102_v36  ;;  %v5167_v8 = vadd.f32 %v11134_v24, %v5103_v1  ;;  %v5810_v24 = vld [vmem:[%s437_s17] sm:$0x3] }
 0xacd   : > { %5863 = vmatpush.msra.mxu2 %v5824_v11  ;;  %5883 = vmatpush.msrb.mxu3 %v5840_v6  ;;  %v5812_v48 = vperm.slane %v5810_v24, 0  ;;  %v5813_v43 = vperm.slane %v5810_v24, 1  ;;  %v7050_v6 = vld [vmem:[%s445_s27] ss:$0 sm:$0xff] }
 0xacf   : > { %5864 = vmatpush.msra.mxu2 %v5823_v60  ;;  %5884 = vmatpush.msrb.mxu3 %v5839_v13 }
 0xad1   : > { %5865 = vmatpush.msra.mxu2 %v5822_v30  ;;  %5885 = vmatpush.msrb.mxu3 %v5838_v25 }
 0xad3   : > { %5866 = vmatpush.msra.mxu2 %v5821_v49  ;;  %5886 = vmatpush.msrb.mxu3 %v5837_v22 }
 0xad5   : > { %5867 = vmatpush.msra.mxu2 %v5820_v21  ;;  %5887 = vmatpush.msrb.mxu3 %v5836_v3 }
 0xad7   : > { %5868 = vmatpush.msra.mxu2 %v5819_v26  ;;  %5888 = vmatpush.msrb.mxu3 %v5835_v29 }
 0xad9   : > { %5869 = vmatpush.msra.mxu2 %v5818_v5  ;;  %5889 = vmatpush.msrb.mxu3 %v5834_v41 }
 0xada   : > { %v5721_v63 = vpop.f32.mrf.mxu1 }
 0xadb   : > { %v5207_v53 = vpop.f32.mrf.mxu2 }
 0xadc   : > { %v11137_v12 = vpop.f32.mrf.mxu3  ;;  %v5230_v57 = vadd.f32 %v5207_v53, %v5166_v4 }
 0xadd   : > { %v5231_v2 = vadd.f32 %v11137_v12, %v5167_v8 }
 0xaec   : > { %v5271_v9 = vpop.f32.mrf.mxu2 }
 0xaed   : > { %v5291_v47 = vpop.f32.mrf.mxu3  ;;  %v5294_v19 = vadd.f32 %v5271_v9, %v5230_v57 }
 0xaee   : > { %v5295_v35 = vadd.f32 %v5291_v47, %v5231_v2 }
 0xaef   : > { %v5359_v16 = vadd.f32 %v5336_v28, %v5294_v19  ;;  %v5805_v28 = vpop.f32.mrf.mxu1 }
 0xafd   : > { %v5356_v20 = vpop.f32.mrf.mxu2  ;;  %v5400_v10 = vpop.f32.mrf.mxu3 }
 0xafe   : > { %v5360_v50 = vadd.f32 %v5356_v20, %v5295_v35  ;;  %v5423_v54 = vadd.f32 %v5400_v10, %v5359_v16 }
 0xb00   : > { %v5424_v55 = vadd.f32 %v5420_v40, %v5360_v50 }
 0xb0d   : > { %v5464_v38 = vpop.f32.mrf.mxu2  ;;  %v5484_v17 = vpop.f32.mrf.mxu3 }
 0xb0e   : > { %v5487_v62 = vadd.f32 %v5464_v38, %v5423_v54  ;;  %v5488_v59 = vadd.f32 %v5484_v17, %v5424_v55 }
 0xb10   : > { %v5551_v34 = vadd.f32 %v5528_v52, %v5487_v62 }
 0xb1d   : > { %v5548_v46 = vpop.f32.mrf.mxu2  ;;  %v5593_v39 = vpop.f32.mrf.mxu3 }
 0xb1e   : > { %v5552_v32 = vadd.f32 %v5548_v46, %v5488_v59  ;;  %v5616_v56 = vadd.f32 %v5593_v39, %v5551_v34 }
 0xb20   : > { %v5617_v42 = vadd.f32 %v5613_v31, %v5552_v32 }
 0xb2d   : > { %v5657_v0 = vpop.f32.mrf.mxu2  ;;  %v5677_v14 = vpop.f32.mrf.mxu3 }
 0xb2e   : > { %v5680_v61 = vadd.f32 %v5657_v0, %v5616_v56  ;;  %v5681_v53 = vadd.f32 %v5677_v14, %v5617_v42 }
 0xb30   : > { %v5744_v12 = vadd.f32 %v5721_v63, %v5680_v61 }
 0xb3d   : > { %v5741_v7 = vpop.f32.mrf.mxu2  ;;  %v5785_v33 = vpop.f32.mrf.mxu3 }
 0xb3e   : > { %v5745_v15 = vadd.f32 %v5741_v7, %v5681_v53  ;;  %v5808_v45 = vadd.f32 %v5785_v33, %v5744_v12 }
 0xb40   : > { %v5809_v11 = vadd.f32 %v5805_v28, %v5745_v15  ;;  %v5816_v23 = vadd.f32 %v5812_v48, %v5808_v45 }
 0xb42   : > { %v5817_v60 = vadd.f32 %v5813_v43, %v5809_v11  ;;  %5870 = vmatmul.f32.vlgmr.msra.gmra.mxu2 %v5816_v23 }
 0xb44   : > { %5890 = vmatmul.f32.vlgmr.msrb.gmra.mxu3 %v5817_v60 }
 0xbc5   : > { %v5871_v9 = vpop.f32.mrf.mxu2 }
 0xbc6   : > { %v5872_v47 = vadd.f32 %v7050_v6, %v5871_v9 }
 0xbc7   : > { %v5891_v30 = vpop.f32.mrf.mxu3 }
 0xbc8   : > { %v5892_v13 = vadd.f32 %v5891_v30, %v5872_v47 }
 0xbca   : > { %v5895_v49 = vsel %vm5894_vm7, %v5892_v13, -inf }
 0xbcb   : > { %5896 = vmax.xlane.f32.xlu0 %v5895_v49 }
 0xc3e   : > { %v5897_v25 = vpop.xlane.xlu0 %5896 }
 0xc3f   : > { %v5898_v27 = vsub.f32 %v5892_v13, %v5897_v25 }
 0xc41   : > { %v5899_v40 = vmul.f32 1.442695, %v5898_v27 }
 0xc43   : > { %7051 = vpow2.f32 %v5899_v40 }
 0xc49   : > { %v7052_v21 = vpop.eup %7051 }
 0xc4a   : > { %v5901_v22 = vsel %vm5894_vm7, %v7052_v21, 0.0 }
 0xc4b   : > { %5902 = vadd.xlane.f32.xlu0 %v5901_v22 }
 0xcbe   : > { %v5903_v20 = vpop.xlane.xlu0 %5902 }
 0xcbf   : > { %7053 = vrcp.f32 %v5903_v20  ;;  %v5915_v3 = vand.u32 2147483648, %v5903_v20  ;;  %v5913_v44 = vand.u32 2147483647, %v5903_v20  ;;  %vm5909_vm9 = vweird.f32 %v5903_v20 }
 0xcc1   : > { %v5916_v29 = vor.u32 1.1754944e-38, %v5915_v3  ;;  %vm5914_vm11 = vcmp.eq.f32.partialorder %v5913_v44, 8.507059e+37 }
 0xcc5   : > { %v7054_v10 = vpop.eup %7053 }
 0xcc6   : > { %v5905_v37 = vmul.f32 %v7054_v10, %v5903_v20  ;;  %vm5910_vm8 = vweird.f32 %v7054_v10 }
 0xcc7   : > { %vm5911_vm10 = vmor %vm5909_vm9, %vm5910_vm8 }
 0xcc8   : > { %v5906_v26 = vsub.f32 1.0, %v5905_v37 }
 0xcca   : > { %v5907_v51 = vmul.f32 %v7054_v10, %v5906_v26 }
 0xccc   : > { %v5908_v5 = vadd.f32 %v7054_v10, %v5907_v51 }
 0xcce   : > { %v5912_v18 = vsel %vm5911_vm10, %v7054_v10, %v5908_v5 }
 0xccf   : > { %v5917_v36 = vsel %vm5914_vm11, %v5916_v29, %v5912_v18 }
 0xcd0   : > { %v5918_v41 = vmul.f32 %v7052_v21, %v5917_v36 }
 0xcd2   : > { %5919 = vst.msk [vmem:[%s449_s21] sm:$0x3] %vm5894_vm7, %v5918_v41 }
 0xcd3 PF: > { %s19_s30 = sadd.s32 1, %s7063_s30  }
 0xcd4   : > { %p16_p4 = scmp.ge.s32.totalorder %s19_s30, 4  }
 0xcd6   :  { %18 = sbr.rel (!%p16_p4) target bundleno = 1 (0x1), region = 146 }

</bundles_post_ra>
